<compile_context>
chip_gen: v7x
topology: tpu7x:2x2x1
jax: 0.10.0
libtpu: 0.0.40
codegen_flags: <defaults>
</compile_context>

<pallas_src>
from typing import Dict, List

import jax
import jax.numpy as jnp
import numpy as np
from jax.experimental import pallas as pl
from jax.experimental.pallas import tpu as pltpu

NUM_CLASSES = 4                 # matches YOLOv9.__init__ default
C_IMG = 8                       # image channels padded 3 -> 8
C_STEM = 16
C_DOWN = 32
C_BLOCK = 32
C_HEAD = 4 + NUM_CLASSES        # 4 box coords + class logits
GRID = 8                        # final detection grid (32x32 input / stride 4)
FOLD = 4                        # total downsampling folded into the input lanes
K_STEM = 9 * C_IMG              # 72
K_DOWN = 9 * C_STEM             # 144
K_BLOCK = 9 * C_DOWN            # 288

# (name, kh, kw, stride, padding, activation) — synthetic YOLOv9-ish net
ARCH = (
    ("stem",  3, 3, 2, 1, "silu"),    # 3  -> 16
    ("down",  3, 3, 2, 1, "silu"),    # 16 -> 32
    ("block", 3, 3, 1, 1, "silu"),    # 32 -> 32
    ("head",  1, 1, 1, 0, "none"),    # 32 -> 4 + NUM_CLASSES
)


# ---------------------------------------------------------------------------
# Fused Pallas kernel: whole backbone + head for one image per grid step
# ---------------------------------------------------------------------------
def _yolo_fused_kernel(x_ref, ws_ref, bs_ref, wd_ref, bd_ref, wb_ref, bb_ref,
                       wh_ref, bh_ref, pred_ref, cls_ref,
                       col_s, stem_pad, col_d, blk_pad, col_b):
    G = GRID
    f32 = jnp.float32
    bf16 = jnp.bfloat16

    # Zero the halo-padded activation scratches; interiors are fully
    # overwritten below, halo cells stay zero (the conv padding).
    stem_pad[...] = jnp.zeros_like(stem_pad)
    blk_pad[...] = jnp.zeros_like(blk_pad)

    # ===================== stem: 3x3 / stride 2 ==============================
    # The image arrives 4x4 space-to-depth folded: lane block (py*4+px)*C_IMG of
    # x_ref[0, U, V, :] holds padded-image pixel (4U+py, 4V+px).  im2col rows
    # are grouped by the phase (a, b) the NEXT stride-2 conv wants, so every
    # tap gather and the output scatter are contiguous static slices.
    for a in range(2):
        for b in range(2):
            p = a * 2 + b
            for i in range(3):
                for j in range(3):
                    t = i * 3 + j
                    du, py = divmod(2 * a + i, FOLD)
                    dv, px = divmod(2 * b + j, FOLD)
                    c0 = (py * FOLD + px) * C_IMG
                    col_s[p * G:(p + 1) * G, :, t * C_IMG:(t + 1) * C_IMG] = (
                        x_ref[0, du:du + G, dv:dv + G, c0:c0 + C_IMG])
    acc = jnp.dot(col_s[...].reshape(4 * G * G, K_STEM), ws_ref[...],
                  preferred_element_type=f32)
    acc = acc + bs_ref[...]
    acc = acc * jax.nn.sigmoid(acc)                       # SiLU (f32 epilogue)
    stem_act = acc.astype(bf16)                           # rows = (a, b, u, v)

    # Scatter phase (a, b) at spatial offset (a, b) into the halo scratch:
    #   stem_pad[y, x, p*16:+16] == stem_out[2y - a, 2x - b]   (zero outside)
    for a in range(2):
        for b in range(2):
            p = a * 2 + b
            for u in range(G):
                r0 = p * G * G + u * G
                stem_pad[a + u, b:b + G, p * C_STEM:(p + 1) * C_STEM] = (
                    stem_act[r0:r0 + G, :])

    # ===================== down: 3x3 / stride 2 ==============================
    # Tap (i, j) of output (u, v) needs stem_out[2u+i-1, 2v+j-1]; in the
    # phase-grouped scratch that is a contiguous 8x8 window of one lane block.
    for i in range(3):
        for j in range(3):
            t = i * 3 + j
            a, b = (i + 1) % 2, (j + 1) % 2
            di, dj = (1 if i == 2 else 0), (1 if j == 2 else 0)
            p = a * 2 + b
            col_d[:, :, t * C_STEM:(t + 1) * C_STEM] = (
                stem_pad[di:di + G, dj:dj + G, p * C_STEM:(p + 1) * C_STEM])
    acc = jnp.dot(col_d[...].reshape(G * G, K_DOWN), wd_ref[...],
                  preferred_element_type=f32)
    acc = acc + bd_ref[...]
    acc = acc * jax.nn.sigmoid(acc)
    down_act = acc.astype(bf16)                           # (64, 32)

    for u in range(G):                                    # write into 1px halo
        blk_pad[1 + u, 1:1 + G, :] = down_act[u * G:(u + 1) * G, :]

    # ===================== block: 3x3 / stride 1 =============================
    for i in range(3):
        for j in range(3):
            t = i * 3 + j
            col_b[:, :, t * C_DOWN:(t + 1) * C_DOWN] = blk_pad[i:i + G, j:j + G, :]
    acc = jnp.dot(col_b[...].reshape(G * G, K_BLOCK), wb_ref[...],
                  preferred_element_type=f32)
    acc = acc + bb_ref[...]
    acc = acc * jax.nn.sigmoid(acc)
    blk_act = acc.astype(bf16)                            # (64, 32)

    # ===================== head: 1x1 conv + fused sigmoid ====================
    raw = jnp.dot(blk_act, wh_ref[...], preferred_element_type=f32) + bh_ref[...]
    pred_ref[0] = raw.astype(pred_ref.dtype)
    cls_ref[0] = jax.nn.sigmoid(raw[:, 4:]).astype(cls_ref.dtype)


# ---------------------------------------------------------------------------
# Wrapper: tiny one-time fold of the raw image, then a single pallas_call
# ---------------------------------------------------------------------------
def _fold_image(x_nchw):
    """NCHW f32 image -> (n, 9, 9, 128) bf16 4x4 space-to-depth folded + padded."""
    x = jnp.transpose(x_nchw, (0, 2, 3, 1))                            # NHWC
    x = jnp.pad(x, ((0, 0), (0, 0), (0, 0), (0, C_IMG - x.shape[-1])))  # ch 3->8
    # 1px conv halo on top/left; 1px halo + 2px fold alignment on bottom/right.
    x = jnp.pad(x, ((0, 0), (1, 3), (1, 3), (0, 0)))                   # 36 x 36
    n, H, W, C = x.shape
    x = x.reshape(n, H // FOLD, FOLD, W // FOLD, FOLD, C)
    x = x.transpose(0, 1, 3, 2, 4, 5).reshape(n, H // FOLD, W // FOLD,
                                              FOLD * FOLD * C)
    return x.astype(jnp.bfloat16)


@jax.jit
def _forward_impl(params, x_nchw):
    xf = _fold_image(x_nchw)                                # (n, 9, 9, 128)
    n = xf.shape[0]

    def rep(shape):  # whole-array block, replicated (not re-DMA'd) per step
        return pl.BlockSpec(shape, lambda b: (0,) * len(shape))

    pred, cls = pl.pallas_call(
        _yolo_fused_kernel,
        out_shape=(
            jax.ShapeDtypeStruct((n, GRID * GRID, C_HEAD), jnp.float32),
            jax.ShapeDtypeStruct((n, GRID * GRID, NUM_CLASSES), jnp.float32),
        ),
        grid_spec=pltpu.PrefetchScalarGridSpec(
            num_scalar_prefetch=0,
            grid=(n,),
            in_specs=[
                pl.BlockSpec((1, 9, 9, FOLD * FOLD * C_IMG),
                             lambda b: (b, 0, 0, 0)),
                rep((K_STEM, C_STEM)), rep((1, C_STEM)),
                rep((K_DOWN, C_DOWN)), rep((1, C_DOWN)),
                rep((K_BLOCK, C_BLOCK)), rep((1, C_BLOCK)),
                rep((C_BLOCK, C_HEAD)), rep((1, C_HEAD)),
            ],
            out_specs=(
                pl.BlockSpec((1, GRID * GRID, C_HEAD), lambda b: (b, 0, 0)),
                pl.BlockSpec((1, GRID * GRID, NUM_CLASSES), lambda b: (b, 0, 0)),
            ),
            scratch_shapes=[
                pltpu.VMEM((4 * GRID, GRID, K_STEM), jnp.bfloat16),      # stem im2col
                pltpu.VMEM((GRID + 1, GRID + 1, 4 * C_STEM), jnp.bfloat16),
                pltpu.VMEM((GRID, GRID, K_DOWN), jnp.bfloat16),          # down im2col
                pltpu.VMEM((GRID + 2, GRID + 2, C_DOWN), jnp.bfloat16),  # block halo
                pltpu.VMEM((GRID, GRID, K_BLOCK), jnp.bfloat16),         # block im2col
            ],
        ),
        compiler_params=pltpu.CompilerParams(
            dimension_semantics=("parallel",)),
    )(xf,
      params["stem"]["w"], params["stem"]["b"],
      params["down"]["w"], params["down"]["b"],
      params["block"]["w"], params["block"]["b"],
      params["head"]["w"], params["head"]["b"])

    return {"pred": pred, "boxes": pred[..., :4], "class_scores": cls}


# ---------------------------------------------------------------------------
# Deterministic synthetic parameters — packed matmul-ready once at init
# ---------------------------------------------------------------------------
def init_params(key):
    def conv_init(k, cout, cin, kh, kw):
        kw_, kb_ = jax.random.split(k)
        fan_in = cin * kh * kw
        w = jax.random.normal(kw_, (cout, cin, kh, kw), jnp.float32) / jnp.sqrt(fan_in)
        b = 0.01 * jax.random.normal(kb_, (cout,), jnp.float32)
        return w, b

    def pack(w_oihw, b, cin_pad):
        cout, cin, kh, kw = w_oihw.shape
        wt = jnp.transpose(w_oihw, (2, 3, 1, 0))                 # (kh,kw,cin,cout)
        wt = jnp.pad(wt, ((0, 0), (0, 0), (0, cin_pad - cin), (0, 0)))
        w_mat = wt.reshape(kh * kw * cin_pad, cout).astype(jnp.bfloat16)
        b_row = b.reshape(1, cout).astype(jnp.float32)
        return {"w": w_mat, "b": b_row}

    k1, k2, k3, k4 = jax.random.split(key, 4)
    raw = {
        "stem":  conv_init(k1, C_STEM, 3, 3, 3),
        "down":  conv_init(k2, C_DOWN, C_STEM, 3, 3),
        "block": conv_init(k3, C_BLOCK, C_DOWN, 3, 3),
        "head":  conv_init(k4, C_HEAD, C_BLOCK, 1, 1),
    }
    packed = {
        "stem":  pack(*raw["stem"], C_IMG),
        "down":  pack(*raw["down"], C_STEM),
        "block": pack(*raw["block"], C_DOWN),
        "head":  pack(*raw["head"], C_BLOCK),
    }
    return packed, raw


# ---------------------------------------------------------------------------
# Pure-JAX reference (f32, lax conv) for correctness checking
# ---------------------------------------------------------------------------
def _reference_forward(raw_params, x_nchw):
    x = jnp.transpose(x_nchw, (0, 2, 3, 1)).astype(jnp.float32)
    for name, kh, kw, stride, pad, act in ARCH:
        w, b = raw_params[name]
        w_hwio = jnp.transpose(w, (2, 3, 1, 0))
        x = jax.lax.conv_general_dilated(
            x, w_hwio, window_strides=(stride, stride),
            padding=((pad, pad), (pad, pad)),
            dimension_numbers=("NHWC", "HWIO", "NHWC"),
            precision=jax.lax.Precision.HIGHEST)
        x = x + b
        if act == "silu":
            x = x * jax.nn.sigmoid(x)
    n, h, w_, c = x.shape
    return x.reshape(n, h * w_, c)


# ---------------------------------------------------------------------------
# Forward pass (mirrors YOLOv9.forward: images, annotation -> Dict)
# ---------------------------------------------------------------------------
def yolov9_forward(params,
                   images: List[jnp.ndarray],
                   annotation: List[Dict[str, jnp.ndarray]] = None) -> Dict[str, jnp.ndarray]:
    x = jnp.stack(images, axis=0) if isinstance(images, (list, tuple)) else images
    # TODO(synk): ultralytics training loss vs `annotation` and predict()-time
    #             NMS / label remapping are not reproduced; raw preds returned.
    return _forward_impl(params, x)


if __name__ == "__main__":
    key = jax.random.PRNGKey(0)
    pkey, xkey = jax.random.split(key)
    params, raw_params = init_params(pkey)

    # Two 3-channel 32x32 "images" (NCHW, like the PyTorch module receives)
    images = jnp.stack(
        [jax.random.uniform(jax.random.fold_in(xkey, i), (3, 32, 32), jnp.float32)
         for i in range(2)], axis=0)                          # (2, 3, 32, 32)
    annotation = [{"boxes": jnp.zeros((1, 4), jnp.float32),
                   "labels": jnp.zeros((1,), jnp.int32)} for _ in range(2)]

    out = yolov9_forward(params, images, annotation)
    jax.block_until_ready(out)

    assert out["pred"].shape == (2, GRID * GRID, C_HEAD)
    assert out["boxes"].shape == (2, GRID * GRID, 4)
    assert out["class_scores"].shape == (2, GRID * GRID, NUM_CLASSES)

    ref = _reference_forward(raw_params, images)
    np.testing.assert_allclose(np.asarray(out["pred"]), np.asarray(ref),
                               atol=0.1, rtol=0.1)            # bf16 vs f32 tolerance
    print("KERNEL_OK")
</pallas_src>

<mosaic_0001>
module attributes {stable_mosaic.version = 11 : i64} {
  func.func @_yolo_fused_kernel(%arg0: i32, %arg1: memref<1x9x9x128xbf16, #tpu.memory_space<vmem>>, %arg2: memref<72x16xbf16, #tpu.memory_space<vmem>>, %arg3: memref<1x16xf32, #tpu.memory_space<vmem>>, %arg4: memref<144x32xbf16, #tpu.memory_space<vmem>>, %arg5: memref<1x32xf32, #tpu.memory_space<vmem>>, %arg6: memref<288x32xbf16, #tpu.memory_space<vmem>>, %arg7: memref<1x32xf32, #tpu.memory_space<vmem>>, %arg8: memref<32x8xbf16, #tpu.memory_space<vmem>>, %arg9: memref<1x8xf32, #tpu.memory_space<vmem>>, %arg10: memref<1x64x8xf32, #tpu.memory_space<vmem>>, %arg11: memref<1x64x4xf32, #tpu.memory_space<vmem>>, %arg12: memref<32x8x72xbf16, #tpu.memory_space<vmem>>, %arg13: memref<9x9x64xbf16, #tpu.memory_space<vmem>>, %arg14: memref<8x8x144xbf16, #tpu.memory_space<vmem>>, %arg15: memref<10x10x32xbf16, #tpu.memory_space<vmem>>, %arg16: memref<8x8x288xbf16, #tpu.memory_space<vmem>>) attributes {dimension_semantics = [#tpu.dimension_semantics<parallel>], iteration_bounds = array<i64: 2>, scalar_prefetch = 0 : i64, scratch_operands = 5 : i64, tpu.core_type = #tpu.core_type<tc>, window_params = [{transform_indices = @transform_0, window_bounds = array<i64: 1, 9, 9, 128>}, {pipeline_mode = #tpu.pipeline_mode<synchronous>, transform_indices = @transform_1, window_bounds = array<i64: 72, 16>}, {pipeline_mode = #tpu.pipeline_mode<synchronous>, transform_indices = @transform_2, window_bounds = array<i64: 1, 16>}, {pipeline_mode = #tpu.pipeline_mode<synchronous>, transform_indices = @transform_3, window_bounds = array<i64: 144, 32>}, {pipeline_mode = #tpu.pipeline_mode<synchronous>, transform_indices = @transform_4, window_bounds = array<i64: 1, 32>}, {pipeline_mode = #tpu.pipeline_mode<synchronous>, transform_indices = @transform_5, window_bounds = array<i64: 288, 32>}, {pipeline_mode = #tpu.pipeline_mode<synchronous>, transform_indices = @transform_6, window_bounds = array<i64: 1, 32>}, {pipeline_mode = #tpu.pipeline_mode<synchronous>, transform_indices = @transform_7, window_bounds = array<i64: 32, 8>}, {pipeline_mode = #tpu.pipeline_mode<synchronous>, transform_indices = @transform_8, window_bounds = array<i64: 1, 8>}, {transform_indices = @transform_9, window_bounds = array<i64: 1, 64, 8>}, {transform_indices = @transform_10, window_bounds = array<i64: 1, 64, 4>}]} {
    %cst = arith.constant 0.000000e+00 : bf16
    %0 = vector.broadcast %cst : bf16 to vector<9x9x64xbf16>
    %c0 = arith.constant 0 : index
    %c0_0 = arith.constant 0 : index
    %c0_1 = arith.constant 0 : index
    %1 = vector.load %arg13[%c0, %c0_0, %c0_1] : memref<9x9x64xbf16, #tpu.memory_space<vmem>>, vector<9x9x64xbf16>
    tpu.vector_store %arg13[%c0, %c0_0, %c0_1], %0 {strides = array<i32>} : memref<9x9x64xbf16, #tpu.memory_space<vmem>>, vector<9x9x64xbf16>,
    %cst_2 = arith.constant 0.000000e+00 : bf16
    %2 = vector.broadcast %cst_2 : bf16 to vector<10x10x32xbf16>
    %c0_3 = arith.constant 0 : index
    %c0_4 = arith.constant 0 : index
    %c0_5 = arith.constant 0 : index
    %3 = vector.load %arg15[%c0_3, %c0_4, %c0_5] : memref<10x10x32xbf16, #tpu.memory_space<vmem>>, vector<10x10x32xbf16>
    tpu.vector_store %arg15[%c0_3, %c0_4, %c0_5], %2 {strides = array<i32>} : memref<10x10x32xbf16, #tpu.memory_space<vmem>>, vector<10x10x32xbf16>,
    %c0_6 = arith.constant 0 : index
    %c0_7 = arith.constant 0 : index
    %c0_8 = arith.constant 0 : index
    %c0_9 = arith.constant 0 : index
    %4 = vector.load %arg1[%c0_6, %c0_7, %c0_8, %c0_9] : memref<1x9x9x128xbf16, #tpu.memory_space<vmem>>, vector<1x8x8x8xbf16>
    %5 = vector.shape_cast %4 : vector<1x8x8x8xbf16> to vector<8x8x8xbf16>
    %c0_10 = arith.constant 0 : index
    %c0_11 = arith.constant 0 : index
    %c0_12 = arith.constant 0 : index
    %6 = vector.load %arg12[%c0_10, %c0_11, %c0_12] : memref<32x8x72xbf16, #tpu.memory_space<vmem>>, vector<8x8x8xbf16>
    tpu.vector_store %arg12[%c0_10, %c0_11, %c0_12], %5 {strides = array<i32>} : memref<32x8x72xbf16, #tpu.memory_space<vmem>>, vector<8x8x8xbf16>,
    %c0_13 = arith.constant 0 : index
    %c0_14 = arith.constant 0 : index
    %c0_15 = arith.constant 0 : index
    %c8 = arith.constant 8 : index
    %7 = vector.load %arg1[%c0_13, %c0_14, %c0_15, %c8] : memref<1x9x9x128xbf16, #tpu.memory_space<vmem>>, vector<1x8x8x8xbf16>
    %8 = vector.shape_cast %7 : vector<1x8x8x8xbf16> to vector<8x8x8xbf16>
    %c0_16 = arith.constant 0 : index
    %c0_17 = arith.constant 0 : index
    %c8_18 = arith.constant 8 : index
    %9 = vector.load %arg12[%c0_16, %c0_17, %c8_18] : memref<32x8x72xbf16, #tpu.memory_space<vmem>>, vector<8x8x8xbf16>
    tpu.vector_store %arg12[%c0_16, %c0_17, %c8_18], %8 {strides = array<i32>} : memref<32x8x72xbf16, #tpu.memory_space<vmem>>, vector<8x8x8xbf16>,
    %c0_19 = arith.constant 0 : index
    %c0_20 = arith.constant 0 : index
    %c0_21 = arith.constant 0 : index
    %c16 = arith.constant 16 : index
    %10 = vector.load %arg1[%c0_19, %c0_20, %c0_21, %c16] : memref<1x9x9x128xbf16, #tpu.memory_space<vmem>>, vector<1x8x8x8xbf16>
    %11 = vector.shape_cast %10 : vector<1x8x8x8xbf16> to vector<8x8x8xbf16>
    %c0_22 = arith.constant 0 : index
    %c0_23 = arith.constant 0 : index
    %c16_24 = arith.constant 16 : index
    %12 = vector.load %arg12[%c0_22, %c0_23, %c16_24] : memref<32x8x72xbf16, #tpu.memory_space<vmem>>, vector<8x8x8xbf16>
    tpu.vector_store %arg12[%c0_22, %c0_23, %c16_24], %11 {strides = array<i32>} : memref<32x8x72xbf16, #tpu.memory_space<vmem>>, vector<8x8x8xbf16>,
    %c0_25 = arith.constant 0 : index
    %c0_26 = arith.constant 0 : index
    %c0_27 = arith.constant 0 : index
    %c32 = arith.constant 32 : index
    %13 = vector.load %arg1[%c0_25, %c0_26, %c0_27, %c32] : memref<1x9x9x128xbf16, #tpu.memory_space<vmem>>, vector<1x8x8x8xbf16>
    %14 = vector.shape_cast %13 : vector<1x8x8x8xbf16> to vector<8x8x8xbf16>
    %c0_28 = arith.constant 0 : index
    %c0_29 = arith.constant 0 : index
    %c24 = arith.constant 24 : index
    %15 = vector.load %arg12[%c0_28, %c0_29, %c24] : memref<32x8x72xbf16, #tpu.memory_space<vmem>>, vector<8x8x8xbf16>
    tpu.vector_store %arg12[%c0_28, %c0_29, %c24], %14 {strides = array<i32>} : memref<32x8x72xbf16, #tpu.memory_space<vmem>>, vector<8x8x8xbf16>,
    %c0_30 = arith.constant 0 : index
    %c0_31 = arith.constant 0 : index
    %c0_32 = arith.constant 0 : index
    %c40 = arith.constant 40 : index
    %16 = vector.load %arg1[%c0_30, %c0_31, %c0_32, %c40] : memref<1x9x9x128xbf16, #tpu.memory_space<vmem>>, vector<1x8x8x8xbf16>
    %17 = vector.shape_cast %16 : vector<1x8x8x8xbf16> to vector<8x8x8xbf16>
    %c0_33 = arith.constant 0 : index
    %c0_34 = arith.constant 0 : index
    %c32_35 = arith.constant 32 : index
    %18 = vector.load %arg12[%c0_33, %c0_34, %c32_35] : memref<32x8x72xbf16, #tpu.memory_space<vmem>>, vector<8x8x8xbf16>
    tpu.vector_store %arg12[%c0_33, %c0_34, %c32_35], %17 {strides = array<i32>} : memref<32x8x72xbf16, #tpu.memory_space<vmem>>, vector<8x8x8xbf16>,
    %c0_36 = arith.constant 0 : index
    %c0_37 = arith.constant 0 : index
    %c0_38 = arith.constant 0 : index
    %c48 = arith.constant 48 : index
    %19 = vector.load %arg1[%c0_36, %c0_37, %c0_38, %c48] : memref<1x9x9x128xbf16, #tpu.memory_space<vmem>>, vector<1x8x8x8xbf16>
    %20 = vector.shape_cast %19 : vector<1x8x8x8xbf16> to vector<8x8x8xbf16>
    %c0_39 = arith.constant 0 : index
    %c0_40 = arith.constant 0 : index
    %c40_41 = arith.constant 40 : index
    %21 = vector.load %arg12[%c0_39, %c0_40, %c40_41] : memref<32x8x72xbf16, #tpu.memory_space<vmem>>, vector<8x8x8xbf16>
    tpu.vector_store %arg12[%c0_39, %c0_40, %c40_41], %20 {strides = array<i32>} : memref<32x8x72xbf16, #tpu.memory_space<vmem>>, vector<8x8x8xbf16>,
    %c0_42 = arith.constant 0 : index
    %c0_43 = arith.constant 0 : index
    %c0_44 = arith.constant 0 : index
    %c64 = arith.constant 64 : index
    %22 = vector.load %arg1[%c0_42, %c0_43, %c0_44, %c64] : memref<1x9x9x128xbf16, #tpu.memory_space<vmem>>, vector<1x8x8x8xbf16>
    %23 = vector.shape_cast %22 : vector<1x8x8x8xbf16> to vector<8x8x8xbf16>
    %c0_45 = arith.constant 0 : index
    %c0_46 = arith.constant 0 : index
    %c48_47 = arith.constant 48 : index
    %24 = vector.load %arg12[%c0_45, %c0_46, %c48_47] : memref<32x8x72xbf16, #tpu.memory_space<vmem>>, vector<8x8x8xbf16>
    tpu.vector_store %arg12[%c0_45, %c0_46, %c48_47], %23 {strides = array<i32>} : memref<32x8x72xbf16, #tpu.memory_space<vmem>>, vector<8x8x8xbf16>,
    %c0_48 = arith.constant 0 : index
    %c0_49 = arith.constant 0 : index
    %c0_50 = arith.constant 0 : index
    %c72 = arith.constant 72 : index
    %25 = vector.load %arg1[%c0_48, %c0_49, %c0_50, %c72] : memref<1x9x9x128xbf16, #tpu.memory_space<vmem>>, vector<1x8x8x8xbf16>
    %26 = vector.shape_cast %25 : vector<1x8x8x8xbf16> to vector<8x8x8xbf16>
    %c0_51 = arith.constant 0 : index
    %c0_52 = arith.constant 0 : index
    %c56 = arith.constant 56 : index
    %27 = vector.load %arg12[%c0_51, %c0_52, %c56] : memref<32x8x72xbf16, #tpu.memory_space<vmem>>, vector<8x8x8xbf16>
    tpu.vector_store %arg12[%c0_51, %c0_52, %c56], %26 {strides = array<i32>} : memref<32x8x72xbf16, #tpu.memory_space<vmem>>, vector<8x8x8xbf16>,
    %c0_53 = arith.constant 0 : index
    %c0_54 = arith.constant 0 : index
    %c0_55 = arith.constant 0 : index
    %c80 = arith.constant 80 : index
    %28 = vector.load %arg1[%c0_53, %c0_54, %c0_55, %c80] : memref<1x9x9x128xbf16, #tpu.memory_space<vmem>>, vector<1x8x8x8xbf16>
    %29 = vector.shape_cast %28 : vector<1x8x8x8xbf16> to vector<8x8x8xbf16>
    %c0_56 = arith.constant 0 : index
    %c0_57 = arith.constant 0 : index
    %c64_58 = arith.constant 64 : index
    %30 = vector.load %arg12[%c0_56, %c0_57, %c64_58] : memref<32x8x72xbf16, #tpu.memory_space<vmem>>, vector<8x8x8xbf16>
    tpu.vector_store %arg12[%c0_56, %c0_57, %c64_58], %29 {strides = array<i32>} : memref<32x8x72xbf16, #tpu.memory_space<vmem>>, vector<8x8x8xbf16>,
    %c0_59 = arith.constant 0 : index
    %c0_60 = arith.constant 0 : index
    %c0_61 = arith.constant 0 : index
    %c16_62 = arith.constant 16 : index
    %31 = vector.load %arg1[%c0_59, %c0_60, %c0_61, %c16_62] : memref<1x9x9x128xbf16, #tpu.memory_space<vmem>>, vector<1x8x8x8xbf16>
    %32 = vector.shape_cast %31 : vector<1x8x8x8xbf16> to vector<8x8x8xbf16>
    %c8_63 = arith.constant 8 : index
    %c0_64 = arith.constant 0 : index
    %c0_65 = arith.constant 0 : index
    %33 = vector.load %arg12[%c8_63, %c0_64, %c0_65] : memref<32x8x72xbf16, #tpu.memory_space<vmem>>, vector<8x8x8xbf16>
    tpu.vector_store %arg12[%c8_63, %c0_64, %c0_65], %32 {strides = array<i32>} : memref<32x8x72xbf16, #tpu.memory_space<vmem>>, vector<8x8x8xbf16>,
    %c0_66 = arith.constant 0 : index
    %c0_67 = arith.constant 0 : index
    %c0_68 = arith.constant 0 : index
    %c24_69 = arith.constant 24 : index
    %34 = vector.load %arg1[%c0_66, %c0_67, %c0_68, %c24_69] : memref<1x9x9x128xbf16, #tpu.memory_space<vmem>>, vector<1x8x8x8xbf16>
    %35 = vector.shape_cast %34 : vector<1x8x8x8xbf16> to vector<8x8x8xbf16>
    %c8_70 = arith.constant 8 : index
    %c0_71 = arith.constant 0 : index
    %c8_72 = arith.constant 8 : index
    %36 = vector.load %arg12[%c8_70, %c0_71, %c8_72] : memref<32x8x72xbf16, #tpu.memory_space<vmem>>, vector<8x8x8xbf16>
    tpu.vector_store %arg12[%c8_70, %c0_71, %c8_72], %35 {strides = array<i32>} : memref<32x8x72xbf16, #tpu.memory_space<vmem>>, vector<8x8x8xbf16>,
    %c0_73 = arith.constant 0 : index
    %c0_74 = arith.constant 0 : index
    %c1 = arith.constant 1 : index
    %c0_75 = arith.constant 0 : index
    %37 = vector.load %arg1[%c0_73, %c0_74, %c1, %c0_75] : memref<1x9x9x128xbf16, #tpu.memory_space<vmem>>, vector<1x8x8x8xbf16>
    %38 = vector.shape_cast %37 : vector<1x8x8x8xbf16> to vector<8x8x8xbf16>
    %c8_76 = arith.constant 8 : index
    %c0_77 = arith.constant 0 : index
    %c16_78 = arith.constant 16 : index
    %39 = vector.load %arg12[%c8_76, %c0_77, %c16_78] : memref<32x8x72xbf16, #tpu.memory_space<vmem>>, vector<8x8x8xbf16>
    tpu.vector_store %arg12[%c8_76, %c0_77, %c16_78], %38 {strides = array<i32>} : memref<32x8x72xbf16, #tpu.memory_space<vmem>>, vector<8x8x8xbf16>,
    %c0_79 = arith.constant 0 : index
    %c0_80 = arith.constant 0 : index
    %c0_81 = arith.constant 0 : index
    %c48_82 = arith.constant 48 : index
    %40 = vector.load %arg1[%c0_79, %c0_80, %c0_81, %c48_82] : memref<1x9x9x128xbf16, #tpu.memory_space<vmem>>, vector<1x8x8x8xbf16>
    %41 = vector.shape_cast %40 : vector<1x8x8x8xbf16> to vector<8x8x8xbf16>
    %c8_83 = arith.constant 8 : index
    %c0_84 = arith.constant 0 : index
    %c24_85 = arith.constant 24 : index
    %42 = vector.load %arg12[%c8_83, %c0_84, %c24_85] : memref<32x8x72xbf16, #tpu.memory_space<vmem>>, vector<8x8x8xbf16>
    tpu.vector_store %arg12[%c8_83, %c0_84, %c24_85], %41 {strides = array<i32>} : memref<32x8x72xbf16, #tpu.memory_space<vmem>>, vector<8x8x8xbf16>,
    %c0_86 = arith.constant 0 : index
    %c0_87 = arith.constant 0 : index
    %c0_88 = arith.constant 0 : index
    %c56_89 = arith.constant 56 : index
    %43 = vector.load %arg1[%c0_86, %c0_87, %c0_88, %c56_89] : memref<1x9x9x128xbf16, #tpu.memory_space<vmem>>, vector<1x8x8x8xbf16>
    %44 = vector.shape_cast %43 : vector<1x8x8x8xbf16> to vector<8x8x8xbf16>
    %c8_90 = arith.constant 8 : index
    %c0_91 = arith.constant 0 : index
    %c32_92 = arith.constant 32 : index
    %45 = vector.load %arg12[%c8_90, %c0_91, %c32_92] : memref<32x8x72xbf16, #tpu.memory_space<vmem>>, vector<8x8x8xbf16>
    tpu.vector_store %arg12[%c8_90, %c0_91, %c32_92], %44 {strides = array<i32>} : memref<32x8x72xbf16, #tpu.memory_space<vmem>>, vector<8x8x8xbf16>,
    %c0_93 = arith.constant 0 : index
    %c0_94 = arith.constant 0 : index
    %c1_95 = arith.constant 1 : index
    %c32_96 = arith.constant 32 : index
    %46 = vector.load %arg1[%c0_93, %c0_94, %c1_95, %c32_96] : memref<1x9x9x128xbf16, #tpu.memory_space<vmem>>, vector<1x8x8x8xbf16>
    %47 = vector.shape_cast %46 : vector<1x8x8x8xbf16> to vector<8x8x8xbf16>
    %c8_97 = arith.constant 8 : index
    %c0_98 = arith.constant 0 : index
    %c40_99 = arith.constant 40 : index
    %48 = vector.load %arg12[%c8_97, %c0_98, %c40_99] : memref<32x8x72xbf16, #tpu.memory_space<vmem>>, vector<8x8x8xbf16>
    tpu.vector_store %arg12[%c8_97, %c0_98, %c40_99], %47 {strides = array<i32>} : memref<32x8x72xbf16, #tpu.memory_space<vmem>>, vector<8x8x8xbf16>,
    %c0_100 = arith.constant 0 : index
    %c0_101 = arith.constant 0 : index
    %c0_102 = arith.constant 0 : index
    %c80_103 = arith.constant 80 : index
    %49 = vector.load %arg1[%c0_100, %c0_101, %c0_102, %c80_103] : memref<1x9x9x128xbf16, #tpu.memory_space<vmem>>, vector<1x8x8x8xbf16>
    %50 = vector.shape_cast %49 : vector<1x8x8x8xbf16> to vector<8x8x8xbf16>
    %c8_104 = arith.constant 8 : index
    %c0_105 = arith.constant 0 : index
    %c48_106 = arith.constant 48 : index
    %51 = vector.load %arg12[%c8_104, %c0_105, %c48_106] : memref<32x8x72xbf16, #tpu.memory_space<vmem>>, vector<8x8x8xbf16>
    tpu.vector_store %arg12[%c8_104, %c0_105, %c48_106], %50 {strides = array<i32>} : memref<32x8x72xbf16, #tpu.memory_space<vmem>>, vector<8x8x8xbf16>,
    %c0_107 = arith.constant 0 : index
    %c0_108 = arith.constant 0 : index
    %c0_109 = arith.constant 0 : index
    %c88 = arith.constant 88 : index
    %52 = vector.load %arg1[%c0_107, %c0_108, %c0_109, %c88] : memref<1x9x9x128xbf16, #tpu.memory_space<vmem>>, vector<1x8x8x8xbf16>
    %53 = vector.shape_cast %52 : vector<1x8x8x8xbf16> to vector<8x8x8xbf16>
    %c8_110 = arith.constant 8 : index
    %c0_111 = arith.constant 0 : index
    %c56_112 = arith.constant 56 : index
    %54 = vector.load %arg12[%c8_110, %c0_111, %c56_112] : memref<32x8x72xbf16, #tpu.memory_space<vmem>>, vector<8x8x8xbf16>
    tpu.vector_store %arg12[%c8_110, %c0_111, %c56_112], %53 {strides = array<i32>} : memref<32x8x72xbf16, #tpu.memory_space<vmem>>, vector<8x8x8xbf16>,
    %c0_113 = arith.constant 0 : index
    %c0_114 = arith.constant 0 : index
    %c1_115 = arith.constant 1 : index
    %c64_116 = arith.constant 64 : index
    %55 = vector.load %arg1[%c0_113, %c0_114, %c1_115, %c64_116] : memref<1x9x9x128xbf16, #tpu.memory_space<vmem>>, vector<1x8x8x8xbf16>
    %56 = vector.shape_cast %55 : vector<1x8x8x8xbf16> to vector<8x8x8xbf16>
    %c8_117 = arith.constant 8 : index
    %c0_118 = arith.constant 0 : index
    %c64_119 = arith.constant 64 : index
    %57 = vector.load %arg12[%c8_117, %c0_118, %c64_119] : memref<32x8x72xbf16, #tpu.memory_space<vmem>>, vector<8x8x8xbf16>
    tpu.vector_store %arg12[%c8_117, %c0_118, %c64_119], %56 {strides = array<i32>} : memref<32x8x72xbf16, #tpu.memory_space<vmem>>, vector<8x8x8xbf16>,
    %c0_120 = arith.constant 0 : index
    %c0_121 = arith.constant 0 : index
    %c0_122 = arith.constant 0 : index
    %c64_123 = arith.constant 64 : index
    %58 = vector.load %arg1[%c0_120, %c0_121, %c0_122, %c64_123] : memref<1x9x9x128xbf16, #tpu.memory_space<vmem>>, vector<1x8x8x8xbf16>
    %59 = vector.shape_cast %58 : vector<1x8x8x8xbf16> to vector<8x8x8xbf16>
    %c16_124 = arith.constant 16 : index
    %c0_125 = arith.constant 0 : index
    %c0_126 = arith.constant 0 : index
    %60 = vector.load %arg12[%c16_124, %c0_125, %c0_126] : memref<32x8x72xbf16, #tpu.memory_space<vmem>>, vector<8x8x8xbf16>
    tpu.vector_store %arg12[%c16_124, %c0_125, %c0_126], %59 {strides = array<i32>} : memref<32x8x72xbf16, #tpu.memory_space<vmem>>, vector<8x8x8xbf16>,
    %c0_127 = arith.constant 0 : index
    %c0_128 = arith.constant 0 : index
    %c0_129 = arith.constant 0 : index
    %c72_130 = arith.constant 72 : index
    %61 = vector.load %arg1[%c0_127, %c0_128, %c0_129, %c72_130] : memref<1x9x9x128xbf16, #tpu.memory_space<vmem>>, vector<1x8x8x8xbf16>
    %62 = vector.shape_cast %61 : vector<1x8x8x8xbf16> to vector<8x8x8xbf16>
    %c16_131 = arith.constant 16 : index
    %c0_132 = arith.constant 0 : index
    %c8_133 = arith.constant 8 : index
    %63 = vector.load %arg12[%c16_131, %c0_132, %c8_133] : memref<32x8x72xbf16, #tpu.memory_space<vmem>>, vector<8x8x8xbf16>
    tpu.vector_store %arg12[%c16_131, %c0_132, %c8_133], %62 {strides = array<i32>} : memref<32x8x72xbf16, #tpu.memory_space<vmem>>, vector<8x8x8xbf16>,
    %c0_134 = arith.constant 0 : index
    %c0_135 = arith.constant 0 : index
    %c0_136 = arith.constant 0 : index
    %c80_137 = arith.constant 80 : index
    %64 = vector.load %arg1[%c0_134, %c0_135, %c0_136, %c80_137] : memref<1x9x9x128xbf16, #tpu.memory_space<vmem>>, vector<1x8x8x8xbf16>
    %65 = vector.shape_cast %64 : vector<1x8x8x8xbf16> to vector<8x8x8xbf16>
    %c16_138 = arith.constant 16 : index
    %c0_139 = arith.constant 0 : index
    %c16_140 = arith.constant 16 : index
    %66 = vector.load %arg12[%c16_138, %c0_139, %c16_140] : memref<32x8x72xbf16, #tpu.memory_space<vmem>>, vector<8x8x8xbf16>
    tpu.vector_store %arg12[%c16_138, %c0_139, %c16_140], %65 {strides = array<i32>} : memref<32x8x72xbf16, #tpu.memory_space<vmem>>, vector<8x8x8xbf16>,
    %c0_141 = arith.constant 0 : index
    %c0_142 = arith.constant 0 : index
    %c0_143 = arith.constant 0 : index
    %c96 = arith.constant 96 : index
    %67 = vector.load %arg1[%c0_141, %c0_142, %c0_143, %c96] : memref<1x9x9x128xbf16, #tpu.memory_space<vmem>>, vector<1x8x8x8xbf16>
    %68 = vector.shape_cast %67 : vector<1x8x8x8xbf16> to vector<8x8x8xbf16>
    %c16_144 = arith.constant 16 : index
    %c0_145 = arith.constant 0 : index
    %c24_146 = arith.constant 24 : index
    %69 = vector.load %arg12[%c16_144, %c0_145, %c24_146] : memref<32x8x72xbf16, #tpu.memory_space<vmem>>, vector<8x8x8xbf16>
    tpu.vector_store %arg12[%c16_144, %c0_145, %c24_146], %68 {strides = array<i32>} : memref<32x8x72xbf16, #tpu.memory_space<vmem>>, vector<8x8x8xbf16>,
    %c0_147 = arith.constant 0 : index
    %c0_148 = arith.constant 0 : index
    %c0_149 = arith.constant 0 : index
    %c104 = arith.constant 104 : index
    %70 = vector.load %arg1[%c0_147, %c0_148, %c0_149, %c104] : memref<1x9x9x128xbf16, #tpu.memory_space<vmem>>, vector<1x8x8x8xbf16>
    %71 = vector.shape_cast %70 : vector<1x8x8x8xbf16> to vector<8x8x8xbf16>
    %c16_150 = arith.constant 16 : index
    %c0_151 = arith.constant 0 : index
    %c32_152 = arith.constant 32 : index
    %72 = vector.load %arg12[%c16_150, %c0_151, %c32_152] : memref<32x8x72xbf16, #tpu.memory_space<vmem>>, vector<8x8x8xbf16>
    tpu.vector_store %arg12[%c16_150, %c0_151, %c32_152], %71 {strides = array<i32>} : memref<32x8x72xbf16, #tpu.memory_space<vmem>>, vector<8x8x8xbf16>,
    %c0_153 = arith.constant 0 : index
    %c0_154 = arith.constant 0 : index
    %c0_155 = arith.constant 0 : index
    %c112 = arith.constant 112 : index
    %73 = vector.load %arg1[%c0_153, %c0_154, %c0_155, %c112] : memref<1x9x9x128xbf16, #tpu.memory_space<vmem>>, vector<1x8x8x8xbf16>
    %74 = vector.shape_cast %73 : vector<1x8x8x8xbf16> to vector<8x8x8xbf16>
    %c16_156 = arith.constant 16 : index
    %c0_157 = arith.constant 0 : index
    %c40_158 = arith.constant 40 : index
    %75 = vector.load %arg12[%c16_156, %c0_157, %c40_158] : memref<32x8x72xbf16, #tpu.memory_space<vmem>>, vector<8x8x8xbf16>
    tpu.vector_store %arg12[%c16_156, %c0_157, %c40_158], %74 {strides = array<i32>} : memref<32x8x72xbf16, #tpu.memory_space<vmem>>, vector<8x8x8xbf16>,
    %c0_159 = arith.constant 0 : index
    %c1_160 = arith.constant 1 : index
    %c0_161 = arith.constant 0 : index
    %c0_162 = arith.constant 0 : index
    %76 = vector.load %arg1[%c0_159, %c1_160, %c0_161, %c0_162] : memref<1x9x9x128xbf16, #tpu.memory_space<vmem>>, vector<1x8x8x8xbf16>
    %77 = vector.shape_cast %76 : vector<1x8x8x8xbf16> to vector<8x8x8xbf16>
    %c16_163 = arith.constant 16 : index
    %c0_164 = arith.constant 0 : index
    %c48_165 = arith.constant 48 : index
    %78 = vector.load %arg12[%c16_163, %c0_164, %c48_165] : memref<32x8x72xbf16, #tpu.memory_space<vmem>>, vector<8x8x8xbf16>
    tpu.vector_store %arg12[%c16_163, %c0_164, %c48_165], %77 {strides = array<i32>} : memref<32x8x72xbf16, #tpu.memory_space<vmem>>, vector<8x8x8xbf16>,
    %c0_166 = arith.constant 0 : index
    %c1_167 = arith.constant 1 : index
    %c0_168 = arith.constant 0 : index
    %c8_169 = arith.constant 8 : index
    %79 = vector.load %arg1[%c0_166, %c1_167, %c0_168, %c8_169] : memref<1x9x9x128xbf16, #tpu.memory_space<vmem>>, vector<1x8x8x8xbf16>
    %80 = vector.shape_cast %79 : vector<1x8x8x8xbf16> to vector<8x8x8xbf16>
    %c16_170 = arith.constant 16 : index
    %c0_171 = arith.constant 0 : index
    %c56_172 = arith.constant 56 : index
    %81 = vector.load %arg12[%c16_170, %c0_171, %c56_172] : memref<32x8x72xbf16, #tpu.memory_space<vmem>>, vector<8x8x8xbf16>
    tpu.vector_store %arg12[%c16_170, %c0_171, %c56_172], %80 {strides = array<i32>} : memref<32x8x72xbf16, #tpu.memory_space<vmem>>, vector<8x8x8xbf16>,
    %c0_173 = arith.constant 0 : index
    %c1_174 = arith.constant 1 : index
    %c0_175 = arith.constant 0 : index
    %c16_176 = arith.constant 16 : index
    %82 = vector.load %arg1[%c0_173, %c1_174, %c0_175, %c16_176] : memref<1x9x9x128xbf16, #tpu.memory_space<vmem>>, vector<1x8x8x8xbf16>
    %83 = vector.shape_cast %82 : vector<1x8x8x8xbf16> to vector<8x8x8xbf16>
    %c16_177 = arith.constant 16 : index
    %c0_178 = arith.constant 0 : index
    %c64_179 = arith.constant 64 : index
    %84 = vector.load %arg12[%c16_177, %c0_178, %c64_179] : memref<32x8x72xbf16, #tpu.memory_space<vmem>>, vector<8x8x8xbf16>
    tpu.vector_store %arg12[%c16_177, %c0_178, %c64_179], %83 {strides = array<i32>} : memref<32x8x72xbf16, #tpu.memory_space<vmem>>, vector<8x8x8xbf16>,
    %c0_180 = arith.constant 0 : index
    %c0_181 = arith.constant 0 : index
    %c0_182 = arith.constant 0 : index
    %c80_183 = arith.constant 80 : index
    %85 = vector.load %arg1[%c0_180, %c0_181, %c0_182, %c80_183] : memref<1x9x9x128xbf16, #tpu.memory_space<vmem>>, vector<1x8x8x8xbf16>
    %86 = vector.shape_cast %85 : vector<1x8x8x8xbf16> to vector<8x8x8xbf16>
    %c24_184 = arith.constant 24 : index
    %c0_185 = arith.constant 0 : index
    %c0_186 = arith.constant 0 : index
    %87 = vector.load %arg12[%c24_184, %c0_185, %c0_186] : memref<32x8x72xbf16, #tpu.memory_space<vmem>>, vector<8x8x8xbf16>
    tpu.vector_store %arg12[%c24_184, %c0_185, %c0_186], %86 {strides = array<i32>} : memref<32x8x72xbf16, #tpu.memory_space<vmem>>, vector<8x8x8xbf16>,
    %c0_187 = arith.constant 0 : index
    %c0_188 = arith.constant 0 : index
    %c0_189 = arith.constant 0 : index
    %c88_190 = arith.constant 88 : index
    %88 = vector.load %arg1[%c0_187, %c0_188, %c0_189, %c88_190] : memref<1x9x9x128xbf16, #tpu.memory_space<vmem>>, vector<1x8x8x8xbf16>
    %89 = vector.shape_cast %88 : vector<1x8x8x8xbf16> to vector<8x8x8xbf16>
    %c24_191 = arith.constant 24 : index
    %c0_192 = arith.constant 0 : index
    %c8_193 = arith.constant 8 : index
    %90 = vector.load %arg12[%c24_191, %c0_192, %c8_193] : memref<32x8x72xbf16, #tpu.memory_space<vmem>>, vector<8x8x8xbf16>
    tpu.vector_store %arg12[%c24_191, %c0_192, %c8_193], %89 {strides = array<i32>} : memref<32x8x72xbf16, #tpu.memory_space<vmem>>, vector<8x8x8xbf16>,
    %c0_194 = arith.constant 0 : index
    %c0_195 = arith.constant 0 : index
    %c1_196 = arith.constant 1 : index
    %c64_197 = arith.constant 64 : index
    %91 = vector.load %arg1[%c0_194, %c0_195, %c1_196, %c64_197] : memref<1x9x9x128xbf16, #tpu.memory_space<vmem>>, vector<1x8x8x8xbf16>
    %92 = vector.shape_cast %91 : vector<1x8x8x8xbf16> to vector<8x8x8xbf16>
    %c24_198 = arith.constant 24 : index
    %c0_199 = arith.constant 0 : index
    %c16_200 = arith.constant 16 : index
    %93 = vector.load %arg12[%c24_198, %c0_199, %c16_200] : memref<32x8x72xbf16, #tpu.memory_space<vmem>>, vector<8x8x8xbf16>
    tpu.vector_store %arg12[%c24_198, %c0_199, %c16_200], %92 {strides = array<i32>} : memref<32x8x72xbf16, #tpu.memory_space<vmem>>, vector<8x8x8xbf16>,
    %c0_201 = arith.constant 0 : index
    %c0_202 = arith.constant 0 : index
    %c0_203 = arith.constant 0 : index
    %c112_204 = arith.constant 112 : index
    %94 = vector.load %arg1[%c0_201, %c0_202, %c0_203, %c112_204] : memref<1x9x9x128xbf16, #tpu.memory_space<vmem>>, vector<1x8x8x8xbf16>
    %95 = vector.shape_cast %94 : vector<1x8x8x8xbf16> to vector<8x8x8xbf16>
    %c24_205 = arith.constant 24 : index
    %c0_206 = arith.constant 0 : index
    %c24_207 = arith.constant 24 : index
    %96 = vector.load %arg12[%c24_205, %c0_206, %c24_207] : memref<32x8x72xbf16, #tpu.memory_space<vmem>>, vector<8x8x8xbf16>
    tpu.vector_store %arg12[%c24_205, %c0_206, %c24_207], %95 {strides = array<i32>} : memref<32x8x72xbf16, #tpu.memory_space<vmem>>, vector<8x8x8xbf16>,
    %c0_208 = arith.constant 0 : index
    %c0_209 = arith.constant 0 : index
    %c0_210 = arith.constant 0 : index
    %c120 = arith.constant 120 : index
    %97 = vector.load %arg1[%c0_208, %c0_209, %c0_210, %c120] : memref<1x9x9x128xbf16, #tpu.memory_space<vmem>>, vector<1x8x8x8xbf16>
    %98 = vector.shape_cast %97 : vector<1x8x8x8xbf16> to vector<8x8x8xbf16>
    %c24_211 = arith.constant 24 : index
    %c0_212 = arith.constant 0 : index
    %c32_213 = arith.constant 32 : index
    %99 = vector.load %arg12[%c24_211, %c0_212, %c32_213] : memref<32x8x72xbf16, #tpu.memory_space<vmem>>, vector<8x8x8xbf16>
    tpu.vector_store %arg12[%c24_211, %c0_212, %c32_213], %98 {strides = array<i32>} : memref<32x8x72xbf16, #tpu.memory_space<vmem>>, vector<8x8x8xbf16>,
    %c0_214 = arith.constant 0 : index
    %c0_215 = arith.constant 0 : index
    %c1_216 = arith.constant 1 : index
    %c96_217 = arith.constant 96 : index
    %100 = vector.load %arg1[%c0_214, %c0_215, %c1_216, %c96_217] : memref<1x9x9x128xbf16, #tpu.memory_space<vmem>>, vector<1x8x8x8xbf16>
    %101 = vector.shape_cast %100 : vector<1x8x8x8xbf16> to vector<8x8x8xbf16>
    %c24_218 = arith.constant 24 : index
    %c0_219 = arith.constant 0 : index
    %c40_220 = arith.constant 40 : index
    %102 = vector.load %arg12[%c24_218, %c0_219, %c40_220] : memref<32x8x72xbf16, #tpu.memory_space<vmem>>, vector<8x8x8xbf16>
    tpu.vector_store %arg12[%c24_218, %c0_219, %c40_220], %101 {strides = array<i32>} : memref<32x8x72xbf16, #tpu.memory_space<vmem>>, vector<8x8x8xbf16>,
    %c0_221 = arith.constant 0 : index
    %c1_222 = arith.constant 1 : index
    %c0_223 = arith.constant 0 : index
    %c16_224 = arith.constant 16 : index
    %103 = vector.load %arg1[%c0_221, %c1_222, %c0_223, %c16_224] : memref<1x9x9x128xbf16, #tpu.memory_space<vmem>>, vector<1x8x8x8xbf16>
    %104 = vector.shape_cast %103 : vector<1x8x8x8xbf16> to vector<8x8x8xbf16>
    %c24_225 = arith.constant 24 : index
    %c0_226 = arith.constant 0 : index
    %c48_227 = arith.constant 48 : index
    %105 = vector.load %arg12[%c24_225, %c0_226, %c48_227] : memref<32x8x72xbf16, #tpu.memory_space<vmem>>, vector<8x8x8xbf16>
    tpu.vector_store %arg12[%c24_225, %c0_226, %c48_227], %104 {strides = array<i32>} : memref<32x8x72xbf16, #tpu.memory_space<vmem>>, vector<8x8x8xbf16>,
    %c0_228 = arith.constant 0 : index
    %c1_229 = arith.constant 1 : index
    %c0_230 = arith.constant 0 : index
    %c24_231 = arith.constant 24 : index
    %106 = vector.load %arg1[%c0_228, %c1_229, %c0_230, %c24_231] : memref<1x9x9x128xbf16, #tpu.memory_space<vmem>>, vector<1x8x8x8xbf16>
    %107 = vector.shape_cast %106 : vector<1x8x8x8xbf16> to vector<8x8x8xbf16>
    %c24_232 = arith.constant 24 : index
    %c0_233 = arith.constant 0 : index
    %c56_234 = arith.constant 56 : index
    %108 = vector.load %arg12[%c24_232, %c0_233, %c56_234] : memref<32x8x72xbf16, #tpu.memory_space<vmem>>, vector<8x8x8xbf16>
    tpu.vector_store %arg12[%c24_232, %c0_233, %c56_234], %107 {strides = array<i32>} : memref<32x8x72xbf16, #tpu.memory_space<vmem>>, vector<8x8x8xbf16>,
    %c0_235 = arith.constant 0 : index
    %c1_236 = arith.constant 1 : index
    %c1_237 = arith.constant 1 : index
    %c0_238 = arith.constant 0 : index
    %109 = vector.load %arg1[%c0_235, %c1_236, %c1_237, %c0_238] : memref<1x9x9x128xbf16, #tpu.memory_space<vmem>>, vector<1x8x8x8xbf16>
    %110 = vector.shape_cast %109 : vector<1x8x8x8xbf16> to vector<8x8x8xbf16>
    %c24_239 = arith.constant 24 : index
    %c0_240 = arith.constant 0 : index
    %c64_241 = arith.constant 64 : index
    %111 = vector.load %arg12[%c24_239, %c0_240, %c64_241] : memref<32x8x72xbf16, #tpu.memory_space<vmem>>, vector<8x8x8xbf16>
    tpu.vector_store %arg12[%c24_239, %c0_240, %c64_241], %110 {strides = array<i32>} : memref<32x8x72xbf16, #tpu.memory_space<vmem>>, vector<8x8x8xbf16>,
    %c0_242 = arith.constant 0 : index
    %c0_243 = arith.constant 0 : index
    %c0_244 = arith.constant 0 : index
    %112 = vector.load %arg12[%c0_242, %c0_243, %c0_244] : memref<32x8x72xbf16, #tpu.memory_space<vmem>>, vector<32x8x72xbf16>
    %113 = vector.shape_cast %112 : vector<32x8x72xbf16> to vector<256x72xbf16>
    %c0_245 = arith.constant 0 : index
    %c0_246 = arith.constant 0 : index
    %114 = vector.load %arg2[%c0_245, %c0_246] : memref<72x16xbf16, #tpu.memory_space<vmem>>, vector<72x16xbf16>
    %cst_247 = arith.constant dense<0.000000e+00> : vector<256x16xf32>
    %115 = tpu.matmul %113, %114, %cst_247 {dimension_numbers = #tpu.dot_dimension_numbers<[1], [0], [0], [1], [0, 0, 1, 1], [], []>} : vector<256x72xbf16>, vector<72x16xbf16>, vector<256x16xf32> -> vector<256x16xf32>
    %c0_248 = arith.constant 0 : index
    %c0_249 = arith.constant 0 : index
    %116 = vector.load %arg3[%c0_248, %c0_249] : memref<1x16xf32, #tpu.memory_space<vmem>>, vector<1x16xf32>
    %117 = vector.broadcast %116 : vector<1x16xf32> to vector<256x16xf32>
    %118 = arith.addf %115, %117 : vector<256x16xf32>
    %119 = arith.negf %118 : vector<256x16xf32>
    %120 = math.exp %119 : vector<256x16xf32>
    %cst_250 = arith.constant 1.000000e+00 : f32
    %121 = vector.broadcast %cst_250 : f32 to vector<256x16xf32>
    %122 = arith.addf %121, %120 : vector<256x16xf32>
    %123 = arith.divf %121, %122 : vector<256x16xf32>
    %124 = arith.mulf %118, %123 : vector<256x16xf32>
    %125 = arith.truncf %124 : vector<256x16xf32> to vector<256x16xbf16>
    %126 = vector.extract_strided_slice %125 {offsets = [0, 0], sizes = [8, 16], strides = [1, 1]} : vector<256x16xbf16> to vector<8x16xbf16>
    %c0_251 = arith.constant 0 : index
    %c0_252 = arith.constant 0 : index
    %c0_253 = arith.constant 0 : index
    %127 = vector.load %arg13[%c0_251, %c0_252, %c0_253] : memref<9x9x64xbf16, #tpu.memory_space<vmem>>, vector<1x8x16xbf16>
    %128 = vector.shape_cast %127 : vector<1x8x16xbf16> to vector<8x16xbf16>
    %129 = vector.shape_cast %126 : vector<8x16xbf16> to vector<1x8x16xbf16>
    tpu.vector_store %arg13[%c0_251, %c0_252, %c0_253], %129 {strides = array<i32>} : memref<9x9x64xbf16, #tpu.memory_space<vmem>>, vector<1x8x16xbf16>,
    %130 = vector.extract_strided_slice %125 {offsets = [8, 0], sizes = [8, 16], strides = [1, 1]} : vector<256x16xbf16> to vector<8x16xbf16>
    %c1_254 = arith.constant 1 : index
    %c0_255 = arith.constant 0 : index
    %c0_256 = arith.constant 0 : index
    %131 = vector.load %arg13[%c1_254, %c0_255, %c0_256] : memref<9x9x64xbf16, #tpu.memory_space<vmem>>, vector<1x8x16xbf16>
    %132 = vector.shape_cast %131 : vector<1x8x16xbf16> to vector<8x16xbf16>
    %133 = vector.shape_cast %130 : vector<8x16xbf16> to vector<1x8x16xbf16>
    tpu.vector_store %arg13[%c1_254, %c0_255, %c0_256], %133 {strides = array<i32>} : memref<9x9x64xbf16, #tpu.memory_space<vmem>>, vector<1x8x16xbf16>,
    %134 = vector.extract_strided_slice %125 {offsets = [16, 0], sizes = [8, 16], strides = [1, 1]} : vector<256x16xbf16> to vector<8x16xbf16>
    %c2 = arith.constant 2 : index
    %c0_257 = arith.constant 0 : index
    %c0_258 = arith.constant 0 : index
    %135 = vector.load %arg13[%c2, %c0_257, %c0_258] : memref<9x9x64xbf16, #tpu.memory_space<vmem>>, vector<1x8x16xbf16>
    %136 = vector.shape_cast %135 : vector<1x8x16xbf16> to vector<8x16xbf16>
    %137 = vector.shape_cast %134 : vector<8x16xbf16> to vector<1x8x16xbf16>
    tpu.vector_store %arg13[%c2, %c0_257, %c0_258], %137 {strides = array<i32>} : memref<9x9x64xbf16, #tpu.memory_space<vmem>>, vector<1x8x16xbf16>,
    %138 = vector.extract_strided_slice %125 {offsets = [24, 0], sizes = [8, 16], strides = [1, 1]} : vector<256x16xbf16> to vector<8x16xbf16>
    %c3 = arith.constant 3 : index
    %c0_259 = arith.constant 0 : index
    %c0_260 = arith.constant 0 : index
    %139 = vector.load %arg13[%c3, %c0_259, %c0_260] : memref<9x9x64xbf16, #tpu.memory_space<vmem>>, vector<1x8x16xbf16>
    %140 = vector.shape_cast %139 : vector<1x8x16xbf16> to vector<8x16xbf16>
    %141 = vector.shape_cast %138 : vector<8x16xbf16> to vector<1x8x16xbf16>
    tpu.vector_store %arg13[%c3, %c0_259, %c0_260], %141 {strides = array<i32>} : memref<9x9x64xbf16, #tpu.memory_space<vmem>>, vector<1x8x16xbf16>,
    %142 = vector.extract_strided_slice %125 {offsets = [32, 0], sizes = [8, 16], strides = [1, 1]} : vector<256x16xbf16> to vector<8x16xbf16>
    %c4 = arith.constant 4 : index
    %c0_261 = arith.constant 0 : index
    %c0_262 = arith.constant 0 : index
    %143 = vector.load %arg13[%c4, %c0_261, %c0_262] : memref<9x9x64xbf16, #tpu.memory_space<vmem>>, vector<1x8x16xbf16>
    %144 = vector.shape_cast %143 : vector<1x8x16xbf16> to vector<8x16xbf16>
    %145 = vector.shape_cast %142 : vector<8x16xbf16> to vector<1x8x16xbf16>
    tpu.vector_store %arg13[%c4, %c0_261, %c0_262], %145 {strides = array<i32>} : memref<9x9x64xbf16, #tpu.memory_space<vmem>>, vector<1x8x16xbf16>,
    %146 = vector.extract_strided_slice %125 {offsets = [40, 0], sizes = [8, 16], strides = [1, 1]} : vector<256x16xbf16> to vector<8x16xbf16>
    %c5 = arith.constant 5 : index
    %c0_263 = arith.constant 0 : index
    %c0_264 = arith.constant 0 : index
    %147 = vector.load %arg13[%c5, %c0_263, %c0_264] : memref<9x9x64xbf16, #tpu.memory_space<vmem>>, vector<1x8x16xbf16>
    %148 = vector.shape_cast %147 : vector<1x8x16xbf16> to vector<8x16xbf16>
    %149 = vector.shape_cast %146 : vector<8x16xbf16> to vector<1x8x16xbf16>
    tpu.vector_store %arg13[%c5, %c0_263, %c0_264], %149 {strides = array<i32>} : memref<9x9x64xbf16, #tpu.memory_space<vmem>>, vector<1x8x16xbf16>,
    %150 = vector.extract_strided_slice %125 {offsets = [48, 0], sizes = [8, 16], strides = [1, 1]} : vector<256x16xbf16> to vector<8x16xbf16>
    %c6 = arith.constant 6 : index
    %c0_265 = arith.constant 0 : index
    %c0_266 = arith.constant 0 : index
    %151 = vector.load %arg13[%c6, %c0_265, %c0_266] : memref<9x9x64xbf16, #tpu.memory_space<vmem>>, vector<1x8x16xbf16>
    %152 = vector.shape_cast %151 : vector<1x8x16xbf16> to vector<8x16xbf16>
    %153 = vector.shape_cast %150 : vector<8x16xbf16> to vector<1x8x16xbf16>
    tpu.vector_store %arg13[%c6, %c0_265, %c0_266], %153 {strides = array<i32>} : memref<9x9x64xbf16, #tpu.memory_space<vmem>>, vector<1x8x16xbf16>,
    %154 = vector.extract_strided_slice %125 {offsets = [56, 0], sizes = [8, 16], strides = [1, 1]} : vector<256x16xbf16> to vector<8x16xbf16>
    %c7 = arith.constant 7 : index
    %c0_267 = arith.constant 0 : index
    %c0_268 = arith.constant 0 : index
    %155 = vector.load %arg13[%c7, %c0_267, %c0_268] : memref<9x9x64xbf16, #tpu.memory_space<vmem>>, vector<1x8x16xbf16>
    %156 = vector.shape_cast %155 : vector<1x8x16xbf16> to vector<8x16xbf16>
    %157 = vector.shape_cast %154 : vector<8x16xbf16> to vector<1x8x16xbf16>
    tpu.vector_store %arg13[%c7, %c0_267, %c0_268], %157 {strides = array<i32>} : memref<9x9x64xbf16, #tpu.memory_space<vmem>>, vector<1x8x16xbf16>,
    %158 = vector.extract_strided_slice %125 {offsets = [64, 0], sizes = [8, 16], strides = [1, 1]} : vector<256x16xbf16> to vector<8x16xbf16>
    %c0_269 = arith.constant 0 : index
    %c1_270 = arith.constant 1 : index
    %c16_271 = arith.constant 16 : index
    %159 = vector.load %arg13[%c0_269, %c1_270, %c16_271] : memref<9x9x64xbf16, #tpu.memory_space<vmem>>, vector<1x8x16xbf16>
    %160 = vector.shape_cast %159 : vector<1x8x16xbf16> to vector<8x16xbf16>
    %161 = vector.shape_cast %158 : vector<8x16xbf16> to vector<1x8x16xbf16>
    tpu.vector_store %arg13[%c0_269, %c1_270, %c16_271], %161 {strides = array<i32>} : memref<9x9x64xbf16, #tpu.memory_space<vmem>>, vector<1x8x16xbf16>,
    %162 = vector.extract_strided_slice %125 {offsets = [72, 0], sizes = [8, 16], strides = [1, 1]} : vector<256x16xbf16> to vector<8x16xbf16>
    %c1_272 = arith.constant 1 : index
    %c1_273 = arith.constant 1 : index
    %c16_274 = arith.constant 16 : index
    %163 = vector.load %arg13[%c1_272, %c1_273, %c16_274] : memref<9x9x64xbf16, #tpu.memory_space<vmem>>, vector<1x8x16xbf16>
    %164 = vector.shape_cast %163 : vector<1x8x16xbf16> to vector<8x16xbf16>
    %165 = vector.shape_cast %162 : vector<8x16xbf16> to vector<1x8x16xbf16>
    tpu.vector_store %arg13[%c1_272, %c1_273, %c16_274], %165 {strides = array<i32>} : memref<9x9x64xbf16, #tpu.memory_space<vmem>>, vector<1x8x16xbf16>,
    %166 = vector.extract_strided_slice %125 {offsets = [80, 0], sizes = [8, 16], strides = [1, 1]} : vector<256x16xbf16> to vector<8x16xbf16>
    %c2_275 = arith.constant 2 : index
    %c1_276 = arith.constant 1 : index
    %c16_277 = arith.constant 16 : index
    %167 = vector.load %arg13[%c2_275, %c1_276, %c16_277] : memref<9x9x64xbf16, #tpu.memory_space<vmem>>, vector<1x8x16xbf16>
    %168 = vector.shape_cast %167 : vector<1x8x16xbf16> to vector<8x16xbf16>
    %169 = vector.shape_cast %166 : vector<8x16xbf16> to vector<1x8x16xbf16>
    tpu.vector_store %arg13[%c2_275, %c1_276, %c16_277], %169 {strides = array<i32>} : memref<9x9x64xbf16, #tpu.memory_space<vmem>>, vector<1x8x16xbf16>,
    %170 = vector.extract_strided_slice %125 {offsets = [88, 0], sizes = [8, 16], strides = [1, 1]} : vector<256x16xbf16> to vector<8x16xbf16>
    %c3_278 = arith.constant 3 : index
    %c1_279 = arith.constant 1 : index
    %c16_280 = arith.constant 16 : index
    %171 = vector.load %arg13[%c3_278, %c1_279, %c16_280] : memref<9x9x64xbf16, #tpu.memory_space<vmem>>, vector<1x8x16xbf16>
    %172 = vector.shape_cast %171 : vector<1x8x16xbf16> to vector<8x16xbf16>
    %173 = vector.shape_cast %170 : vector<8x16xbf16> to vector<1x8x16xbf16>
    tpu.vector_store %arg13[%c3_278, %c1_279, %c16_280], %173 {strides = array<i32>} : memref<9x9x64xbf16, #tpu.memory_space<vmem>>, vector<1x8x16xbf16>,
    %174 = vector.extract_strided_slice %125 {offsets = [96, 0], sizes = [8, 16], strides = [1, 1]} : vector<256x16xbf16> to vector<8x16xbf16>
    %c4_281 = arith.constant 4 : index
    %c1_282 = arith.constant 1 : index
    %c16_283 = arith.constant 16 : index
    %175 = vector.load %arg13[%c4_281, %c1_282, %c16_283] : memref<9x9x64xbf16, #tpu.memory_space<vmem>>, vector<1x8x16xbf16>
    %176 = vector.shape_cast %175 : vector<1x8x16xbf16> to vector<8x16xbf16>
    %177 = vector.shape_cast %174 : vector<8x16xbf16> to vector<1x8x16xbf16>
    tpu.vector_store %arg13[%c4_281, %c1_282, %c16_283], %177 {strides = array<i32>} : memref<9x9x64xbf16, #tpu.memory_space<vmem>>, vector<1x8x16xbf16>,
    %178 = vector.extract_strided_slice %125 {offsets = [104, 0], sizes = [8, 16], strides = [1, 1]} : vector<256x16xbf16> to vector<8x16xbf16>
    %c5_284 = arith.constant 5 : index
    %c1_285 = arith.constant 1 : index
    %c16_286 = arith.constant 16 : index
    %179 = vector.load %arg13[%c5_284, %c1_285, %c16_286] : memref<9x9x64xbf16, #tpu.memory_space<vmem>>, vector<1x8x16xbf16>
    %180 = vector.shape_cast %179 : vector<1x8x16xbf16> to vector<8x16xbf16>
    %181 = vector.shape_cast %178 : vector<8x16xbf16> to vector<1x8x16xbf16>
    tpu.vector_store %arg13[%c5_284, %c1_285, %c16_286], %181 {strides = array<i32>} : memref<9x9x64xbf16, #tpu.memory_space<vmem>>, vector<1x8x16xbf16>,
    %182 = vector.extract_strided_slice %125 {offsets = [112, 0], sizes = [8, 16], strides = [1, 1]} : vector<256x16xbf16> to vector<8x16xbf16>
    %c6_287 = arith.constant 6 : index
    %c1_288 = arith.constant 1 : index
    %c16_289 = arith.constant 16 : index
    %183 = vector.load %arg13[%c6_287, %c1_288, %c16_289] : memref<9x9x64xbf16, #tpu.memory_space<vmem>>, vector<1x8x16xbf16>
    %184 = vector.shape_cast %183 : vector<1x8x16xbf16> to vector<8x16xbf16>
    %185 = vector.shape_cast %182 : vector<8x16xbf16> to vector<1x8x16xbf16>
    tpu.vector_store %arg13[%c6_287, %c1_288, %c16_289], %185 {strides = array<i32>} : memref<9x9x64xbf16, #tpu.memory_space<vmem>>, vector<1x8x16xbf16>,
    %186 = vector.extract_strided_slice %125 {offsets = [120, 0], sizes = [8, 16], strides = [1, 1]} : vector<256x16xbf16> to vector<8x16xbf16>
    %c7_290 = arith.constant 7 : index
    %c1_291 = arith.constant 1 : index
    %c16_292 = arith.constant 16 : index
    %187 = vector.load %arg13[%c7_290, %c1_291, %c16_292] : memref<9x9x64xbf16, #tpu.memory_space<vmem>>, vector<1x8x16xbf16>
    %188 = vector.shape_cast %187 : vector<1x8x16xbf16> to vector<8x16xbf16>
    %189 = vector.shape_cast %186 : vector<8x16xbf16> to vector<1x8x16xbf16>
    tpu.vector_store %arg13[%c7_290, %c1_291, %c16_292], %189 {strides = array<i32>} : memref<9x9x64xbf16, #tpu.memory_space<vmem>>, vector<1x8x16xbf16>,
    %190 = vector.extract_strided_slice %125 {offsets = [128, 0], sizes = [8, 16], strides = [1, 1]} : vector<256x16xbf16> to vector<8x16xbf16>
    %c1_293 = arith.constant 1 : index
    %c0_294 = arith.constant 0 : index
    %c32_295 = arith.constant 32 : index
    %191 = vector.load %arg13[%c1_293, %c0_294, %c32_295] : memref<9x9x64xbf16, #tpu.memory_space<vmem>>, vector<1x8x16xbf16>
    %192 = vector.shape_cast %191 : vector<1x8x16xbf16> to vector<8x16xbf16>
    %193 = vector.shape_cast %190 : vector<8x16xbf16> to vector<1x8x16xbf16>
    tpu.vector_store %arg13[%c1_293, %c0_294, %c32_295], %193 {strides = array<i32>} : memref<9x9x64xbf16, #tpu.memory_space<vmem>>, vector<1x8x16xbf16>,
    %194 = vector.extract_strided_slice %125 {offsets = [136, 0], sizes = [8, 16], strides = [1, 1]} : vector<256x16xbf16> to vector<8x16xbf16>
    %c2_296 = arith.constant 2 : index
    %c0_297 = arith.constant 0 : index
    %c32_298 = arith.constant 32 : index
    %195 = vector.load %arg13[%c2_296, %c0_297, %c32_298] : memref<9x9x64xbf16, #tpu.memory_space<vmem>>, vector<1x8x16xbf16>
    %196 = vector.shape_cast %195 : vector<1x8x16xbf16> to vector<8x16xbf16>
    %197 = vector.shape_cast %194 : vector<8x16xbf16> to vector<1x8x16xbf16>
    tpu.vector_store %arg13[%c2_296, %c0_297, %c32_298], %197 {strides = array<i32>} : memref<9x9x64xbf16, #tpu.memory_space<vmem>>, vector<1x8x16xbf16>,
    %198 = vector.extract_strided_slice %125 {offsets = [144, 0], sizes = [8, 16], strides = [1, 1]} : vector<256x16xbf16> to vector<8x16xbf16>
    %c3_299 = arith.constant 3 : index
    %c0_300 = arith.constant 0 : index
    %c32_301 = arith.constant 32 : index
    %199 = vector.load %arg13[%c3_299, %c0_300, %c32_301] : memref<9x9x64xbf16, #tpu.memory_space<vmem>>, vector<1x8x16xbf16>
    %200 = vector.shape_cast %199 : vector<1x8x16xbf16> to vector<8x16xbf16>
    %201 = vector.shape_cast %198 : vector<8x16xbf16> to vector<1x8x16xbf16>
    tpu.vector_store %arg13[%c3_299, %c0_300, %c32_301], %201 {strides = array<i32>} : memref<9x9x64xbf16, #tpu.memory_space<vmem>>, vector<1x8x16xbf16>,
    %202 = vector.extract_strided_slice %125 {offsets = [152, 0], sizes = [8, 16], strides = [1, 1]} : vector<256x16xbf16> to vector<8x16xbf16>
    %c4_302 = arith.constant 4 : index
    %c0_303 = arith.constant 0 : index
    %c32_304 = arith.constant 32 : index
    %203 = vector.load %arg13[%c4_302, %c0_303, %c32_304] : memref<9x9x64xbf16, #tpu.memory_space<vmem>>, vector<1x8x16xbf16>
    %204 = vector.shape_cast %203 : vector<1x8x16xbf16> to vector<8x16xbf16>
    %205 = vector.shape_cast %202 : vector<8x16xbf16> to vector<1x8x16xbf16>
    tpu.vector_store %arg13[%c4_302, %c0_303, %c32_304], %205 {strides = array<i32>} : memref<9x9x64xbf16, #tpu.memory_space<vmem>>, vector<1x8x16xbf16>,
    %206 = vector.extract_strided_slice %125 {offsets = [160, 0], sizes = [8, 16], strides = [1, 1]} : vector<256x16xbf16> to vector<8x16xbf16>
    %c5_305 = arith.constant 5 : index
    %c0_306 = arith.constant 0 : index
    %c32_307 = arith.constant 32 : index
    %207 = vector.load %arg13[%c5_305, %c0_306, %c32_307] : memref<9x9x64xbf16, #tpu.memory_space<vmem>>, vector<1x8x16xbf16>
    %208 = vector.shape_cast %207 : vector<1x8x16xbf16> to vector<8x16xbf16>
    %209 = vector.shape_cast %206 : vector<8x16xbf16> to vector<1x8x16xbf16>
    tpu.vector_store %arg13[%c5_305, %c0_306, %c32_307], %209 {strides = array<i32>} : memref<9x9x64xbf16, #tpu.memory_space<vmem>>, vector<1x8x16xbf16>,
    %210 = vector.extract_strided_slice %125 {offsets = [168, 0], sizes = [8, 16], strides = [1, 1]} : vector<256x16xbf16> to vector<8x16xbf16>
    %c6_308 = arith.constant 6 : index
    %c0_309 = arith.constant 0 : index
    %c32_310 = arith.constant 32 : index
    %211 = vector.load %arg13[%c6_308, %c0_309, %c32_310] : memref<9x9x64xbf16, #tpu.memory_space<vmem>>, vector<1x8x16xbf16>
    %212 = vector.shape_cast %211 : vector<1x8x16xbf16> to vector<8x16xbf16>
    %213 = vector.shape_cast %210 : vector<8x16xbf16> to vector<1x8x16xbf16>
    tpu.vector_store %arg13[%c6_308, %c0_309, %c32_310], %213 {strides = array<i32>} : memref<9x9x64xbf16, #tpu.memory_space<vmem>>, vector<1x8x16xbf16>,
    %214 = vector.extract_strided_slice %125 {offsets = [176, 0], sizes = [8, 16], strides = [1, 1]} : vector<256x16xbf16> to vector<8x16xbf16>
    %c7_311 = arith.constant 7 : index
    %c0_312 = arith.constant 0 : index
    %c32_313 = arith.constant 32 : index
    %215 = vector.load %arg13[%c7_311, %c0_312, %c32_313] : memref<9x9x64xbf16, #tpu.memory_space<vmem>>, vector<1x8x16xbf16>
    %216 = vector.shape_cast %215 : vector<1x8x16xbf16> to vector<8x16xbf16>
    %217 = vector.shape_cast %214 : vector<8x16xbf16> to vector<1x8x16xbf16>
    tpu.vector_store %arg13[%c7_311, %c0_312, %c32_313], %217 {strides = array<i32>} : memref<9x9x64xbf16, #tpu.memory_space<vmem>>, vector<1x8x16xbf16>,
    %218 = vector.extract_strided_slice %125 {offsets = [184, 0], sizes = [8, 16], strides = [1, 1]} : vector<256x16xbf16> to vector<8x16xbf16>
    %c8_314 = arith.constant 8 : index
    %c0_315 = arith.constant 0 : index
    %c32_316 = arith.constant 32 : index
    %219 = vector.load %arg13[%c8_314, %c0_315, %c32_316] : memref<9x9x64xbf16, #tpu.memory_space<vmem>>, vector<1x8x16xbf16>
    %220 = vector.shape_cast %219 : vector<1x8x16xbf16> to vector<8x16xbf16>
    %221 = vector.shape_cast %218 : vector<8x16xbf16> to vector<1x8x16xbf16>
    tpu.vector_store %arg13[%c8_314, %c0_315, %c32_316], %221 {strides = array<i32>} : memref<9x9x64xbf16, #tpu.memory_space<vmem>>, vector<1x8x16xbf16>,
    %222 = vector.extract_strided_slice %125 {offsets = [192, 0], sizes = [8, 16], strides = [1, 1]} : vector<256x16xbf16> to vector<8x16xbf16>
    %c1_317 = arith.constant 1 : index
    %c1_318 = arith.constant 1 : index
    %c48_319 = arith.constant 48 : index
    %223 = vector.load %arg13[%c1_317, %c1_318, %c48_319] : memref<9x9x64xbf16, #tpu.memory_space<vmem>>, vector<1x8x16xbf16>
    %224 = vector.shape_cast %223 : vector<1x8x16xbf16> to vector<8x16xbf16>
    %225 = vector.shape_cast %222 : vector<8x16xbf16> to vector<1x8x16xbf16>
    tpu.vector_store %arg13[%c1_317, %c1_318, %c48_319], %225 {strides = array<i32>} : memref<9x9x64xbf16, #tpu.memory_space<vmem>>, vector<1x8x16xbf16>,
    %226 = vector.extract_strided_slice %125 {offsets = [200, 0], sizes = [8, 16], strides = [1, 1]} : vector<256x16xbf16> to vector<8x16xbf16>
    %c2_320 = arith.constant 2 : index
    %c1_321 = arith.constant 1 : index
    %c48_322 = arith.constant 48 : index
    %227 = vector.load %arg13[%c2_320, %c1_321, %c48_322] : memref<9x9x64xbf16, #tpu.memory_space<vmem>>, vector<1x8x16xbf16>
    %228 = vector.shape_cast %227 : vector<1x8x16xbf16> to vector<8x16xbf16>
    %229 = vector.shape_cast %226 : vector<8x16xbf16> to vector<1x8x16xbf16>
    tpu.vector_store %arg13[%c2_320, %c1_321, %c48_322], %229 {strides = array<i32>} : memref<9x9x64xbf16, #tpu.memory_space<vmem>>, vector<1x8x16xbf16>,
    %230 = vector.extract_strided_slice %125 {offsets = [208, 0], sizes = [8, 16], strides = [1, 1]} : vector<256x16xbf16> to vector<8x16xbf16>
    %c3_323 = arith.constant 3 : index
    %c1_324 = arith.constant 1 : index
    %c48_325 = arith.constant 48 : index
    %231 = vector.load %arg13[%c3_323, %c1_324, %c48_325] : memref<9x9x64xbf16, #tpu.memory_space<vmem>>, vector<1x8x16xbf16>
    %232 = vector.shape_cast %231 : vector<1x8x16xbf16> to vector<8x16xbf16>
    %233 = vector.shape_cast %230 : vector<8x16xbf16> to vector<1x8x16xbf16>
    tpu.vector_store %arg13[%c3_323, %c1_324, %c48_325], %233 {strides = array<i32>} : memref<9x9x64xbf16, #tpu.memory_space<vmem>>, vector<1x8x16xbf16>,
    %234 = vector.extract_strided_slice %125 {offsets = [216, 0], sizes = [8, 16], strides = [1, 1]} : vector<256x16xbf16> to vector<8x16xbf16>
    %c4_326 = arith.constant 4 : index
    %c1_327 = arith.constant 1 : index
    %c48_328 = arith.constant 48 : index
    %235 = vector.load %arg13[%c4_326, %c1_327, %c48_328] : memref<9x9x64xbf16, #tpu.memory_space<vmem>>, vector<1x8x16xbf16>
    %236 = vector.shape_cast %235 : vector<1x8x16xbf16> to vector<8x16xbf16>
    %237 = vector.shape_cast %234 : vector<8x16xbf16> to vector<1x8x16xbf16>
    tpu.vector_store %arg13[%c4_326, %c1_327, %c48_328], %237 {strides = array<i32>} : memref<9x9x64xbf16, #tpu.memory_space<vmem>>, vector<1x8x16xbf16>,
    %238 = vector.extract_strided_slice %125 {offsets = [224, 0], sizes = [8, 16], strides = [1, 1]} : vector<256x16xbf16> to vector<8x16xbf16>
    %c5_329 = arith.constant 5 : index
    %c1_330 = arith.constant 1 : index
    %c48_331 = arith.constant 48 : index
    %239 = vector.load %arg13[%c5_329, %c1_330, %c48_331] : memref<9x9x64xbf16, #tpu.memory_space<vmem>>, vector<1x8x16xbf16>
    %240 = vector.shape_cast %239 : vector<1x8x16xbf16> to vector<8x16xbf16>
    %241 = vector.shape_cast %238 : vector<8x16xbf16> to vector<1x8x16xbf16>
    tpu.vector_store %arg13[%c5_329, %c1_330, %c48_331], %241 {strides = array<i32>} : memref<9x9x64xbf16, #tpu.memory_space<vmem>>, vector<1x8x16xbf16>,
    %242 = vector.extract_strided_slice %125 {offsets = [232, 0], sizes = [8, 16], strides = [1, 1]} : vector<256x16xbf16> to vector<8x16xbf16>
    %c6_332 = arith.constant 6 : index
    %c1_333 = arith.constant 1 : index
    %c48_334 = arith.constant 48 : index
    %243 = vector.load %arg13[%c6_332, %c1_333, %c48_334] : memref<9x9x64xbf16, #tpu.memory_space<vmem>>, vector<1x8x16xbf16>
    %244 = vector.shape_cast %243 : vector<1x8x16xbf16> to vector<8x16xbf16>
    %245 = vector.shape_cast %242 : vector<8x16xbf16> to vector<1x8x16xbf16>
    tpu.vector_store %arg13[%c6_332, %c1_333, %c48_334], %245 {strides = array<i32>} : memref<9x9x64xbf16, #tpu.memory_space<vmem>>, vector<1x8x16xbf16>,
    %246 = vector.extract_strided_slice %125 {offsets = [240, 0], sizes = [8, 16], strides = [1, 1]} : vector<256x16xbf16> to vector<8x16xbf16>
    %c7_335 = arith.constant 7 : index
    %c1_336 = arith.constant 1 : index
    %c48_337 = arith.constant 48 : index
    %247 = vector.load %arg13[%c7_335, %c1_336, %c48_337] : memref<9x9x64xbf16, #tpu.memory_space<vmem>>, vector<1x8x16xbf16>
    %248 = vector.shape_cast %247 : vector<1x8x16xbf16> to vector<8x16xbf16>
    %249 = vector.shape_cast %246 : vector<8x16xbf16> to vector<1x8x16xbf16>
    tpu.vector_store %arg13[%c7_335, %c1_336, %c48_337], %249 {strides = array<i32>} : memref<9x9x64xbf16, #tpu.memory_space<vmem>>, vector<1x8x16xbf16>,
    %250 = vector.extract_strided_slice %125 {offsets = [248, 0], sizes = [8, 16], strides = [1, 1]} : vector<256x16xbf16> to vector<8x16xbf16>
    %c8_338 = arith.constant 8 : index
    %c1_339 = arith.constant 1 : index
    %c48_340 = arith.constant 48 : index
    %251 = vector.load %arg13[%c8_338, %c1_339, %c48_340] : memref<9x9x64xbf16, #tpu.memory_space<vmem>>, vector<1x8x16xbf16>
    %252 = vector.shape_cast %251 : vector<1x8x16xbf16> to vector<8x16xbf16>
    %253 = vector.shape_cast %250 : vector<8x16xbf16> to vector<1x8x16xbf16>
    tpu.vector_store %arg13[%c8_338, %c1_339, %c48_340], %253 {strides = array<i32>} : memref<9x9x64xbf16, #tpu.memory_space<vmem>>, vector<1x8x16xbf16>,
    %c0_341 = arith.constant 0 : index
    %c0_342 = arith.constant 0 : index
    %c48_343 = arith.constant 48 : index
    %254 = vector.load %arg13[%c0_341, %c0_342, %c48_343] : memref<9x9x64xbf16, #tpu.memory_space<vmem>>, vector<8x8x16xbf16>
    %c0_344 = arith.constant 0 : index
    %c0_345 = arith.constant 0 : index
    %c0_346 = arith.constant 0 : index
    %255 = vector.load %arg14[%c0_344, %c0_345, %c0_346] : memref<8x8x144xbf16, #tpu.memory_space<vmem>>, vector<8x8x16xbf16>
    tpu.vector_store %arg14[%c0_344, %c0_345, %c0_346], %254 {strides = array<i32>} : memref<8x8x144xbf16, #tpu.memory_space<vmem>>, vector<8x8x16xbf16>,
    %c0_347 = arith.constant 0 : index
    %c0_348 = arith.constant 0 : index
    %c32_349 = arith.constant 32 : index
    %256 = vector.load %arg13[%c0_347, %c0_348, %c32_349] : memref<9x9x64xbf16, #tpu.memory_space<vmem>>, vector<8x8x16xbf16>
    %c0_350 = arith.constant 0 : index
    %c0_351 = arith.constant 0 : index
    %c16_352 = arith.constant 16 : index
    %257 = vector.load %arg14[%c0_350, %c0_351, %c16_352] : memref<8x8x144xbf16, #tpu.memory_space<vmem>>, vector<8x8x16xbf16>
    tpu.vector_store %arg14[%c0_350, %c0_351, %c16_352], %256 {strides = array<i32>} : memref<8x8x144xbf16, #tpu.memory_space<vmem>>, vector<8x8x16xbf16>,
    %c0_353 = arith.constant 0 : index
    %c1_354 = arith.constant 1 : index
    %c48_355 = arith.constant 48 : index
    %258 = vector.load %arg13[%c0_353, %c1_354, %c48_355] : memref<9x9x64xbf16, #tpu.memory_space<vmem>>, vector<8x8x16xbf16>
    %c0_356 = arith.constant 0 : index
    %c0_357 = arith.constant 0 : index
    %c32_358 = arith.constant 32 : index
    %259 = vector.load %arg14[%c0_356, %c0_357, %c32_358] : memref<8x8x144xbf16, #tpu.memory_space<vmem>>, vector<8x8x16xbf16>
    tpu.vector_store %arg14[%c0_356, %c0_357, %c32_358], %258 {strides = array<i32>} : memref<8x8x144xbf16, #tpu.memory_space<vmem>>, vector<8x8x16xbf16>,
    %c0_359 = arith.constant 0 : index
    %c0_360 = arith.constant 0 : index
    %c16_361 = arith.constant 16 : index
    %260 = vector.load %arg13[%c0_359, %c0_360, %c16_361] : memref<9x9x64xbf16, #tpu.memory_space<vmem>>, vector<8x8x16xbf16>
    %c0_362 = arith.constant 0 : index
    %c0_363 = arith.constant 0 : index
    %c48_364 = arith.constant 48 : index
    %261 = vector.load %arg14[%c0_362, %c0_363, %c48_364] : memref<8x8x144xbf16, #tpu.memory_space<vmem>>, vector<8x8x16xbf16>
    tpu.vector_store %arg14[%c0_362, %c0_363, %c48_364], %260 {strides = array<i32>} : memref<8x8x144xbf16, #tpu.memory_space<vmem>>, vector<8x8x16xbf16>,
    %c0_365 = arith.constant 0 : index
    %c0_366 = arith.constant 0 : index
    %c0_367 = arith.constant 0 : index
    %262 = vector.load %arg13[%c0_365, %c0_366, %c0_367] : memref<9x9x64xbf16, #tpu.memory_space<vmem>>, vector<8x8x16xbf16>
    %c0_368 = arith.constant 0 : index
    %c0_369 = arith.constant 0 : index
    %c64_370 = arith.constant 64 : index
    %263 = vector.load %arg14[%c0_368, %c0_369, %c64_370] : memref<8x8x144xbf16, #tpu.memory_space<vmem>>, vector<8x8x16xbf16>
    tpu.vector_store %arg14[%c0_368, %c0_369, %c64_370], %262 {strides = array<i32>} : memref<8x8x144xbf16, #tpu.memory_space<vmem>>, vector<8x8x16xbf16>,
    %c0_371 = arith.constant 0 : index
    %c1_372 = arith.constant 1 : index
    %c16_373 = arith.constant 16 : index
    %264 = vector.load %arg13[%c0_371, %c1_372, %c16_373] : memref<9x9x64xbf16, #tpu.memory_space<vmem>>, vector<8x8x16xbf16>
    %c0_374 = arith.constant 0 : index
    %c0_375 = arith.constant 0 : index
    %c80_376 = arith.constant 80 : index
    %265 = vector.load %arg14[%c0_374, %c0_375, %c80_376] : memref<8x8x144xbf16, #tpu.memory_space<vmem>>, vector<8x8x16xbf16>
    tpu.vector_store %arg14[%c0_374, %c0_375, %c80_376], %264 {strides = array<i32>} : memref<8x8x144xbf16, #tpu.memory_space<vmem>>, vector<8x8x16xbf16>,
    %c1_377 = arith.constant 1 : index
    %c0_378 = arith.constant 0 : index
    %c48_379 = arith.constant 48 : index
    %266 = vector.load %arg13[%c1_377, %c0_378, %c48_379] : memref<9x9x64xbf16, #tpu.memory_space<vmem>>, vector<8x8x16xbf16>
    %c0_380 = arith.constant 0 : index
    %c0_381 = arith.constant 0 : index
    %c96_382 = arith.constant 96 : index
    %267 = vector.load %arg14[%c0_380, %c0_381, %c96_382] : memref<8x8x144xbf16, #tpu.memory_space<vmem>>, vector<8x8x16xbf16>
    tpu.vector_store %arg14[%c0_380, %c0_381, %c96_382], %266 {strides = array<i32>} : memref<8x8x144xbf16, #tpu.memory_space<vmem>>, vector<8x8x16xbf16>,
    %c1_383 = arith.constant 1 : index
    %c0_384 = arith.constant 0 : index
    %c32_385 = arith.constant 32 : index
    %268 = vector.load %arg13[%c1_383, %c0_384, %c32_385] : memref<9x9x64xbf16, #tpu.memory_space<vmem>>, vector<8x8x16xbf16>
    %c0_386 = arith.constant 0 : index
    %c0_387 = arith.constant 0 : index
    %c112_388 = arith.constant 112 : index
    %269 = vector.load %arg14[%c0_386, %c0_387, %c112_388] : memref<8x8x144xbf16, #tpu.memory_space<vmem>>, vector<8x8x16xbf16>
    tpu.vector_store %arg14[%c0_386, %c0_387, %c112_388], %268 {strides = array<i32>} : memref<8x8x144xbf16, #tpu.memory_space<vmem>>, vector<8x8x16xbf16>,
    %c1_389 = arith.constant 1 : index
    %c1_390 = arith.constant 1 : index
    %c48_391 = arith.constant 48 : index
    %270 = vector.load %arg13[%c1_389, %c1_390, %c48_391] : memref<9x9x64xbf16, #tpu.memory_space<vmem>>, vector<8x8x16xbf16>
    %c0_392 = arith.constant 0 : index
    %c0_393 = arith.constant 0 : index
    %c128 = arith.constant 128 : index
    %271 = vector.load %arg14[%c0_392, %c0_393, %c128] : memref<8x8x144xbf16, #tpu.memory_space<vmem>>, vector<8x8x16xbf16>
    tpu.vector_store %arg14[%c0_392, %c0_393, %c128], %270 {strides = array<i32>} : memref<8x8x144xbf16, #tpu.memory_space<vmem>>, vector<8x8x16xbf16>,
    %c0_394 = arith.constant 0 : index
    %c0_395 = arith.constant 0 : index
    %c0_396 = arith.constant 0 : index
    %272 = vector.load %arg14[%c0_394, %c0_395, %c0_396] : memref<8x8x144xbf16, #tpu.memory_space<vmem>>, vector<8x8x144xbf16>
    %273 = vector.shape_cast %272 : vector<8x8x144xbf16> to vector<64x144xbf16>
    %c0_397 = arith.constant 0 : index
    %c0_398 = arith.constant 0 : index
    %274 = vector.load %arg4[%c0_397, %c0_398] : memref<144x32xbf16, #tpu.memory_space<vmem>>, vector<144x32xbf16>
    %cst_399 = arith.constant dense<0.000000e+00> : vector<64x32xf32>
    %275 = tpu.matmul %273, %274, %cst_399 {dimension_numbers = #tpu.dot_dimension_numbers<[1], [0], [0], [1], [0, 0, 1, 1], [], []>} : vector<64x144xbf16>, vector<144x32xbf16>, vector<64x32xf32> -> vector<64x32xf32>
    %c0_400 = arith.constant 0 : index
    %c0_401 = arith.constant 0 : index
    %276 = vector.load %arg5[%c0_400, %c0_401] : memref<1x32xf32, #tpu.memory_space<vmem>>, vector<1x32xf32>
    %277 = vector.broadcast %276 : vector<1x32xf32> to vector<64x32xf32>
    %278 = arith.addf %275, %277 : vector<64x32xf32>
    %279 = arith.negf %278 : vector<64x32xf32>
    %280 = math.exp %279 : vector<64x32xf32>
    %cst_402 = arith.constant 1.000000e+00 : f32
    %281 = vector.broadcast %cst_402 : f32 to vector<64x32xf32>
    %282 = arith.addf %281, %280 : vector<64x32xf32>
    %283 = arith.divf %281, %282 : vector<64x32xf32>
    %284 = arith.mulf %278, %283 : vector<64x32xf32>
    %285 = arith.truncf %284 : vector<64x32xf32> to vector<64x32xbf16>
    %286 = vector.extract_strided_slice %285 {offsets = [0, 0], sizes = [8, 32], strides = [1, 1]} : vector<64x32xbf16> to vector<8x32xbf16>
    %c1_403 = arith.constant 1 : index
    %c1_404 = arith.constant 1 : index
    %c0_405 = arith.constant 0 : index
    %287 = vector.load %arg15[%c1_403, %c1_404, %c0_405] : memref<10x10x32xbf16, #tpu.memory_space<vmem>>, vector<1x8x32xbf16>
    %288 = vector.shape_cast %287 : vector<1x8x32xbf16> to vector<8x32xbf16>
    %289 = vector.shape_cast %286 : vector<8x32xbf16> to vector<1x8x32xbf16>
    tpu.vector_store %arg15[%c1_403, %c1_404, %c0_405], %289 {strides = array<i32>} : memref<10x10x32xbf16, #tpu.memory_space<vmem>>, vector<1x8x32xbf16>,
    %290 = vector.extract_strided_slice %285 {offsets = [8, 0], sizes = [8, 32], strides = [1, 1]} : vector<64x32xbf16> to vector<8x32xbf16>
    %c2_406 = arith.constant 2 : index
    %c1_407 = arith.constant 1 : index
    %c0_408 = arith.constant 0 : index
    %291 = vector.load %arg15[%c2_406, %c1_407, %c0_408] : memref<10x10x32xbf16, #tpu.memory_space<vmem>>, vector<1x8x32xbf16>
    %292 = vector.shape_cast %291 : vector<1x8x32xbf16> to vector<8x32xbf16>
    %293 = vector.shape_cast %290 : vector<8x32xbf16> to vector<1x8x32xbf16>
    tpu.vector_store %arg15[%c2_406, %c1_407, %c0_408], %293 {strides = array<i32>} : memref<10x10x32xbf16, #tpu.memory_space<vmem>>, vector<1x8x32xbf16>,
    %294 = vector.extract_strided_slice %285 {offsets = [16, 0], sizes = [8, 32], strides = [1, 1]} : vector<64x32xbf16> to vector<8x32xbf16>
    %c3_409 = arith.constant 3 : index
    %c1_410 = arith.constant 1 : index
    %c0_411 = arith.constant 0 : index
    %295 = vector.load %arg15[%c3_409, %c1_410, %c0_411] : memref<10x10x32xbf16, #tpu.memory_space<vmem>>, vector<1x8x32xbf16>
    %296 = vector.shape_cast %295 : vector<1x8x32xbf16> to vector<8x32xbf16>
    %297 = vector.shape_cast %294 : vector<8x32xbf16> to vector<1x8x32xbf16>
    tpu.vector_store %arg15[%c3_409, %c1_410, %c0_411], %297 {strides = array<i32>} : memref<10x10x32xbf16, #tpu.memory_space<vmem>>, vector<1x8x32xbf16>,
    %298 = vector.extract_strided_slice %285 {offsets = [24, 0], sizes = [8, 32], strides = [1, 1]} : vector<64x32xbf16> to vector<8x32xbf16>
    %c4_412 = arith.constant 4 : index
    %c1_413 = arith.constant 1 : index
    %c0_414 = arith.constant 0 : index
    %299 = vector.load %arg15[%c4_412, %c1_413, %c0_414] : memref<10x10x32xbf16, #tpu.memory_space<vmem>>, vector<1x8x32xbf16>
    %300 = vector.shape_cast %299 : vector<1x8x32xbf16> to vector<8x32xbf16>
    %301 = vector.shape_cast %298 : vector<8x32xbf16> to vector<1x8x32xbf16>
    tpu.vector_store %arg15[%c4_412, %c1_413, %c0_414], %301 {strides = array<i32>} : memref<10x10x32xbf16, #tpu.memory_space<vmem>>, vector<1x8x32xbf16>,
    %302 = vector.extract_strided_slice %285 {offsets = [32, 0], sizes = [8, 32], strides = [1, 1]} : vector<64x32xbf16> to vector<8x32xbf16>
    %c5_415 = arith.constant 5 : index
    %c1_416 = arith.constant 1 : index
    %c0_417 = arith.constant 0 : index
    %303 = vector.load %arg15[%c5_415, %c1_416, %c0_417] : memref<10x10x32xbf16, #tpu.memory_space<vmem>>, vector<1x8x32xbf16>
    %304 = vector.shape_cast %303 : vector<1x8x32xbf16> to vector<8x32xbf16>
    %305 = vector.shape_cast %302 : vector<8x32xbf16> to vector<1x8x32xbf16>
    tpu.vector_store %arg15[%c5_415, %c1_416, %c0_417], %305 {strides = array<i32>} : memref<10x10x32xbf16, #tpu.memory_space<vmem>>, vector<1x8x32xbf16>,
    %306 = vector.extract_strided_slice %285 {offsets = [40, 0], sizes = [8, 32], strides = [1, 1]} : vector<64x32xbf16> to vector<8x32xbf16>
    %c6_418 = arith.constant 6 : index
    %c1_419 = arith.constant 1 : index
    %c0_420 = arith.constant 0 : index
    %307 = vector.load %arg15[%c6_418, %c1_419, %c0_420] : memref<10x10x32xbf16, #tpu.memory_space<vmem>>, vector<1x8x32xbf16>
    %308 = vector.shape_cast %307 : vector<1x8x32xbf16> to vector<8x32xbf16>
    %309 = vector.shape_cast %306 : vector<8x32xbf16> to vector<1x8x32xbf16>
    tpu.vector_store %arg15[%c6_418, %c1_419, %c0_420], %309 {strides = array<i32>} : memref<10x10x32xbf16, #tpu.memory_space<vmem>>, vector<1x8x32xbf16>,
    %310 = vector.extract_strided_slice %285 {offsets = [48, 0], sizes = [8, 32], strides = [1, 1]} : vector<64x32xbf16> to vector<8x32xbf16>
    %c7_421 = arith.constant 7 : index
    %c1_422 = arith.constant 1 : index
    %c0_423 = arith.constant 0 : index
    %311 = vector.load %arg15[%c7_421, %c1_422, %c0_423] : memref<10x10x32xbf16, #tpu.memory_space<vmem>>, vector<1x8x32xbf16>
    %312 = vector.shape_cast %311 : vector<1x8x32xbf16> to vector<8x32xbf16>
    %313 = vector.shape_cast %310 : vector<8x32xbf16> to vector<1x8x32xbf16>
    tpu.vector_store %arg15[%c7_421, %c1_422, %c0_423], %313 {strides = array<i32>} : memref<10x10x32xbf16, #tpu.memory_space<vmem>>, vector<1x8x32xbf16>,
    %314 = vector.extract_strided_slice %285 {offsets = [56, 0], sizes = [8, 32], strides = [1, 1]} : vector<64x32xbf16> to vector<8x32xbf16>
    %c8_424 = arith.constant 8 : index
    %c1_425 = arith.constant 1 : index
    %c0_426 = arith.constant 0 : index
    %315 = vector.load %arg15[%c8_424, %c1_425, %c0_426] : memref<10x10x32xbf16, #tpu.memory_space<vmem>>, vector<1x8x32xbf16>
    %316 = vector.shape_cast %315 : vector<1x8x32xbf16> to vector<8x32xbf16>
    %317 = vector.shape_cast %314 : vector<8x32xbf16> to vector<1x8x32xbf16>
    tpu.vector_store %arg15[%c8_424, %c1_425, %c0_426], %317 {strides = array<i32>} : memref<10x10x32xbf16, #tpu.memory_space<vmem>>, vector<1x8x32xbf16>,
    %c0_427 = arith.constant 0 : index
    %c0_428 = arith.constant 0 : index
    %c0_429 = arith.constant 0 : index
    %318 = vector.load %arg15[%c0_427, %c0_428, %c0_429] : memref<10x10x32xbf16, #tpu.memory_space<vmem>>, vector<8x8x32xbf16>
    %c0_430 = arith.constant 0 : index
    %c0_431 = arith.constant 0 : index
    %c0_432 = arith.constant 0 : index
    %319 = vector.load %arg16[%c0_430, %c0_431, %c0_432] : memref<8x8x288xbf16, #tpu.memory_space<vmem>>, vector<8x8x32xbf16>
    tpu.vector_store %arg16[%c0_430, %c0_431, %c0_432], %318 {strides = array<i32>} : memref<8x8x288xbf16, #tpu.memory_space<vmem>>, vector<8x8x32xbf16>,
    %c0_433 = arith.constant 0 : index
    %c1_434 = arith.constant 1 : index
    %c0_435 = arith.constant 0 : index
    %320 = vector.load %arg15[%c0_433, %c1_434, %c0_435] : memref<10x10x32xbf16, #tpu.memory_space<vmem>>, vector<8x8x32xbf16>
    %c0_436 = arith.constant 0 : index
    %c0_437 = arith.constant 0 : index
    %c32_438 = arith.constant 32 : index
    %321 = vector.load %arg16[%c0_436, %c0_437, %c32_438] : memref<8x8x288xbf16, #tpu.memory_space<vmem>>, vector<8x8x32xbf16>
    tpu.vector_store %arg16[%c0_436, %c0_437, %c32_438], %320 {strides = array<i32>} : memref<8x8x288xbf16, #tpu.memory_space<vmem>>, vector<8x8x32xbf16>,
    %c0_439 = arith.constant 0 : index
    %c2_440 = arith.constant 2 : index
    %c0_441 = arith.constant 0 : index
    %322 = vector.load %arg15[%c0_439, %c2_440, %c0_441] : memref<10x10x32xbf16, #tpu.memory_space<vmem>>, vector<8x8x32xbf16>
    %c0_442 = arith.constant 0 : index
    %c0_443 = arith.constant 0 : index
    %c64_444 = arith.constant 64 : index
    %323 = vector.load %arg16[%c0_442, %c0_443, %c64_444] : memref<8x8x288xbf16, #tpu.memory_space<vmem>>, vector<8x8x32xbf16>
    tpu.vector_store %arg16[%c0_442, %c0_443, %c64_444], %322 {strides = array<i32>} : memref<8x8x288xbf16, #tpu.memory_space<vmem>>, vector<8x8x32xbf16>,
    %c1_445 = arith.constant 1 : index
    %c0_446 = arith.constant 0 : index
    %c0_447 = arith.constant 0 : index
    %324 = vector.load %arg15[%c1_445, %c0_446, %c0_447] : memref<10x10x32xbf16, #tpu.memory_space<vmem>>, vector<8x8x32xbf16>
    %c0_448 = arith.constant 0 : index
    %c0_449 = arith.constant 0 : index
    %c96_450 = arith.constant 96 : index
    %325 = vector.load %arg16[%c0_448, %c0_449, %c96_450] : memref<8x8x288xbf16, #tpu.memory_space<vmem>>, vector<8x8x32xbf16>
    tpu.vector_store %arg16[%c0_448, %c0_449, %c96_450], %324 {strides = array<i32>} : memref<8x8x288xbf16, #tpu.memory_space<vmem>>, vector<8x8x32xbf16>,
    %c1_451 = arith.constant 1 : index
    %c1_452 = arith.constant 1 : index
    %c0_453 = arith.constant 0 : index
    %326 = vector.load %arg15[%c1_451, %c1_452, %c0_453] : memref<10x10x32xbf16, #tpu.memory_space<vmem>>, vector<8x8x32xbf16>
    %c0_454 = arith.constant 0 : index
    %c0_455 = arith.constant 0 : index
    %c128_456 = arith.constant 128 : index
    %327 = vector.load %arg16[%c0_454, %c0_455, %c128_456] : memref<8x8x288xbf16, #tpu.memory_space<vmem>>, vector<8x8x32xbf16>
    tpu.vector_store %arg16[%c0_454, %c0_455, %c128_456], %326 {strides = array<i32>} : memref<8x8x288xbf16, #tpu.memory_space<vmem>>, vector<8x8x32xbf16>,
    %c1_457 = arith.constant 1 : index
    %c2_458 = arith.constant 2 : index
    %c0_459 = arith.constant 0 : index
    %328 = vector.load %arg15[%c1_457, %c2_458, %c0_459] : memref<10x10x32xbf16, #tpu.memory_space<vmem>>, vector<8x8x32xbf16>
    %c0_460 = arith.constant 0 : index
    %c0_461 = arith.constant 0 : index
    %c160 = arith.constant 160 : index
    %329 = vector.load %arg16[%c0_460, %c0_461, %c160] : memref<8x8x288xbf16, #tpu.memory_space<vmem>>, vector<8x8x32xbf16>
    tpu.vector_store %arg16[%c0_460, %c0_461, %c160], %328 {strides = array<i32>} : memref<8x8x288xbf16, #tpu.memory_space<vmem>>, vector<8x8x32xbf16>,
    %c2_462 = arith.constant 2 : index
    %c0_463 = arith.constant 0 : index
    %c0_464 = arith.constant 0 : index
    %330 = vector.load %arg15[%c2_462, %c0_463, %c0_464] : memref<10x10x32xbf16, #tpu.memory_space<vmem>>, vector<8x8x32xbf16>
    %c0_465 = arith.constant 0 : index
    %c0_466 = arith.constant 0 : index
    %c192 = arith.constant 192 : index
    %331 = vector.load %arg16[%c0_465, %c0_466, %c192] : memref<8x8x288xbf16, #tpu.memory_space<vmem>>, vector<8x8x32xbf16>
    tpu.vector_store %arg16[%c0_465, %c0_466, %c192], %330 {strides = array<i32>} : memref<8x8x288xbf16, #tpu.memory_space<vmem>>, vector<8x8x32xbf16>,
    %c2_467 = arith.constant 2 : index
    %c1_468 = arith.constant 1 : index
    %c0_469 = arith.constant 0 : index
    %332 = vector.load %arg15[%c2_467, %c1_468, %c0_469] : memref<10x10x32xbf16, #tpu.memory_space<vmem>>, vector<8x8x32xbf16>
    %c0_470 = arith.constant 0 : index
    %c0_471 = arith.constant 0 : index
    %c224 = arith.constant 224 : index
    %333 = vector.load %arg16[%c0_470, %c0_471, %c224] : memref<8x8x288xbf16, #tpu.memory_space<vmem>>, vector<8x8x32xbf16>
    tpu.vector_store %arg16[%c0_470, %c0_471, %c224], %332 {strides = array<i32>} : memref<8x8x288xbf16, #tpu.memory_space<vmem>>, vector<8x8x32xbf16>,
    %c2_472 = arith.constant 2 : index
    %c2_473 = arith.constant 2 : index
    %c0_474 = arith.constant 0 : index
    %334 = vector.load %arg15[%c2_472, %c2_473, %c0_474] : memref<10x10x32xbf16, #tpu.memory_space<vmem>>, vector<8x8x32xbf16>
    %c0_475 = arith.constant 0 : index
    %c0_476 = arith.constant 0 : index
    %c256 = arith.constant 256 : index
    %335 = vector.load %arg16[%c0_475, %c0_476, %c256] : memref<8x8x288xbf16, #tpu.memory_space<vmem>>, vector<8x8x32xbf16>
    tpu.vector_store %arg16[%c0_475, %c0_476, %c256], %334 {strides = array<i32>} : memref<8x8x288xbf16, #tpu.memory_space<vmem>>, vector<8x8x32xbf16>,
    %c0_477 = arith.constant 0 : index
    %c0_478 = arith.constant 0 : index
    %c0_479 = arith.constant 0 : index
    %336 = vector.load %arg16[%c0_477, %c0_478, %c0_479] : memref<8x8x288xbf16, #tpu.memory_space<vmem>>, vector<8x8x288xbf16>
    %337 = vector.shape_cast %336 : vector<8x8x288xbf16> to vector<64x288xbf16>
    %c0_480 = arith.constant 0 : index
    %c0_481 = arith.constant 0 : index
    %338 = vector.load %arg6[%c0_480, %c0_481] : memref<288x32xbf16, #tpu.memory_space<vmem>>, vector<288x32xbf16>
    %cst_482 = arith.constant dense<0.000000e+00> : vector<64x32xf32>
    %339 = tpu.matmul %337, %338, %cst_482 {dimension_numbers = #tpu.dot_dimension_numbers<[1], [0], [0], [1], [0, 0, 1, 1], [], []>} : vector<64x288xbf16>, vector<288x32xbf16>, vector<64x32xf32> -> vector<64x32xf32>
    %c0_483 = arith.constant 0 : index
    %c0_484 = arith.constant 0 : index
    %340 = vector.load %arg7[%c0_483, %c0_484] : memref<1x32xf32, #tpu.memory_space<vmem>>, vector<1x32xf32>
    %341 = vector.broadcast %340 : vector<1x32xf32> to vector<64x32xf32>
    %342 = arith.addf %339, %341 : vector<64x32xf32>
    %343 = arith.negf %342 : vector<64x32xf32>
    %344 = math.exp %343 : vector<64x32xf32>
    %cst_485 = arith.constant 1.000000e+00 : f32
    %345 = vector.broadcast %cst_485 : f32 to vector<64x32xf32>
    %346 = arith.addf %345, %344 : vector<64x32xf32>
    %347 = arith.divf %345, %346 : vector<64x32xf32>
    %348 = arith.mulf %342, %347 : vector<64x32xf32>
    %349 = arith.truncf %348 : vector<64x32xf32> to vector<64x32xbf16>
    %c0_486 = arith.constant 0 : index
    %c0_487 = arith.constant 0 : index
    %350 = vector.load %arg8[%c0_486, %c0_487] : memref<32x8xbf16, #tpu.memory_space<vmem>>, vector<32x8xbf16>
    %cst_488 = arith.constant dense<0.000000e+00> : vector<64x8xf32>
    %351 = tpu.matmul %349, %350, %cst_488 {dimension_numbers = #tpu.dot_dimension_numbers<[1], [0], [0], [1], [0, 0, 1, 1], [], []>} : vector<64x32xbf16>, vector<32x8xbf16>, vector<64x8xf32> -> vector<64x8xf32>
    %c0_489 = arith.constant 0 : index
    %c0_490 = arith.constant 0 : index
    %352 = vector.load %arg9[%c0_489, %c0_490] : memref<1x8xf32, #tpu.memory_space<vmem>>, vector<1x8xf32>
    %353 = vector.broadcast %352 : vector<1x8xf32> to vector<64x8xf32>
    %354 = arith.addf %351, %353 : vector<64x8xf32>
    %c0_491 = arith.constant 0 : index
    %c0_492 = arith.constant 0 : index
    %c0_493 = arith.constant 0 : index
    %355 = vector.load %arg10[%c0_491, %c0_492, %c0_493] : memref<1x64x8xf32, #tpu.memory_space<vmem>>, vector<1x64x8xf32>
    %356 = vector.shape_cast %355 : vector<1x64x8xf32> to vector<64x8xf32>
    %357 = vector.shape_cast %354 : vector<64x8xf32> to vector<1x64x8xf32>
    tpu.vector_store %arg10[%c0_491, %c0_492, %c0_493], %357 {strides = array<i32>} : memref<1x64x8xf32, #tpu.memory_space<vmem>>, vector<1x64x8xf32>,
    %358 = vector.extract_strided_slice %354 {offsets = [0, 4], sizes = [64, 4], strides = [1, 1]} : vector<64x8xf32> to vector<64x4xf32>
    %359 = arith.negf %358 : vector<64x4xf32>
    %360 = math.exp %359 : vector<64x4xf32>
    %cst_494 = arith.constant 1.000000e+00 : f32
    %361 = vector.broadcast %cst_494 : f32 to vector<64x4xf32>
    %362 = arith.addf %361, %360 : vector<64x4xf32>
    %363 = arith.divf %361, %362 : vector<64x4xf32>
    %c0_495 = arith.constant 0 : index
    %c0_496 = arith.constant 0 : index
    %c0_497 = arith.constant 0 : index
    %364 = vector.load %arg11[%c0_495, %c0_496, %c0_497] : memref<1x64x4xf32, #tpu.memory_space<vmem>>, vector<1x64x4xf32>
    %365 = vector.shape_cast %364 : vector<1x64x4xf32> to vector<64x4xf32>
    %366 = vector.shape_cast %363 : vector<64x4xf32> to vector<1x64x4xf32>
    tpu.vector_store %arg11[%c0_495, %c0_496, %c0_497], %366 {strides = array<i32>} : memref<1x64x4xf32, #tpu.memory_space<vmem>>, vector<1x64x4xf32>,
    return
  }
  func.func @transform_0(%arg0: i32) -> (i32, i32, i32, i32) {
    %c0_i32 = arith.constant 0 : i32
    %c0_i32_0 = arith.constant 0 : i32
    %c0_i32_1 = arith.constant 0 : i32
    %c0_i32_2 = arith.constant 0 : i32
    return %arg0, %c0_i32, %c0_i32_0, %c0_i32_1 : i32, i32, i32, i32
  }
  func.func @transform_1(%arg0: i32) -> (i32, i32) {
    %c0_i32 = arith.constant 0 : i32
    %c0_i32_0 = arith.constant 0 : i32
    %c0_i32_1 = arith.constant 0 : i32
    return %c0_i32, %c0_i32_0 : i32, i32
  }
  func.func @transform_2(%arg0: i32) -> (i32, i32) {
    %c0_i32 = arith.constant 0 : i32
    %c0_i32_0 = arith.constant 0 : i32
    %c0_i32_1 = arith.constant 0 : i32
    return %c0_i32, %c0_i32_0 : i32, i32
  }
  func.func @transform_3(%arg0: i32) -> (i32, i32) {
    %c0_i32 = arith.constant 0 : i32
    %c0_i32_0 = arith.constant 0 : i32
    %c0_i32_1 = arith.constant 0 : i32
    return %c0_i32, %c0_i32_0 : i32, i32
  }
  func.func @transform_4(%arg0: i32) -> (i32, i32) {
    %c0_i32 = arith.constant 0 : i32
    %c0_i32_0 = arith.constant 0 : i32
    %c0_i32_1 = arith.constant 0 : i32
    return %c0_i32, %c0_i32_0 : i32, i32
  }
  func.func @transform_5(%arg0: i32) -> (i32, i32) {
    %c0_i32 = arith.constant 0 : i32
    %c0_i32_0 = arith.constant 0 : i32
    %c0_i32_1 = arith.constant 0 : i32
    return %c0_i32, %c0_i32_0 : i32, i32
  }
  func.func @transform_6(%arg0: i32) -> (i32, i32) {
    %c0_i32 = arith.constant 0 : i32
    %c0_i32_0 = arith.constant 0 : i32
    %c0_i32_1 = arith.constant 0 : i32
    return %c0_i32, %c0_i32_0 : i32, i32
  }
  func.func @transform_7(%arg0: i32) -> (i32, i32) {
    %c0_i32 = arith.constant 0 : i32
    %c0_i32_0 = arith.constant 0 : i32
    %c0_i32_1 = arith.constant 0 : i32
    return %c0_i32, %c0_i32_0 : i32, i32
  }
  func.func @transform_8(%arg0: i32) -> (i32, i32) {
    %c0_i32 = arith.constant 0 : i32
    %c0_i32_0 = arith.constant 0 : i32
    %c0_i32_1 = arith.constant 0 : i32
    return %c0_i32, %c0_i32_0 : i32, i32
  }
  func.func @transform_9(%arg0: i32) -> (i32, i32, i32) {
    %c0_i32 = arith.constant 0 : i32
    %c0_i32_0 = arith.constant 0 : i32
    %c0_i32_1 = arith.constant 0 : i32
    return %arg0, %c0_i32, %c0_i32_0 : i32, i32, i32
  }
  func.func @transform_10(%arg0: i32) -> (i32, i32, i32) {
    %c0_i32 = arith.constant 0 : i32
    %c0_i32_0 = arith.constant 0 : i32
    %c0_i32_1 = arith.constant 0 : i32
    return %arg0, %c0_i32, %c0_i32_0 : i32, i32, i32
  }
}

</mosaic_0001>

<bundles_post_ra>
// kernel: _forward_impl.1
= control target key start
LH: loop header
LB: loop body
LE: loop exit
PB: predicated region body
PF: predicated region fallthrough
CT: control target
= control target key end

     0   :  { %s7443_s13 = smov 0   ;;  %s9553_s0 = inlined_call_operand.vmem [shape: bf16[2,9,9,128], index: 0, kind: input, shape index: {}]   ;;  %s9554_s1 = inlined_call_operand.vmem [shape: bf16[72,16], index: 1, kind: input, shape index: {}]   ;;  %s9555_s2 = inlined_call_operand.vmem [shape: f32[1,16], index: 2, kind: input, shape index: {}]   ;;  %s9556_s3 = inlined_call_operand.vmem [shape: bf16[144,32], index: 3, kind: input, shape index: {}]   ;;  %s9557_s4 = inlined_call_operand.vmem [shape: f32[1,32], index: 4, kind: input, shape index: {}]   ;;  %s9558_s5 = inlined_call_operand.vmem [shape: bf16[288,32], index: 5, kind: input, shape index: {}]   ;;  %s9559_s6 = inlined_call_operand.vmem [shape: f32[1,32], index: 6, kind: input, shape index: {}]   ;;  %s9560_s7 = inlined_call_operand.vmem [shape: bf16[32,8], index: 7, kind: input, shape index: {}]   ;;  %s9561_s8 = inlined_call_operand.vmem [shape: f32[1,8], index: 8, kind: input, shape index: {}]   ;;  %s9562_s9 = inlined_call_operand.vmem [shape: f32[2,64,8], index: 9, kind: output, shape index: {0}]   ;;  %s9563_s10 = inlined_call_operand.vmem [shape: f32[2,64,4], index: 10, kind: output, shape index: {1}]  }
   0x1 LB: > { %s6569_s14 = sadd.s32 4294967295, %s7371_s13   ;;  %p6573_p0 = scmp.ge.s32.totalorder %s7371_s13, 1  ;;  %s7371_s13 = sphi %s7443_s13, %s21_s13  }
   0x2   : > { %p315_p1 = scmp.lt.s32.totalorder %s7371_s13, 3 }
   0x4   : > { %p316_p2 = pnand %p6573_p0, %p315_p1 }
   0x5   : > { %p358_p3 = scmp.lt.s32.totalorder (!%p316_p2), %s6569_s14, 1  ;;  %s7373_s19 = smov (!%p316_p2), 120   ;;  %vm444_vm0 = vcmask (!%p316_p2), 60416   ;;  %vm461_vm1 = vcmask (!%p316_p2), 126016   ;;  %vm478_vm2 = vcmask (!%p316_p2), 191616   ;;  %v7061_v12 = vld [vmem:[%s9554_s1] sm:$0xff] (!%p316_p2)  }
   0x6   : > { %319 = sbr.rel (%p316_p2) target bundleno = 2255 (0x8cf), region = 56  ;;  %6966 = vmatprep.subr.bf16.mxu0 (!%p316_p2), %v7061_v12  ;;  %s7374_s22 = smov (!%p316_p2), 112   ;;  %v7062_v26 = vld [vmem:[%s9554_s1 + $0x8] sm:$0xff] (!%p316_p2)   ;;  %v7063_v29 = vld [vmem:[%s9554_s1 + $0x10] sm:$0xff] (!%p316_p2)   ;;  %v7064_v35 = vld [vmem:[%s9554_s1 + $0x18] sm:$0xff] (!%p316_p2)   ;;  %vm2944_vm3 = vcmask (!%p316_p2), 1043456  }
   0x7   : > { %6967 = vmatpush3.bf16.msra.mxu0 (!%p316_p2), %v7061_v12  ;;  %v7065_v50 = vld [vmem:[%s9554_s1 + $0x20] ss:$0 sps:$4 sm:$0xff] (!%p316_p2)   ;;  %vm894_vm4 = vsmask.f32 (!%p316_p2), 3328  ;;  %vm895_vm5 = vsmask.f32 (!%p316_p2), 7440 }
   0x8   : > { %6968 = vmatprep.subr.bf16.mxu0 (!%p316_p2), %v7062_v26  ;;  %v2946_v56 = vsel (!%p316_p2), %vm2944_vm3, %v7065_v50, 0  ;;  %vm7640_vm6 = vmor (!%p316_p2), %vm894_vm4, %vm895_vm5  ;;  %s7375_s11 = smov (!%p316_p2), 16   ;;  %vm527_vm7 = vcmask (!%p316_p2), 257216   ;;  %vm576_vm8 = vcmask (!%p316_p2), 322816   ;;  %s7376_s12 = smov (!%p316_p2), 104   ;;  %vm625_vm9 = vcmask (!%p316_p2), 388416  }
   0x9   : > { %vm674_vm10 = vcmask (!%p316_p2), 454016   ;;  %s7378_s16 = smov (!%p316_p2), 96   ;;  %vm723_vm11 = vcmask (!%p316_p2), 519616   ;;  %vm772_vm12 = vcmask (!%p316_p2), 585216   ;;  %vm2895_vm13 = vcmask (!%p316_p2), 588800   ;;  %s7379_s17 = smov (!%p316_p2), 64  }
   0xa   : > { %s7381_s20 = smov (!%p316_p2), 48   ;;  %vm374_vm14 = vcmask (!%p316_p2), 519168   ;;  %s7383_s24 = smov (!%p316_p2), 80   ;;  %vm3349_vm15 = vcmask (!%p316_p2), 125952   ;;  %vm376_vm4 = vcmask (!%p316_p2), 516096  }
   0xb   : > { %6969 = vmatpush3.bf16.msra.mxu0 (!%p316_p2), %v7062_v26  ;;  %s7384_s25 = smov (!%p316_p2), 40   ;;  %s7385_s26 = smov (!%p316_p2), 72   ;;  %vm377_vm5 = vsmask.f32 (!%p316_p2), 256 }
   0xc   : > { %6970 = vmatprep.subr.bf16.mxu0 (!%p316_p2), %v7063_v29  ;;  %s7386_s27 = smov (!%p316_p2), 32   ;;  %s7387_s28 = smov (!%p316_p2), 124  }
   0xd   : > { %s9583_s14 = smov (!%p358_p3, %s6569_s14), 1 }
   0xe   : > { %s7037_s15 = smul.u32 72, %s9583_s14 }
   0xf   : > { %6971 = vmatpush3.bf16.msra.mxu0 %v7063_v29 }
  0x10   : > { %s7457_s18 = scalar_lea.vmem %s9553_s0, %s7037_s15  ;;  %6972 = vmatprep.subr.bf16.mxu0 %v7064_v35  ;;  %s7377_s15 = smov 8  }
  0x11   : > { %v489_v0 = vld [vmem:[%s7457_s18 + $0x10] sm:$0xf]  ;;  %v487_v1 = vld [vmem:[%s7457_s18] sm:$0xf]  ;;  %v490_v2 = vld [vmem:[%s7457_s18 + $0x18] sm:$0xf] }
  0x12   : > { %507 = vrot.lane.b32.xlu1 %v489_v0, %s7373_s19  ;;  %503 = vrot.lane.b32.xlu0 %v487_v1, %s7373_s19  ;;  %v488_v3 = vld [vmem:[%s7457_s18 + $0x8] sm:$0xf]  ;;  %v536_v5 = vld [vmem:[%s7457_s18] sm:$0xf] }
  0x13   : > { %v537_v4 = vld [vmem:[%s7457_s18 + $0x8] sm:$0xf]  ;;  %v539_v6 = vld [vmem:[%s7457_s18 + $0x18] sm:$0xf]  ;;  %v538_v7 = vld [vmem:[%s7457_s18 + $0x10] sm:$0xf]  ;;  %6973 = vmatpush3.bf16.msra.mxu0 %v7064_v35 }
  0x14   : > { %v586_v8 = vld [vmem:[%s7457_s18 + $0x8] sm:$0xf]  ;;  %v585_v9 = vld [vmem:[%s7457_s18] sm:$0xf]  ;;  %v588_v10 = vld [vmem:[%s7457_s18 + $0x18] sm:$0xf]  ;;  %7036 = vmatprep.subr.msk.bf16.mxu0 %vm2944_vm3, %v7065_v50 }
  0x15   : > { %v587_v11 = vld [vmem:[%s7457_s18 + $0x10] sm:$0xf]  ;;  %v635_v13 = vld [vmem:[%s7457_s18 + $0x8] sm:$0xf]  ;;  %v634_v14 = vld [vmem:[%s7457_s18] sm:$0xf] }
  0x16   : > { %509 = vrot.lane.b32.xlu1 %v490_v2, %s7373_s19  ;;  %505 = vrot.lane.b32.xlu0 %v488_v3, %s7373_s19  ;;  %v438_v15 = vld [vmem:[%s7457_s18 + $0x10] sm:$0xf]  ;;  %v436_v18 = vld [vmem:[%s7457_s18] sm:$0xf]  ;;  %vm414_vm3 = vcmask 257024  }
  0x17   : > { %447 = vst.msk [vmem:[#allocation2 + $0x8] sm:$0xf] %vm444_vm0, %v438_v15  ;;  %v455_v16 = vld [vmem:[%s7457_s18 + $0x10] sm:$0xf]  ;;  %445 = vst.msk [vmem:[#allocation2] sm:$0xf] %vm444_vm0, %v436_v18  ;;  %6975 = vmatpush3.bf16.msra.mxu0 %v2946_v56 }
  0x18   : > { %464 = vst.msk [vmem:[#allocation2 + $0x8] sm:$0xf] %vm461_vm1, %v455_v16  ;;  %v472_v17 = vld [vmem:[%s7457_s18 + $0x10] sm:$0xf]  ;;  %v453_v19 = vld [vmem:[%s7457_s18] sm:$0xf] }
  0x19   : > { %481 = vst.msk [vmem:[#allocation2 + $0x8] sm:$0xf] %vm478_vm2, %v472_v17  ;;  %v470_v20 = vld [vmem:[%s7457_s18] sm:$0xf]  ;;  %v637_v21 = vld [vmem:[%s7457_s18 + $0x18] sm:$0xf] }
  0x1a   : > { %554 = vrot.lane.b32.xlu1 %v537_v4, %s7373_s19  ;;  %552 = vrot.lane.b32.xlu0 %v536_v5, %s7373_s19  ;;  %v636_v22 = vld [vmem:[%s7457_s18 + $0x10] sm:$0xf]  ;;  %462 = vst.msk [vmem:[#allocation2] sm:$0xf] %vm461_vm1, %v453_v19  ;;  %v684_v23 = vld [vmem:[%s7457_s18 + $0x8] sm:$0xf] }
  0x1b   : > { %479 = vst.msk [vmem:[#allocation2] sm:$0xf] %vm478_vm2, %v470_v20  ;;  %v439_v24 = vld [vmem:[%s7457_s18 + $0x18] sm:$0xf]  ;;  %v683_v27 = vld [vmem:[%s7457_s18] sm:$0xf] }
  0x1c   : > { %448 = vst.msk [vmem:[#allocation2 + $0xc] sm:$0xf] %vm444_vm0, %v439_v24  ;;  %v456_v25 = vld [vmem:[%s7457_s18 + $0x18] sm:$0xf]  ;;  %v437_v30 = vld [vmem:[%s7457_s18 + $0x8] sm:$0xf] }
  0x1d   : > { %465 = vst.msk [vmem:[#allocation2 + $0xc] sm:$0xf] %vm461_vm1, %v456_v25  ;;  %v473_v28 = vld [vmem:[%s7457_s18 + $0x18] sm:$0xf]  ;;  %v454_v31 = vld [vmem:[%s7457_s18 + $0x8] sm:$0xf] }
  0x1e   : > { %558 = vrot.lane.b32.xlu1 %v539_v6, %s7373_s19  ;;  %556 = vrot.lane.b32.xlu0 %v538_v7, %s7373_s19  ;;  %482 = vst.msk [vmem:[#allocation2 + $0xc] sm:$0xf] %vm478_vm2, %v473_v28  ;;  %v471_v32 = vld [vmem:[%s7457_s18 + $0x8] sm:$0xf]  ;;  %v686_v33 = vld [vmem:[%s7457_s18 + $0x18] sm:$0xf] }
  0x1f   : > { %446 = vst.msk [vmem:[#allocation2 + $0x4] sm:$0xf] %vm444_vm0, %v437_v30  ;;  %v685_v34 = vld [vmem:[%s7457_s18 + $0x10] sm:$0xf]  ;;  %v733_v36 = vld [vmem:[%s7457_s18 + $0x8] sm:$0xf] }
  0x20   : > { %463 = vst.msk [vmem:[#allocation2 + $0x4] sm:$0xf] %vm461_vm1, %v454_v31  ;;  %v732_v37 = vld [vmem:[%s7457_s18] sm:$0xf]  ;;  %v735_v38 = vld [vmem:[%s7457_s18 + $0x18] sm:$0xf] }
  0x21   : > { %480 = vst.msk [vmem:[#allocation2 + $0x4] sm:$0xf] %vm478_vm2, %v471_v32  ;;  %v734_v39 = vld [vmem:[%s7457_s18 + $0x10] sm:$0xf]  ;;  %v492_v40 = vld [vmem:[%s7457_s18 + $0x28] sm:$0xf] }
  0x22   : > { %603 = vrot.lane.b32.xlu1 %v586_v8, %s7373_s19  ;;  %601 = vrot.lane.b32.xlu0 %v585_v9, %s7373_s19  ;;  %v491_v41 = vld [vmem:[%s7457_s18 + $0x20] sm:$0xf]  ;;  %v441_v42 = vld [vmem:[%s7457_s18 + $0x28] sm:$0xf] }
  0x23   : > { %450 = vst.msk [vmem:[#allocation2 + $0x14] sm:$0xf] %vm444_vm0, %v441_v42  ;;  %v458_v43 = vld [vmem:[%s7457_s18 + $0x28] sm:$0xf]  ;;  %v440_v45 = vld [vmem:[%s7457_s18 + $0x20] sm:$0xf] }
  0x24   : > { %v475_v44 = vld [vmem:[%s7457_s18 + $0x28] sm:$0xf]  ;;  %467 = vst.msk [vmem:[#allocation2 + $0x14] sm:$0xf] %vm461_vm1, %v458_v43  ;;  %v457_v46 = vld [vmem:[%s7457_s18 + $0x20] sm:$0xf] }
  0x25   : > { %v474_v47 = vld [vmem:[%s7457_s18 + $0x20] sm:$0xf]  ;;  %v494_v48 = vld [vmem:[%s7457_s18 + $0x38] sm:$0xf]  ;;  %v493_v49 = vld [vmem:[%s7457_s18 + $0x30] sm:$0xf] }
  0x26   : > { %607 = vrot.lane.b32.xlu1 %v588_v10, %s7373_s19  ;;  %605 = vrot.lane.b32.xlu0 %v587_v11, %s7373_s19  ;;  %484 = vst.msk [vmem:[#allocation2 + $0x14] sm:$0xf] %vm478_vm2, %v475_v44  ;;  %v443_v51 = vld [vmem:[%s7457_s18 + $0x38] sm:$0xf]  ;;  %v442_v54 = vld [vmem:[%s7457_s18 + $0x30] sm:$0xf] }
  0x27   : > { %449 = vst.msk [vmem:[#allocation2 + $0x10] sm:$0xf] %vm444_vm0, %v440_v45  ;;  %v460_v52 = vld [vmem:[%s7457_s18 + $0x38] sm:$0xf]  ;;  %452 = vst.msk [vmem:[#allocation2 + $0x1c] sm:$0xf] %vm444_vm0, %v443_v51 }
  0x28   : > { %466 = vst.msk [vmem:[#allocation2 + $0x10] sm:$0xf] %vm461_vm1, %v457_v46  ;;  %v477_v53 = vld [vmem:[%s7457_s18 + $0x38] sm:$0xf]  ;;  %v459_v55 = vld [vmem:[%s7457_s18 + $0x30] sm:$0xf] }
  0x29   : > { %483 = vst.msk [vmem:[#allocation2 + $0x10] sm:$0xf] %vm478_vm2, %v474_v47  ;;  %v476_v57 = vld [vmem:[%s7457_s18 + $0x30] sm:$0xf]  ;;  %v541_v58 = vld [vmem:[%s7457_s18 + $0x28] sm:$0xf] }
  0x2a   : > { %652 = vrot.lane.b32.xlu1 %v635_v13, %s7374_s22  ;;  %650 = vrot.lane.b32.xlu0 %v634_v14, %s7374_s22  ;;  %469 = vst.msk [vmem:[#allocation2 + $0x1c] sm:$0xf] %vm461_vm1, %v460_v52  ;;  %v540_v59 = vld [vmem:[%s7457_s18 + $0x20] sm:$0xf]  ;;  %v543_v60 = vld [vmem:[%s7457_s18 + $0x38] sm:$0xf] }
  0x2b   : > { %451 = vst.msk [vmem:[#allocation2 + $0x18] sm:$0xf] %vm444_vm0, %v442_v54  ;;  %v542_v61 = vld [vmem:[%s7457_s18 + $0x30] sm:$0xf]  ;;  %v590_v62 = vld [vmem:[%s7457_s18 + $0x28] sm:$0xf] }
  0x2c   : > { %486 = vst.msk [vmem:[#allocation2 + $0x1c] sm:$0xf] %vm478_vm2, %v477_v53  ;;  %v589_v63 = vld [vmem:[%s7457_s18 + $0x20] sm:$0xf]  ;;  %v592_v0 = vld [vmem:[%s7457_s18 + $0x38] sm:$0xf] }
  0x2d   : > { %468 = vst.msk [vmem:[#allocation2 + $0x18] sm:$0xf] %vm461_vm1, %v459_v55  ;;  %v591_v1 = vld [vmem:[%s7457_s18 + $0x30] sm:$0xf]  ;;  %v639_v2 = vld [vmem:[%s7457_s18 + $0x28] sm:$0xf] }
  0x2e   : > { %656 = vrot.lane.b32.xlu1 %v637_v21, %s7374_s22  ;;  %654 = vrot.lane.b32.xlu0 %v636_v22, %s7374_s22  ;;  %485 = vst.msk [vmem:[#allocation2 + $0x18] sm:$0xf] %vm478_vm2, %v476_v57  ;;  %v638_v3 = vld [vmem:[%s7457_s18 + $0x20] sm:$0xf]  ;;  %v641_v4 = vld [vmem:[%s7457_s18 + $0x38] sm:$0xf] }
  0x2f   : > { %v640_v5 = vld [vmem:[%s7457_s18 + $0x30] sm:$0xf]  ;;  %v688_v6 = vld [vmem:[%s7457_s18 + $0x28] sm:$0xf]  ;;  %v687_v7 = vld [vmem:[%s7457_s18 + $0x20] sm:$0xf] }
  0x30   : > { %v690_v8 = vld [vmem:[%s7457_s18 + $0x38] sm:$0xf]  ;;  %v689_v9 = vld [vmem:[%s7457_s18 + $0x30] sm:$0xf]  ;;  %v737_v10 = vld [vmem:[%s7457_s18 + $0x28] sm:$0xf] }
  0x31   : > { %v736_v11 = vld [vmem:[%s7457_s18 + $0x20] sm:$0xf]  ;;  %v782_v12 = vld [vmem:[%s7457_s18 + $0x8] sm:$0xf]  ;;  %v739_v16 = vld [vmem:[%s7457_s18 + $0x38] sm:$0xf] }
  0x32   : > { %701 = vrot.lane.b32.xlu1 %v684_v23, %s7374_s22  ;;  %699 = vrot.lane.b32.xlu0 %v683_v27, %s7374_s22  ;;  %v781_v13 = vld [vmem:[%s7457_s18] sm:$0xf]  ;;  %v880_v14 = vld [vmem:[%s7457_s18 + $0x8] sm:$0xf] }
  0x33   : > { %v878_v15 = vld [vmem:[%s7457_s18] sm:$0xf]  ;;  %v738_v17 = vld [vmem:[%s7457_s18 + $0x30] sm:$0xf]  ;;  %v912_v18 = vshrl.u32 %v880_v14, 16  ;;  %v915_v19 = vshll.u32 %v880_v14, 16 }
  0x34   : > { %v898_v20 = vshrl.u32 %v878_v15, 16  ;;  %v901_v21 = vshll.u32 %v878_v15, 16  ;;  %v884_v22 = vld [vmem:[%s7457_s18 + $0x18] sm:$0xf]  ;;  %v882_v23 = vld [vmem:[%s7457_s18 + $0x10] sm:$0xf] }
  0x35   : > { %v784_v24 = vld [vmem:[%s7457_s18 + $0x18] sm:$0xf]  ;;  %v783_v25 = vld [vmem:[%s7457_s18 + $0x10] sm:$0xf]  ;;  %v881_v26 = vld [vmem:[%s7457_s18 + $0xc] sm:$0x1] }
  0x36   : > { %705 = vrot.lane.b32.xlu1 %v686_v33, %s7374_s22  ;;  %703 = vrot.lane.b32.xlu0 %v685_v34, %s7374_s22  ;;  %v914_v27 = vrot.slane %v912_v18, 4  ;;  %v917_v28 = vrot.slane %v915_v19, 5  ;;  %v900_v29 = vrot.slane %v898_v20, 4  ;;  %v903_v30 = vrot.slane %v901_v21, 5  ;;  %v879_v31 = vld [vmem:[%s7457_s18 + $0x4] sm:$0x1] }
  0x37   : > { %v940_v32 = vshrl.u32 %v884_v22, 16  ;;  %v943_v33 = vshll.u32 %v884_v22, 16  ;;  %v926_v34 = vshrl.u32 %v882_v23, 16  ;;  %v929_v35 = vshll.u32 %v882_v23, 16  ;;  %v885_v42 = vld [vmem:[%s7457_s18 + $0x1c] sm:$0x1] }
  0x38   : > { %v883_v47 = vld [vmem:[%s7457_s18 + $0x14] sm:$0x1]  ;;  %v949_v51 = vshll.u32 %v885_v42, 16  ;;  %v833_v52 = vld [vmem:[%s7457_s18 + $0x18] sm:$0xf] }
  0x39   : > { %v942_v43 = vrot.slane %v940_v32, 4  ;;  %v945_v44 = vrot.slane %v943_v33, 5  ;;  %v928_v45 = vrot.slane %v926_v34, 4  ;;  %v931_v46 = vrot.slane %v929_v35, 5  ;;  %v832_v53 = vld [vmem:[%s7457_s18 + $0x10] sm:$0xf] }
  0x3a   : > { %750 = vrot.lane.b32.xlu1 %v733_v36, %s7374_s22  ;;  %748 = vrot.lane.b32.xlu0 %v732_v37, %s7374_s22  ;;  %v831_v36 = vld [vmem:[%s7457_s18 + $0x8] sm:$0xf]  ;;  %v830_v37 = vld [vmem:[%s7457_s18] sm:$0xf] }
  0x3b   : > { %v946_v56 = vor.u32 %v945_v44, %v942_v43  ;;  %v932_v57 = vor.u32 %v931_v46, %v928_v45  ;;  %v1143_v15 = vld [vmem:[%s7457_s18 + $0x18] sm:$0xf]  ;;  %v1043_v18 = vld [vmem:[%s7457_s18 + $0x10] sm:$0xf]  ;;  %v1140_v19 = vld [vmem:[%s7457_s18 + $0xc] sm:$0x1] }
  0x3c   : > { %v1089_v32 = vld [vmem:[%s7457_s18] sm:$0xf]  ;;  %v1177_v34 = vshll.u32 %v1140_v19, 16  ;;  %v1142_v44 = vld [vmem:[%s7457_s18 + $0x14] sm:$0x1] }
  0x3d   : > { %v785_v19 = vld [vmem:[%s7457_s18 + $0x20] sm:$0xf] }
  0x3e   : > { %754 = vrot.lane.b32.xlu1 %v735_v38, %s7374_s22  ;;  %752 = vrot.lane.b32.xlu0 %v734_v39, %s7374_s22  ;;  %v918_v38 = vor.u32 %v917_v28, %v914_v27  ;;  %v921_v39 = vshll.u32 %v881_v26, 16  ;;  %v1199_v26 = vshll.u32 %v1143_v15, 16  ;;  %v1179_v46 = vrot.slane %v1177_v34, 5  ;;  %v788_v34 = vld [vmem:[%s7457_s18 + $0x38] sm:$0xf] }
  0x42   : > { %513 = vrot.lane.b32.xlu1 %v492_v40, %s7373_s19  ;;  %511 = vrot.lane.b32.xlu0 %v491_v41, %s7373_s19  ;;  %v904_v40 = vor.u32 %v903_v30, %v900_v29  ;;  %v907_v41 = vshll.u32 %v879_v31, 16  ;;  %v1090_v31 = vld [vmem:[%s7457_s18 + $0x8] sm:$0xf] }
  0x44   : > { %v909_v50 = vrot.slane %v907_v41, 5  ;;  %v905_v55 = vrot.slane %v904_v40, 4 }
  0x46   : > { %517 = vrot.lane.b32.xlu1 %v494_v48, %s7373_s19  ;;  %515 = vrot.lane.b32.xlu0 %v493_v49, %s7373_s19  ;;  %v919_v48 = vrot.slane %v918_v38, 4  ;;  %v923_v49 = vrot.slane %v921_v39, 5  ;;  %v1201_v39 = vrot.slane %v1199_v26, 5 }
  0x4a   : > { %562 = vrot.lane.b32.xlu1 %v541_v58, %s7373_s19  ;;  %560 = vrot.lane.b32.xlu0 %v540_v59, %s7373_s19  ;;  %v935_v58 = vshll.u32 %v883_v47, 16  ;;  %v924_v59 = vsel %vm7640_vm6, %v919_v48, %v923_v49  ;;  %v1092_v49 = vld [vmem:[%s7457_s18 + $0x18] sm:$0xf] }
  0x4e   : > { %566 = vrot.lane.b32.xlu1 %v543_v60, %s7373_s19  ;;  %564 = vrot.lane.b32.xlu0 %v542_v61, %s7373_s19  ;;  %v951_v60 = vrot.slane %v949_v51, 5  ;;  %v910_v61 = vsel %vm7640_vm6, %v905_v55, %v909_v50  ;;  %v1091_v50 = vld [vmem:[%s7457_s18 + $0x10] sm:$0xf]  ;;  %v1191_v55 = vshll.u32 %v1142_v44, 16 }
  0x52   : > { %611 = vrot.lane.b32.xlu1 %v590_v62, %s7373_s19  ;;  %609 = vrot.lane.b32.xlu0 %v589_v63, %s7373_s19  ;;  %v947_v62 = vrot.slane %v946_v56, 4  ;;  %v933_v63 = vrot.slane %v932_v57, 4 }
  0x56   : > { %615 = vrot.lane.b32.xlu1 %v592_v0, %s7373_s19  ;;  %613 = vrot.lane.b32.xlu0 %v591_v1, %s7373_s19  ;;  %v937_v0 = vrot.slane %v935_v58, 5  ;;  %v952_v1 = vsel %vm7640_vm6, %v947_v62, %v951_v60  ;;  %s7380_s19 = smov 56  }
  0x5a   : > { %660 = vrot.lane.b32.xlu1 %v639_v2, %s7374_s22  ;;  %658 = vrot.lane.b32.xlu0 %v638_v3, %s7374_s22  ;;  %v938_v2 = vsel %vm7640_vm6, %v933_v63, %v937_v0  ;;  %v1139_v3 = vld [vmem:[%s7457_s18 + $0x8] sm:$0xf]  ;;  %v1193_v63 = vrot.slane %v1191_v55, 5 }
  0x5e   : > { %664 = vrot.lane.b32.xlu1 %v641_v4, %s7374_s22  ;;  %662 = vrot.lane.b32.xlu0 %v640_v5, %s7374_s22  ;;  %v1137_v4 = vld [vmem:[%s7457_s18] sm:$0xf] }
  0x62   : > { %709 = vrot.lane.b32.xlu1 %v688_v6, %s7374_s22  ;;  %707 = vrot.lane.b32.xlu0 %v687_v7, %s7374_s22  ;;  %v1168_v7 = vshrl.u32 %v1139_v3, 16 }
  0x64   : > { %v1170_v20 = vrot.slane %v1168_v7, 4  ;;  %v1297_v7 = vld [vmem:[%s7457_s18] sm:$0xf] }
  0x66   : > { %713 = vrot.lane.b32.xlu1 %v690_v8, %s7374_s22  ;;  %711 = vrot.lane.b32.xlu0 %v689_v9, %s7374_s22  ;;  %v1171_v8 = vshll.u32 %v1139_v3, 16  ;;  %v1154_v9 = vshrl.u32 %v1137_v4, 16 }
  0x68   : > { %v1173_v21 = vrot.slane %v1171_v8, 5  ;;  %v1156_v22 = vrot.slane %v1154_v9, 4 }
  0x6a   : > { %758 = vrot.lane.b32.xlu1 %v737_v10, %s7374_s22  ;;  %756 = vrot.lane.b32.xlu0 %v736_v11, %s7374_s22  ;;  %v1157_v10 = vshll.u32 %v1137_v4, 16  ;;  %v1042_v11 = vld [vmem:[%s7457_s18 + $0x8] sm:$0xf]  ;;  %v1174_v33 = vor.u32 %v1173_v21, %v1170_v20  ;;  %v886_v21 = vld [vmem:[%s7457_s18 + $0x20] sm:$0xf] }
  0x6b   : > { %v888_v20 = vld [vmem:[%s7457_s18 + $0x28] sm:$0xf]  ;;  %v954_v26 = vshrl.u32 %v886_v21, 16 }
  0x6c   : > { %v1159_v23 = vrot.slane %v1157_v10, 5  ;;  %v1175_v45 = vrot.slane %v1174_v33, 4  ;;  %v1300_v10 = vld [vmem:[%s7457_s18 + $0x18] sm:$0xf]  ;;  %v890_v33 = vld [vmem:[%s7457_s18 + $0x30] sm:$0xf] }
  0x6d   : > { %v982_v44 = vshrl.u32 %v890_v33, 16 }
  0x6e   : > { %799 = vrot.lane.b32.xlu1 %v782_v12, %s7374_s22  ;;  %797 = vrot.lane.b32.xlu0 %v781_v13, %s7374_s22  ;;  %v1041_v12 = vld [vmem:[%s7457_s18] sm:$0xf]  ;;  %v1160_v35 = vor.u32 %v1159_v23, %v1156_v22  ;;  %v1180_v58 = vsel %vm7640_vm6, %v1175_v45, %v1179_v46  ;;  %v985_v45 = vshll.u32 %v890_v33, 16 }
  0x70   : > { %v1161_v51 = vrot.slane %v1160_v35, 4  ;;  %v787_v35 = vld [vmem:[%s7457_s18 + $0x30] sm:$0xf] }
  0x72   : > { %762 = vrot.lane.b32.xlu1 %v739_v16, %s7374_s22  ;;  %760 = vrot.lane.b32.xlu0 %v738_v17, %s7374_s22  ;;  %v1141_v16 = vld [vmem:[%s7457_s18 + $0x10] sm:$0xf]  ;;  %v1044_v17 = vld [vmem:[%s7457_s18 + $0x18] sm:$0xf] }
  0x73   : > { %v1182_v27 = vshrl.u32 %v1141_v16, 16  ;;  %v1185_v28 = vshll.u32 %v1141_v16, 16 }
  0x75   : > { %v1184_v40 = vrot.slane %v1182_v27, 4  ;;  %v1187_v41 = vrot.slane %v1185_v28, 5  ;;  %v957_v27 = vshll.u32 %v886_v21, 16  ;;  %v1348_v28 = vld [vmem:[%s7457_s18 + $0x18] sm:$0xf] }
  0x76   : > { %803 = vrot.lane.b32.xlu1 %v784_v24, %s7374_s22  ;;  %801 = vrot.lane.b32.xlu0 %v783_v25, %s7374_s22  ;;  %v1138_v24 = vld [vmem:[%s7457_s18 + $0x4] sm:$0x1]  ;;  %v1196_v25 = vshrl.u32 %v1143_v15, 16  ;;  %v1345_v15 = vld [vmem:[%s7457_s18] sm:$0xf] }
  0x78   : > { %v1198_v38 = vrot.slane %v1196_v25, 4  ;;  %v971_v25 = vshll.u32 %v888_v20, 16 }
  0x7a   : > { %848 = vrot.lane.b32.xlu1 %v831_v36, %s7374_s22  ;;  %846 = vrot.lane.b32.xlu0 %v830_v37, %s7374_s22  ;;  %v1163_v36 = vshll.u32 %v1138_v24, 16  ;;  %v1144_v37 = vld [vmem:[%s7457_s18 + $0x1c] sm:$0x1]  ;;  %v968_v24 = vshrl.u32 %v888_v20, 16 }
  0x7b   : > { %v1205_v48 = vshll.u32 %v1144_v37, 16 }
  0x7c   : > { %v1165_v47 = vrot.slane %v1163_v36, 5  ;;  %v889_v36 = vld [vmem:[%s7457_s18 + $0x2c] sm:$0x1]  ;;  %v970_v37 = vrot.slane %v968_v24, 4  ;;  %v1145_v24 = vld [vmem:[%s7457_s18 + $0x20] sm:$0xf] }
  0x7e   : > { %852 = vrot.lane.b32.xlu1 %v833_v52, %s7374_s22  ;;  %850 = vrot.lane.b32.xlu0 %v832_v53, %s7374_s22  ;;  %v1202_v52 = vor.u32 %v1201_v39, %v1198_v38  ;;  %v1188_v53 = vor.u32 %v1187_v41, %v1184_v40  ;;  %v1166_v60 = vsel %vm7640_vm6, %v1161_v51, %v1165_v47  ;;  %v973_v38 = vrot.slane %v971_v25, 5  ;;  %v887_v41 = vld [vmem:[%s7457_s18 + $0x24] sm:$0x1] }
  0x7f   : > { %v956_v39 = vrot.slane %v954_v26, 4  ;;  %v959_v40 = vrot.slane %v957_v27, 5  ;;  %v963_v55 = vshll.u32 %v887_v41, 16 }
  0x80   : > { %v1189_v62 = vrot.slane %v1188_v53, 4  ;;  %v974_v51 = vor.u32 %v973_v38, %v970_v37  ;;  %v1048_v37 = vld [vmem:[%s7457_s18 + $0x38] sm:$0xf]  ;;  %v1047_v38 = vld [vmem:[%s7457_s18 + $0x30] sm:$0xf] }
  0x81   : > { %v960_v53 = vor.u32 %v959_v40, %v956_v39  ;;  %v1148_v39 = vld [vmem:[%s7457_s18 + $0x2c] sm:$0x1] }
  0x82   : > { %1011 = vrot.lane.b32.xlu1 %v924_v59, %s7375_s11  ;;  %1009 = vrot.lane.b32.xlu0 %v910_v61, %s7375_s11  ;;  %v1207_v59 = vrot.slane %v1205_v48, 5  ;;  %v1203_v61 = vrot.slane %v1202_v52, 4  ;;  %v1194_v3 = vsel %vm7640_vm6, %v1189_v62, %v1193_v63  ;;  %v977_v52 = vshll.u32 %v889_v36, 16  ;;  %v1149_v36 = vld [vmem:[%s7457_s18 + $0x30] sm:$0xf] }
  0x84   : > { %v508_v5 = vpop.permute.xlu1 %507  ;;  %v504_v6 = vpop.permute.xlu0 %503 }
  0x85   : > { %530 = vst.msk [vmem:[#allocation2 + $0x8] sm:$0xf] %vm527_vm7, %v508_v5  ;;  %528 = vst.msk [vmem:[#allocation2] sm:$0xf] %vm527_vm7, %v504_v6  ;;  %v1298_v6 = vld [vmem:[%s7457_s18 + $0x8] sm:$0xf] }
  0x86   : > { %1015 = vrot.lane.b32.xlu1 %v952_v1, %s7375_s11  ;;  %1013 = vrot.lane.b32.xlu0 %v938_v2, %s7375_s11  ;;  %v1208_v2 = vsel %vm7640_vm6, %v1203_v61, %v1207_v59  ;;  %v891_v59 = vld [vmem:[%s7457_s18 + $0x34] sm:$0x1]  ;;  %v987_v61 = vrot.slane %v985_v45, 5 }
  0x88   : > { %v510_v13 = vpop.permute.xlu1 %509  ;;  %v506_v14 = vpop.permute.xlu0 %505 }
  0x89   : > { %531 = vst.msk [vmem:[#allocation2 + $0xc] sm:$0xf] %vm527_vm7, %v510_v13  ;;  %529 = vst.msk [vmem:[#allocation2 + $0x4] sm:$0xf] %vm527_vm7, %v506_v14  ;;  %v1346_v14 = vld [vmem:[%s7457_s18 + $0x8] sm:$0xf] }
  0x8a   : > { %1059 = vrot.lane.b32.xlu1 %v1042_v11, %s7376_s12  ;;  %1057 = vrot.lane.b32.xlu0 %v1041_v12, %s7376_s12  ;;  %v1299_v11 = vld [vmem:[%s7457_s18 + $0x10] sm:$0xf] }
  0x8c   : > { %v555_v29 = vpop.permute.xlu1 %554  ;;  %v553_v30 = vpop.permute.xlu0 %552 }
  0x8d   : > { %578 = vst.msk [vmem:[#allocation2 + $0x4] sm:$0xf] %vm576_vm8, %v555_v29  ;;  %577 = vst.msk [vmem:[#allocation2] sm:$0xf] %vm576_vm8, %v553_v30  ;;  %v1347_v29 = vld [vmem:[%s7457_s18 + $0x10] sm:$0xf] }
  0x8e   : > { %1063 = vrot.lane.b32.xlu1 %v1044_v17, %s7376_s12  ;;  %1061 = vrot.lane.b32.xlu0 %v1043_v18, %s7376_s12  ;;  %v786_v18 = vld [vmem:[%s7457_s18 + $0x28] sm:$0xf] }
  0x90   : > { %v559_v42 = vpop.permute.xlu1 %558  ;;  %v557_v43 = vpop.permute.xlu0 %556 }
  0x91   : > { %580 = vst.msk [vmem:[#allocation2 + $0xc] sm:$0xf] %vm576_vm8, %v559_v42  ;;  %579 = vst.msk [vmem:[#allocation2 + $0x8] sm:$0xf] %vm576_vm8, %v557_v43 }
  0x92   : > { %1107 = vrot.lane.b32.xlu1 %v1090_v31, %s7376_s12  ;;  %1105 = vrot.lane.b32.xlu0 %v1089_v32, %s7376_s12  ;;  %v892_v32 = vld [vmem:[%s7457_s18 + $0x38] sm:$0xf] }
  0x93   : > { %v996_v42 = vshrl.u32 %v892_v32, 16  ;;  %v999_v43 = vshll.u32 %v892_v32, 16  ;;  %v1045_v32 = vld [vmem:[%s7457_s18 + $0x20] sm:$0xf] }
  0x94   : > { %v604_v56 = vpop.permute.xlu1 %603  ;;  %v602_v57 = vpop.permute.xlu0 %601 }
  0x95   : > { %627 = vst.msk [vmem:[#allocation2 + $0x4] sm:$0xf] %vm625_vm9, %v604_v56  ;;  %626 = vst.msk [vmem:[#allocation2] sm:$0xf] %vm625_vm9, %v602_v57  ;;  %v893_v56 = vld [vmem:[%s7457_s18 + $0x3c] sm:$0x1] }
  0x96   : > { %1111 = vrot.lane.b32.xlu1 %v1092_v49, %s7376_s12  ;;  %1109 = vrot.lane.b32.xlu0 %v1091_v50, %s7376_s12  ;;  %v835_v49 = vld [vmem:[%s7457_s18 + $0x28] sm:$0xf]  ;;  %v834_v50 = vld [vmem:[%s7457_s18 + $0x20] sm:$0xf]  ;;  %v998_v57 = vrot.slane %v996_v42, 4 }
  0x98   : > { %v608_v0 = vpop.permute.xlu1 %607  ;;  %v606_v1 = vpop.permute.xlu0 %605 }
  0x99   : > { %629 = vst.msk [vmem:[#allocation2 + $0xc] sm:$0xf] %vm625_vm9, %v608_v0  ;;  %628 = vst.msk [vmem:[#allocation2 + $0x8] sm:$0xf] %vm625_vm9, %v606_v1  ;;  %v975_v1 = vrot.slane %v974_v51, 4 }
  0x9a   : > { %1267 = vrot.lane.b32.xlu1 %v1180_v58, %s7377_s15  ;;  %1265 = vrot.lane.b32.xlu0 %v1166_v60, %s7377_s15  ;;  %v1001_v58 = vrot.slane %v999_v43, 5  ;;  %v984_v60 = vrot.slane %v982_v44, 4  ;;  %v1146_v44 = vld [vmem:[%s7457_s18 + $0x24] sm:$0x1]  ;;  %v1094_v51 = vld [vmem:[%s7457_s18 + $0x28] sm:$0xf] }
  0x9c   : > { %v653_v4 = vpop.permute.xlu1 %652  ;;  %v651_v5 = vpop.permute.xlu0 %650 }
  0x9d   : > { %676 = vst.msk [vmem:[#allocation2 + $0x4] sm:$0xf] %vm674_vm10, %v653_v4  ;;  %675 = vst.msk [vmem:[#allocation2] sm:$0xf] %vm674_vm10, %v651_v5  ;;  %v1005_v4 = vshll.u32 %v893_v56, 16  ;;  %v1219_v56 = vshll.u32 %v1146_v44, 16 }
  0x9e   : > { %1271 = vrot.lane.b32.xlu1 %v1208_v2, %s7377_s15  ;;  %1269 = vrot.lane.b32.xlu0 %v1194_v3, %s7377_s15  ;;  %v979_v2 = vrot.slane %v977_v52, 5  ;;  %v965_v3 = vrot.slane %v963_v55, 5  ;;  %v837_v5 = vld [vmem:[%s7457_s18 + $0x38] sm:$0xf]  ;;  %v1538_v44 = vld [vmem:[%s7457_s18 + $0x8] sm:$0xf] }
  0xa0   : > { %v657_v8 = vpop.permute.xlu1 %656  ;;  %v655_v9 = vpop.permute.xlu0 %654 }
  0xa1   : > { %678 = vst.msk [vmem:[#allocation2 + $0xc] sm:$0xf] %vm674_vm10, %v657_v8  ;;  %677 = vst.msk [vmem:[#allocation2 + $0x8] sm:$0xf] %vm674_vm10, %v655_v9  ;;  %v1002_v8 = vor.u32 %v1001_v58, %v998_v57  ;;  %v988_v9 = vor.u32 %v987_v61, %v984_v60  ;;  %v1093_v57 = vld [vmem:[%s7457_s18 + $0x20] sm:$0xf] }
  0xa2   : > { %1315 = vrot.lane.b32.xlu1 %v1298_v6, %s7378_s16  ;;  %1313 = vrot.lane.b32.xlu0 %v1297_v7, %s7378_s16  ;;  %v836_v6 = vld [vmem:[%s7457_s18 + $0x30] sm:$0xf]  ;;  %v961_v7 = vrot.slane %v960_v53, 4  ;;  %v1233_v53 = vshll.u32 %v1148_v39, 16  ;;  %v1352_v39 = vld [vmem:[%s7457_s18 + $0x38] sm:$0xf] }
  0xa4   : > { %v702_v12 = vpop.permute.xlu1 %701  ;;  %v700_v13 = vpop.permute.xlu0 %699 }
  0xa5   : > { %725 = vst.msk [vmem:[#allocation2 + $0x4] sm:$0xf] %vm723_vm11, %v702_v12  ;;  %724 = vst.msk [vmem:[#allocation2] sm:$0xf] %vm723_vm11, %v700_v13  ;;  %v980_v13 = vsel %vm7640_vm6, %v975_v1, %v979_v2  ;;  %v1150_v1 = vld [vmem:[%s7457_s18 + $0x34] sm:$0x1] }
  0xa6   : > { %1319 = vrot.lane.b32.xlu1 %v1300_v10, %s7378_s16  ;;  %1317 = vrot.lane.b32.xlu0 %v1299_v11, %s7378_s16  ;;  %v991_v10 = vshll.u32 %v891_v59, 16 }
  0xa8   : > { %v706_v16 = vpop.permute.xlu1 %705  ;;  %v704_v17 = vpop.permute.xlu0 %703 }
  0xa9   : > { %727 = vst.msk [vmem:[#allocation2 + $0xc] sm:$0xf] %vm723_vm11, %v706_v16  ;;  %726 = vst.msk [vmem:[#allocation2 + $0x8] sm:$0xf] %vm723_vm11, %v704_v17  ;;  %v1003_v16 = vrot.slane %v1002_v8, 4  ;;  %v989_v17 = vrot.slane %v988_v9, 4 }
  0xaa   : > { %1363 = vrot.lane.b32.xlu1 %v1346_v14, %s7378_s16  ;;  %1361 = vrot.lane.b32.xlu0 %v1345_v15, %s7378_s16  ;;  %v1007_v14 = vrot.slane %v1005_v4, 5  ;;  %v966_v15 = vsel %vm7640_vm6, %v961_v7, %v965_v3  ;;  %v1235_v3 = vrot.slane %v1233_v53, 5  ;;  %v1095_v7 = vld [vmem:[%s7457_s18 + $0x30] sm:$0xf]  ;;  %v1586_v53 = vld [vmem:[%s7457_s18] sm:$0xf] }
  0xac   : > { %v751_v22 = vpop.permute.xlu1 %750  ;;  %v749_v23 = vpop.permute.xlu0 %748  ;;  %v1008_v21 = vsel %vm7640_vm6, %v1003_v16, %v1007_v14 }
  0xad   : > { %774 = vst.msk [vmem:[#allocation2 + $0x4] sm:$0xf] %vm772_vm12, %v751_v22  ;;  %773 = vst.msk [vmem:[#allocation2] sm:$0xf] %vm772_vm12, %v749_v23  ;;  %v1147_v23 = vld [vmem:[%s7457_s18 + $0x28] sm:$0xf] }
  0xae   : > { %807 = vrot.lane.b32.xlu1 %v786_v18, %s7374_s22  ;;  %805 = vrot.lane.b32.xlu0 %v785_v19, %s7374_s22  ;;  %v993_v18 = vrot.slane %v991_v10, 5  ;;  %v1224_v27 = vshrl.u32 %v1147_v23, 16 }
  0xb0   : > { %v755_v30 = vpop.permute.xlu1 %754  ;;  %v753_v31 = vpop.permute.xlu0 %752  ;;  %v994_v22 = vsel %vm7640_vm6, %v989_v17, %v993_v18  ;;  %v1226_v40 = vrot.slane %v1224_v27, 4  ;;  %v1301_v27 = vld [vmem:[%s7457_s18 + $0x20] sm:$0xf] }
  0xb1   : > { %776 = vst.msk [vmem:[#allocation2 + $0xc] sm:$0xf] %vm772_vm12, %v755_v30  ;;  %775 = vst.msk [vmem:[#allocation2 + $0x8] sm:$0xf] %vm772_vm12, %v753_v31  ;;  %v1213_v30 = vshll.u32 %v1145_v24, 16 }
  0xb2   : > { %1367 = vrot.lane.b32.xlu1 %v1348_v28, %s7378_s16  ;;  %1365 = vrot.lane.b32.xlu0 %v1347_v29, %s7378_s16  ;;  %v1227_v28 = vshll.u32 %v1147_v23, 16  ;;  %v1210_v29 = vshrl.u32 %v1145_v24, 16  ;;  %v1046_v31 = vld [vmem:[%s7457_s18 + $0x28] sm:$0xf] }
  0xb3   : > { %v1215_v43 = vrot.slane %v1213_v30, 5  ;;  %v1304_v30 = vld [vmem:[%s7457_s18 + $0x38] sm:$0xf] }
  0xb4   : > { %v514_v46 = vpop.permute.xlu1 %513  ;;  %v512_v47 = vpop.permute.xlu0 %511  ;;  %v7066_v48 = vld [vmem:[#allocation2] sm:$0xff]   ;;  %v1229_v41 = vrot.slane %v1227_v28, 5  ;;  %v1212_v42 = vrot.slane %v1210_v29, 4 }
  0xb5   : > { %533 = vst.msk [vmem:[#allocation2 + $0x14] sm:$0xf] %vm527_vm7, %v514_v46  ;;  %532 = vst.msk [vmem:[#allocation2 + $0x10] sm:$0xf] %vm527_vm7, %v512_v47  ;;  %6976 = vmatprep.mubr.msk.bf16.mxu0 %vm2895_vm13, %v7066_v48  ;;  %v1238_v47 = vshrl.u32 %v1149_v36, 16  ;;  %v1241_v48 = vshll.u32 %v1149_v36, 16 }
  0xb6   : > { %811 = vrot.lane.b32.xlu1 %v788_v34, %s7374_s22  ;;  %809 = vrot.lane.b32.xlu0 %v787_v35, %s7374_s22  ;;  %v1151_v35 = vld [vmem:[%s7457_s18 + $0x38] sm:$0xf]  ;;  %v1230_v52 = vor.u32 %v1229_v41, %v1226_v40  ;;  %v1216_v55 = vor.u32 %v1215_v43, %v1212_v42  ;;  %v1349_v36 = vld [vmem:[%s7457_s18 + $0x20] sm:$0xf] }
  0xb7   : > { %v1252_v45 = vshrl.u32 %v1151_v35, 16  ;;  %v1255_v46 = vshll.u32 %v1151_v35, 16  ;;  %v1240_v60 = vrot.slane %v1238_v47, 4  ;;  %v1243_v61 = vrot.slane %v1241_v48, 5  ;;  %v1350_v35 = vld [vmem:[%s7457_s18 + $0x28] sm:$0xf] }
  0xb8   : > { %v518_v62 = vpop.permute.xlu1 %517  ;;  %v516_v63 = vpop.permute.xlu0 %515  ;;  %v7067_v0 = vld [vmem:[#allocation2 + $0x8] sm:$0xff]   ;;  %v1231_v2 = vrot.slane %v1230_v52, 4  ;;  %v1217_v4 = vrot.slane %v1216_v55, 4  ;;  %v1351_v40 = vld [vmem:[%s7457_s18 + $0x30] sm:$0xf] }
  0xb9   : > { %535 = vst.msk [vmem:[#allocation2 + $0x1c] sm:$0xf] %vm527_vm7, %v518_v62  ;;  %534 = vst.msk [vmem:[#allocation2 + $0x18] sm:$0xf] %vm527_vm7, %v516_v63  ;;  %6977 = vmatmul.mubr.msk.bf16.vlgmr.msra.gmra.mrb[0].mxu0 %vm2895_vm13, %v7067_v0  ;;  %v1254_v58 = vrot.slane %v1252_v45, 4  ;;  %v1257_v59 = vrot.slane %v1255_v46, 5  ;;  %v1244_v10 = vor.u32 %v1243_v61, %v1240_v60 }
  0xba   : > { %856 = vrot.lane.b32.xlu1 %v835_v49, %s7374_s22  ;;  %854 = vrot.lane.b32.xlu0 %v834_v50, %s7374_s22  ;;  %v1152_v0 = vld [vmem:[%s7457_s18 + $0x3c] sm:$0x1]  ;;  %v1236_v14 = vsel %vm7640_vm6, %v1231_v2, %v1235_v3  ;;  %v1537_v45 = vld [vmem:[%s7457_s18] sm:$0xf] }
  0xbb   : > { %v1258_v8 = vor.u32 %v1257_v59, %v1254_v58  ;;  %v1261_v9 = vshll.u32 %v1152_v0, 16  ;;  %v1245_v18 = vrot.slane %v1244_v10, 4  ;;  %v1540_v48 = vld [vmem:[%s7457_s18 + $0x18] sm:$0xf]  ;;  %v1587_v52 = vld [vmem:[%s7457_s18 + $0x8] sm:$0xf] }
  0xbc   : > { %v563_v11 = vpop.permute.xlu1 %562  ;;  %v561_v12 = vpop.permute.xlu0 %560  ;;  %v1588_v58 = vld [vmem:[%s7457_s18 + $0x10] sm:$0xf]  ;;  %v1635_v61 = vld [vmem:[%s7457_s18 + $0x8] sm:$0xf]  ;;  %v1393_v10 = vld [vmem:[%s7457_s18] sm:$0xf] }
  0xbd   : > { %582 = vst.msk [vmem:[#allocation2 + $0x14] sm:$0xf] %vm576_vm8, %v563_v11  ;;  %581 = vst.msk [vmem:[#allocation2 + $0x10] sm:$0xf] %vm576_vm8, %v561_v12  ;;  %v1247_v11 = vshll.u32 %v1150_v1, 16  ;;  %v1259_v16 = vrot.slane %v1258_v8, 4 }
  0xbe   : > { %860 = vrot.lane.b32.xlu1 %v837_v5, %s7374_s22  ;;  %858 = vrot.lane.b32.xlu0 %v836_v6, %s7374_s22  ;;  %v1221_v5 = vrot.slane %v1219_v56, 5  ;;  %v1096_v6 = vld [vmem:[%s7457_s18 + $0x38] sm:$0xf]  ;;  %v1263_v17 = vrot.slane %v1261_v9, 5  ;;  %v1636_v2 = vld [vmem:[%s7457_s18 + $0x10] sm:$0xf] }
  0xbf   : > { %v1637_v1 = vld [vmem:[%s7457_s18 + $0x18] sm:$0xf] }
  0xc0   : > { %v567_v19 = vpop.permute.xlu1 %566  ;;  %v565_v20 = vpop.permute.xlu0 %564 }
  0xc1   : > { %584 = vst.msk [vmem:[#allocation2 + $0x1c] sm:$0xf] %vm576_vm8, %v567_v19  ;;  %583 = vst.msk [vmem:[#allocation2 + $0x18] sm:$0xf] %vm576_vm8, %v565_v20  ;;  %v1249_v19 = vrot.slane %v1247_v11, 5 }
  0xc2   : > { %1019 = vrot.lane.b32.xlu1 %v980_v13, %s7375_s11  ;;  %1017 = vrot.lane.b32.xlu0 %v966_v15, %s7375_s11  ;;  %v1222_v15 = vsel %vm7640_vm6, %v1217_v4, %v1221_v5  ;;  %v1683_v5 = vld [vmem:[%s7457_s18 + $0x8] sm:$0xf] }
  0xc3   : > { %v1250_v23 = vsel %vm7640_vm6, %v1245_v18, %v1249_v19  ;;  %v1731_v19 = vld [vmem:[%s7457_s18 + $0x8] sm:$0xf] }
  0xc4   : > { %v612_v25 = vpop.permute.xlu1 %611  ;;  %v610_v26 = vpop.permute.xlu0 %609 }
  0xc5   : > { %631 = vst.msk [vmem:[#allocation2 + $0x14] sm:$0xf] %vm625_vm9, %v612_v25  ;;  %630 = vst.msk [vmem:[#allocation2 + $0x10] sm:$0xf] %vm625_vm9, %v610_v26  ;;  %v1302_v26 = vld [vmem:[%s7457_s18 + $0x28] sm:$0xf] }
  0xc6   : > { %1023 = vrot.lane.b32.xlu1 %v1008_v21, %s7375_s11  ;;  %1021 = vrot.lane.b32.xlu0 %v994_v22, %s7375_s11  ;;  %v1264_v22 = vsel %vm7640_vm6, %v1259_v16, %v1263_v17  ;;  %v1413_v16 = vshll.u32 %v1393_v10, 16 }
  0xc8   : > { %v616_v33 = vpop.permute.xlu1 %615  ;;  %v614_v34 = vpop.permute.xlu0 %613 }
  0xc9   : > { %633 = vst.msk [vmem:[#allocation2 + $0x1c] sm:$0xf] %vm625_vm9, %v616_v33  ;;  %632 = vst.msk [vmem:[#allocation2 + $0x18] sm:$0xf] %vm625_vm9, %v614_v34 }
  0xca   : > { %1067 = vrot.lane.b32.xlu1 %v1046_v31, %s7376_s12  ;;  %1065 = vrot.lane.b32.xlu0 %v1045_v32, %s7376_s12  ;;  %v1303_v31 = vld [vmem:[%s7457_s18 + $0x30] sm:$0xf] }
  0xcc   : > { %v661_v49 = vpop.permute.xlu1 %660  ;;  %v659_v50 = vpop.permute.xlu0 %658 }
  0xcd   : > { %680 = vst.msk [vmem:[#allocation2 + $0x14] sm:$0xf] %vm674_vm10, %v661_v49  ;;  %679 = vst.msk [vmem:[#allocation2 + $0x10] sm:$0xf] %vm674_vm10, %v659_v50  ;;  %v1539_v49 = vld [vmem:[%s7457_s18 + $0x10] sm:$0xf] }
  0xce   : > { %1071 = vrot.lane.b32.xlu1 %v1048_v37, %s7376_s12  ;;  %1069 = vrot.lane.b32.xlu0 %v1047_v38, %s7376_s12 }
  0xd0   : > { %v665_v62 = vpop.permute.xlu1 %664  ;;  %v663_v63 = vpop.permute.xlu0 %662 }
  0xd1   : > { %682 = vst.msk [vmem:[#allocation2 + $0x1c] sm:$0xf] %vm674_vm10, %v665_v62  ;;  %681 = vst.msk [vmem:[#allocation2 + $0x18] sm:$0xf] %vm674_vm10, %v663_v63  ;;  %v1634_v62 = vld [vmem:[%s7457_s18] sm:$0xf] }
  0xd2   : > { %1115 = vrot.lane.b32.xlu1 %v1094_v51, %s7376_s12  ;;  %1113 = vrot.lane.b32.xlu0 %v1093_v57, %s7376_s12  ;;  %v1589_v57 = vld [vmem:[%s7457_s18 + $0x18] sm:$0xf] }
  0xd4   : > { %v710_v12 = vpop.permute.xlu1 %709  ;;  %v708_v13 = vpop.permute.xlu0 %707 }
  0xd5   : > { %729 = vst.msk [vmem:[#allocation2 + $0x14] sm:$0xf] %vm723_vm11, %v710_v12  ;;  %728 = vst.msk [vmem:[#allocation2 + $0x10] sm:$0xf] %vm723_vm11, %v708_v13  ;;  %v1685_v13 = vld [vmem:[%s7457_s18 + $0x18] sm:$0xf] }
  0xd6   : > { %1119 = vrot.lane.b32.xlu1 %v1096_v6, %s7376_s12  ;;  %1117 = vrot.lane.b32.xlu0 %v1095_v7, %s7376_s12  ;;  %v1682_v6 = vld [vmem:[%s7457_s18] sm:$0xf]  ;;  %v1395_v7 = vld [vmem:[%s7457_s18 + $0x8] sm:$0xf] }
  0xd7   : > { %v1424_v11 = vshrl.u32 %v1395_v7, 16  ;;  %v1427_v12 = vshll.u32 %v1395_v7, 16 }
  0xd8   : > { %v714_v20 = vpop.permute.xlu1 %713  ;;  %v712_v21 = vpop.permute.xlu0 %711 }
  0xd9   : > { %731 = vst.msk [vmem:[#allocation2 + $0x1c] sm:$0xf] %vm723_vm11, %v714_v20  ;;  %730 = vst.msk [vmem:[#allocation2 + $0x18] sm:$0xf] %vm723_vm11, %v712_v21  ;;  %v1730_v20 = vld [vmem:[%s7457_s18] sm:$0xf] }
  0xda   : > { %1275 = vrot.lane.b32.xlu1 %v1236_v14, %s7377_s15  ;;  %1273 = vrot.lane.b32.xlu0 %v1222_v15, %s7377_s15  ;;  %v1684_v14 = vld [vmem:[%s7457_s18 + $0x10] sm:$0xf]  ;;  %v1410_v15 = vshrl.u32 %v1393_v10, 16  ;;  %v1396_v21 = vld [vmem:[%s7457_s18 + $0xc] sm:$0x1] }
  0xdc   : > { %v759_v24 = vpop.permute.xlu1 %758  ;;  %v757_v25 = vpop.permute.xlu0 %756 }
  0xdd   : > { %778 = vst.msk [vmem:[#allocation2 + $0x14] sm:$0xf] %vm772_vm12, %v759_v24  ;;  %777 = vst.msk [vmem:[#allocation2 + $0x10] sm:$0xf] %vm772_vm12, %v757_v25  ;;  %v1394_v24 = vld [vmem:[%s7457_s18 + $0x4] sm:$0x1] }
  0xde   : > { %1279 = vrot.lane.b32.xlu1 %v1264_v22, %s7377_s15  ;;  %1277 = vrot.lane.b32.xlu0 %v1250_v23, %s7377_s15  ;;  %v1426_v22 = vrot.slane %v1424_v11, 4  ;;  %v1429_v23 = vrot.slane %v1427_v12, 5  ;;  %v1412_v25 = vrot.slane %v1410_v15, 4  ;;  %v6581_v15 = vld [vmem:[%s7457_s18 + $0x18] sm:$0xf] }
  0xe0   : > { %v800_v28 = vpop.permute.xlu1 %799  ;;  %v798_v29 = vpop.permute.xlu0 %797 }
  0xe1   : > { %823 = vst.msk [vmem:[#allocation2 + $0x24] sm:$0xf] %vm444_vm0, %v800_v28  ;;  %822 = vst.msk [vmem:[#allocation2 + $0x20] sm:$0xf] %vm444_vm0, %v798_v29 }
  0xe2   : > { %1323 = vrot.lane.b32.xlu1 %v1302_v26, %s7378_s16  ;;  %1321 = vrot.lane.b32.xlu0 %v1301_v27, %s7378_s16  ;;  %v1415_v26 = vrot.slane %v1413_v16, 5  ;;  %v1399_v27 = vld [vmem:[%s7457_s18 + $0x18] sm:$0xf] }
  0xe4   : > { %v763_v32 = vpop.permute.xlu1 %762  ;;  %v761_v33 = vpop.permute.xlu0 %760  ;;  %v7068_v34 = vld [vmem:[#allocation2 + $0x10] sm:$0xff]  }
  0xe5   : > { %780 = vst.msk [vmem:[#allocation2 + $0x1c] sm:$0xf] %vm772_vm12, %v763_v32  ;;  %779 = vst.msk [vmem:[#allocation2 + $0x18] sm:$0xf] %vm772_vm12, %v761_v33  ;;  %6980 = vmatprep.mubr.msk.bf16.mxu0 %vm2895_vm13, %v7068_v34  ;;  %v1430_v32 = vor.u32 %v1429_v23, %v1426_v22  ;;  %v1433_v33 = vshll.u32 %v1396_v21, 16  ;;  %v1419_v34 = vshll.u32 %v1394_v24, 16 }
  0xe6   : > { %1327 = vrot.lane.b32.xlu1 %v1304_v30, %s7378_s16  ;;  %1325 = vrot.lane.b32.xlu0 %v1303_v31, %s7378_s16  ;;  %v1397_v30 = vld [vmem:[%s7457_s18 + $0x10] sm:$0xf]  ;;  %v1733_v31 = vld [vmem:[%s7457_s18 + $0x18] sm:$0xf] }
  0xe7   : > { %v1542_v23 = vld [vmem:[%s7457_s18 + $0x28] sm:$0xf]  ;;  %v1541_v24 = vld [vmem:[%s7457_s18 + $0x20] sm:$0xf] }
  0xe8   : > { %v804_v37 = vpop.permute.xlu1 %803  ;;  %v802_v38 = vpop.permute.xlu0 %801 }
  0xe9   : > { %825 = vst.msk [vmem:[#allocation2 + $0x2c] sm:$0xf] %vm444_vm0, %v804_v37  ;;  %824 = vst.msk [vmem:[#allocation2 + $0x28] sm:$0xf] %vm444_vm0, %v802_v38  ;;  %v1416_v37 = vor.u32 %v1415_v26, %v1412_v25  ;;  %v1455_v38 = vshll.u32 %v1399_v27, 16 }
  0xea   : > { %1371 = vrot.lane.b32.xlu1 %v1350_v35, %s7378_s16  ;;  %1369 = vrot.lane.b32.xlu0 %v1349_v36, %s7378_s16  ;;  %v1452_v35 = vshrl.u32 %v1399_v27, 16  ;;  %v1732_v36 = vld [vmem:[%s7457_s18 + $0x10] sm:$0xf] }
  0xec   : > { %v849_v41 = vpop.permute.xlu1 %848  ;;  %v847_v42 = vpop.permute.xlu0 %846  ;;  %v7069_v43 = vld [vmem:[#allocation2 + $0x18] sm:$0xff]  }
  0xed   : > { %871 = vst.msk [vmem:[#allocation2 + $0x24] sm:$0xf] %vm461_vm1, %v849_v41  ;;  %870 = vst.msk [vmem:[#allocation2 + $0x20] sm:$0xf] %vm461_vm1, %v847_v42  ;;  %6981 = vmatmul.mubr.msk.bf16.gmra.mrb[4].mxu0 %vm2895_vm13, %v7069_v43  ;;  %v1779_v43 = vld [vmem:[%s7457_s18 + $0x8] sm:$0xf] }
  0xee   : > { %1375 = vrot.lane.b32.xlu1 %v1352_v39, %s7378_s16  ;;  %1373 = vrot.lane.b32.xlu0 %v1351_v40, %s7378_s16  ;;  %v1438_v39 = vshrl.u32 %v1397_v30, 16  ;;  %v1441_v40 = vshll.u32 %v1397_v30, 16 }
  0xf0   : > { %v853_v46 = vpop.permute.xlu1 %852  ;;  %v851_v47 = vpop.permute.xlu0 %850 }
  0xf1   : > { %873 = vst.msk [vmem:[#allocation2 + $0x2c] sm:$0xf] %vm461_vm1, %v853_v46  ;;  %872 = vst.msk [vmem:[#allocation2 + $0x28] sm:$0xf] %vm461_vm1, %v851_v47  ;;  %v1435_v46 = vrot.slane %v1433_v33, 5  ;;  %v1421_v47 = vrot.slane %v1419_v34, 5 }
  0xf2   : > { %1555 = vrot.lane.b32.xlu1 %v1538_v44, %s7379_s17  ;;  %1553 = vrot.lane.b32.xlu0 %v1537_v45, %s7379_s17  ;;  %v1778_v44 = vld [vmem:[%s7457_s18] sm:$0xf]  ;;  %v1431_v45 = vrot.slane %v1430_v32, 4  ;;  %v7382_v32 = vmov 0   ;;  %v6596_v33 = vld [vmem:[%s7457_s18 + $0x10] sm:$0xf] }
  0xf3   : > { %382 = vst.msk [vmem:[#allocation3 + $0x8] sm:$0xf] %vm374_vm14, %v7382_v32  ;;  %375 = vst.msk [vmem:[#allocation3] sm:$0xf] %vm374_vm14, %v7382_v32  ;;  %4714 = vmatprep.subr.bf16.mxu1 %v7382_v32  ;;  %v6595_v34 = vld [vmem:[%s7457_s18 + $0x8] sm:$0xf] }
  0xf4   : > { %v1012_v50 = vpop.permute.xlu1 %1011  ;;  %v1010_v51 = vpop.permute.xlu0 %1009  ;;  %386 = vst.msk [vmem:[#allocation3 + $0x10] sm:$0xf] %vm374_vm14, %v7382_v32  ;;  %390 = vst.msk [vmem:[#allocation3 + $0x18] sm:$0xf] %vm374_vm14, %v7382_v32 }
  0xf5   : > { %1034 = vst.msk [vmem:[#allocation2 + $0x24] sm:$0xf] %vm478_vm2, %v1012_v50  ;;  %1033 = vst.msk [vmem:[#allocation2 + $0x20] sm:$0xf] %vm478_vm2, %v1010_v51  ;;  %v1400_v50 = vld [vmem:[%s7457_s18 + $0x1c] sm:$0x1] }
  0xf6   : > { %1559 = vrot.lane.b32.xlu1 %v1540_v48, %s7379_s17  ;;  %1557 = vrot.lane.b32.xlu0 %v1539_v49, %s7379_s17  ;;  %v1454_v48 = vrot.slane %v1452_v35, 4  ;;  %v1417_v49 = vrot.slane %v1416_v37, 4  ;;  %v1457_v51 = vrot.slane %v1455_v38, 5  ;;  %394 = vst.msk [vmem:[#allocation3 + $0x20] sm:$0xf] %vm374_vm14, %v7382_v32 }
  0xf7   : > { %398 = vst.msk [vmem:[#allocation3 + $0x28] sm:$0xf] %vm374_vm14, %v7382_v32  ;;  %402 = vst.msk [vmem:[#allocation3 + $0x30] sm:$0xf] %vm374_vm14, %v7382_v32  ;;  %v1544_v37 = vld [vmem:[%s7457_s18 + $0x38] sm:$0xf] }
  0xf8   : > { %v1016_v55 = vpop.permute.xlu1 %1015  ;;  %v1014_v56 = vpop.permute.xlu0 %1013  ;;  %406 = vst.msk [vmem:[#allocation3 + $0x38] sm:$0xf] %vm374_vm14, %v7382_v32  ;;  %410 = vst.msk [vmem:[#allocation3 + $0x40] sm:$0xf] %vm374_vm14, %v7382_v32  ;;  %v1543_v38 = vld [vmem:[%s7457_s18 + $0x30] sm:$0xf] }
  0xf9   : > { %1036 = vst.msk [vmem:[#allocation2 + $0x2c] sm:$0xf] %vm478_vm2, %v1016_v55  ;;  %1035 = vst.msk [vmem:[#allocation2 + $0x28] sm:$0xf] %vm478_vm2, %v1014_v56 }
  0xfa   : > { %1604 = vrot.lane.b32.xlu1 %v1587_v52, %s7379_s17  ;;  %1602 = vrot.lane.b32.xlu0 %v1586_v53, %s7379_s17  ;;  %v1440_v52 = vrot.slane %v1438_v39, 4  ;;  %v1443_v53 = vrot.slane %v1441_v40, 5  ;;  %415 = vst.msk [vmem:[#allocation5] sm:$0xf] %vm414_vm3, %v7382_v32  ;;  %418 = vst.msk [vmem:[#allocation5 + $0x8] sm:$0xf] %vm414_vm3, %v7382_v32 }
  0xfb   : > { %420 = vst.msk [vmem:[#allocation5 + $0x10] sm:$0xf] %vm414_vm3, %v7382_v32  ;;  %422 = vst.msk [vmem:[#allocation5 + $0x18] sm:$0xf] %vm414_vm3, %v7382_v32 }
  0xfc   : > { %v1060_v59 = vpop.permute.xlu1 %1059  ;;  %v1058_v60 = vpop.permute.xlu0 %1057  ;;  %424 = vst.msk [vmem:[#allocation5 + $0x20] sm:$0xf] %vm414_vm3, %v7382_v32  ;;  %426 = vst.msk [vmem:[#allocation5 + $0x28] sm:$0xf] %vm414_vm3, %v7382_v32 }
  0xfd   : > { %1082 = vst.msk [vmem:[#allocation2 + $0x24] sm:$0xf] %vm527_vm7, %v1060_v59  ;;  %1081 = vst.msk [vmem:[#allocation2 + $0x20] sm:$0xf] %vm527_vm7, %v1058_v60  ;;  %v1461_v59 = vshll.u32 %v1400_v50, 16  ;;  %v1422_v60 = vsel %vm7640_vm6, %v1417_v49, %v1421_v47 }
  0xfe   : > { %1608 = vrot.lane.b32.xlu1 %v1589_v57, %s7379_s17  ;;  %1606 = vrot.lane.b32.xlu0 %v1588_v58, %s7379_s17  ;;  %v1398_v57 = vld [vmem:[%s7457_s18 + $0x14] sm:$0x1]  ;;  %v1436_v58 = vsel %vm7640_vm6, %v1431_v45, %v1435_v46  ;;  %v6598_v45 = vld [vmem:[%s7457_s18 + $0x20] sm:$0xf]  ;;  %428 = vst.msk [vmem:[#allocation5 + $0x30] sm:$0xf] %vm414_vm3, %v7382_v32 }
  0xff   : > { %v1463_v7 = vrot.slane %v1461_v59, 5  ;;  %v6597_v46 = vld [vmem:[%s7457_s18 + $0x18] sm:$0xf]  ;;  %v1592_v50 = vld [vmem:[%s7457_s18 + $0x30] sm:$0xf] }
 0x100   : > { %v1064_v63 = vpop.permute.xlu1 %1063  ;;  %v1062_v0 = vpop.permute.xlu0 %1061  ;;  %v1593_v49 = vld [vmem:[%s7457_s18 + $0x38] sm:$0xf]  ;;  %430 = vst.msk [vmem:[#allocation5 + $0x38] sm:$0xf] %vm414_vm3, %v7382_v32  ;;  %432 = vst.msk [vmem:[#allocation5 + $0x40] sm:$0xf] %vm414_vm3, %v7382_v32 }
 0x101   : > { %1084 = vst.msk [vmem:[#allocation2 + $0x2c] sm:$0xf] %vm527_vm7, %v1064_v63  ;;  %1083 = vst.msk [vmem:[#allocation2 + $0x28] sm:$0xf] %vm527_vm7, %v1062_v0  ;;  %v1458_v63 = vor.u32 %v1457_v51, %v1454_v48  ;;  %v1444_v0 = vor.u32 %v1443_v53, %v1440_v52  ;;  %v1639_v53 = vld [vmem:[%s7457_s18 + $0x28] sm:$0xf] }
 0x102   : > { %1652 = vrot.lane.b32.xlu1 %v1635_v61, %s7379_s17  ;;  %1650 = vrot.lane.b32.xlu0 %v1634_v62, %s7379_s17  ;;  %v1781_v61 = vld [vmem:[%s7457_s18 + $0x18] sm:$0xf]  ;;  %v1780_v62 = vld [vmem:[%s7457_s18 + $0x10] sm:$0xf]  ;;  %434 = vst.msk [vmem:[#allocation5 + $0x48] sm:$0xf] %vm414_vm3, %v7382_v32 }
 0x104   : > { %v1108_v3 = vpop.permute.xlu1 %1107  ;;  %v1106_v4 = vpop.permute.xlu0 %1105 }
 0x105   : > { %1130 = vst.msk [vmem:[#allocation2 + $0x24] sm:$0xf] %vm576_vm8, %v1108_v3  ;;  %1129 = vst.msk [vmem:[#allocation2 + $0x20] sm:$0xf] %vm576_vm8, %v1106_v4  ;;  %v6580_v4 = vld [vmem:[%s7457_s18 + $0x10] sm:$0xf] }
 0x106   : > { %1656 = vrot.lane.b32.xlu1 %v1637_v1, %s7379_s17  ;;  %1654 = vrot.lane.b32.xlu0 %v1636_v2, %s7379_s17  ;;  %v1447_v1 = vshll.u32 %v1398_v57, 16  ;;  %v1401_v57 = vld [vmem:[%s7457_s18 + $0x20] sm:$0xf] }
 0x108   : > { %v1112_v8 = vpop.permute.xlu1 %1111  ;;  %v1110_v9 = vpop.permute.xlu0 %1109 }
 0x109   : > { %1132 = vst.msk [vmem:[#allocation2 + $0x2c] sm:$0xf] %vm576_vm8, %v1112_v8  ;;  %1131 = vst.msk [vmem:[#allocation2 + $0x28] sm:$0xf] %vm576_vm8, %v1110_v9  ;;  %v1445_v8 = vrot.slane %v1444_v0, 4  ;;  %v1449_v9 = vrot.slane %v1447_v1, 5 }
 0x10a   : > { %1700 = vrot.lane.b32.xlu1 %v1683_v5, %s7380_s19  ;;  %1698 = vrot.lane.b32.xlu0 %v1682_v6, %s7380_s19  ;;  %v6579_v5 = vld [vmem:[%s7457_s18 + $0x8] sm:$0xf]  ;;  %v1459_v6 = vrot.slane %v1458_v63, 4  ;;  %v1469_v63 = vshll.u32 %v1401_v57, 16  ;;  %v1641_v0 = vld [vmem:[%s7457_s18 + $0x38] sm:$0xf] }
 0x10b   : > { %v1640_v1 = vld [vmem:[%s7457_s18 + $0x30] sm:$0xf] }
 0x10c   : > { %v1268_v17 = vpop.permute.xlu1 %1267  ;;  %v1266_v18 = vpop.permute.xlu0 %1265  ;;  %v1464_v12 = vsel %vm7640_vm6, %v1459_v6, %v1463_v7  ;;  %v1687_v6 = vld [vmem:[%s7457_s18 + $0x28] sm:$0xf]  ;;  %v1686_v7 = vld [vmem:[%s7457_s18 + $0x20] sm:$0xf] }
 0x10d   : > { %1290 = vst.msk [vmem:[#allocation2 + $0x24] sm:$0xf] %vm625_vm9, %v1268_v17  ;;  %1289 = vst.msk [vmem:[#allocation2 + $0x20] sm:$0xf] %vm625_vm9, %v1266_v18 }
 0x10e   : > { %1704 = vrot.lane.b32.xlu1 %v1685_v13, %s7380_s19  ;;  %1702 = vrot.lane.b32.xlu0 %v1684_v14, %s7380_s19  ;;  %v1450_v13 = vsel %vm7640_vm6, %v1445_v8, %v1449_v9  ;;  %v6582_v14 = vld [vmem:[%s7457_s18 + $0x20] sm:$0xf]  ;;  %v1404_v8 = vld [vmem:[%s7457_s18 + $0x2c] sm:$0x1] }
 0x110   : > { %v1272_v28 = vpop.permute.xlu1 %1271  ;;  %v1270_v29 = vpop.permute.xlu0 %1269 }
 0x111   : > { %1292 = vst.msk [vmem:[#allocation2 + $0x2c] sm:$0xf] %vm625_vm9, %v1272_v28  ;;  %1291 = vst.msk [vmem:[#allocation2 + $0x28] sm:$0xf] %vm625_vm9, %v1270_v29  ;;  %v6590_v28 = vld [vmem:[%s7457_s18 + $0x20] sm:$0xf] }
 0x112   : > { %1748 = vrot.lane.b32.xlu1 %v1731_v19, %s7380_s19  ;;  %1746 = vrot.lane.b32.xlu0 %v1730_v20, %s7380_s19  ;;  %v6588_v19 = vld [vmem:[%s7457_s18 + $0x10] sm:$0xf]  ;;  %v6587_v20 = vld [vmem:[%s7457_s18 + $0x8] sm:$0xf] }
 0x113   : > { %v6589_v29 = vld [vmem:[%s7457_s18 + $0x18] sm:$0xf] }
 0x114   : > { %v1316_v41 = vpop.permute.xlu1 %1315  ;;  %v1314_v42 = vpop.permute.xlu0 %1313 }
 0x115   : > { %1338 = vst.msk [vmem:[#allocation2 + $0x24] sm:$0xf] %vm674_vm10, %v1316_v41  ;;  %1337 = vst.msk [vmem:[#allocation2 + $0x20] sm:$0xf] %vm674_vm10, %v1314_v42  ;;  %v1591_v41 = vld [vmem:[%s7457_s18 + $0x28] sm:$0xf] }
 0x116   : > { %1752 = vrot.lane.b32.xlu1 %v1733_v31, %s7380_s19  ;;  %1750 = vrot.lane.b32.xlu0 %v1732_v36, %s7380_s19  ;;  %v1590_v42 = vld [vmem:[%s7457_s18 + $0x20] sm:$0xf] }
 0x118   : > { %v1320_v55 = vpop.permute.xlu1 %1319  ;;  %v1318_v56 = vpop.permute.xlu0 %1317 }
 0x119   : > { %1340 = vst.msk [vmem:[#allocation2 + $0x2c] sm:$0xf] %vm674_vm10, %v1320_v55  ;;  %1339 = vst.msk [vmem:[#allocation2 + $0x28] sm:$0xf] %vm674_vm10, %v1318_v56  ;;  %v1638_v55 = vld [vmem:[%s7457_s18 + $0x20] sm:$0xf] }
 0x11a   : > { %1796 = vrot.lane.b32.xlu1 %v1779_v43, %s7380_s19  ;;  %1794 = vrot.lane.b32.xlu0 %v1778_v44, %s7380_s19  ;;  %v1403_v56 = vld [vmem:[%s7457_s18 + $0x28] sm:$0xf] }
 0x11c   : > { %v1364_v2 = vpop.permute.xlu1 %1363  ;;  %v1362_v3 = vpop.permute.xlu0 %1361 }
 0x11d   : > { %1386 = vst.msk [vmem:[#allocation2 + $0x24] sm:$0xf] %vm723_vm11, %v1364_v2  ;;  %1385 = vst.msk [vmem:[#allocation2 + $0x20] sm:$0xf] %vm723_vm11, %v1362_v3 }
 0x11e   : > { %1530 = vst.msk [vmem:[#allocation2 + $0x24] sm:$0xf] %vm772_vm12, %v1436_v58  ;;  %1529 = vst.msk [vmem:[#allocation2 + $0x20] sm:$0xf] %vm772_vm12, %v1422_v60  ;;  %1800 = vrot.lane.b32.xlu1 %v1781_v61, %s7380_s19  ;;  %1798 = vrot.lane.b32.xlu0 %v1780_v62, %s7380_s19  ;;  %v1480_v60 = vshrl.u32 %v1403_v56, 16  ;;  %v1483_v61 = vshll.u32 %v1403_v56, 16 }
 0x11f   : > { %v1466_v62 = vshrl.u32 %v1401_v57, 16 }
 0x120   : > { %v808_v10 = vpop.permute.xlu1 %807  ;;  %v806_v11 = vpop.permute.xlu0 %805  ;;  %v1482_v9 = vrot.slane %v1480_v60, 4  ;;  %v1783_v60 = vld [vmem:[%s7457_s18 + $0x28] sm:$0xf] }
 0x121   : > { %827 = vst.msk [vmem:[#allocation2 + $0x34] sm:$0xf] %vm444_vm0, %v808_v10  ;;  %826 = vst.msk [vmem:[#allocation2 + $0x30] sm:$0xf] %vm444_vm0, %v806_v11  ;;  %v1485_v10 = vrot.slane %v1483_v61, 5  ;;  %v1468_v11 = vrot.slane %v1466_v62, 4 }
 0x122   : > { %1845 = vrot.lane.b32.xlu1 %v6580_v4, %s7381_s20  ;;  %1843 = vrot.lane.b32.xlu0 %v6579_v5, %s7381_s20  ;;  %v1407_v4 = vld [vmem:[%s7457_s18 + $0x38] sm:$0xf]  ;;  %v1405_v5 = vld [vmem:[%s7457_s18 + $0x30] sm:$0xf] }
 0x123   : > { %v1782_v61 = vld [vmem:[%s7457_s18 + $0x20] sm:$0xf] }
 0x124   : > { %v1368_v16 = vpop.permute.xlu1 %1367  ;;  %v1366_v17 = vpop.permute.xlu0 %1365 }
 0x125   : > { %1388 = vst.msk [vmem:[#allocation2 + $0x2c] sm:$0xf] %vm723_vm11, %v1368_v16  ;;  %1387 = vst.msk [vmem:[#allocation2 + $0x28] sm:$0xf] %vm723_vm11, %v1366_v17  ;;  %v7070_v18 = vld [vmem:[#allocation2 + $0x20] sm:$0xff]   ;;  %v1494_v16 = vshrl.u32 %v1405_v5, 16 }
 0x126   : > { %1532 = vst.msk [vmem:[#allocation2 + $0x2c] sm:$0xf] %vm772_vm12, %v1464_v12  ;;  %1531 = vst.msk [vmem:[#allocation2 + $0x28] sm:$0xf] %vm772_vm12, %v1450_v13  ;;  %1849 = vrot.lane.b32.xlu1 %v6582_v14, %s7381_s20  ;;  %1847 = vrot.lane.b32.xlu0 %v6581_v15, %s7381_s20  ;;  %v1471_v12 = vrot.slane %v1469_v63, 5  ;;  %v1508_v14 = vshrl.u32 %v1407_v4, 16 }
 0x127   : > { %6984 = vmatprep.mubr.msk.bf16.mxu0 %vm2895_vm13, %v7070_v18  ;;  %v1402_v13 = vld [vmem:[%s7457_s18 + $0x24] sm:$0x1]  ;;  %v1511_v15 = vshll.u32 %v1407_v4, 16  ;;  %v1497_v17 = vshll.u32 %v1405_v5, 16  ;;  %v6584_v5 = vld [vmem:[%s7457_s18 + $0x30] sm:$0xf] }
 0x128   : > { %v812_v21 = vpop.permute.xlu1 %811  ;;  %v810_v22 = vpop.permute.xlu0 %809 }
 0x129   : > { %829 = vst.msk [vmem:[#allocation2 + $0x3c] sm:$0xf] %vm444_vm0, %v812_v21  ;;  %828 = vst.msk [vmem:[#allocation2 + $0x38] sm:$0xf] %vm444_vm0, %v810_v22  ;;  %v1688_v21 = vld [vmem:[%s7457_s18 + $0x30] sm:$0xf]  ;;  %v1486_v22 = vor.u32 %v1485_v10, %v1482_v9 }
 0x12a   : > { %1893 = vrot.lane.b32.xlu1 %v6588_v19, %s7381_s20  ;;  %1891 = vrot.lane.b32.xlu0 %v6587_v20, %s7381_s20  ;;  %v1689_v20 = vld [vmem:[%s7457_s18 + $0x38] sm:$0xf]  ;;  %v6586_v10 = vld [vmem:[%s7457_s18 + $0x40] sm:$0xf] }
 0x12c   : > { %v857_v25 = vpop.permute.xlu1 %856  ;;  %v855_v26 = vpop.permute.xlu0 %854 }
 0x12d   : > { %875 = vst.msk [vmem:[#allocation2 + $0x34] sm:$0xf] %vm461_vm1, %v857_v25  ;;  %874 = vst.msk [vmem:[#allocation2 + $0x30] sm:$0xf] %vm461_vm1, %v855_v26  ;;  %v7071_v27 = vld [vmem:[#allocation2 + $0x28] sm:$0xff]   ;;  %v1475_v25 = vshll.u32 %v1402_v13, 16 }
 0x12e   : > { %1563 = vrot.lane.b32.xlu1 %v1542_v23, %s7379_s17  ;;  %1561 = vrot.lane.b32.xlu0 %v1541_v24, %s7379_s17  ;;  %v1489_v23 = vshll.u32 %v1404_v8, 16  ;;  %v1472_v24 = vor.u32 %v1471_v12, %v1468_v11  ;;  %v1408_v26 = vld [vmem:[%s7457_s18 + $0x3c] sm:$0x1]  ;;  %v6585_v11 = vld [vmem:[%s7457_s18 + $0x38] sm:$0xf] }
 0x12f   : > { %6985 = vmatmul.mubr.msk.bf16.gmra.mrb[8].mxu0 %vm2895_vm13, %v7071_v27  ;;  %v1510_v27 = vrot.slane %v1508_v14, 4  ;;  %v6592_v14 = vld [vmem:[%s7457_s18 + $0x30] sm:$0xf] }
 0x130   : > { %v861_v30 = vpop.permute.xlu1 %860  ;;  %v859_v31 = vpop.permute.xlu0 %858 }
 0x131   : > { %877 = vst.msk [vmem:[#allocation2 + $0x3c] sm:$0xf] %vm461_vm1, %v861_v30  ;;  %876 = vst.msk [vmem:[#allocation2 + $0x38] sm:$0xf] %vm461_vm1, %v859_v31  ;;  %v1499_v30 = vrot.slane %v1497_v17, 5 }
 0x132   : > { %1897 = vrot.lane.b32.xlu1 %v6590_v28, %s7381_s20  ;;  %1895 = vrot.lane.b32.xlu0 %v6589_v29, %s7381_s20  ;;  %v1513_v28 = vrot.slane %v1511_v15, 5  ;;  %v1496_v29 = vrot.slane %v1494_v16, 4  ;;  %v6591_v15 = vld [vmem:[%s7457_s18 + $0x28] sm:$0xf] }
 0x134   : > { %v1020_v35 = vpop.permute.xlu1 %1019  ;;  %v1018_v36 = vpop.permute.xlu0 %1017 }
 0x135   : > { %1038 = vst.msk [vmem:[#allocation2 + $0x34] sm:$0xf] %vm478_vm2, %v1020_v35  ;;  %1037 = vst.msk [vmem:[#allocation2 + $0x30] sm:$0xf] %vm478_vm2, %v1018_v36  ;;  %v1487_v35 = vrot.slane %v1486_v22, 4  ;;  %v1491_v36 = vrot.slane %v1489_v23, 5 }
 0x136   : > { %1941 = vrot.lane.b32.xlu1 %v6596_v33, %s7381_s20  ;;  %1939 = vrot.lane.b32.xlu0 %v6595_v34, %s7381_s20  ;;  %v1406_v34 = vld [vmem:[%s7457_s18 + $0x34] sm:$0x1]  ;;  %v6600_v22 = vld [vmem:[%s7457_s18 + $0x30] sm:$0xf] }
 0x137   : > { %v6599_v23 = vld [vmem:[%s7457_s18 + $0x28] sm:$0xf] }
 0x138   : > { %v1024_v39 = vpop.permute.xlu1 %1023  ;;  %v1022_v40 = vpop.permute.xlu0 %1021 }
 0x139   : > { %1040 = vst.msk [vmem:[#allocation2 + $0x3c] sm:$0xf] %vm478_vm2, %v1024_v39  ;;  %1039 = vst.msk [vmem:[#allocation2 + $0x38] sm:$0xf] %vm478_vm2, %v1022_v40  ;;  %v1735_v39 = vld [vmem:[%s7457_s18 + $0x28] sm:$0xf] }
 0x13a   : > { %1567 = vrot.lane.b32.xlu1 %v1544_v37, %s7379_s17  ;;  %1565 = vrot.lane.b32.xlu0 %v1543_v38, %s7379_s17  ;;  %v1477_v37 = vrot.slane %v1475_v25, 5  ;;  %v1517_v38 = vshll.u32 %v1408_v26, 16  ;;  %v1734_v40 = vld [vmem:[%s7457_s18 + $0x20] sm:$0xf]  ;;  %v2070_v26 = vld [vmem:[%s7457_s18 + $0x8] sm:$0xf] }
 0x13c   : > { %v1068_v43 = vpop.permute.xlu1 %1067  ;;  %v1066_v44 = vpop.permute.xlu0 %1065 }
 0x13d   : > { %1086 = vst.msk [vmem:[#allocation2 + $0x34] sm:$0xf] %vm527_vm7, %v1068_v43  ;;  %1085 = vst.msk [vmem:[#allocation2 + $0x30] sm:$0xf] %vm527_vm7, %v1066_v44  ;;  %v1500_v43 = vor.u32 %v1499_v30, %v1496_v29  ;;  %v1503_v44 = vshll.u32 %v1406_v34, 16  ;;  %v2102_v34 = vshll.u32 %v2070_v26, 16 }
 0x13e   : > { %1612 = vrot.lane.b32.xlu1 %v1591_v41, %s7379_s17  ;;  %1610 = vrot.lane.b32.xlu0 %v1590_v42, %s7379_s17  ;;  %v1473_v41 = vrot.slane %v1472_v24, 4  ;;  %v1514_v42 = vor.u32 %v1513_v28, %v1510_v27  ;;  %v1972_v27 = vld [vmem:[%s7457_s18 + $0x8] sm:$0xf]  ;;  %v1971_v28 = vld [vmem:[%s7457_s18] sm:$0xf] }
 0x13f   : > { %v2068_v29 = vld [vmem:[%s7457_s18] sm:$0xf] }
 0x140   : > { %v1072_v47 = vpop.permute.xlu1 %1071  ;;  %v1070_v48 = vpop.permute.xlu0 %1069 }
 0x141   : > { %1088 = vst.msk [vmem:[#allocation2 + $0x3c] sm:$0xf] %vm527_vm7, %v1072_v47  ;;  %1087 = vst.msk [vmem:[#allocation2 + $0x38] sm:$0xf] %vm527_vm7, %v1070_v48  ;;  %v1492_v47 = vsel %vm7640_vm6, %v1487_v35, %v1491_v36  ;;  %v1737_v48 = vld [vmem:[%s7457_s18 + $0x38] sm:$0xf] }
 0x142   : > { %1945 = vrot.lane.b32.xlu1 %v6598_v45, %s7381_s20  ;;  %1943 = vrot.lane.b32.xlu0 %v6597_v46, %s7381_s20  ;;  %v2085_v35 = vshrl.u32 %v2068_v29, 16  ;;  %v2088_v36 = vshll.u32 %v2068_v29, 16 }
 0x144   : > { %v1116_v51 = vpop.permute.xlu1 %1115  ;;  %v1114_v52 = vpop.permute.xlu0 %1113 }
 0x145   : > { %1134 = vst.msk [vmem:[#allocation2 + $0x34] sm:$0xf] %vm576_vm8, %v1116_v51  ;;  %1133 = vst.msk [vmem:[#allocation2 + $0x30] sm:$0xf] %vm576_vm8, %v1114_v52  ;;  %v1736_v51 = vld [vmem:[%s7457_s18 + $0x30] sm:$0xf] }
 0x146   : > { %1616 = vrot.lane.b32.xlu1 %v1593_v49, %s7379_s17  ;;  %1614 = vrot.lane.b32.xlu0 %v1592_v50, %s7379_s17  ;;  %v1519_v49 = vrot.slane %v1517_v38, 5  ;;  %v1478_v50 = vsel %vm7640_vm6, %v1473_v41, %v1477_v37  ;;  %v1515_v52 = vrot.slane %v1514_v42, 4  ;;  %v6602_v37 = vld [vmem:[%s7457_s18 + $0x40] sm:$0xf]  ;;  %v6601_v38 = vld [vmem:[%s7457_s18 + $0x38] sm:$0xf] }
 0x147   : > { %v2074_v41 = vld [vmem:[%s7457_s18 + $0x18] sm:$0xf]  ;;  %v2072_v42 = vld [vmem:[%s7457_s18 + $0x10] sm:$0xf] }
 0x148   : > { %v1120_v58 = vpop.permute.xlu1 %1119  ;;  %v1118_v59 = vpop.permute.xlu0 %1117 }
 0x149   : > { %1136 = vst.msk [vmem:[#allocation2 + $0x3c] sm:$0xf] %vm576_vm8, %v1120_v58  ;;  %1135 = vst.msk [vmem:[#allocation2 + $0x38] sm:$0xf] %vm576_vm8, %v1118_v59  ;;  %v1520_v58 = vsel %vm7640_vm6, %v1515_v52, %v1519_v49  ;;  %v2090_v49 = vrot.slane %v2088_v36, 5  ;;  %v2130_v52 = vshll.u32 %v2074_v41, 16 }
 0x14a   : > { %1660 = vrot.lane.b32.xlu1 %v1639_v53, %s7379_s17  ;;  %1658 = vrot.lane.b32.xlu0 %v1638_v55, %s7379_s17  ;;  %v1501_v53 = vrot.slane %v1500_v43, 4  ;;  %v1505_v55 = vrot.slane %v1503_v44, 5  ;;  %v1974_v43 = vld [vmem:[%s7457_s18 + $0x18] sm:$0xf] }
 0x14c   : > { %v1276_v2 = vpop.permute.xlu1 %1275  ;;  %v1274_v3 = vpop.permute.xlu0 %1273  ;;  %v1506_v59 = vsel %vm7640_vm6, %v1501_v53, %v1505_v55  ;;  %v2113_v53 = vshrl.u32 %v2072_v42, 16  ;;  %v2116_v55 = vshll.u32 %v2072_v42, 16 }
 0x14d   : > { %1294 = vst.msk [vmem:[#allocation2 + $0x34] sm:$0xf] %vm625_vm9, %v1276_v2  ;;  %1293 = vst.msk [vmem:[#allocation2 + $0x30] sm:$0xf] %vm625_vm9, %v1274_v3 }
 0x14e   : > { %1664 = vrot.lane.b32.xlu1 %v1641_v0, %s7379_s17  ;;  %1662 = vrot.lane.b32.xlu0 %v1640_v1, %s7379_s17  ;;  %v1785_v0 = vld [vmem:[%s7457_s18 + $0x38] sm:$0xf]  ;;  %v1784_v1 = vld [vmem:[%s7457_s18 + $0x30] sm:$0xf] }
 0x150   : > { %v1280_v18 = vpop.permute.xlu1 %1279  ;;  %v1278_v19 = vpop.permute.xlu0 %1277 }
 0x151   : > { %1296 = vst.msk [vmem:[#allocation2 + $0x3c] sm:$0xf] %vm625_vm9, %v1280_v18  ;;  %1295 = vst.msk [vmem:[#allocation2 + $0x38] sm:$0xf] %vm625_vm9, %v1278_v19  ;;  %v6594_v18 = vld [vmem:[%s7457_s18 + $0x40] sm:$0xf] }
 0x152   : > { %1708 = vrot.lane.b32.xlu1 %v1687_v6, %s7380_s19  ;;  %1706 = vrot.lane.b32.xlu0 %v1686_v7, %s7380_s19  ;;  %v6583_v6 = vld [vmem:[%s7457_s18 + $0x28] sm:$0xf]  ;;  %v6593_v19 = vld [vmem:[%s7457_s18 + $0x38] sm:$0xf] }
 0x154   : > { %v1324_v31 = vpop.permute.xlu1 %1323  ;;  %v1322_v33 = vpop.permute.xlu0 %1321 }
 0x155   : > { %1342 = vst.msk [vmem:[#allocation2 + $0x34] sm:$0xf] %vm674_vm10, %v1324_v31  ;;  %1341 = vst.msk [vmem:[#allocation2 + $0x30] sm:$0xf] %vm674_vm10, %v1322_v33  ;;  %v2099_v33 = vshrl.u32 %v2070_v26, 16 }
 0x156   : > { %1712 = vrot.lane.b32.xlu1 %v1689_v20, %s7380_s19  ;;  %1710 = vrot.lane.b32.xlu0 %v1688_v21, %s7380_s19 }
 0x157   : > { %v2101_v44 = vrot.slane %v2099_v33, 4 }
 0x158   : > { %v1328_v45 = vpop.permute.xlu1 %1327  ;;  %v1326_v46 = vpop.permute.xlu0 %1325 }
 0x159   : > { %1344 = vst.msk [vmem:[#allocation2 + $0x3c] sm:$0xf] %vm674_vm10, %v1328_v45  ;;  %1343 = vst.msk [vmem:[#allocation2 + $0x38] sm:$0xf] %vm674_vm10, %v1326_v46  ;;  %v2104_v45 = vrot.slane %v2102_v34, 5 }
 0x15a   : > { %1756 = vrot.lane.b32.xlu1 %v1735_v39, %s7380_s19  ;;  %1754 = vrot.lane.b32.xlu0 %v1734_v40, %s7380_s19  ;;  %v1973_v46 = vld [vmem:[%s7457_s18 + $0x10] sm:$0xf] }
 0x15c   : > { %v1372_v56 = vpop.permute.xlu1 %1371  ;;  %v1370_v57 = vpop.permute.xlu0 %1369 }
 0x15d   : > { %1390 = vst.msk [vmem:[#allocation2 + $0x34] sm:$0xf] %vm723_vm11, %v1372_v56  ;;  %1389 = vst.msk [vmem:[#allocation2 + $0x30] sm:$0xf] %vm723_vm11, %v1370_v57 }
 0x15e   : > { %1534 = vst.msk [vmem:[#allocation2 + $0x34] sm:$0xf] %vm772_vm12, %v1492_v47  ;;  %1533 = vst.msk [vmem:[#allocation2 + $0x30] sm:$0xf] %vm772_vm12, %v1478_v50  ;;  %1760 = vrot.lane.b32.xlu1 %v1737_v48, %s7380_s19  ;;  %1758 = vrot.lane.b32.xlu0 %v1736_v51, %s7380_s19  ;;  %v2071_v47 = vld [vmem:[%s7457_s18 + $0xc] sm:$0x1] }
 0x15f   : > { %v2087_v48 = vrot.slane %v2085_v35, 4  ;;  %v2069_v50 = vld [vmem:[%s7457_s18 + $0x4] sm:$0x1]  ;;  %v2127_v51 = vshrl.u32 %v2074_v41, 16 }
 0x160   : > { %v1376_v62 = vpop.permute.xlu1 %1375  ;;  %v1374_v63 = vpop.permute.xlu0 %1373 }
 0x161   : > { %1392 = vst.msk [vmem:[#allocation2 + $0x3c] sm:$0xf] %vm723_vm11, %v1376_v62  ;;  %1391 = vst.msk [vmem:[#allocation2 + $0x38] sm:$0xf] %vm723_vm11, %v1374_v63  ;;  %v2091_v62 = vor.u32 %v2090_v49, %v2087_v48  ;;  %v2094_v63 = vshll.u32 %v2069_v50, 16 }
 0x162   : > { %1536 = vst.msk [vmem:[#allocation2 + $0x3c] sm:$0xf] %vm772_vm12, %v1520_v58  ;;  %1535 = vst.msk [vmem:[#allocation2 + $0x38] sm:$0xf] %vm772_vm12, %v1506_v59  ;;  %1804 = vrot.lane.b32.xlu1 %v1783_v60, %s7380_s19  ;;  %1802 = vrot.lane.b32.xlu0 %v1782_v61, %s7380_s19  ;;  %v2105_v58 = vor.u32 %v2104_v45, %v2101_v44  ;;  %v2021_v59 = vld [vmem:[%s7457_s18 + $0x8] sm:$0xf] }
 0x163   : > { %v2020_v60 = vld [vmem:[%s7457_s18] sm:$0xf]  ;;  %v2108_v61 = vshll.u32 %v2071_v47, 16  ;;  %v2229_v50 = vld [vmem:[%s7457_s18 + $0x8] sm:$0xf] }
 0x164   : > { %v1556_v2 = vpop.permute.xlu1 %1555  ;;  %v1554_v3 = vpop.permute.xlu0 %1553 }
 0x165   : > { %1579 = vst.msk [vmem:[#allocation2 + $0x44] sm:$0xf] %vm444_vm0, %v1556_v2  ;;  %1578 = vst.msk [vmem:[#allocation2 + $0x40] sm:$0xf] %vm444_vm0, %v1554_v3  ;;  %v7072_v4 = vld [vmem:[#allocation2 + $0x30] sm:$0xff]   ;;  %v2132_v2 = vrot.slane %v2130_v52, 5 }
 0x166   : > { %1808 = vrot.lane.b32.xlu1 %v1785_v0, %s7380_s19  ;;  %1806 = vrot.lane.b32.xlu0 %v1784_v1, %s7380_s19  ;;  %v2075_v0 = vld [vmem:[%s7457_s18 + $0x1c] sm:$0x1]  ;;  %v2129_v1 = vrot.slane %v2127_v51, 4  ;;  %v2115_v3 = vrot.slane %v2113_v53, 4  ;;  %v2228_v53 = vld [vmem:[%s7457_s18] sm:$0xf] }
 0x167   : > { %6988 = vmatprep.mubr.msk.bf16.mxu0 %vm2895_vm13, %v7072_v4  ;;  %v2118_v4 = vrot.slane %v2116_v55, 5  ;;  %v2330_v55 = vld [vmem:[%s7457_s18 + $0x18] sm:$0xf] }
 0x168   : > { %v1560_v7 = vpop.permute.xlu1 %1559  ;;  %v1558_v8 = vpop.permute.xlu0 %1557 }
 0x169   : > { %1581 = vst.msk [vmem:[#allocation2 + $0x4c] sm:$0xf] %vm444_vm0, %v1560_v7  ;;  %1580 = vst.msk [vmem:[#allocation2 + $0x48] sm:$0xf] %vm444_vm0, %v1558_v8  ;;  %v7073_v9 = vld [vmem:[#allocation2 + $0x38] sm:$0xff]   ;;  %v2106_v8 = vrot.slane %v2105_v58, 4 }
 0x16a   : > { %1853 = vrot.lane.b32.xlu1 %v6584_v5, %s7381_s20  ;;  %1851 = vrot.lane.b32.xlu0 %v6583_v6, %s7381_s20  ;;  %v2073_v7 = vld [vmem:[%s7457_s18 + $0x14] sm:$0x1]  ;;  %v2328_v58 = vld [vmem:[%s7457_s18 + $0x10] sm:$0xf] }
 0x16b   : > { %6989 = vmatmul.mubr.msk.bf16.gmra.mrb[12].mxu0 %vm2895_vm13, %v7073_v9  ;;  %v2110_v9 = vrot.slane %v2108_v61, 5 }
 0x16c   : > { %v1605_v12 = vpop.permute.xlu1 %1604  ;;  %v1603_v13 = vpop.permute.xlu0 %1602 }
 0x16d   : > { %1627 = vst.msk [vmem:[#allocation2 + $0x44] sm:$0xf] %vm461_vm1, %v1605_v12  ;;  %1626 = vst.msk [vmem:[#allocation2 + $0x40] sm:$0xf] %vm461_vm1, %v1603_v13  ;;  %v2136_v12 = vshll.u32 %v2075_v0, 16 }
 0x16e   : > { %1857 = vrot.lane.b32.xlu1 %v6586_v10, %s7381_s20  ;;  %1855 = vrot.lane.b32.xlu0 %v6585_v11, %s7381_s20  ;;  %v2092_v10 = vrot.slane %v2091_v62, 4  ;;  %v2096_v11 = vrot.slane %v2094_v63, 5  ;;  %v2023_v13 = vld [vmem:[%s7457_s18 + $0x18] sm:$0xf]  ;;  %v2325_v63 = vld [vmem:[%s7457_s18 + $0x4] sm:$0x1] }
 0x170   : > { %v1609_v16 = vpop.permute.xlu1 %1608  ;;  %v1607_v17 = vpop.permute.xlu0 %1606 }
 0x171   : > { %1629 = vst.msk [vmem:[#allocation2 + $0x4c] sm:$0xf] %vm461_vm1, %v1609_v16  ;;  %1628 = vst.msk [vmem:[#allocation2 + $0x48] sm:$0xf] %vm461_vm1, %v1607_v17  ;;  %v2119_v16 = vor.u32 %v2118_v4, %v2115_v3  ;;  %v2122_v17 = vshll.u32 %v2073_v7, 16  ;;  %v2386_v4 = vshll.u32 %v2330_v55, 16 }
 0x172   : > { %1901 = vrot.lane.b32.xlu1 %v6592_v14, %s7381_s20  ;;  %1899 = vrot.lane.b32.xlu0 %v6591_v15, %s7381_s20  ;;  %v2022_v14 = vld [vmem:[%s7457_s18 + $0x10] sm:$0xf]  ;;  %v2133_v15 = vor.u32 %v2132_v2, %v2129_v1  ;;  %v2383_v2 = vshrl.u32 %v2330_v55, 16 }
 0x173   : > { %v2124_v29 = vrot.slane %v2122_v17, 5  ;;  %v2230_v3 = vld [vmem:[%s7457_s18 + $0x10] sm:$0xf] }
 0x174   : > { %v1653_v20 = vpop.permute.xlu1 %1652  ;;  %v1651_v21 = vpop.permute.xlu0 %1650 }
 0x175   : > { %1675 = vst.msk [vmem:[#allocation2 + $0x44] sm:$0xf] %vm478_vm2, %v1653_v20  ;;  %1674 = vst.msk [vmem:[#allocation2 + $0x40] sm:$0xf] %vm478_vm2, %v1651_v21  ;;  %v8157_v20 = vld [vmem:[%s9555_s2] ss:$0 sm:$0xff] }
 0x176   : > { %1905 = vrot.lane.b32.xlu1 %v6594_v18, %s7381_s20  ;;  %1903 = vrot.lane.b32.xlu0 %v6593_v19, %s7381_s20 }
 0x178   : > { %v1657_v24 = vpop.permute.xlu1 %1656  ;;  %v1655_v25 = vpop.permute.xlu0 %1654 }
 0x179   : > { %1677 = vst.msk [vmem:[#allocation2 + $0x4c] sm:$0xf] %vm478_vm2, %v1657_v24  ;;  %1676 = vst.msk [vmem:[#allocation2 + $0x48] sm:$0xf] %vm478_vm2, %v1655_v25  ;;  %v2138_v24 = vrot.slane %v2136_v12, 5  ;;  %v2350_v12 = vshll.u32 %v2325_v63, 16 }
 0x17a   : > { %1949 = vrot.lane.b32.xlu1 %v6600_v22, %s7381_s20  ;;  %1947 = vrot.lane.b32.xlu0 %v6599_v23, %s7381_s20  ;;  %v2111_v22 = vsel %vm7640_vm6, %v2106_v8, %v2110_v9  ;;  %v2097_v23 = vsel %vm7640_vm6, %v2092_v10, %v2096_v11 }
 0x17c   : > { %v1701_v30 = vpop.permute.xlu1 %1700  ;;  %v1699_v31 = vpop.permute.xlu0 %1698 }
 0x17d   : > { %1723 = vst.msk [vmem:[#allocation2 + $0x44] sm:$0xf] %vm527_vm7, %v1701_v30  ;;  %1722 = vst.msk [vmem:[#allocation2 + $0x40] sm:$0xf] %vm527_vm7, %v1699_v31 }
 0x17e   : > { %1989 = vrot.lane.b32.xlu1 %v1972_v27, %s7381_s20  ;;  %1987 = vrot.lane.b32.xlu0 %v1971_v28, %s7381_s20  ;;  %v2134_v27 = vrot.slane %v2133_v15, 4  ;;  %v2120_v28 = vrot.slane %v2119_v16, 4  ;;  %v2277_v15 = vld [vmem:[%s7457_s18 + $0x8] sm:$0xf]  ;;  %v2276_v16 = vld [vmem:[%s7457_s18] sm:$0xf] }
 0x180   : > { %v1705_v39 = vpop.permute.xlu1 %1704  ;;  %v1703_v40 = vpop.permute.xlu0 %1702  ;;  %v2139_v41 = vsel %vm7640_vm6, %v2134_v27, %v2138_v24  ;;  %v2125_v42 = vsel %vm7640_vm6, %v2120_v28, %v2124_v29 }
 0x181   : > { %1725 = vst.msk [vmem:[#allocation2 + $0x4c] sm:$0xf] %vm527_vm7, %v1705_v39  ;;  %1724 = vst.msk [vmem:[#allocation2 + $0x48] sm:$0xf] %vm527_vm7, %v1703_v40  ;;  %v2326_v39 = vld [vmem:[%s7457_s18 + $0x8] sm:$0xf] }
 0x182   : > { %1953 = vrot.lane.b32.xlu1 %v6602_v37, %s7381_s20  ;;  %1951 = vrot.lane.b32.xlu0 %v6601_v38, %s7381_s20  ;;  %v2355_v48 = vshrl.u32 %v2326_v39, 16  ;;  %v2358_v49 = vshll.u32 %v2326_v39, 16 }
 0x184   : > { %v1749_v56 = vpop.permute.xlu1 %1748  ;;  %v1747_v57 = vpop.permute.xlu0 %1746  ;;  %v2357_v61 = vrot.slane %v2355_v48, 4  ;;  %v2360_v62 = vrot.slane %v2358_v49, 5 }
 0x185   : > { %1771 = vst.msk [vmem:[#allocation2 + $0x44] sm:$0xf] %vm576_vm8, %v1749_v56  ;;  %1770 = vst.msk [vmem:[#allocation2 + $0x40] sm:$0xf] %vm576_vm8, %v1747_v57 }
 0x186   : > { %1993 = vrot.lane.b32.xlu1 %v1974_v43, %s7381_s20  ;;  %1991 = vrot.lane.b32.xlu0 %v1973_v46, %s7381_s20  ;;  %v2324_v43 = vld [vmem:[%s7457_s18] sm:$0xf]  ;;  %v2361_v11 = vor.u32 %v2360_v62, %v2357_v61  ;;  %v6619_v62 = vld [vmem:[%s7457_s18 + $0x8] sm:$0xf] }
 0x187   : > { %v2341_v51 = vshrl.u32 %v2324_v43, 16  ;;  %v2344_v52 = vshll.u32 %v2324_v43, 16  ;;  %v2278_v43 = vld [vmem:[%s7457_s18 + $0x10] sm:$0xf] }
 0x188   : > { %v1753_v5 = vpop.permute.xlu1 %1752  ;;  %v1751_v6 = vpop.permute.xlu0 %1750 }
 0x189   : > { %1773 = vst.msk [vmem:[#allocation2 + $0x4c] sm:$0xf] %vm576_vm8, %v1753_v5  ;;  %1772 = vst.msk [vmem:[#allocation2 + $0x48] sm:$0xf] %vm576_vm8, %v1751_v6  ;;  %v2343_v0 = vrot.slane %v2341_v51, 4  ;;  %v2346_v1 = vrot.slane %v2344_v52, 5 }
 0x18a   : > { %2038 = vrot.lane.b32.xlu1 %v2021_v59, %s7381_s20  ;;  %2036 = vrot.lane.b32.xlu0 %v2020_v60, %s7381_s20  ;;  %v2231_v59 = vld [vmem:[%s7457_s18 + $0x18] sm:$0xf]  ;;  %v2327_v60 = vld [vmem:[%s7457_s18 + $0xc] sm:$0x1]  ;;  %v2369_v5 = vshrl.u32 %v2328_v58, 16  ;;  %v2372_v6 = vshll.u32 %v2328_v58, 16 }
 0x18b   : > { %v2364_v9 = vshll.u32 %v2327_v60, 16  ;;  %v2347_v17 = vor.u32 %v2346_v1, %v2343_v0  ;;  %v6621_v58 = vld [vmem:[%s7457_s18 + $0x10] sm:$0xf] }
 0x18c   : > { %v1797_v18 = vpop.permute.xlu1 %1796  ;;  %v1795_v19 = vpop.permute.xlu0 %1794  ;;  %v2374_v24 = vrot.slane %v2372_v6, 5 }
 0x18d   : > { %1819 = vst.msk [vmem:[#allocation2 + $0x44] sm:$0xf] %vm625_vm9, %v1797_v18  ;;  %1818 = vst.msk [vmem:[#allocation2 + $0x40] sm:$0xf] %vm625_vm9, %v1795_v19  ;;  %v6978_v21 = vpop.f32.mrb[0].mxu0  ;;  %v2385_v18 = vrot.slane %v2383_v2, 4 }
 0x18e   : > { %2042 = vrot.lane.b32.xlu1 %v2023_v13, %s7381_s20  ;;  %2040 = vrot.lane.b32.xlu0 %v2022_v14, %s7381_s20  ;;  %v8168_v25 = vadd.f32 %v6978_v21, %v8157_v20  ;;  %v2982_v26 = vpop.f32.mrb[1].mxu0  ;;  %v2331_v21 = vld [vmem:[%s7457_s18 + $0x1c] sm:$0x1]  ;;  %v2366_v29 = vrot.slane %v2364_v9, 5  ;;  %v2348_v39 = vrot.slane %v2347_v17, 4  ;;  %v2597_v9 = vshrl.u32 %v6619_v62, 16 }
 0x18f   : > { %v8171_v30 = vadd.f32 %v8157_v20, %v2982_v26  ;;  %v6979_v35 = vpop.f32.mrb[2].mxu0 }
 0x190   : > { %v1801_v31 = vpop.permute.xlu1 %1800  ;;  %v1799_v33 = vpop.permute.xlu0 %1798  ;;  %v6675_v34 = vmul.f32 -1.442695, %v8168_v25  ;;  %v8178_v37 = vadd.f32 %v6979_v35, %v8157_v20  ;;  %v2362_v35 = vrot.slane %v2361_v11, 4 }
 0x191   : > { %1821 = vst.msk [vmem:[#allocation2 + $0x4c] sm:$0xf] %vm625_vm9, %v1801_v31  ;;  %1820 = vst.msk [vmem:[#allocation2 + $0x48] sm:$0xf] %vm625_vm9, %v1799_v33  ;;  %v6673_v36 = vmul.f32 -1.442695, %v8171_v30 }
 0x192   : > { %v2985_v38 = vpop.f32.mrb[3].mxu0  ;;  %2198 = vrot.lane.b32.xlu1 %v2111_v22, %s7383_s24  ;;  %2196 = vrot.lane.b32.xlu0 %v2097_v23, %s7383_s24  ;;  %7137 = vpow2.f32 %v6675_v34  ;;  %v6676_v44 = vmul.f32 -1.442695, %v8178_v37  ;;  %v2388_v22 = vrot.slane %v2386_v4, 5  ;;  %v2371_v23 = vrot.slane %v2369_v5, 4 }
 0x193   : > { %v8184_v40 = vadd.f32 %v8157_v20, %v2985_v38  ;;  %7139 = vpow2.f32 %v6673_v36  ;;  %v2329_v31 = vld [vmem:[%s7457_s18 + $0x14] sm:$0x1]  ;;  %v2352_v36 = vrot.slane %v2350_v12, 5  ;;  %v2367_v49 = vsel %vm7640_vm6, %v2362_v35, %v2366_v29 }
 0x194   : > { %v1846_v45 = vpop.permute.xlu1 %1845  ;;  %v1844_v46 = vpop.permute.xlu0 %1843  ;;  %7141 = vpow2.f32 %v6676_v44  ;;  %v2389_v44 = vor.u32 %v2388_v22, %v2385_v18  ;;  %v2614_v4 = vshll.u32 %v6621_v58, 16  ;;  %v6606_v22 = vld [vmem:[%s7457_s18 + $0x20] sm:$0xf] }
 0x195   : > { %v6674_v47 = vmul.f32 -1.442695, %v8184_v40  ;;  %1868 = vst.msk [vmem:[#allocation2 + $0x44] sm:$0xf] %vm674_vm10, %v1846_v45  ;;  %1867 = vst.msk [vmem:[#allocation2 + $0x40] sm:$0xf] %vm674_vm10, %v1844_v46  ;;  %v2375_v45 = vor.u32 %v2374_v24, %v2371_v23 }
 0x196   : > { %2202 = vrot.lane.b32.xlu1 %v2139_v41, %s7383_s24  ;;  %2200 = vrot.lane.b32.xlu0 %v2125_v42, %s7383_s24  ;;  %v2392_v41 = vshll.u32 %v2331_v21, 16  ;;  %v2279_v42 = vld [vmem:[%s7457_s18 + $0x18] sm:$0xf]  ;;  %v2378_v46 = vshll.u32 %v2329_v31, 16  ;;  %v2390_v51 = vrot.slane %v2389_v44, 4  ;;  %v2616_v24 = vrot.slane %v2614_v4, 5 }
 0x197   : > { %7143 = vpow2.f32 %v6674_v47  ;;  %v6611_v44 = vld [vmem:[%s7457_s18 + $0x8] sm:$0xf] }
 0x198   : > { %v1850_v56 = vpop.permute.xlu1 %1849  ;;  %v1848_v57 = vpop.permute.xlu0 %1847  ;;  %v2394_v52 = vrot.slane %v2392_v41, 5  ;;  %v2380_v55 = vrot.slane %v2378_v46, 5 }
 0x199   : > { %1870 = vst.msk [vmem:[#allocation2 + $0x4c] sm:$0xf] %vm674_vm10, %v1850_v56  ;;  %1869 = vst.msk [vmem:[#allocation2 + $0x48] sm:$0xf] %vm674_vm10, %v1848_v57 }
 0x19a   : > { %2246 = vrot.lane.b32.xlu1 %v2229_v50, %s7384_s25  ;;  %2244 = vrot.lane.b32.xlu0 %v2228_v53, %s7384_s25  ;;  %v2353_v50 = vsel %vm7640_vm6, %v2348_v39, %v2352_v36  ;;  %v2376_v53 = vrot.slane %v2375_v45, 4  ;;  %v2395_v60 = vsel %vm7640_vm6, %v2390_v51, %v2394_v52  ;;  %v6626_v51 = vld [vmem:[%s7457_s18 + $0x24] sm:$0x1]  ;;  %v6624_v52 = vld [vmem:[%s7457_s18 + $0x1c] sm:$0x1] }
 0x19c   : > { %v1894_v7 = vpop.permute.xlu1 %1893  ;;  %v1892_v8 = vpop.permute.xlu0 %1891  ;;  %v2381_v61 = vsel %vm7640_vm6, %v2376_v53, %v2380_v55 }
 0x19d   : > { %v7138_v10 = vpop.eup %7137  ;;  %1916 = vst.msk [vmem:[#allocation2 + $0x44] sm:$0xf] %vm723_vm11, %v1894_v7  ;;  %1915 = vst.msk [vmem:[#allocation2 + $0x40] sm:$0xf] %vm723_vm11, %v1892_v8  ;;  %v6604_v8 = vld [vmem:[%s7457_s18 + $0x10] sm:$0xf] }
 0x19e   : > { %v7140_v13 = vpop.eup %7139  ;;  %v3207_v14 = vadd.f32 1.0, %v7138_v10  ;;  %2250 = vrot.lane.b32.xlu1 %v2231_v59, %s7384_s25  ;;  %2248 = vrot.lane.b32.xlu0 %v2230_v3, %s7384_s25  ;;  %v2611_v3 = vshrl.u32 %v6621_v58, 16  ;;  %v2600_v10 = vshll.u32 %v6619_v62, 16  ;;  %v6614_v58 = vld [vmem:[%s7457_s18 + $0x20] sm:$0xf] }
 0x19f   : > { %v3205_v19 = vadd.f32 1.0, %v7140_v13  ;;  %v7142_v26 = vpop.eup %7141  ;;  %v6603_v13 = vld [vmem:[%s7457_s18 + $0x8] sm:$0xf] }
 0x1a0   : > { %v1564_v27 = vpop.permute.xlu1 %1563  ;;  %v1562_v28 = vpop.permute.xlu0 %1561  ;;  %7145 = vrcp.f32 %v3207_v14  ;;  %v3208_v34 = vadd.f32 1.0, %v7142_v26  ;;  %v6625_v14 = vld [vmem:[%s7457_s18 + $0x20] sm:$0xf]  ;;  %v2613_v23 = vrot.slane %v2611_v3, 4  ;;  %v2599_v26 = vrot.slane %v2597_v9, 4 }
 0x1a1   : > { %v7144_v33 = vpop.eup %7143  ;;  %1583 = vst.msk [vmem:[#allocation2 + $0x54] sm:$0xf] %vm444_vm0, %v1564_v27  ;;  %1582 = vst.msk [vmem:[#allocation2 + $0x50] sm:$0xf] %vm444_vm0, %v1562_v28  ;;  %7147 = vrcp.f32 %v3205_v19  ;;  %v2602_v27 = vrot.slane %v2600_v10, 5  ;;  %v2639_v29 = vshrl.u32 %v6625_v14, 16 }
 0x1a2   : > { %v3206_v38 = vadd.f32 1.0, %v7144_v33  ;;  %2294 = vrot.lane.b32.xlu1 %v2277_v15, %s7384_s25  ;;  %2292 = vrot.lane.b32.xlu0 %v2276_v16, %s7384_s25  ;;  %7149 = vrcp.f32 %v3208_v34  ;;  %v6623_v15 = vld [vmem:[%s7457_s18 + $0x18] sm:$0xf]  ;;  %v6620_v28 = vld [vmem:[%s7457_s18 + $0xc] sm:$0x1]  ;;  %v2642_v31 = vshll.u32 %v6625_v14, 16  ;;  %v2617_v39 = vor.u32 %v2616_v24, %v2613_v23 }
 0x1a3   : > { %v2625_v33 = vshrl.u32 %v6623_v15, 16  ;;  %v2628_v34 = vshll.u32 %v6623_v15, 16  ;;  %v2641_v45 = vrot.slane %v2639_v29, 4  ;;  %v1976_v29 = vld [vmem:[%s7457_s18 + $0x28] sm:$0xf] }
 0x1a4   : > { %7151 = vrcp.f32 %v3206_v38  ;;  %v1898_v47 = vpop.permute.xlu1 %1897  ;;  %v1896_v48 = vpop.permute.xlu0 %1895  ;;  %v6612_v38 = vld [vmem:[%s7457_s18 + $0x10] sm:$0xf]  ;;  %v2644_v46 = vrot.slane %v2642_v31, 5  ;;  %v2618_v53 = vrot.slane %v2617_v39, 4  ;;  %v1975_v31 = vld [vmem:[%s7457_s18 + $0x20] sm:$0xf] }
 0x1a5   : > { %1918 = vst.msk [vmem:[#allocation2 + $0x4c] sm:$0xf] %vm723_vm11, %v1898_v47  ;;  %1917 = vst.msk [vmem:[#allocation2 + $0x48] sm:$0xf] %vm723_vm11, %v1896_v48  ;;  %v2627_v47 = vrot.slane %v2625_v33, 4  ;;  %v2630_v48 = vrot.slane %v2628_v34, 5 }
 0x1a6   : > { %2298 = vrot.lane.b32.xlu1 %v2279_v42, %s7384_s25  ;;  %2296 = vrot.lane.b32.xlu0 %v2278_v43, %s7384_s25  ;;  %v2603_v42 = vor.u32 %v2602_v27, %v2599_v26  ;;  %v2606_v43 = vshll.u32 %v6620_v28, 16  ;;  %v2082_v33 = vld [vmem:[%s7457_s18 + $0x38] sm:$0xf] }
 0x1a7   : > { %v2631_v62 = vor.u32 %v2630_v48, %v2627_v47  ;;  %v2183_v47 = vshrl.u32 %v2082_v33, 16  ;;  %v2077_v48 = vld [vmem:[%s7457_s18 + $0x24] sm:$0x1] }
 0x1a8   : > { %v1942_v56 = vpop.permute.xlu1 %1941  ;;  %v1940_v57 = vpop.permute.xlu0 %1939 }
 0x1a9   : > { %1964 = vst.msk [vmem:[#allocation2 + $0x44] sm:$0xf] %vm772_vm12, %v1942_v56  ;;  %1963 = vst.msk [vmem:[#allocation2 + $0x40] sm:$0xf] %vm772_vm12, %v1940_v57  ;;  %v2604_v56 = vrot.slane %v2603_v42, 4  ;;  %v2608_v57 = vrot.slane %v2606_v43, 5 }
 0x1aa   : > { %2454 = vrot.lane.b32.xlu1 %v2367_v49, %s7385_s26  ;;  %2452 = vrot.lane.b32.xlu0 %v2353_v50, %s7385_s26  ;;  %v7146_v59 = vpop.eup %7145 }
 0x1ab   : > { %v7148_v63 = vpop.eup %7147  ;;  %v3303_v6 = vmul.f32 %v7146_v59, %v8168_v25  ;;  %v6613_v59 = vld [vmem:[%s7457_s18 + $0x18] sm:$0xf]  ;;  %v2609_v4 = vsel %vm7640_vm6, %v2604_v56, %v2608_v57  ;;  %v2025_v57 = vld [vmem:[%s7457_s18 + $0x28] sm:$0xf] }
 0x1ac   : > { %v1568_v0 = vpop.permute.xlu1 %1567  ;;  %v1566_v1 = vpop.permute.xlu0 %1565  ;;  %v3301_v11 = vmul.f32 %v7148_v63, %v8171_v30  ;;  %v6605_v30 = vld [vmem:[%s7457_s18 + $0x18] sm:$0xf]  ;;  %v2634_v63 = vshll.u32 %v6624_v52, 16 }
 0x1ad   : > { %v7150_v2 = vpop.eup %7149  ;;  %1585 = vst.msk [vmem:[#allocation2 + $0x5c] sm:$0xf] %vm444_vm0, %v1568_v0  ;;  %1584 = vst.msk [vmem:[#allocation2 + $0x58] sm:$0xf] %vm444_vm0, %v1566_v1 }
 0x1ae   : > { %v7152_v5 = vpop.eup %7151  ;;  %v3304_v7 = vmul.f32 %v7150_v2, %v8178_v37  ;;  %2458 = vrot.lane.b32.xlu1 %v2395_v60, %s7385_s26  ;;  %2456 = vrot.lane.b32.xlu0 %v2381_v61, %s7385_s26  ;;  %v2645_v60 = vor.u32 %v2644_v46, %v2641_v45  ;;  %v2648_v61 = vshll.u32 %v6626_v51, 16 }
 0x1af   : > { %v3302_v12 = vmul.f32 %v7152_v5, %v8184_v40  ;;  %v6622_v40 = vld [vmem:[%s7457_s18 + $0x14] sm:$0x1] }
 0x1b0   : > { %v3334_v25 = vpack.c.bf16 %v3304_v7, %v3303_v6  ;;  %v6858_v16 = vpack.c.bf16 %v3304_v7, %v3304_v7  ;;  %v1613_v37 = vpop.permute.xlu1 %1612  ;;  %v1611_v17 = vpop.permute.xlu0 %1610  ;;  %v7074_v18 = vld [vmem:[#allocation2 + $0x40] sm:$0xff]   ;;  %v2620_v41 = vshll.u32 %v6622_v40, 16  ;;  %v2646_v5 = vrot.slane %v2645_v60, 4 }
 0x1b1   : > { %v3333_v19 = vpack.c.bf16 %v3302_v12, %v3301_v11  ;;  %v6857_v21 = vpack.c.bf16 %v3302_v12, %v3302_v12  ;;  %1631 = vst.msk [vmem:[#allocation2 + $0x54] sm:$0xf] %vm461_vm1, %v1613_v37  ;;  %1630 = vst.msk [vmem:[#allocation2 + $0x50] sm:$0xf] %vm461_vm1, %v1611_v17  ;;  %6992 = vmatprep.mubr.msk.bf16.mxu0 %vm2895_vm13, %v7074_v18  ;;  %v2650_v6 = vrot.slane %v2648_v61, 5  ;;  %v2632_v7 = vrot.slane %v2631_v62, 4 }
 0x1b2   : > { %2502 = vrot.lane.b32.xlu1 %v6604_v8, %s7386_s27  ;;  %2500 = vrot.lane.b32.xlu0 %v6603_v13, %s7386_s27  ;;  %3358 = vst.msk [vmem:[#allocation3 + $0x10] sm:$0xf] %vm3349_vm15, %v3334_v25  ;;  %3364 = vst.msk [vmem:[#allocation3 + $0x18] sm:$0xf] %vm3349_vm15, %v6858_v16  ;;  %v2622_v55 = vrot.slane %v2620_v41, 5  ;;  %v2636_v8 = vrot.slane %v2634_v63, 5 }
 0x1b3   : > { %3356 = vst.msk [vmem:[#allocation3 + $0x8] sm:$0xf] %vm3349_vm15, %v6857_v21  ;;  %3350 = vst.msk [vmem:[#allocation3] sm:$0xf] %vm3349_vm15, %v3333_v19  ;;  %v2078_v12 = vld [vmem:[%s7457_s18 + $0x28] sm:$0xf]  ;;  %v2651_v15 = vsel %vm7640_vm6, %v2646_v5, %v2650_v6 }
 0x1b4   : > { %v1946_v35 = vpop.permute.xlu1 %1945  ;;  %v1944_v36 = vpop.permute.xlu0 %1943  ;;  %v2623_v3 = vsel %vm7640_vm6, %v2618_v53, %v2622_v55  ;;  %v2637_v25 = vsel %vm7640_vm6, %v2632_v7, %v2636_v8  ;;  %v2076_v16 = vld [vmem:[%s7457_s18 + $0x20] sm:$0xf]  ;;  %v1978_v41 = vld [vmem:[%s7457_s18 + $0x38] sm:$0xf]  ;;  %v2150_v60 = vshll.u32 %v2077_v48, 16  ;;  %v2185_v62 = vrot.slane %v2183_v47, 4 }
 0x1b5   : > { %1966 = vst.msk [vmem:[#allocation2 + $0x4c] sm:$0xf] %vm772_vm12, %v1946_v35  ;;  %1965 = vst.msk [vmem:[#allocation2 + $0x48] sm:$0xf] %vm772_vm12, %v1944_v36  ;;  %v2141_v26 = vshrl.u32 %v2076_v16, 16  ;;  %v2144_v27 = vshll.u32 %v2076_v16, 16 }
 0x1b6   : > { %2506 = vrot.lane.b32.xlu1 %v6606_v22, %s7386_s27  ;;  %2504 = vrot.lane.b32.xlu0 %v6605_v30, %s7386_s27  ;;  %v2155_v22 = vshrl.u32 %v2078_v12, 16  ;;  %v2158_v30 = vshll.u32 %v2078_v12, 16  ;;  %v2083_v61 = vld [vmem:[%s7457_s18 + $0x3c] sm:$0x1] }
 0x1b7   : > { %v2143_v45 = vrot.slane %v2141_v26, 4  ;;  %v2146_v46 = vrot.slane %v2144_v27, 5  ;;  %v2192_v12 = vshll.u32 %v2083_v61, 16 }
 0x1b8   : > { %v1617_v49 = vpop.permute.xlu1 %1616  ;;  %v1615_v50 = vpop.permute.xlu0 %1614  ;;  %v2157_v42 = vrot.slane %v2155_v22, 4  ;;  %v2160_v43 = vrot.slane %v2158_v30, 5 }
 0x1b9   : > { %1633 = vst.msk [vmem:[#allocation2 + $0x5c] sm:$0xf] %vm461_vm1, %v1617_v49  ;;  %1632 = vst.msk [vmem:[#allocation2 + $0x58] sm:$0xf] %vm461_vm1, %v1615_v50  ;;  %v2186_v49 = vshll.u32 %v2082_v33, 16 }
 0x1ba   : > { %2550 = vrot.lane.b32.xlu1 %v6612_v38, %s7386_s27  ;;  %2548 = vrot.lane.b32.xlu0 %v6611_v44, %s7386_s27  ;;  %v2080_v38 = vld [vmem:[%s7457_s18 + $0x30] sm:$0xf]  ;;  %v2079_v44 = vld [vmem:[%s7457_s18 + $0x2c] sm:$0x1]  ;;  %v2161_v55 = vor.u32 %v2160_v43, %v2157_v42 }
 0x1bb   : > { %v2169_v50 = vshrl.u32 %v2080_v38, 16  ;;  %v2172_v51 = vshll.u32 %v2080_v38, 16  ;;  %v2164_v56 = vshll.u32 %v2079_v44, 16  ;;  %v2188_v63 = vrot.slane %v2186_v49, 5  ;;  %v2334_v38 = vld [vmem:[%s7457_s18 + $0x28] sm:$0xf] }
 0x1bc   : > { %v1661_v0 = vpop.permute.xlu1 %1660  ;;  %v1659_v1 = vpop.permute.xlu0 %1658  ;;  %v7075_v2 = vld [vmem:[#allocation2 + $0x48] sm:$0xff]   ;;  %v2162_v6 = vrot.slane %v2161_v55, 4  ;;  %v2411_v44 = vshrl.u32 %v2334_v38, 16 }
 0x1bd   : > { %1679 = vst.msk [vmem:[#allocation2 + $0x54] sm:$0xf] %vm478_vm2, %v1661_v0  ;;  %1678 = vst.msk [vmem:[#allocation2 + $0x50] sm:$0xf] %vm478_vm2, %v1659_v1  ;;  %6993 = vmatmul.mubr.msk.bf16.gmra.mrb[16].mxu0 %vm2895_vm13, %v7075_v2  ;;  %v2171_v0 = vrot.slane %v2169_v50, 4  ;;  %v2174_v1 = vrot.slane %v2172_v51, 5  ;;  %v2189_v16 = vor.u32 %v2188_v63, %v2185_v62 }
 0x1be   : > { %2554 = vrot.lane.b32.xlu1 %v6614_v58, %s7386_s27  ;;  %2552 = vrot.lane.b32.xlu0 %v6613_v59, %s7386_s27  ;;  %v2024_v58 = vld [vmem:[%s7457_s18 + $0x20] sm:$0xf]  ;;  %v2147_v59 = vor.u32 %v2146_v46, %v2143_v45  ;;  %v2166_v7 = vrot.slane %v2164_v56, 5  ;;  %v2414_v45 = vshll.u32 %v2334_v38, 16  ;;  %v2233_v49 = vld [vmem:[%s7457_s18 + $0x28] sm:$0xf] }
 0x1bf   : > { %v2232_v50 = vld [vmem:[%s7457_s18 + $0x20] sm:$0xf]  ;;  %v2338_v51 = vld [vmem:[%s7457_s18 + $0x38] sm:$0xf]  ;;  %v2336_v56 = vld [vmem:[%s7457_s18 + $0x30] sm:$0xf] }
 0x1c0   : > { %v1665_v9 = vpop.permute.xlu1 %1664  ;;  %v1663_v10 = vpop.permute.xlu0 %1662 }
 0x1c1   : > { %1681 = vst.msk [vmem:[#allocation2 + $0x5c] sm:$0xf] %vm478_vm2, %v1665_v9  ;;  %1680 = vst.msk [vmem:[#allocation2 + $0x58] sm:$0xf] %vm478_vm2, %v1663_v10  ;;  %v6982_v11 = vpop.f32.mrb[4].mxu0  ;;  %v2148_v10 = vrot.slane %v2147_v59, 4 }
 0x1c2   : > { %2710 = vrot.lane.b32.xlu1 %v2623_v3, %s7379_s17  ;;  %2708 = vrot.lane.b32.xlu0 %v2609_v4, %s7379_s17  ;;  %v8295_v13 = vadd.f32 %v6982_v11, %v8157_v20  ;;  %v2998_v14 = vpop.f32.mrb[5].mxu0  ;;  %v2081_v4 = vld [vmem:[%s7457_s18 + $0x34] sm:$0x1]  ;;  %v2152_v11 = vrot.slane %v2150_v60, 5  ;;  %v2416_v59 = vrot.slane %v2414_v45, 5 }
 0x1c3   : > { %v8303_v37 = vadd.f32 %v8157_v20, %v2998_v14  ;;  %v6983_v21 = vpop.f32.mrb[6].mxu0 }
 0x1c4   : > { %v1709_v17 = vpop.permute.xlu1 %1708  ;;  %v1707_v18 = vpop.permute.xlu0 %1706  ;;  %v6679_v19 = vmul.f32 -1.442695, %v8295_v13  ;;  %v8310_v23 = vadd.f32 %v6983_v21, %v8157_v20  ;;  %v2153_v27 = vsel %vm7640_vm6, %v2148_v10, %v2152_v11  ;;  %v2428_v10 = vshll.u32 %v2336_v56, 16 }
 0x1c5   : > { %1727 = vst.msk [vmem:[#allocation2 + $0x54] sm:$0xf] %vm527_vm7, %v1709_v17  ;;  %1726 = vst.msk [vmem:[#allocation2 + $0x50] sm:$0xf] %vm527_vm7, %v1707_v18  ;;  %v6677_v40 = vmul.f32 -1.442695, %v8303_v37  ;;  %v2175_v17 = vor.u32 %v2174_v1, %v2171_v0 }
 0x1c6   : > { %v3001_v24 = vpop.f32.mrb[7].mxu0  ;;  %2714 = vrot.lane.b32.xlu1 %v2651_v15, %s7379_s17  ;;  %2712 = vrot.lane.b32.xlu0 %v2637_v25, %s7379_s17  ;;  %7153 = vpow2.f32 %v6679_v19  ;;  %v6680_v34 = vmul.f32 -1.442695, %v8310_v23  ;;  %v2027_v15 = vld [vmem:[%s7457_s18 + $0x38] sm:$0xf]  ;;  %v2178_v18 = vshll.u32 %v2081_v4, 16 }
 0x1c7   : > { %v8315_v28 = vadd.f32 %v8157_v20, %v3001_v24  ;;  %7155 = vpow2.f32 %v6677_v40  ;;  %v1977_v20 = vld [vmem:[%s7457_s18 + $0x30] sm:$0xf]  ;;  %v2167_v24 = vsel %vm7640_vm6, %v2162_v6, %v2166_v7  ;;  %v2176_v33 = vrot.slane %v2175_v17, 4  ;;  %v2235_v1 = vld [vmem:[%s7457_s18 + $0x38] sm:$0xf] }
 0x1c8   : > { %v1713_v35 = vpop.permute.xlu1 %1712  ;;  %v1711_v36 = vpop.permute.xlu0 %1710  ;;  %7157 = vpow2.f32 %v6680_v34  ;;  %v2026_v25 = vld [vmem:[%s7457_s18 + $0x30] sm:$0xf]  ;;  %v2180_v34 = vrot.slane %v2178_v18, 5  ;;  %v2442_v4 = vshll.u32 %v2338_v51, 16  ;;  %v2335_v7 = vld [vmem:[%s7457_s18 + $0x2c] sm:$0x1] }
 0x1c9   : > { %v6678_v39 = vmul.f32 -1.442695, %v8315_v28  ;;  %1729 = vst.msk [vmem:[#allocation2 + $0x5c] sm:$0xf] %vm527_vm7, %v1713_v35  ;;  %1728 = vst.msk [vmem:[#allocation2 + $0x58] sm:$0xf] %vm527_vm7, %v1711_v36 }
 0x1ca   : > { %1997 = vrot.lane.b32.xlu1 %v1976_v29, %s7381_s20  ;;  %1995 = vrot.lane.b32.xlu0 %v1975_v31, %s7381_s20  ;;  %v2194_v29 = vrot.slane %v2192_v12, 5  ;;  %v2190_v31 = vrot.slane %v2189_v16, 4  ;;  %v2280_v18 = vld [vmem:[%s7457_s18 + $0x20] sm:$0xf] }
 0x1cb   : > { %7159 = vpow2.f32 %v6678_v39  ;;  %v2332_v39 = vld [vmem:[%s7457_s18 + $0x20] sm:$0xf] }
 0x1cc   : > { %v1757_v52 = vpop.permute.xlu1 %1756  ;;  %v1755_v53 = vpop.permute.xlu0 %1754  ;;  %v2397_v46 = vshrl.u32 %v2332_v39, 16  ;;  %v2400_v47 = vshll.u32 %v2332_v39, 16 }
 0x1cd   : > { %1775 = vst.msk [vmem:[#allocation2 + $0x54] sm:$0xf] %vm576_vm8, %v1757_v52  ;;  %1774 = vst.msk [vmem:[#allocation2 + $0x50] sm:$0xf] %vm576_vm8, %v1755_v53 }
 0x1ce   : > { %2001 = vrot.lane.b32.xlu1 %v1978_v41, %s7381_s20  ;;  %1999 = vrot.lane.b32.xlu0 %v1977_v20, %s7381_s20  ;;  %v2195_v41 = vsel %vm7640_vm6, %v2190_v31, %v2194_v29  ;;  %v2181_v20 = vsel %vm7640_vm6, %v2176_v33, %v2180_v34  ;;  %v2399_v60 = vrot.slane %v2397_v46, 4  ;;  %v2402_v61 = vrot.slane %v2400_v47, 5 }
 0x1d0   : > { %v1761_v2 = vpop.permute.xlu1 %1760  ;;  %v1759_v3 = vpop.permute.xlu0 %1758  ;;  %v2403_v16 = vor.u32 %v2402_v61, %v2399_v60 }
 0x1d1   : > { %v7154_v5 = vpop.eup %7153  ;;  %1777 = vst.msk [vmem:[#allocation2 + $0x5c] sm:$0xf] %vm576_vm8, %v1761_v2  ;;  %1776 = vst.msk [vmem:[#allocation2 + $0x58] sm:$0xf] %vm576_vm8, %v1759_v3  ;;  %v2234_v2 = vld [vmem:[%s7457_s18 + $0x30] sm:$0xf] }
 0x1d2   : > { %v7156_v8 = vpop.eup %7155  ;;  %v3211_v9 = vadd.f32 1.0, %v7154_v5  ;;  %2046 = vrot.lane.b32.xlu1 %v2025_v57, %s7381_s20  ;;  %2044 = vrot.lane.b32.xlu0 %v2024_v58, %s7381_s20  ;;  %v2413_v58 = vrot.slane %v2411_v44, 4  ;;  %v2439_v3 = vshrl.u32 %v2338_v51, 16  ;;  %v2404_v33 = vrot.slane %v2403_v16, 4 }
 0x1d3   : > { %v3209_v14 = vadd.f32 1.0, %v7156_v8  ;;  %v7158_v19 = vpop.eup %7157  ;;  %v2333_v8 = vld [vmem:[%s7457_s18 + $0x24] sm:$0x1] }
 0x1d4   : > { %v1805_v21 = vpop.permute.xlu1 %1804  ;;  %v1803_v22 = vpop.permute.xlu0 %1802  ;;  %7161 = vrcp.f32 %v3211_v9  ;;  %v3212_v40 = vadd.f32 1.0, %v7158_v19  ;;  %v2425_v9 = vshrl.u32 %v2336_v56, 16  ;;  %v2406_v17 = vshll.u32 %v2333_v8, 16  ;;  %v6627_v56 = vld [vmem:[%s7457_s18 + $0x28] sm:$0xf] }
 0x1d5   : > { %v7160_v30 = vpop.eup %7159  ;;  %1823 = vst.msk [vmem:[#allocation2 + $0x54] sm:$0xf] %vm625_vm9, %v1805_v21  ;;  %1822 = vst.msk [vmem:[#allocation2 + $0x50] sm:$0xf] %vm625_vm9, %v1803_v22  ;;  %7163 = vrcp.f32 %v3209_v14  ;;  %v2441_v19 = vrot.slane %v2439_v3, 4  ;;  %v2444_v21 = vrot.slane %v2442_v4, 5 }
 0x1d6   : > { %v3210_v26 = vadd.f32 1.0, %v7160_v30  ;;  %2050 = vrot.lane.b32.xlu1 %v2027_v15, %s7381_s20  ;;  %2048 = vrot.lane.b32.xlu0 %v2026_v25, %s7381_s20  ;;  %7165 = vrcp.f32 %v3212_v40  ;;  %v2420_v25 = vshll.u32 %v2335_v7, 16  ;;  %v2427_v22 = vrot.slane %v2425_v9, 4  ;;  %v6633_v4 = vld [vmem:[%s7457_s18 + $0x40] sm:$0xf] }
 0x1d7   : > { %v2430_v30 = vrot.slane %v2428_v10, 5  ;;  %v2408_v34 = vrot.slane %v2406_v17, 5  ;;  %v2445_v38 = vor.u32 %v2444_v21, %v2441_v19  ;;  %v6609_v9 = vld [vmem:[%s7457_s18 + $0x38] sm:$0xf]  ;;  %v6630_v10 = vld [vmem:[%s7457_s18 + $0x34] sm:$0x1] }
 0x1d8   : > { %7167 = vrcp.f32 %v3210_v26  ;;  %v1809_v35 = vpop.permute.xlu1 %1808  ;;  %v1807_v36 = vpop.permute.xlu0 %1806  ;;  %v2339_v26 = vld [vmem:[%s7457_s18 + $0x3c] sm:$0x1]  ;;  %v2422_v31 = vrot.slane %v2420_v25, 5  ;;  %v6615_v19 = vld [vmem:[%s7457_s18 + $0x28] sm:$0xf]  ;;  %v2676_v21 = vshll.u32 %v6630_v10, 16 }
 0x1d9   : > { %1825 = vst.msk [vmem:[#allocation2 + $0x5c] sm:$0xf] %vm625_vm9, %v1809_v35  ;;  %1824 = vst.msk [vmem:[#allocation2 + $0x58] sm:$0xf] %vm625_vm9, %v1807_v36  ;;  %v2283_v35 = vld [vmem:[%s7457_s18 + $0x38] sm:$0xf]  ;;  %v2409_v45 = vsel %vm7640_vm6, %v2404_v33, %v2408_v34 }
 0x1da   : > { %2206 = vrot.lane.b32.xlu1 %v2167_v24, %s7383_s24  ;;  %2204 = vrot.lane.b32.xlu0 %v2153_v27, %s7383_s24  ;;  %v2337_v27 = vld [vmem:[%s7457_s18 + $0x34] sm:$0x1]  ;;  %v2282_v36 = vld [vmem:[%s7457_s18 + $0x30] sm:$0xf]  ;;  %v2448_v39 = vshll.u32 %v2339_v26, 16  ;;  %v2446_v46 = vrot.slane %v2445_v38, 4 }
 0x1db   : > { %v6632_v34 = vld [vmem:[%s7457_s18 + $0x3c] sm:$0x1]  ;;  %v2678_v38 = vrot.slane %v2676_v21, 5 }
 0x1dc   : > { %v1854_v42 = vpop.permute.xlu1 %1853  ;;  %v1852_v43 = vpop.permute.xlu0 %1851  ;;  %v2450_v47 = vrot.slane %v2448_v39, 5 }
 0x1dd   : > { %1872 = vst.msk [vmem:[#allocation2 + $0x54] sm:$0xf] %vm674_vm10, %v1854_v42  ;;  %1871 = vst.msk [vmem:[#allocation2 + $0x50] sm:$0xf] %vm674_vm10, %v1852_v43 }
 0x1de   : > { %2210 = vrot.lane.b32.xlu1 %v2195_v41, %s7383_s24  ;;  %2208 = vrot.lane.b32.xlu0 %v2181_v20, %s7383_s24  ;;  %v7162_v48 = vpop.eup %7161  ;;  %v2431_v41 = vor.u32 %v2430_v30, %v2427_v22  ;;  %v2434_v20 = vshll.u32 %v2337_v27, 16 }
 0x1df   : > { %v7164_v52 = vpop.eup %7163  ;;  %v3307_v63 = vmul.f32 %v7162_v48, %v8295_v13 }
 0x1e0   : > { %v1858_v53 = vpop.permute.xlu1 %1857  ;;  %v1856_v55 = vpop.permute.xlu0 %1855  ;;  %v3305_v5 = vmul.f32 %v7164_v52, %v8303_v37  ;;  %v2281_v37 = vld [vmem:[%s7457_s18 + $0x28] sm:$0xf]  ;;  %v2432_v48 = vrot.slane %v2431_v41, 4  ;;  %v6629_v52 = vld [vmem:[%s7457_s18 + $0x30] sm:$0xf] }
 0x1e1   : > { %v7166_v57 = vpop.eup %7165  ;;  %1874 = vst.msk [vmem:[#allocation2 + $0x5c] sm:$0xf] %vm674_vm10, %v1858_v53  ;;  %1873 = vst.msk [vmem:[#allocation2 + $0x58] sm:$0xf] %vm674_vm10, %v1856_v55  ;;  %v2451_v53 = vsel %vm7640_vm6, %v2446_v46, %v2450_v47  ;;  %v2667_v60 = vshrl.u32 %v6629_v52, 16  ;;  %v2670_v61 = vshll.u32 %v6629_v52, 16 }
 0x1e2   : > { %v7168_v62 = vpop.eup %7167  ;;  %v3308_v0 = vmul.f32 %v7166_v57, %v8310_v23  ;;  %2254 = vrot.lane.b32.xlu1 %v2233_v49, %s7384_s25  ;;  %2252 = vrot.lane.b32.xlu0 %v2232_v50, %s7384_s25  ;;  %v2436_v49 = vrot.slane %v2434_v20, 5  ;;  %v2690_v47 = vshll.u32 %v6632_v34, 16 }
 0x1e3   : > { %v3306_v6 = vmul.f32 %v7168_v62, %v8315_v28  ;;  %v2417_v28 = vor.u32 %v2416_v59, %v2413_v58  ;;  %v2653_v62 = vshrl.u32 %v6627_v56, 16  ;;  %v2669_v7 = vrot.slane %v2667_v60, 4 }
 0x1e4   : > { %v3336_v13 = vpack.c.bf16 %v3308_v0, %v3307_v63  ;;  %v6860_v11 = vpack.c.bf16 %v3308_v0, %v3308_v0  ;;  %v1902_v23 = vpop.permute.xlu1 %1901  ;;  %v1900_v12 = vpop.permute.xlu0 %1899  ;;  %v2437_v55 = vsel %vm7640_vm6, %v2432_v48, %v2436_v49  ;;  %v2656_v63 = vshll.u32 %v6627_v56, 16  ;;  %v6608_v0 = vld [vmem:[%s7457_s18 + $0x30] sm:$0xf]  ;;  %v8468_v56 = vld [vmem:[%s9555_s2] ss:$0 sm:$0xff] }
 0x1e5   : > { %v3335_v14 = vpack.c.bf16 %v3306_v6, %v3305_v5  ;;  %v6859_v15 = vpack.c.bf16 %v3306_v6, %v3306_v6  ;;  %1920 = vst.msk [vmem:[#allocation2 + $0x54] sm:$0xf] %vm723_vm11, %v1902_v23  ;;  %1919 = vst.msk [vmem:[#allocation2 + $0x50] sm:$0xf] %vm723_vm11, %v1900_v12  ;;  %v2418_v29 = vrot.slane %v2417_v28, 4  ;;  %v2672_v8 = vrot.slane %v2670_v61, 5 }
 0x1e6   : > { %2258 = vrot.lane.b32.xlu1 %v2235_v1, %s7384_s25  ;;  %2256 = vrot.lane.b32.xlu0 %v2234_v2, %s7384_s25  ;;  %3374 = vst.msk [vmem:[#allocation3 + $0x30] sm:$0xf] %vm3349_vm15, %v3336_v13  ;;  %3380 = vst.msk [vmem:[#allocation3 + $0x38] sm:$0xf] %vm3349_vm15, %v6860_v11  ;;  %v6607_v1 = vld [vmem:[%s7457_s18 + $0x28] sm:$0xf] }
 0x1e7   : > { %3366 = vst.msk [vmem:[#allocation3 + $0x20] sm:$0xf] %vm3349_vm15, %v3335_v14  ;;  %3372 = vst.msk [vmem:[#allocation3 + $0x28] sm:$0xf] %vm3349_vm15, %v6859_v15  ;;  %v2423_v44 = vsel %vm7640_vm6, %v2418_v29, %v2422_v31  ;;  %v6631_v5 = vld [vmem:[%s7457_s18 + $0x38] sm:$0xf]  ;;  %v2673_v17 = vor.u32 %v2672_v8, %v2669_v7 }
 0x1e8   : > { %v1906_v40 = vpop.permute.xlu1 %1905  ;;  %v1904_v24 = vpop.permute.xlu0 %1903  ;;  %v6610_v6 = vld [vmem:[%s7457_s18 + $0x40] sm:$0xf]  ;;  %v2655_v13 = vrot.slane %v2653_v62, 4  ;;  %v2658_v11 = vrot.slane %v2656_v63, 5  ;;  %v6628_v23 = vld [vmem:[%s7457_s18 + $0x2c] sm:$0x1] }
 0x1e9   : > { %1922 = vst.msk [vmem:[#allocation2 + $0x5c] sm:$0xf] %vm723_vm11, %v1906_v40  ;;  %1921 = vst.msk [vmem:[#allocation2 + $0x58] sm:$0xf] %vm723_vm11, %v1904_v24  ;;  %v2695_v12 = vshrl.u32 %v6633_v4, 16  ;;  %v2698_v14 = vshll.u32 %v6633_v4, 16 }
 0x1ea   : > { %2302 = vrot.lane.b32.xlu1 %v2281_v37, %s7384_s25  ;;  %2300 = vrot.lane.b32.xlu0 %v2280_v18, %s7384_s25  ;;  %v2681_v15 = vshrl.u32 %v6631_v5, 16  ;;  %v2684_v37 = vshll.u32 %v6631_v5, 16  ;;  %v6616_v18 = vld [vmem:[%s7457_s18 + $0x30] sm:$0xf]  ;;  %v2659_v22 = vor.u32 %v2658_v11, %v2655_v13  ;;  %v2662_v30 = vshll.u32 %v6628_v23, 16 }
 0x1eb   : > { %v6634_v40 = vld [vmem:[%s7457_s18 + $0x44] sm:$0x1]  ;;  %v2697_v24 = vrot.slane %v2695_v12, 4  ;;  %v2700_v26 = vrot.slane %v2698_v14, 5  ;;  %v2692_v60 = vrot.slane %v2690_v47, 5 }
 0x1ec   : > { %v1950_v42 = vpop.permute.xlu1 %1949  ;;  %v1948_v43 = vpop.permute.xlu0 %1947  ;;  %v2683_v27 = vrot.slane %v2681_v15, 4  ;;  %v2686_v29 = vrot.slane %v2684_v37, 5  ;;  %v2660_v39 = vrot.slane %v2659_v22, 4  ;;  %v2664_v41 = vrot.slane %v2662_v30, 5 }
 0x1ed   : > { %1968 = vst.msk [vmem:[#allocation2 + $0x54] sm:$0xf] %vm772_vm12, %v1950_v42  ;;  %1967 = vst.msk [vmem:[#allocation2 + $0x50] sm:$0xf] %vm772_vm12, %v1948_v43  ;;  %v2704_v20 = vshll.u32 %v6634_v40, 16 }
 0x1ee   : > { %2306 = vrot.lane.b32.xlu1 %v2283_v35, %s7384_s25  ;;  %2304 = vrot.lane.b32.xlu0 %v2282_v36, %s7384_s25  ;;  %v2674_v35 = vrot.slane %v2673_v17, 4  ;;  %v6618_v43 = vld [vmem:[%s7457_s18 + $0x40] sm:$0xf]  ;;  %v2687_v46 = vor.u32 %v2686_v29, %v2683_v27 }
 0x1f0   : > { %v1990_v50 = vpop.permute.xlu1 %1989  ;;  %v1988_v51 = vpop.permute.xlu0 %1987  ;;  %v2679_v52 = vsel %vm7640_vm6, %v2674_v35, %v2678_v38 }
 0x1f1   : > { %2013 = vst.msk [vmem:[#allocation2 + $0x64] sm:$0xf] %vm444_vm0, %v1990_v50  ;;  %2012 = vst.msk [vmem:[#allocation2 + $0x60] sm:$0xf] %vm444_vm0, %v1988_v51 }
 0x1f2   : > { %2462 = vrot.lane.b32.xlu1 %v2423_v44, %s7385_s26  ;;  %2460 = vrot.lane.b32.xlu0 %v2409_v45, %s7385_s26  ;;  %v6617_v44 = vld [vmem:[%s7457_s18 + $0x38] sm:$0xf]  ;;  %v2701_v45 = vor.u32 %v2700_v26, %v2697_v24 }
 0x1f4   : > { %v1954_v57 = vpop.permute.xlu1 %1953  ;;  %v1952_v58 = vpop.permute.xlu0 %1951  ;;  %v7076_v59 = vld [vmem:[#allocation2 + $0x50] sm:$0xff]  }
 0x1f5   : > { %1970 = vst.msk [vmem:[#allocation2 + $0x5c] sm:$0xf] %vm772_vm12, %v1954_v57  ;;  %1969 = vst.msk [vmem:[#allocation2 + $0x58] sm:$0xf] %vm772_vm12, %v1952_v58  ;;  %6996 = vmatprep.mubr.msk.bf16.mxu0 %vm2895_vm13, %v7076_v59  ;;  %v2702_v58 = vrot.slane %v2701_v45, 4  ;;  %v2688_v59 = vrot.slane %v2687_v46, 4 }
 0x1f6   : > { %2466 = vrot.lane.b32.xlu1 %v2451_v53, %s7385_s26  ;;  %2464 = vrot.lane.b32.xlu0 %v2437_v55, %s7385_s26  ;;  %v2665_v53 = vsel %vm7640_vm6, %v2660_v39, %v2664_v41  ;;  %v2706_v55 = vrot.slane %v2704_v20, 5 }
 0x1f8   : > { %v1994_v2 = vpop.permute.xlu1 %1993  ;;  %v1992_v3 = vpop.permute.xlu0 %1991 }
 0x1f9   : > { %2015 = vst.msk [vmem:[#allocation2 + $0x6c] sm:$0xf] %vm444_vm0, %v1994_v2  ;;  %2014 = vst.msk [vmem:[#allocation2 + $0x68] sm:$0xf] %vm444_vm0, %v1992_v3 }
 0x1fa   : > { %2510 = vrot.lane.b32.xlu1 %v6608_v0, %s7386_s27  ;;  %2508 = vrot.lane.b32.xlu0 %v6607_v1, %s7386_s27  ;;  %v2707_v0 = vsel %vm7640_vm6, %v2702_v58, %v2706_v55  ;;  %v2693_v1 = vsel %vm7640_vm6, %v2688_v59, %v2692_v60 }
 0x1fc   : > { %v2039_v28 = vpop.permute.xlu1 %2038  ;;  %v2037_v25 = vpop.permute.xlu0 %2036  ;;  %v7077_v16 = vld [vmem:[#allocation2 + $0x58] sm:$0xff]  }
 0x1fd   : > { %2061 = vst.msk [vmem:[#allocation2 + $0x64] sm:$0xf] %vm461_vm1, %v2039_v28  ;;  %2060 = vst.msk [vmem:[#allocation2 + $0x60] sm:$0xf] %vm461_vm1, %v2037_v25  ;;  %6997 = vmatmul.mubr.msk.bf16.gmra.mrb[20].mxu0 %vm2895_vm13, %v7077_v16 }
 0x1fe   : > { %2514 = vrot.lane.b32.xlu1 %v6610_v6, %s7386_s27  ;;  %2512 = vrot.lane.b32.xlu0 %v6609_v9, %s7386_s27 }
 0x200   : > { %v2043_v31 = vpop.permute.xlu1 %2042  ;;  %v2041_v33 = vpop.permute.xlu0 %2040 }
 0x201   : > { %2063 = vst.msk [vmem:[#allocation2 + $0x6c] sm:$0xf] %vm461_vm1, %v2043_v31  ;;  %2062 = vst.msk [vmem:[#allocation2 + $0x68] sm:$0xf] %vm461_vm1, %v2041_v33 }
 0x202   : > { %2558 = vrot.lane.b32.xlu1 %v6616_v18, %s7386_s27  ;;  %2556 = vrot.lane.b32.xlu0 %v6615_v19, %s7386_s27  ;;  %v8449_v36 = vpop.f32.mrb[8].mxu0 }
 0x203   : > { %v8451_v42 = vpop.f32.mrb[9].mxu0 }
 0x204   : > { %v2199_v48 = vpop.permute.xlu1 %2198  ;;  %v2197_v49 = vpop.permute.xlu0 %2196 }
 0x205   : > { %2221 = vst.msk [vmem:[#allocation2 + $0x64] sm:$0xf] %vm478_vm2, %v2199_v48  ;;  %2220 = vst.msk [vmem:[#allocation2 + $0x60] sm:$0xf] %vm478_vm2, %v2197_v49  ;;  %v8457_v50 = vpop.f32.mrb[10].mxu0 }
 0x206   : > { %2562 = vrot.lane.b32.xlu1 %v6618_v43, %s7386_s27  ;;  %2560 = vrot.lane.b32.xlu0 %v6617_v44, %s7386_s27  ;;  %v3017_v51 = vpop.f32.mrb[11].mxu0 }
 0x207   : > { %v3018_v57 = vadd.f32 %v8468_v56, %v3017_v51 }
 0x208   : > { %v2203_v61 = vpop.permute.xlu1 %2202  ;;  %v2201_v62 = vpop.permute.xlu0 %2200 }
 0x209   : > { %v6682_v63 = vmul.f32 -1.442695, %v3018_v57  ;;  %2223 = vst.msk [vmem:[#allocation2 + $0x6c] sm:$0xf] %vm478_vm2, %v2203_v61  ;;  %2222 = vst.msk [vmem:[#allocation2 + $0x68] sm:$0xf] %vm478_vm2, %v2201_v62 }
 0x20a   : > { %2718 = vrot.lane.b32.xlu1 %v2679_v52, %s7379_s17  ;;  %2716 = vrot.lane.b32.xlu0 %v2665_v53, %s7379_s17 }
 0x20b   : > { %7169 = vpow2.f32 %v6682_v63 }
 0x20c   : > { %v2247_v2 = vpop.permute.xlu1 %2246  ;;  %v2245_v3 = vpop.permute.xlu0 %2244 }
 0x20d   : > { %2269 = vst.msk [vmem:[#allocation2 + $0x64] sm:$0xf] %vm527_vm7, %v2247_v2  ;;  %2268 = vst.msk [vmem:[#allocation2 + $0x60] sm:$0xf] %vm527_vm7, %v2245_v3 }
 0x20e   : > { %2722 = vrot.lane.b32.xlu1 %v2707_v0, %s7379_s17  ;;  %2720 = vrot.lane.b32.xlu0 %v2693_v1, %s7379_s17 }
 0x210   : > { %v2251_v4 = vpop.permute.xlu1 %2250  ;;  %v2249_v5 = vpop.permute.xlu0 %2248 }
 0x211   : > { %2271 = vst.msk [vmem:[#allocation2 + $0x6c] sm:$0xf] %vm527_vm7, %v2251_v4  ;;  %2270 = vst.msk [vmem:[#allocation2 + $0x68] sm:$0xf] %vm527_vm7, %v2249_v5 }
 0x214   : > { %v2295_v6 = vpop.permute.xlu1 %2294  ;;  %v2293_v7 = vpop.permute.xlu0 %2292 }
 0x215   : > { %v7170_v8 = vpop.eup %7169  ;;  %2317 = vst.msk [vmem:[#allocation2 + $0x64] sm:$0xf] %vm576_vm8, %v2295_v6  ;;  %2316 = vst.msk [vmem:[#allocation2 + $0x60] sm:$0xf] %vm576_vm8, %v2293_v7 }
 0x216   : > { %v3214_v9 = vadd.f32 1.0, %v7170_v8 }
 0x218   : > { %7171 = vrcp.f32 %v3214_v9  ;;  %v2299_v10 = vpop.permute.xlu1 %2298  ;;  %v2297_v13 = vpop.permute.xlu0 %2296 }
 0x219   : > { %2319 = vst.msk [vmem:[#allocation2 + $0x6c] sm:$0xf] %vm576_vm8, %v2299_v10  ;;  %2318 = vst.msk [vmem:[#allocation2 + $0x68] sm:$0xf] %vm576_vm8, %v2297_v13 }
 0x21c   : > { %v2455_v11 = vpop.permute.xlu1 %2454  ;;  %v2453_v23 = vpop.permute.xlu0 %2452 }
 0x21d   : > { %2477 = vst.msk [vmem:[#allocation2 + $0x64] sm:$0xf] %vm625_vm9, %v2455_v11  ;;  %2476 = vst.msk [vmem:[#allocation2 + $0x60] sm:$0xf] %vm625_vm9, %v2453_v23 }
 0x220   : > { %v2459_v12 = vpop.permute.xlu1 %2458  ;;  %v2457_v14 = vpop.permute.xlu0 %2456 }
 0x221   : > { %2479 = vst.msk [vmem:[#allocation2 + $0x6c] sm:$0xf] %vm625_vm9, %v2459_v12  ;;  %2478 = vst.msk [vmem:[#allocation2 + $0x68] sm:$0xf] %vm625_vm9, %v2457_v14 }
 0x222   : > { %v7172_v15 = vpop.eup %7171 }
 0x223   : > { %v3310_v37 = vmul.f32 %v7172_v15, %v3018_v57 }
 0x224   : > { %v2503_v28 = vpop.permute.xlu1 %2502  ;;  %v2501_v25 = vpop.permute.xlu0 %2500 }
 0x225   : > { %v6862_v16 = vpack.c.bf16 %v3310_v37, %v3310_v37  ;;  %2525 = vst.msk [vmem:[#allocation2 + $0x64] sm:$0xf] %vm674_vm10, %v2503_v28  ;;  %2524 = vst.msk [vmem:[#allocation2 + $0x60] sm:$0xf] %vm674_vm10, %v2501_v25  ;;  %v3023_v28 = vadd.f32 %v8468_v56, %v8449_v36  ;;  %v3015_v25 = vadd.f32 %v8468_v56, %v8451_v42 }
 0x227   : > { %v3412_v17 = vshrl.u32 %v6862_v16, 16  ;;  %v3415_v18 = vshll.u32 %v6862_v16, 16 }
 0x228   : > { %v2507_v19 = vpop.permute.xlu1 %2506  ;;  %v2505_v21 = vpop.permute.xlu0 %2504 }
 0x229   : > { %v3414_v22 = vrot.slane %v3412_v17, 7  ;;  %2527 = vst.msk [vmem:[#allocation2 + $0x6c] sm:$0xf] %vm674_vm10, %v2507_v19  ;;  %2526 = vst.msk [vmem:[#allocation2 + $0x68] sm:$0xf] %vm674_vm10, %v2505_v21  ;;  %v3026_v21 = vadd.f32 %v8468_v56, %v8457_v50 }
 0x22a   : > { %v6681_v19 = vmul.f32 -1.442695, %v3015_v25 }
 0x22b   : > { %v3417_v30 = vor.u32 %v3415_v18, %v3414_v22  ;;  %v3418_v29 = vrot.slane %v3414_v22, 4  ;;  %v6683_v18 = vmul.f32 -1.442695, %v3023_v28  ;;  %v6684_v36 = vmul.f32 -1.442695, %v3026_v21 }
 0x22c   : > { %v2551_v40 = vpop.permute.xlu1 %2550  ;;  %v2549_v24 = vpop.permute.xlu0 %2548 }
 0x22d   : > { %2573 = vst.msk [vmem:[#allocation2 + $0x64] sm:$0xf] %vm723_vm11, %v2551_v40  ;;  %2572 = vst.msk [vmem:[#allocation2 + $0x60] sm:$0xf] %vm723_vm11, %v2549_v24  ;;  %3419 = vrot.lane.b32.xlu0 %v3417_v30, %s7375_s11  ;;  %7173 = vpow2.f32 %v6683_v18 }
 0x22e   : > { %7175 = vpow2.f32 %v6681_v19 }
 0x22f   : > { %7177 = vpow2.f32 %v6684_v36 }
 0x230   : > { %v2555_v26 = vpop.permute.xlu1 %2554  ;;  %v2553_v27 = vpop.permute.xlu0 %2552 }
 0x231   : > { %2575 = vst.msk [vmem:[#allocation2 + $0x6c] sm:$0xf] %vm723_vm11, %v2555_v26  ;;  %2574 = vst.msk [vmem:[#allocation2 + $0x68] sm:$0xf] %vm723_vm11, %v2553_v27  ;;  %3421 = vrot.lane.b32.xlu0 %v3418_v29, %s7375_s11 }
 0x234   : > { %v2711_v31 = vpop.permute.xlu1 %2710  ;;  %v2709_v33 = vpop.permute.xlu0 %2708 }
 0x235   : > { %2733 = vst.msk [vmem:[#allocation2 + $0x64] sm:$0xf] %vm772_vm12, %v2711_v31  ;;  %2732 = vst.msk [vmem:[#allocation2 + $0x60] sm:$0xf] %vm772_vm12, %v2709_v33 }
 0x237   : > { %v7174_v42 = vpop.eup %7173 }
 0x238   : > { %v2715_v34 = vpop.permute.xlu1 %2714  ;;  %v2713_v35 = vpop.permute.xlu0 %2712  ;;  %v3215_v24 = vadd.f32 1.0, %v7174_v42 }
 0x239   : > { %2735 = vst.msk [vmem:[#allocation2 + $0x6c] sm:$0xf] %vm772_vm12, %v2715_v34  ;;  %2734 = vst.msk [vmem:[#allocation2 + $0x68] sm:$0xf] %vm772_vm12, %v2713_v35  ;;  %v7176_v40 = vpop.eup %7175 }
 0x23a   : > { %v3213_v27 = vadd.f32 1.0, %v7176_v40  ;;  %v7178_v50 = vpop.eup %7177  ;;  %7179 = vrcp.f32 %v3215_v24 }
 0x23c   : > { %v1998_v38 = vpop.permute.xlu1 %1997  ;;  %v1996_v39 = vpop.permute.xlu0 %1995  ;;  %v7078_v41 = vld [vmem:[#allocation2 + $0x60] sm:$0xff]   ;;  %7181 = vrcp.f32 %v3213_v27 }
 0x23d   : > { %2017 = vst.msk [vmem:[#allocation2 + $0x74] sm:$0xf] %vm444_vm0, %v1998_v38  ;;  %2016 = vst.msk [vmem:[#allocation2 + $0x70] sm:$0xf] %vm444_vm0, %v1996_v39  ;;  %7000 = vmatprep.mubr.msk.bf16.mxu0 %vm2895_vm13, %v7078_v41 }
 0x23e   : > { %v8530_v20 = vpop.f32.mrb[12].mxu0 }
 0x23f   : > { %v8532_v43 = vpop.f32.mrb[13].mxu0 }
 0x240   : > { %v2002_v44 = vpop.permute.xlu1 %2001  ;;  %v2000_v45 = vpop.permute.xlu0 %1999  ;;  %v7079_v46 = vld [vmem:[#allocation2 + $0x68] sm:$0xff]  }
 0x241   : > { %2019 = vst.msk [vmem:[#allocation2 + $0x7c] sm:$0xf] %vm444_vm0, %v2002_v44  ;;  %2018 = vst.msk [vmem:[#allocation2 + $0x78] sm:$0xf] %vm444_vm0, %v2000_v45  ;;  %v8536_v47 = vpop.f32.mrb[14].mxu0  ;;  %7001 = vmatmul.mubr.msk.bf16.gmra.mrb[24].mxu0 %vm2895_vm13, %v7079_v46  ;;  %v3216_v45 = vadd.f32 1.0, %v7178_v50 }
 0x242   : > { %v8539_v48 = vpop.f32.mrb[15].mxu0  ;;  %vm3398_vm0 = vcmask 257152  }
 0x243   : > { %v8586_v33 = vadd.f32 %v8468_v56, %v8539_v48 }
 0x244   : > { %v2047_v49 = vpop.permute.xlu1 %2046  ;;  %v2045_v51 = vpop.permute.xlu0 %2044 }
 0x245   : > { %2065 = vst.msk [vmem:[#allocation2 + $0x74] sm:$0xf] %vm461_vm1, %v2047_v49  ;;  %2064 = vst.msk [vmem:[#allocation2 + $0x70] sm:$0xf] %vm461_vm1, %v2045_v51  ;;  %v6686_v46 = vmul.f32 -1.442695, %v8586_v33 }
 0x248   : > { %v2051_v52 = vpop.permute.xlu1 %2050  ;;  %v2049_v53 = vpop.permute.xlu0 %2048 }
 0x249   : > { %2067 = vst.msk [vmem:[#allocation2 + $0x7c] sm:$0xf] %vm461_vm1, %v2051_v52  ;;  %2066 = vst.msk [vmem:[#allocation2 + $0x78] sm:$0xf] %vm461_vm1, %v2049_v53  ;;  %vm3399_vm1 = vsmask.f32 7938 }
 0x24a   : > { %v3425_v53 = vld [vmem:[#allocation3 + $0x8] sm:$0xf] }
 0x24c   : > { %v2207_v55 = vpop.permute.xlu1 %2206  ;;  %v2205_v57 = vpop.permute.xlu0 %2204 }
 0x24d   : > { %2225 = vst.msk [vmem:[#allocation2 + $0x74] sm:$0xf] %vm478_vm2, %v2207_v55  ;;  %2224 = vst.msk [vmem:[#allocation2 + $0x70] sm:$0xf] %vm478_vm2, %v2205_v57  ;;  %v7180_v55 = vpop.eup %7179 }
 0x250   : > { %v2211_v58 = vpop.permute.xlu1 %2210  ;;  %v2209_v59 = vpop.permute.xlu0 %2208 }
 0x251   : > { %2227 = vst.msk [vmem:[#allocation2 + $0x7c] sm:$0xf] %vm478_vm2, %v2211_v58  ;;  %2226 = vst.msk [vmem:[#allocation2 + $0x78] sm:$0xf] %vm478_vm2, %v2209_v59  ;;  %v7182_v58 = vpop.eup %7181 }
 0x252   : > { %vm8594_vm2 = vmand %vm3398_vm0, %vm3399_vm1 }
 0x254   : > { %v2255_v60 = vpop.permute.xlu1 %2254  ;;  %v2253_v61 = vpop.permute.xlu0 %2252 }
 0x255   : > { %2273 = vst.msk [vmem:[#allocation2 + $0x74] sm:$0xf] %vm527_vm7, %v2255_v60  ;;  %2272 = vst.msk [vmem:[#allocation2 + $0x70] sm:$0xf] %vm527_vm7, %v2253_v61 }
 0x258   : > { %v2259_v62 = vpop.permute.xlu1 %2258  ;;  %v2257_v63 = vpop.permute.xlu0 %2256 }
 0x259   : > { %2275 = vst.msk [vmem:[#allocation2 + $0x7c] sm:$0xf] %vm527_vm7, %v2259_v62  ;;  %2274 = vst.msk [vmem:[#allocation2 + $0x78] sm:$0xf] %vm527_vm7, %v2257_v63 }
 0x25a   : > { %vm8605_vm7 = vmand %vm376_vm4, %vm377_vm5 }
 0x25c   : > { %v2303_v0 = vpop.permute.xlu1 %2302  ;;  %v2301_v1 = vpop.permute.xlu0 %2300 }
 0x25d   : > { %2321 = vst.msk [vmem:[#allocation2 + $0x74] sm:$0xf] %vm576_vm8, %v2303_v0  ;;  %2320 = vst.msk [vmem:[#allocation2 + $0x70] sm:$0xf] %vm576_vm8, %v2301_v1  ;;  %v3311_v0 = vmul.f32 %v7180_v55, %v3023_v28 }
 0x260   : > { %v2307_v2 = vpop.permute.xlu1 %2306  ;;  %v2305_v3 = vpop.permute.xlu0 %2304 }
 0x261   : > { %2323 = vst.msk [vmem:[#allocation2 + $0x7c] sm:$0xf] %vm576_vm8, %v2307_v2  ;;  %2322 = vst.msk [vmem:[#allocation2 + $0x78] sm:$0xf] %vm576_vm8, %v2305_v3  ;;  %vm416_vm8 = vcmask 253952  }
 0x262   : > { %417 = vst.msk [vmem:[#allocation5 + $0x4] sm:$0x1] %vm416_vm8, %v7382_v32  ;;  %419 = vst.msk [vmem:[#allocation5 + $0xc] sm:$0x1] %vm416_vm8, %v7382_v32 }
 0x263   : > { %421 = vst.msk [vmem:[#allocation5 + $0x14] sm:$0x1] %vm416_vm8, %v7382_v32  ;;  %423 = vst.msk [vmem:[#allocation5 + $0x1c] sm:$0x1] %vm416_vm8, %v7382_v32 }
 0x264   : > { %v2463_v4 = vpop.permute.xlu1 %2462  ;;  %v2461_v5 = vpop.permute.xlu0 %2460  ;;  %425 = vst.msk [vmem:[#allocation5 + $0x24] sm:$0x1] %vm416_vm8, %v7382_v32  ;;  %427 = vst.msk [vmem:[#allocation5 + $0x2c] sm:$0x1] %vm416_vm8, %v7382_v32 }
 0x265   : > { %2481 = vst.msk [vmem:[#allocation2 + $0x74] sm:$0xf] %vm625_vm9, %v2463_v4  ;;  %2480 = vst.msk [vmem:[#allocation2 + $0x70] sm:$0xf] %vm625_vm9, %v2461_v5  ;;  %v3309_v4 = vmul.f32 %v7182_v58, %v3015_v25 }
 0x266   : > { %429 = vst.msk [vmem:[#allocation5 + $0x34] sm:$0x1] %vm416_vm8, %v7382_v32  ;;  %431 = vst.msk [vmem:[#allocation5 + $0x3c] sm:$0x1] %vm416_vm8, %v7382_v32 }
 0x267   : > { %433 = vst.msk [vmem:[#allocation5 + $0x44] sm:$0x1] %vm416_vm8, %v7382_v32  ;;  %435 = vst.msk [vmem:[#allocation5 + $0x4c] sm:$0x1] %vm416_vm8, %v7382_v32 }
 0x268   : > { %v2467_v6 = vpop.permute.xlu1 %2466  ;;  %v2465_v7 = vpop.permute.xlu0 %2464 }
 0x269   : > { %2483 = vst.msk [vmem:[#allocation2 + $0x7c] sm:$0xf] %vm625_vm9, %v2467_v6  ;;  %2482 = vst.msk [vmem:[#allocation2 + $0x78] sm:$0xf] %vm625_vm9, %v2465_v7  ;;  %v6863_v6 = vpack.c.bf16 %v3311_v0, %v3311_v0  ;;  %vm3404_vm9 = vcmask 254080  }
 0x26c   : > { %v2511_v8 = vpop.permute.xlu1 %2510  ;;  %v2509_v9 = vpop.permute.xlu0 %2508 }
 0x26d   : > { %2529 = vst.msk [vmem:[#allocation2 + $0x74] sm:$0xf] %vm674_vm10, %v2511_v8  ;;  %2528 = vst.msk [vmem:[#allocation2 + $0x70] sm:$0xf] %vm674_vm10, %v2509_v9  ;;  %v6861_v9 = vpack.c.bf16 %v3309_v4, %v3309_v4 }
 0x270   : > { %v2515_v10 = vpop.permute.xlu1 %2514  ;;  %v2513_v13 = vpop.permute.xlu0 %2512 }
 0x271   : > { %2531 = vst.msk [vmem:[#allocation2 + $0x7c] sm:$0xf] %vm674_vm10, %v2515_v10  ;;  %2530 = vst.msk [vmem:[#allocation2 + $0x78] sm:$0xf] %vm674_vm10, %v2513_v13  ;;  %v3435_v10 = vshrl.u32 %v6863_v6, 16 }
 0x272   : > { %vm8650_vm10 = vmand %vm3404_vm9, %vm377_vm5  ;;  %vm4360_vm9 = vcmask 913152  }
 0x274   : > { %v2559_v11 = vpop.permute.xlu1 %2558  ;;  %v2557_v23 = vpop.permute.xlu0 %2556 }
 0x275   : > { %2577 = vst.msk [vmem:[#allocation2 + $0x74] sm:$0xf] %vm723_vm11, %v2559_v11  ;;  %2576 = vst.msk [vmem:[#allocation2 + $0x70] sm:$0xf] %vm723_vm11, %v2557_v23  ;;  %v3385_v11 = vshrl.u32 %v6861_v9, 16 }
 0x277   : > { %v3387_v19 = vrot.slane %v3385_v11, 7 }
 0x278   : > { %v2563_v12 = vpop.permute.xlu1 %2562  ;;  %v2561_v14 = vpop.permute.xlu0 %2560 }
 0x279   : > { %2579 = vst.msk [vmem:[#allocation2 + $0x7c] sm:$0xf] %vm723_vm11, %v2563_v12  ;;  %2578 = vst.msk [vmem:[#allocation2 + $0x78] sm:$0xf] %vm723_vm11, %v2561_v14  ;;  %v3437_v14 = vrot.slane %v3435_v10, 7  ;;  %v3391_v55 = vrot.slane %v3387_v19, 4 }
 0x27a   : > { %vm3572_vm11 = vcmask 388352  }
 0x27c   : > { %v2719_v15 = vpop.permute.xlu1 %2718  ;;  %v2717_v37 = vpop.permute.xlu0 %2716 }
 0x27d   : > { %2737 = vst.msk [vmem:[#allocation2 + $0x74] sm:$0xf] %vm772_vm12, %v2719_v15  ;;  %2736 = vst.msk [vmem:[#allocation2 + $0x70] sm:$0xf] %vm772_vm12, %v2717_v37  ;;  %v3438_v15 = vshll.u32 %v6863_v6, 16 }
 0x27f   : > { %v3440_v42 = vor.u32 %v3438_v15, %v3437_v14 }
 0x280   : > { %v2723_v16 = vpop.permute.xlu1 %2722  ;;  %v2721_v17 = vpop.permute.xlu0 %2720 }
 0x281   : > { %2739 = vst.msk [vmem:[#allocation2 + $0x7c] sm:$0xf] %vm772_vm12, %v2723_v16  ;;  %2738 = vst.msk [vmem:[#allocation2 + $0x78] sm:$0xf] %vm772_vm12, %v2721_v17  ;;  %v379_v16 = vld [vmem:[#allocation3 + $0x4] sm:$0x1] }
 0x282   : > { %v380_v18 = vsel %vm8605_vm7, 0, %v379_v16  ;;  %vm3637_vm12 = vcmask 519552  }
 0x283   : > { %381 = vst [vmem:[#allocation3 + $0x4] sm:$0x1] %v380_v18  ;;  %vm8794_vm14 = vmand %vm3637_vm12, %vm3399_vm1 }
 0x284   : > { %v7080_v22 = vld [vmem:[#allocation2 + $0x70] sm:$0xff]  }
 0x285   : > { %7004 = vmatprep.mubr.msk.bf16.mxu0 %vm2895_vm13, %v7080_v22 }
 0x288   : > { %v7081_v30 = vld [vmem:[#allocation2 + $0x78] sm:$0xff]  }
 0x289   : > { %7005 = vmatmul.mubr.msk.bf16.gmra.mrb[28].mxu0 %vm2895_vm13, %v7081_v30  ;;  %vm3642_vm13 = vcmask 516480  }
 0x28a   : > { %vm8799_vm4 = vmand %vm3642_vm13, %vm377_vm5  ;;  %vm4701_vm13 = vcmask 130048  }
 0x290   : > { %v6994_v26 = vpop.f32.mrb[16].mxu0 }
 0x291   : > { %v8582_v29 = vadd.f32 %v8468_v56, %v6994_v26  ;;  %v3046_v31 = vpop.f32.mrb[17].mxu0 }
 0x292   : > { %v3047_v34 = vadd.f32 %v8468_v56, %v3046_v31  ;;  %v6995_v35 = vpop.f32.mrb[18].mxu0 }
 0x293   : > { %v6691_v38 = vmul.f32 -1.442695, %v8582_v29  ;;  %v3049_v39 = vpop.f32.mrb[19].mxu0  ;;  %v8599_v51 = vadd.f32 %v8468_v56, %v6995_v35 }
 0x294   : > { %v6689_v41 = vmul.f32 -1.442695, %v3047_v34  ;;  %v3050_v44 = vadd.f32 %v8468_v56, %v3049_v39 }
 0x295   : > { %v6692_v60 = vmul.f32 -1.442695, %v8599_v51 }
 0x296   : > { %7183 = vpow2.f32 %v6689_v41  ;;  %v6690_v49 = vmul.f32 -1.442695, %v3050_v44  ;;  %v3441_v41 = vrot.slane %v3437_v14, 4  ;;  %v8671_v14 = vadd.f32 %v8468_v56, %v8532_v43 }
 0x297   : > { %7185 = vpow2.f32 %v6691_v38 }
 0x298   : > { %7187 = vpow2.f32 %v6690_v49 }
 0x299   : > { %7189 = vrcp.f32 %v3216_v45  ;;  %v391_v45 = vld [vmem:[#allocation3 + $0x1c] sm:$0x1] }
 0x29a   : > { %7191 = vpow2.f32 %v6686_v46 }
 0x29f   : > { %v3420_v52 = vpop.permute.xlu0 %3419 }
 0x2a0   : > { %v3426_v57 = vsel %vm8594_vm2, %v3420_v52, %v3425_v53  ;;  %v7184_v59 = vpop.eup %7183 }
 0x2a1   : > { %3427 = vst [vmem:[#allocation3 + $0x8] sm:$0xf] %v3426_v57  ;;  %v7186_v61 = vpop.eup %7185  ;;  %v3221_v62 = vadd.f32 1.0, %v7184_v59 }
 0x2a2   : > { %v7188_v63 = vpop.eup %7187  ;;  %v3223_v5 = vadd.f32 1.0, %v7186_v61 }
 0x2a3   : > { %v7190_v1 = vpop.eup %7189  ;;  %7193 = vrcp.f32 %v3221_v62  ;;  %v3222_v2 = vadd.f32 1.0, %v7188_v63  ;;  %v3422_v62 = vpop.permute.xlu0 %3421 }
 0x2a4   : > { %v7192_v3 = vpop.eup %7191  ;;  %7195 = vpow2.f32 %v6692_v60  ;;  %v3312_v7 = vmul.f32 %v7190_v1, %v3026_v21  ;;  %v3388_v21 = vshll.u32 %v6861_v9, 16  ;;  %v387_v9 = vld [vmem:[#allocation3 + $0x14] sm:$0x1] }
 0x2a5   : > { %7197 = vrcp.f32 %v3222_v2  ;;  %v3218_v8 = vadd.f32 1.0, %v7192_v3  ;;  %v388_v10 = vsel %vm8605_vm7, 0, %v387_v9 }
 0x2a6   : > { %7199 = vrcp.f32 %v3223_v5  ;;  %v6864_v13 = vpack.c.bf16 %v3312_v7, %v3312_v7  ;;  %v3390_v31 = vor.u32 %v3388_v21, %v3387_v19  ;;  %389 = vst [vmem:[#allocation3 + $0x14] sm:$0x1] %v388_v10 }
 0x2a7   : > { %7201 = vrcp.f32 %v3218_v8 }
 0x2a8   : > { %v3457_v37 = vshrl.u32 %v6864_v13, 16  ;;  %v3460_v24 = vshll.u32 %v6864_v13, 16 }
 0x2aa   : > { %v3459_v40 = vrot.slane %v3457_v37, 7  ;;  %v6685_v37 = vmul.f32 -1.442695, %v8671_v14 }
 0x2ac   : > { %v3463_v49 = vrot.slane %v3459_v40, 4 }
 0x2ad   : > { %v7194_v23 = vpop.eup %7193 }
 0x2ae   : > { %v7196_v12 = vpop.eup %7195  ;;  %v3317_v28 = vmul.f32 %v7194_v23, %v3047_v34  ;;  %v3462_v34 = vor.u32 %v3460_v24, %v3459_v40 }
 0x2af   : > { %v7198_v17 = vpop.eup %7197  ;;  %v3224_v30 = vadd.f32 1.0, %v7196_v12  ;;  %v8667_v12 = vadd.f32 %v8468_v56, %v8530_v20 }
 0x2b0   : > { %v6869_v22 = vpack.c.bf16 %v3317_v28, %v3317_v28  ;;  %v3318_v36 = vmul.f32 %v7198_v17, %v3050_v44  ;;  %v7200_v27 = vpop.eup %7199  ;;  %v383_v44 = vld [vmem:[#allocation3 + $0xc] sm:$0x1]  ;;  %v8677_v28 = vadd.f32 %v8468_v56, %v8536_v47 }
 0x2b1   : > { %v7202_v50 = vpop.eup %7201  ;;  %7203 = vrcp.f32 %v3224_v30  ;;  %v3319_v35 = vmul.f32 %v7200_v27, %v8582_v29  ;;  %v384_v29 = vsel %vm8605_vm7, 0, %v383_v44  ;;  %v6687_v15 = vmul.f32 -1.442695, %v8667_v12 }
 0x2b2   : > { %v6870_v26 = vpack.c.bf16 %v3318_v36, %v3318_v36  ;;  %3569 = vrot.lane.b32.xlu1 %v6869_v22, %s7386_s27  ;;  %v3314_v38 = vmul.f32 %v7202_v50, %v8586_v33  ;;  %v392_v33 = vsel %vm8605_vm7, 0, %v391_v45  ;;  %385 = vst [vmem:[#allocation3 + $0xc] sm:$0x1] %v384_v29  ;;  %v6688_v16 = vmul.f32 -1.442695, %v8677_v28 }
 0x2b3   : > { %v6871_v39 = vpack.c.bf16 %v3319_v35, %v3319_v35  ;;  %393 = vst [vmem:[#allocation3 + $0x1c] sm:$0x1] %v392_v33 }
 0x2b4   : > { %3576 = vrot.lane.b32.xlu0 %v6870_v26, %s7386_s27  ;;  %v6866_v46 = vpack.c.bf16 %v3314_v38, %v3314_v38 }
 0x2b6   : > { %3442 = vrot.lane.b32.xlu1 %v3440_v42, %s7375_s11  ;;  %v3502_v53 = vshrl.u32 %v6866_v46, 16  ;;  %v3505_v59 = vshll.u32 %v6866_v46, 16 }
 0x2b8   : > { %3392 = vrot.lane.b32.xlu0 %v3390_v31, %s7375_s11  ;;  %v8646_v58 = vrot.slane %v3502_v53, 7 }
 0x2b9   : > { %v3428_v61 = vld [vmem:[#allocation3 + $0xc] sm:$0x1] }
 0x2ba   : > { %3464 = vrot.lane.b32.xlu1 %v3462_v34, %s7375_s11  ;;  %v3429_v63 = vsel %vm8650_vm10, %v3422_v62, %v3428_v61  ;;  %v3507_v1 = vor.u32 %v3505_v59, %v8646_v58 }
 0x2bb   : > { %v7204_v52 = vpop.eup %7203  ;;  %3430 = vst [vmem:[#allocation3 + $0xc] sm:$0x1] %v3429_v63  ;;  %v3401_v63 = vld [vmem:[#allocation3] sm:$0xf] }
 0x2bc   : > { %3583 = vrot.lane.b32.xlu0 %v6871_v39, %s7386_s27  ;;  %v3320_v57 = vmul.f32 %v7204_v52, %v8599_v51 }
 0x2be   : > { %3444 = vrot.lane.b32.xlu1 %v3441_v41, %s7375_s11  ;;  %v6872_v0 = vpack.c.bf16 %v3320_v57, %v3320_v57 }
 0x2c0   : > { %3466 = vrot.lane.b32.xlu0 %v3463_v49, %s7375_s11 }
 0x2c4   : > { %3394 = vrot.lane.b32.xlu0 %v3391_v55, %s7375_s11 }
 0x2c8   : > { %3589 = vrot.lane.b32.xlu0 %v6872_v0, %s7386_s27 }
 0x2cc   : > { %3509 = vrot.lane.b32.xlu0 %v3507_v1, %s7375_s11 }
 0x2d0   : > { %v6998_v51 = vpop.f32.mrb[20].mxu0 }
 0x2d1   : > { %v3062_v2 = vpop.f32.mrb[21].mxu0  ;;  %v8701_v38 = vadd.f32 %v8468_v56, %v6998_v51 }
 0x2d2   : > { %v3063_v3 = vadd.f32 %v8468_v56, %v3062_v2  ;;  %v8660_v4 = vpop.f32.mrb[22].mxu0  ;;  %v3470_v2 = vld [vmem:[#allocation3 + $0x18] sm:$0xf] }
 0x2d3   : > { %v3065_v5 = vpop.f32.mrb[23].mxu0  ;;  %v6695_v49 = vmul.f32 -1.442695, %v8701_v38 }
 0x2d4   : > { %v6693_v6 = vmul.f32 -1.442695, %v3063_v3  ;;  %v8691_v42 = vadd.f32 %v8468_v56, %v3065_v5 }
 0x2d6   : > { %7205 = vpow2.f32 %v6693_v6  ;;  %v6694_v50 = vmul.f32 -1.442695, %v8691_v42 }
 0x2e0   : > { %v7206_v7 = vpop.eup %7205 }
 0x2e1   : > { %v3225_v8 = vadd.f32 1.0, %v7206_v7 }
 0x2e3   : > { %7207 = vrcp.f32 %v3225_v8 }
 0x2e4   : > { %7209 = vpow2.f32 %v6687_v15 }
 0x2e5   : > { %7211 = vpow2.f32 %v6685_v37 }
 0x2e6   : > { %7213 = vpow2.f32 %v6688_v16 }
 0x2ed   : > { %v7208_v13 = vpop.eup %7207 }
 0x2ee   : > { %v3321_v11 = vmul.f32 %v7208_v13, %v3063_v3  ;;  %v7210_v43 = vpop.eup %7209  ;;  %v3451_v13 = vld [vmem:[#allocation3 + $0x14] sm:$0x1] }
 0x2ef   : > { %v7212_v22 = vpop.eup %7211  ;;  %v3219_v40 = vadd.f32 1.0, %v7210_v43 }
 0x2f0   : > { %v6873_v23 = vpack.c.bf16 %v3321_v11, %v3321_v11  ;;  %v3217_v27 = vadd.f32 1.0, %v7212_v22  ;;  %v7214_v35 = vpop.eup %7213 }
 0x2f1   : > { %v3220_v41 = vadd.f32 1.0, %v7214_v35 }
 0x2f2   : > { %3596 = vrot.lane.b32.xlu0 %v6873_v23, %s7386_s27  ;;  %v3473_v23 = vld [vmem:[#allocation3 + $0x1c] sm:$0x1] }
 0x314   : > { %v7002_v17 = vpop.f32.mrb[24].mxu0 }
 0x315   : > { %v3078_v18 = vpop.f32.mrb[25].mxu0  ;;  %v8684_v36 = vadd.f32 %v8468_v56, %v7002_v17 }
 0x316   : > { %v8681_v20 = vadd.f32 %v8468_v56, %v3078_v18  ;;  %v7003_v19 = vpop.f32.mrb[26].mxu0 }
 0x317   : > { %v3081_v21 = vpop.f32.mrb[27].mxu0  ;;  %v8694_v24 = vadd.f32 %v8468_v56, %v7003_v19  ;;  %v6699_v31 = vmul.f32 -1.442695, %v8684_v36 }
 0x318   : > { %v6697_v30 = vmul.f32 -1.442695, %v8681_v20  ;;  %v8688_v47 = vadd.f32 %v8468_v56, %v3081_v21  ;;  %v3448_v56 = vld [vmem:[#allocation3 + $0x10] sm:$0xf] }
 0x319   : > { %v6700_v34 = vmul.f32 -1.442695, %v8694_v24 }
 0x31a   : > { %7215 = vpow2.f32 %v6697_v30  ;;  %v6698_v26 = vmul.f32 -1.442695, %v8688_v47 }
 0x31c   : > { %7217 = vpow2.f32 %v6698_v26 }
 0x31d   : > { %7219 = vrcp.f32 %v3219_v40  ;;  %v3406_v40 = vld [vmem:[#allocation3 + $0x4] sm:$0x1] }
 0x31e   : > { %7221 = vrcp.f32 %v3217_v27 }
 0x31f   : > { %7223 = vpow2.f32 %v6699_v31 }
 0x320   : > { %7225 = vpow2.f32 %v6694_v50 }
 0x321   : > { %7227 = vpow2.f32 %v6700_v34 }
 0x324   : > { %v7216_v39 = vpop.eup %7215  ;;  %v3570_v45 = vpop.permute.xlu1 %3569 }
 0x325   : > { %v3229_v44 = vadd.f32 1.0, %v7216_v39  ;;  %3573 = vst.msk [vmem:[#allocation3 + $0x8] sm:$0xf] %vm3572_vm11, %v3570_v45 }
 0x326   : > { %v7218_v46 = vpop.eup %7217  ;;  %v3577_v33 = vpop.permute.xlu0 %3576 }
 0x327   : > { %7229 = vrcp.f32 %v3229_v44  ;;  %v3230_v29 = vadd.f32 1.0, %v7218_v46  ;;  %v7220_v52 = vpop.eup %7219 }
 0x328   : > { %7231 = vrcp.f32 %v3220_v41  ;;  %v7222_v53 = vpop.eup %7221  ;;  %v3443_v55 = vpop.permute.xlu1 %3442  ;;  %v3315_v8 = vmul.f32 %v7220_v52, %v8667_v12 }
 0x329   : > { %7233 = vrcp.f32 %v3230_v29  ;;  %v7224_v57 = vpop.eup %7223  ;;  %v3449_v59 = vsel %vm8594_vm2, %v3443_v55, %v3448_v56  ;;  %v3313_v5 = vmul.f32 %v7222_v53, %v8671_v14 }
 0x32a   : > { %7235 = vpow2.f32 %v6695_v49  ;;  %v7226_v61 = vpop.eup %7225  ;;  %3450 = vst [vmem:[#allocation3 + $0x10] sm:$0xf] %v3449_v59  ;;  %v3393_v62 = vpop.permute.xlu0 %3392  ;;  %v3231_v51 = vadd.f32 1.0, %v7224_v57  ;;  %v6867_v12 = vpack.c.bf16 %v3315_v8, %v3315_v8  ;;  %v395_v59 = vld [vmem:[#allocation3 + $0x24] sm:$0x1] }
 0x32b   : > { %v7228_v0 = vpop.eup %7227  ;;  %3579 = vst.msk [vmem:[#allocation3 + $0x10] sm:$0xf] %vm3572_vm11, %v3577_v33  ;;  %v3402_v1 = vsel %vm8594_vm2, %v3393_v62, %v3401_v63  ;;  %v3226_v6 = vadd.f32 1.0, %v7226_v61  ;;  %v6865_v16 = vpack.c.bf16 %v3313_v5, %v3313_v5  ;;  %v396_v62 = vsel %vm8605_vm7, 0, %v395_v59 }
 0x32c   : > { %3403 = vst [vmem:[#allocation3] sm:$0xf] %v3402_v1  ;;  %v3465_v3 = vpop.permute.xlu1 %3464  ;;  %v3232_v9 = vadd.f32 1.0, %v7228_v0  ;;  %7237 = vrcp.f32 %v3231_v51  ;;  %v3525_v31 = vshrl.u32 %v6867_v12, 16  ;;  %v3528_v55 = vshll.u32 %v6867_v12, 16 }
 0x32d   : > { %v3471_v7 = vsel %vm8594_vm2, %v3465_v3, %v3470_v2  ;;  %7239 = vrcp.f32 %v3226_v6  ;;  %v3480_v26 = vshrl.u32 %v6865_v16, 16  ;;  %v3483_v46 = vshll.u32 %v6865_v16, 16  ;;  %397 = vst [vmem:[#allocation3 + $0x24] sm:$0x1] %v396_v62  ;;  %v3515_v2 = vld [vmem:[#allocation3 + $0x28] sm:$0xf] }
 0x32e   : > { %3472 = vst [vmem:[#allocation3 + $0x18] sm:$0xf] %v3471_v7  ;;  %v3584_v10 = vpop.permute.xlu0 %3583  ;;  %7241 = vrcp.f32 %v3232_v9 }
 0x32f   : > { %3586 = vst.msk [vmem:[#allocation3 + $0x18] sm:$0xf] %vm3572_vm11, %v3584_v10 }
 0x330   : > { %v3445_v15 = vpop.permute.xlu1 %3444 }
 0x331   : > { %v7230_v11 = vpop.eup %7229  ;;  %v3452_v17 = vsel %vm8650_vm10, %v3445_v15, %v3451_v13 }
 0x332   : > { %v7232_v37 = vpop.eup %7231  ;;  %v3325_v14 = vmul.f32 %v7230_v11, %v8681_v20  ;;  %v3467_v19 = vpop.permute.xlu0 %3466  ;;  %3453 = vst [vmem:[#allocation3 + $0x14] sm:$0x1] %v3452_v17 }
 0x333   : > { %v7234_v18 = vpop.eup %7233  ;;  %v3474_v30 = vsel %vm8650_vm10, %v3467_v19, %v3473_v23  ;;  %v3316_v50 = vmul.f32 %v7232_v37, %v8677_v28  ;;  %v8726_v28 = vrot.slane %v3525_v31, 7 }
 0x334   : > { %v7236_v43 = vpop.eup %7235  ;;  %v6877_v21 = vpack.c.bf16 %v3325_v14, %v3325_v14  ;;  %v3326_v22 = vmul.f32 %v7234_v18, %v8688_v47  ;;  %3475 = vst [vmem:[#allocation3 + $0x1c] sm:$0x1] %v3474_v30  ;;  %v3482_v47 = vrot.slane %v3480_v26, 7  ;;  %v403_v26 = vld [vmem:[#allocation3 + $0x34] sm:$0x1] }
 0x335   : > { %v3227_v34 = vadd.f32 1.0, %v7236_v43  ;;  %v6868_v52 = vpack.c.bf16 %v3316_v50, %v3316_v50  ;;  %v3530_v3 = vor.u32 %v3528_v55, %v8726_v28 }
 0x336   : > { %v3624_v27 = vshrl.u32 %v6877_v21, 16  ;;  %v6878_v20 = vpack.c.bf16 %v3326_v22, %v3326_v22  ;;  %v3395_v35 = vpop.permute.xlu0 %3394  ;;  %v3627_v41 = vshll.u32 %v6877_v21, 16  ;;  %v7238_v33 = vpop.eup %7237  ;;  %v3485_v63 = vor.u32 %v3483_v46, %v3482_v47 }
 0x337   : > { %v3407_v45 = vsel %vm8650_vm10, %v3395_v35, %v3406_v40  ;;  %7243 = vrcp.f32 %v3227_v34  ;;  %v7240_v56 = vpop.eup %7239  ;;  %v3327_v0 = vmul.f32 %v7238_v33, %v8684_v36  ;;  %v3547_v1 = vshrl.u32 %v6868_v52, 16  ;;  %v7362_v35 = vld [vmem:[%s9555_s2] ss:$0 sm:$0xff] }
 0x338   : > { %v3626_v39 = vrot.slane %v3624_v27, 7  ;;  %v3650_v44 = vshrl.u32 %v6878_v20, 16  ;;  %3408 = vst [vmem:[#allocation3 + $0x4] sm:$0x1] %v3407_v45  ;;  %v7242_v61 = vpop.eup %7241  ;;  %v3322_v5 = vmul.f32 %v7240_v56, %v8691_v42  ;;  %v3550_v9 = vshll.u32 %v6868_v52, 16 }
 0x339   : > { %v3328_v6 = vmul.f32 %v7242_v61, %v8694_v24  ;;  %v6879_v8 = vpack.c.bf16 %v3327_v0, %v3327_v0  ;;  %v8740_v10 = vrot.slane %v3547_v1, 7  ;;  %v3653_v23 = vshll.u32 %v6878_v20, 16  ;;  %v399_v42 = vld [vmem:[#allocation3 + $0x2c] sm:$0x1] }
 0x33a   : > { %v3629_v49 = vor.u32 %v3627_v41, %v3626_v39  ;;  %v3652_v29 = vrot.slane %v3650_v44, 7  ;;  %v8724_v53 = vpop.permute.xlu0 %3589  ;;  %v3630_v36 = vrot.slane %v3626_v39, 4  ;;  %v6874_v13 = vpack.c.bf16 %v3322_v5, %v3322_v5 }
 0x33b   : > { %v6880_v11 = vpack.c.bf16 %v3328_v6, %v3328_v6  ;;  %v400_v15 = vsel %vm8605_vm7, 0, %v399_v42  ;;  %v3673_v37 = vshrl.u32 %v6879_v8, 16  ;;  %v3552_v14 = vor.u32 %v3550_v9, %v8740_v10  ;;  %v407_v6 = vld [vmem:[#allocation3 + $0x3c] sm:$0x1] }
 0x33c   : > { %3631 = vrot.lane.b32.xlu1 %v3629_v49, %s7381_s20  ;;  %v3656_v57 = vrot.slane %v3652_v29, 4  ;;  %v3655_v16 = vor.u32 %v3653_v23, %v3652_v29  ;;  %401 = vst [vmem:[#allocation3 + $0x2c] sm:$0x1] %v400_v15  ;;  %v3486_v19 = vrot.slane %v3482_v47, 4  ;;  %v3676_v21 = vshll.u32 %v6879_v8, 16 }
 0x33d   : > { %v3695_v18 = vshrl.u32 %v6880_v11, 16  ;;  %v3675_v12 = vrot.slane %v3673_v37, 7  ;;  %v3508_v27 = vrot.slane %v8646_v58, 4  ;;  %v3698_v31 = vshll.u32 %v6880_v11, 16 }
 0x33e   : > { %3659 = vrot.lane.b32.xlu0 %v3656_v57, %s7381_s20  ;;  %v3510_v51 = vpop.permute.xlu0 %3509  ;;  %v3531_v58 = vrot.slane %v8726_v28, 4  ;;  %v3074_v29 = vadd.f32 %v7362_v35, %v8660_v4  ;;  %v408_v8 = vsel %vm8605_vm7, 0, %v407_v6 }
 0x33f   : > { %v3516_v7 = vsel %vm8594_vm2, %v3510_v51, %v3515_v2  ;;  %v3697_v22 = vrot.slane %v3695_v18, 7  ;;  %v3678_v30 = vor.u32 %v3676_v21, %v3675_v12  ;;  %v3679_v20 = vrot.slane %v3675_v12, 4  ;;  %409 = vst [vmem:[#allocation3 + $0x3c] sm:$0x1] %v408_v8  ;;  %v3902_v25 = vld [vmem:[#allocation3 + $0x4] sm:$0x1] }
 0x340   : > { %3487 = vrot.lane.b32.xlu1 %v3485_v63, %s7375_s11  ;;  %3517 = vst [vmem:[#allocation3 + $0x28] sm:$0xf] %v3516_v7  ;;  %v6696_v57 = vmul.f32 -1.442695, %v3074_v29  ;;  %v4110_v8 = vld [vmem:[#allocation3] sm:$0xf] }
 0x341   : > { %v7244_v24 = vpop.eup %7243  ;;  %v3701_v40 = vrot.slane %v3697_v22, 4  ;;  %v3700_v50 = vor.u32 %v3698_v31, %v3697_v22  ;;  %v411_v31 = vld [vmem:[#allocation3 + $0x44] sm:$0x1] }
 0x342   : > { %3532 = vrot.lane.b32.xlu0 %v3530_v3, %s7375_s11  ;;  %v3323_v17 = vmul.f32 %v7244_v24, %v8701_v38  ;;  %v404_v38 = vsel %vm8605_vm7, 0, %v403_v26 }
 0x343   : > { %405 = vst [vmem:[#allocation3 + $0x34] sm:$0x1] %v404_v38 }
 0x344   : > { %3633 = vrot.lane.b32.xlu1 %v3630_v36, %s7381_s20  ;;  %v6875_v43 = vpack.c.bf16 %v3323_v17, %v3323_v17 }
 0x346   : > { %3602 = vrot.lane.b32.xlu0 %v6874_v13, %s7386_s27 }
 0x348   : > { %3657 = vrot.lane.b32.xlu1 %v3655_v16, %s7381_s20 }
 0x34a   : > { %3554 = vrot.lane.b32.xlu0 %v3552_v14, %s7375_s11 }
 0x34c   : > { %3489 = vrot.lane.b32.xlu1 %v3486_v19, %s7375_s11 }
 0x34e   : > { %3609 = vrot.lane.b32.xlu0 %v6875_v43, %s7386_s27 }
 0x350   : > { %3680 = vrot.lane.b32.xlu1 %v3678_v30, %s7381_s20 }
 0x352   : > { %3704 = vrot.lane.b32.xlu0 %v3701_v40, %s7381_s20  ;;  %v3553_v40 = vrot.slane %v8740_v10, 4 }
 0x354   : > { %3511 = vrot.lane.b32.xlu1 %v3508_v27, %s7375_s11 }
 0x358   : > { %3682 = vrot.lane.b32.xlu1 %v3679_v20, %s7381_s20 }
 0x35c   : > { %v7006_v34 = vpop.f32.mrb[28].mxu0  ;;  %3702 = vrot.lane.b32.xlu1 %v3700_v50, %s7381_s20  ;;  %v412_v50 = vsel %vm8605_vm7, 0, %v411_v31  ;;  %vm4311_vm7 = vcmask 781952  }
 0x35d   : > { %v3103_v39 = vadd.f32 %v7362_v35, %v7006_v34  ;;  %v3094_v41 = vpop.f32.mrb[29].mxu0  ;;  %413 = vst [vmem:[#allocation3 + $0x44] sm:$0x1] %v412_v50 }
 0x35e   : > { %v3095_v44 = vadd.f32 %v7362_v35, %v3094_v41  ;;  %v7007_v45 = vpop.f32.mrb[30].mxu0 }
 0x35f   : > { %v6703_v47 = vmul.f32 -1.442695, %v3103_v39  ;;  %v3106_v46 = vadd.f32 %v7362_v35, %v7007_v45  ;;  %v3097_v49 = vpop.f32.mrb[31].mxu0 }
 0x360   : > { %v6701_v33 = vmul.f32 -1.442695, %v3095_v44  ;;  %v3098_v52 = vadd.f32 %v7362_v35, %v3097_v49  ;;  %3534 = vrot.lane.b32.xlu1 %v3531_v58, %s7375_s11 }
 0x361   : > { %7245 = vpow2.f32 %v6703_v47  ;;  %v6704_v56 = vmul.f32 -1.442695, %v3106_v46 }
 0x362   : > { %7247 = vpow2.f32 %v6701_v33  ;;  %v6702_v55 = vmul.f32 -1.442695, %v3098_v52 }
 0x363   : > { %7249 = vpow2.f32 %v6704_v56  ;;  %v3804_v56 = vld [vmem:[#allocation3] sm:$0xf] }
 0x364   : > { %7251 = vpow2.f32 %v6702_v55  ;;  %v3597_v59 = vpop.permute.xlu0 %3596  ;;  %v3927_v55 = vshll.u32 %v3902_v25, 16  ;;  %v3560_v25 = vld [vmem:[#allocation3 + $0x38] sm:$0xf] }
 0x365   : > { %3599 = vst.msk [vmem:[#allocation3 + $0x28] sm:$0xf] %vm3572_vm11, %v3597_v59  ;;  %7253 = vpow2.f32 %v6696_v57 }
 0x36b   : > { %v7246_v28 = vpop.eup %7245 }
 0x36c   : > { %v7248_v61 = vpop.eup %7247  ;;  %v3235_v62 = vadd.f32 1.0, %v7246_v28  ;;  %v4159_v28 = vld [vmem:[#allocation3] sm:$0xf] }
 0x36d   : > { %v7250_v63 = vpop.eup %7249  ;;  %v3233_v4 = vadd.f32 1.0, %v7248_v61  ;;  %v3852_v61 = vld [vmem:[#allocation3] sm:$0xf] }
 0x36e   : > { %v7252_v0 = vpop.eup %7251  ;;  %7255 = vrcp.f32 %v3235_v62  ;;  %v3236_v1 = vadd.f32 1.0, %v7250_v63  ;;  %v3929_v62 = vrot.slane %v3927_v55, 5  ;;  %v7083_v55 = vld [vmem:[%s9556_s3 + $0x8] sm:$0xff]  }
 0x36f   : > { %7257 = vrcp.f32 %v3233_v4  ;;  %v3234_v51 = vadd.f32 1.0, %v7252_v0  ;;  %v7254_v2 = vpop.eup %7253  ;;  %v4176_v4 = vshrl.u32 %v4159_v28, 16  ;;  %v4179_v0 = vshll.u32 %v4159_v28, 16 }
 0x370   : > { %7259 = vrcp.f32 %v3236_v1  ;;  %v3228_v3 = vadd.f32 1.0, %v7254_v2 }
 0x371   : > { %7261 = vrcp.f32 %v3234_v51  ;;  %v4160_v51 = vld [vmem:[#allocation3 + $0x4] sm:$0x1]  ;;  %v4178_v2 = vrot.slane %v4176_v4, 4 }
 0x372   : > { %7263 = vrcp.f32 %v3228_v3  ;;  %v4181_v3 = vrot.slane %v4179_v0, 5  ;;  %v4185_v6 = vshll.u32 %v4160_v51, 16  ;;  %v3686_v51 = vld [vmem:[#allocation3 + $0x18] sm:$0xf] }
 0x378   : > { %v7256_v5 = vpop.eup %7255 }
 0x379   : > { %v7258_v7 = vpop.eup %7257  ;;  %v3331_v42 = vmul.f32 %v7256_v5, %v3103_v39  ;;  %v4061_v5 = vld [vmem:[#allocation3] sm:$0xf] }
 0x37a   : > { %v7260_v36 = vpop.eup %7259  ;;  %v3329_v9 = vmul.f32 %v7258_v7, %v3095_v44  ;;  %v3901_v44 = vld [vmem:[#allocation3] sm:$0xf]  ;;  %v4182_v7 = vor.u32 %v4181_v3, %v4178_v2 }
 0x37b   : > { %v7262_v13 = vpop.eup %7261  ;;  %v3332_v15 = vmul.f32 %v7260_v36, %v3106_v46  ;;  %v6883_v18 = vpack.c.bf16 %v3331_v42, %v3331_v42  ;;  %v3918_v58 = vshrl.u32 %v3901_v44, 16  ;;  %v3921_v47 = vshll.u32 %v3901_v44, 16  ;;  %v3639_v42 = vld [vmem:[#allocation3 + $0x8] sm:$0xf] }
 0x37c   : > { %v6881_v11 = vpack.c.bf16 %v3329_v9, %v3329_v9  ;;  %v3330_v23 = vmul.f32 %v7262_v13, %v3098_v52  ;;  %v7264_v22 = vpop.eup %7263  ;;  %v4187_v36 = vrot.slane %v4185_v6, 5  ;;  %v4183_v9 = vrot.slane %v4182_v7, 4 }
 0x37d   : > { %v6884_v19 = vpack.c.bf16 %v3332_v15, %v3332_v15  ;;  %v3324_v26 = vmul.f32 %v7264_v22, %v3074_v29  ;;  %v3763_v38 = vshrl.u32 %v6883_v18, 16  ;;  %v3766_v45 = vshll.u32 %v6883_v18, 16  ;;  %v3493_v18 = vld [vmem:[#allocation3 + $0x20] sm:$0xf] }
 0x37e   : > { %v3718_v24 = vshrl.u32 %v6881_v11, 16  ;;  %v6882_v37 = vpack.c.bf16 %v3330_v23, %v3330_v23  ;;  %v3721_v14 = vshll.u32 %v6881_v11, 16  ;;  %v3920_v29 = vrot.slane %v3918_v58, 4 }
 0x37f   : > { %v3785_v27 = vshrl.u32 %v6884_v19, 16  ;;  %v6876_v34 = vpack.c.bf16 %v3324_v26, %v3324_v26  ;;  %v3765_v35 = vrot.slane %v3763_v38, 7  ;;  %v3788_v10 = vshll.u32 %v6884_v19, 16  ;;  %v3538_v19 = vld [vmem:[#allocation3 + $0x30] sm:$0xf] }
 0x380   : > { %v3720_v16 = vrot.slane %v3718_v24, 7  ;;  %v3740_v17 = vshrl.u32 %v6882_v37, 16  ;;  %v3743_v30 = vshll.u32 %v6882_v37, 16  ;;  %v3923_v33 = vrot.slane %v3921_v47, 5  ;;  %v3666_v37 = vld [vmem:[#allocation3 + $0x14] sm:$0x1] }
 0x381   : > { %v3787_v39 = vrot.slane %v3785_v27, 7  ;;  %v3768_v46 = vor.u32 %v3766_v45, %v3765_v35  ;;  %v3769_v52 = vrot.slane %v3765_v35, 4  ;;  %v4188_v13 = vsel %vm7640_vm6, %v4183_v9, %v4187_v36  ;;  %v7084_v9 = vld [vmem:[%s9556_s3 + $0x10] sm:$0xff]  }
 0x382   : > { %v3723_v12 = vor.u32 %v3721_v14, %v3720_v16  ;;  %v3742_v43 = vrot.slane %v3740_v17, 7  ;;  %v3724_v21 = vrot.slane %v3720_v16, 4  ;;  %v3924_v57 = vor.u32 %v3923_v33, %v3920_v29  ;;  %v3496_v33 = vld [vmem:[#allocation3 + $0x24] sm:$0x1] }
 0x383   : > { %v3790_v49 = vor.u32 %v3788_v10, %v3787_v39  ;;  %v3791_v59 = vrot.slane %v3787_v39, 4 }
 0x384   : > { %3725 = vrot.lane.b32.xlu1 %v3723_v12, %s7381_s20  ;;  %3727 = vrot.lane.b32.xlu0 %v3724_v21, %s7381_s20  ;;  %v3745_v20 = vor.u32 %v3743_v30, %v3742_v43  ;;  %v3746_v41 = vrot.slane %v3742_v43, 4  ;;  %v3925_v63 = vrot.slane %v3924_v57, 4  ;;  %v3644_v30 = vld [vmem:[#allocation3 + $0xc] sm:$0x1] }
 0x386   : > { %v3930_v1 = vsel %vm7640_vm6, %v3925_v63, %v3929_v62 }
 0x388   : > { %3556 = vrot.lane.b32.xlu1 %v3553_v40, %s7375_s11  ;;  %3747 = vrot.lane.b32.xlu0 %v3745_v20, %s7381_s20 }
 0x38c   : > { %3615 = vrot.lane.b32.xlu1 %v6876_v34, %s7386_s27  ;;  %3749 = vrot.lane.b32.xlu0 %v3746_v41, %s7381_s20  ;;  %v3663_v41 = vld [vmem:[#allocation3 + $0x10] sm:$0xf] }
 0x390   : > { %3770 = vrot.lane.b32.xlu1 %v3768_v46, %s7381_s20  ;;  %3792 = vrot.lane.b32.xlu0 %v3790_v49, %s7381_s20  ;;  %v7082_v49 = vld [vmem:[%s9556_s3] sm:$0xff]  }
 0x391   : > { %4715 = vmatpush1.bf16.msra.mxu1 %v7082_v49 }
 0x392   : > { %4716 = vmatprep.subr.bf16.mxu1 %v7382_v32 }
 0x394   : > { %3772 = vrot.lane.b32.xlu1 %v3769_v52, %s7381_s20  ;;  %3820 = vrot.lane.b32.xlu0 %v3804_v56, %s7383_s24 }
 0x395   : > { %4717 = vmatpush1.bf16.msra.mxu1 %v7083_v55 }
 0x396   : > { %4718 = vmatprep.subr.bf16.mxu1 %v7382_v32 }
 0x398   : > { %3794 = vrot.lane.b32.xlu1 %v3791_v59, %s7381_s20  ;;  %3868 = vrot.lane.b32.xlu0 %v3852_v61, %s7374_s22 }
 0x399   : > { %4719 = vmatpush1.bf16.msra.mxu1 %v7084_v9 }
 0x39a   : > { %4720 = vmatprep.subr.bf16.mxu1 %v7382_v32 }
 0x39c   : > { %4029 = vrot.lane.b32.xlu0 %v3930_v1, %s7374_s22 }
 0x3a0   : > { %4077 = vrot.lane.b32.xlu0 %v4061_v5, %s7386_s27 }
 0x3a4   : > { %4126 = vrot.lane.b32.xlu0 %v4110_v8, %s7379_s17 }
 0x3a8   : > { %4287 = vrot.lane.b32.xlu0 %v4188_v13, %s7379_s17 }
 0x3ae   : > { %v3632_v23 = vpop.permute.xlu1 %3631 }
 0x3af   : > { %v3640_v15 = vsel %vm8794_vm14, %v3632_v23, %v3639_v42 }
 0x3b0   : > { %3641 = vst [vmem:[#allocation3 + $0x8] sm:$0xf] %v3640_v15  ;;  %v3660_v16 = vpop.permute.xlu0 %3659  ;;  %v3518_v15 = vld [vmem:[#allocation3 + $0x2c] sm:$0x1] }
 0x3b1   : > { %v3667_v14 = vsel %vm8799_vm4, %v3660_v16, %v3666_v37 }
 0x3b2   : > { %3668 = vst [vmem:[#allocation3 + $0x14] sm:$0x1] %v3667_v14  ;;  %v3488_v17 = vpop.permute.xlu1 %3487 }
 0x3b3   : > { %v3494_v12 = vsel %vm8594_vm2, %v3488_v17, %v3493_v18 }
 0x3b4   : > { %3495 = vst [vmem:[#allocation3 + $0x20] sm:$0xf] %v3494_v12  ;;  %v3533_v43 = vpop.permute.xlu0 %3532 }
 0x3b5   : > { %3592 = vst.msk [vmem:[#allocation3 + $0x20] sm:$0xf] %vm3572_vm11, %v8724_v53  ;;  %v3539_v21 = vsel %vm8594_vm2, %v3533_v43, %v3538_v19 }
 0x3b6   : > { %3540 = vst [vmem:[#allocation3 + $0x30] sm:$0xf] %v3539_v21  ;;  %v3634_v22 = vpop.permute.xlu1 %3633  ;;  %v7085_v21 = vld [vmem:[%s9556_s3 + $0x18] sm:$0xff]  }
 0x3b7   : > { %v3645_v40 = vsel %vm8799_vm4, %v3634_v22, %v3644_v30  ;;  %v3805_v26 = vld [vmem:[#allocation3 + $0x8] sm:$0xf]  ;;  %4721 = vmatpush1.bf16.msra.mxu1 %v7085_v21 }
 0x3b8   : > { %v4320_v38 = vld [vmem:[#allocation3 + $0x8] sm:$0xf]  ;;  %3646 = vst [vmem:[#allocation3 + $0xc] sm:$0x1] %v3645_v40  ;;  %v3603_v27 = vpop.permute.xlu0 %3602  ;;  %3822 = vrot.lane.b32.xlu1 %v3805_v26, %s7383_s24  ;;  %4722 = vmatprep.subr.bf16.mxu1 %v7382_v32 }
 0x3b9   : > { %4336 = vrot.lane.b32.xlu0 %v4320_v38, %s7381_s20  ;;  %v3903_v20 = vld [vmem:[#allocation3 + $0x8] sm:$0xf]  ;;  %3605 = vst.msk [vmem:[#allocation3 + $0x30] sm:$0xf] %vm3572_vm11, %v3603_v27  ;;  %v3906_v43 = vld [vmem:[#allocation3 + $0x14] sm:$0x1] }
 0x3ba   : > { %v4418_v31 = vld [vmem:[#allocation3 + $0x8] sm:$0xf]  ;;  %v3932_v53 = vshrl.u32 %v3903_v20, 16  ;;  %v3935_v50 = vshll.u32 %v3903_v20, 16  ;;  %v3658_v39 = vpop.permute.xlu1 %3657 }
 0x3bb   : > { %v4435_v34 = vshrl.u32 %v4418_v31, 16  ;;  %v4438_v35 = vshll.u32 %v4418_v31, 16  ;;  %v3853_v44 = vld [vmem:[#allocation3 + $0x8] sm:$0xf]  ;;  %v3664_v45 = vsel %vm8794_vm14, %v3658_v39, %v3663_v41 }
 0x3bc   : > { %v4369_v10 = vld [vmem:[#allocation3 + $0x8] sm:$0xf]  ;;  %v3934_v58 = vrot.slane %v3932_v53, 4  ;;  %v3937_v47 = vrot.slane %v3935_v50, 5  ;;  %3665 = vst [vmem:[#allocation3 + $0x10] sm:$0xf] %v3664_v45  ;;  %v3555_v29 = vpop.permute.xlu0 %3554  ;;  %3870 = vrot.lane.b32.xlu1 %v3853_v44, %s7374_s22 }
 0x3bd   : > { %v4437_v46 = vrot.slane %v4435_v34, 4  ;;  %4385 = vrot.lane.b32.xlu0 %v4369_v10, %s7383_s24  ;;  %v4440_v52 = vrot.slane %v4438_v35, 5  ;;  %v3561_v56 = vsel %vm8594_vm2, %v3555_v29, %v3560_v25  ;;  %v4161_v61 = vld [vmem:[#allocation3 + $0x8] sm:$0xf]  ;;  %v3689_v44 = vld [vmem:[#allocation3 + $0x1c] sm:$0x1] }
 0x3be   : > { %3562 = vst [vmem:[#allocation3 + $0x38] sm:$0xf] %v3561_v56  ;;  %v3490_v57 = vpop.permute.xlu1 %3489  ;;  %v3938_v59 = vor.u32 %v3937_v47, %v3934_v58  ;;  %v4190_v2 = vshrl.u32 %v4161_v61, 16  ;;  %v4193_v3 = vshll.u32 %v4161_v61, 16  ;;  %v4062_v31 = vld [vmem:[#allocation3 + $0x8] sm:$0xf] }
 0x3bf   : > { %v4441_v28 = vor.u32 %v4440_v52, %v4437_v46  ;;  %v3497_v62 = vsel %vm8650_vm10, %v3490_v57, %v3496_v33  ;;  %v3904_v63 = vld [vmem:[#allocation3 + $0xc] sm:$0x1]  ;;  %v3955_v45 = vshll.u32 %v3906_v43, 16  ;;  %v7086_v10 = vld [vmem:[%s9556_s3 + $0x20] sm:$0xff]   ;;  %v4111_v47 = vld [vmem:[#allocation3 + $0x8] sm:$0xf] }
 0x3c0   : > { %v4419_v4 = vld [vmem:[#allocation3 + $0xc] sm:$0x1]  ;;  %3498 = vst [vmem:[#allocation3 + $0x24] sm:$0x1] %v3497_v62  ;;  %v3610_v48 = vpop.permute.xlu0 %3609  ;;  %v3941_v0 = vshll.u32 %v3904_v63, 16  ;;  %v3939_v6 = vrot.slane %v3938_v59, 4  ;;  %4723 = vmatpush1.bf16.msra.mxu1 %v7086_v10 }
 0x3c1   : > { %v4444_v1 = vshll.u32 %v4419_v4, 16  ;;  %3612 = vst.msk [vmem:[#allocation3 + $0x38] sm:$0xf] %vm3572_vm11, %v3610_v48  ;;  %v4442_v8 = vrot.slane %v4441_v28, 4  ;;  %v4162_v37 = vld [vmem:[#allocation3 + $0xc] sm:$0x1]  ;;  %4724 = vmatprep.subr.bf16.mxu1 %v7382_v32 }
 0x3c2   : > { %v3681_v5 = vpop.permute.xlu1 %3680  ;;  %v3943_v7 = vrot.slane %v3941_v0, 5  ;;  %v4192_v14 = vrot.slane %v4190_v2, 4  ;;  %v4195_v17 = vrot.slane %v4193_v3, 5  ;;  %v4199_v26 = vshll.u32 %v4162_v37, 16  ;;  %v3708_v59 = vld [vmem:[#allocation3 + $0x20] sm:$0xf] }
 0x3c3   : > { %v4446_v36 = vrot.slane %v4444_v1, 5  ;;  %v3687_v13 = vsel %vm8794_vm14, %v3681_v5, %v3686_v51  ;;  %v3905_v16 = vld [vmem:[#allocation3 + $0x10] sm:$0xf]  ;;  %v3957_v28 = vrot.slane %v3955_v45, 5  ;;  %v3541_v48 = vld [vmem:[#allocation3 + $0x34] sm:$0x1] }
 0x3c4   : > { %3688 = vst [vmem:[#allocation3 + $0x18] sm:$0xf] %v3687_v13  ;;  %v3944_v23 = vsel %vm7640_vm6, %v3939_v6, %v3943_v7  ;;  %v3946_v18 = vshrl.u32 %v3905_v16, 16  ;;  %v3949_v12 = vshll.u32 %v3905_v16, 16  ;;  %v3705_v30 = vpop.permute.xlu0 %3704  ;;  %v3806_v53 = vld [vmem:[#allocation3 + $0x10] sm:$0xf]  ;;  %v4196_v34 = vor.u32 %v4195_v17, %v4192_v14 }
 0x3c5   : > { %v4447_v42 = vsel %vm7640_vm6, %v4442_v8, %v4446_v36  ;;  %4031 = vrot.lane.b32.xlu1 %v3944_v23, %s7374_s22  ;;  %v4420_v50 = vld [vmem:[#allocation3 + $0x10] sm:$0xf]  ;;  %v4201_v46 = vrot.slane %v4199_v26, 5  ;;  %v7087_v2 = vld [vmem:[%s9556_s3 + $0x28] sm:$0xff]   ;;  %v4421_v5 = vld [vmem:[#allocation3 + $0x14] sm:$0x1] }
 0x3c6   : > { %4546 = vrot.lane.b32.xlu0 %v4447_v42, %s7383_s24  ;;  %v3512_v19 = vpop.permute.xlu1 %3511  ;;  %v3948_v38 = vrot.slane %v3946_v18, 4  ;;  %v3951_v27 = vrot.slane %v3949_v12, 5  ;;  %v4163_v39 = vld [vmem:[#allocation3 + $0x10] sm:$0xf]  ;;  %v4449_v49 = vshrl.u32 %v4420_v50, 16  ;;  %v4452_v33 = vshll.u32 %v4420_v50, 16  ;;  %4725 = vmatpush1.bf16.msra.mxu1 %v7087_v2 }
 0x3c7   : > { %v3711_v22 = vld [vmem:[#allocation3 + $0x24] sm:$0x1]  ;;  %v3519_v40 = vsel %vm8650_vm10, %v3512_v19, %v3518_v15  ;;  %v3854_v25 = vld [vmem:[#allocation3 + $0x10] sm:$0xf]  ;;  %v4204_v52 = vshrl.u32 %v4163_v39, 16  ;;  %v4207_v56 = vshll.u32 %v4163_v39, 16  ;;  %4726 = vmatprep.subr.bf16.mxu1 %v7382_v32 }
 0x3c8   : > { %v3712_v20 = vsel %vm8799_vm4, %v3705_v30, %v3711_v22  ;;  %3520 = vst [vmem:[#allocation3 + $0x2c] sm:$0x1] %v3519_v40  ;;  %v3952_v35 = vor.u32 %v3951_v27, %v3948_v38  ;;  %v4197_v55 = vrot.slane %v4196_v34, 4  ;;  %v4451_v63 = vrot.slane %v4449_v49, 4  ;;  %v4164_v6 = vld [vmem:[#allocation3 + $0x14] sm:$0x1] }
 0x3c9   : > { %3713 = vst [vmem:[#allocation3 + $0x24] sm:$0x1] %v3712_v20  ;;  %4079 = vrot.lane.b32.xlu1 %v4062_v31, %s7386_s27  ;;  %v4454_v0 = vrot.slane %v4452_v33, 5  ;;  %v4206_v1 = vrot.slane %v4204_v52, 4  ;;  %v4209_v51 = vrot.slane %v4207_v56, 5  ;;  %v7088_v8 = vld [vmem:[%s9556_s3 + $0x30] sm:$0xff]  }
 0x3ca   : > { %3824 = vrot.lane.b32.xlu0 %v3806_v53, %s7383_s24  ;;  %v3683_v41 = vpop.permute.xlu1 %3682  ;;  %v3953_v29 = vrot.slane %v3952_v35, 4  ;;  %v4202_v62 = vsel %vm7640_vm6, %v4197_v55, %v4201_v46  ;;  %v4321_v36 = vld [vmem:[#allocation3 + $0x10] sm:$0xf]  ;;  %v4458_v42 = vshll.u32 %v4421_v5, 16  ;;  %v4213_v15 = vshll.u32 %v4164_v6, 16  ;;  %4727 = vmatpush1.bf16.msra.mxu1 %v7088_v8  ;;  %v7089_v14 = vld [vmem:[%s9556_s3 + $0x38] sm:$0xff]  }
 0x3cb   : > { %v3690_v58 = vsel %vm8799_vm4, %v3683_v41, %v3689_v44  ;;  %v4063_v9 = vld [vmem:[#allocation3 + $0x10] sm:$0xf]  ;;  %v4455_v13 = vor.u32 %v4454_v0, %v4451_v63  ;;  %v4210_v23 = vor.u32 %v4209_v51, %v4206_v1  ;;  %v3907_v37 = vld [vmem:[#allocation3 + $0x18] sm:$0xf]  ;;  %4728 = vmatprep.subr.bf16.mxu1 %v7382_v32  ;;  %v7090_v38 = vld [vmem:[%s9556_s3 + $0x40] sm:$0xff]   ;;  %vm4150_vm2 = vcmask 650752  }
 0x3cc   : > { %3691 = vst [vmem:[#allocation3 + $0x1c] sm:$0x1] %v3690_v58  ;;  %v3958_v4 = vsel %vm7640_vm6, %v3953_v29, %v3957_v28  ;;  %v4422_v16 = vld [vmem:[#allocation3 + $0x18] sm:$0xf]  ;;  %v4370_v17 = vld [vmem:[#allocation3 + $0x10] sm:$0xf] }
 0x3cd   : > { %4128 = vrot.lane.b32.xlu1 %v4111_v47, %s7379_s17  ;;  %v4112_v18 = vld [vmem:[#allocation3 + $0x10] sm:$0xf]  ;;  %v4456_v12 = vrot.slane %v4455_v13, 4  ;;  %v4211_v19 = vrot.slane %v4210_v23, 4  ;;  %v4460_v43 = vrot.slane %v4458_v42, 5  ;;  %v4215_v21 = vrot.slane %v4213_v15, 5 }
 0x3ce   : > { %3872 = vrot.lane.b32.xlu0 %v3854_v25, %s7374_s22  ;;  %v3703_v57 = vpop.permute.xlu1 %3702  ;;  %v3960_v22 = vshrl.u32 %v3907_v37, 16  ;;  %v3963_v30 = vshll.u32 %v3907_v37, 16  ;;  %v4463_v40 = vshrl.u32 %v4422_v16, 16  ;;  %v4466_v26 = vshll.u32 %v4422_v16, 16  ;;  %4729 = vmatpush1.bf16.msra.mxu1 %v7089_v14  ;;  %v3807_v41 = vld [vmem:[#allocation3 + $0x18] sm:$0xf] }
 0x3cf   : > { %v3709_v61 = vsel %vm8794_vm14, %v3703_v57, %v3708_v59  ;;  %v4461_v27 = vsel %vm7640_vm6, %v4456_v12, %v4460_v43  ;;  %v4216_v20 = vsel %vm7640_vm6, %v4211_v19, %v4215_v21  ;;  %4730 = vmatprep.subr.bf16.mxu1 %v7382_v32  ;;  %v4322_v44 = vld [vmem:[#allocation3 + $0x18] sm:$0xf] }
 0x3d0   : > { %3710 = vst [vmem:[#allocation3 + $0x20] sm:$0xf] %v3709_v61  ;;  %v3962_v50 = vrot.slane %v3960_v22, 4  ;;  %v3965_v34 = vrot.slane %v3963_v30, 5  ;;  %v4465_v35 = vrot.slane %v4463_v40, 4  ;;  %v4468_v39 = vrot.slane %v4466_v26, 5 }
 0x3d1   : > { %4289 = vrot.lane.b32.xlu1 %v4202_v62, %s7379_s17  ;;  %v4165_v46 = vld [vmem:[#allocation3 + $0x18] sm:$0xf]  ;;  %v3910_v2 = vld [vmem:[#allocation3 + $0x24] sm:$0x1] }
 0x3d2   : > { %4033 = vrot.lane.b32.xlu0 %v3958_v4, %s7374_s22  ;;  %v3535_v3 = vpop.permute.xlu1 %3534  ;;  %4731 = vmatpush1.bf16.msra.mxu1 %v7090_v38  ;;  %v3966_v58 = vor.u32 %v3965_v34, %v3962_v50  ;;  %v4469_v47 = vor.u32 %v4468_v39, %v4465_v35  ;;  %v3855_v49 = vld [vmem:[#allocation3 + $0x18] sm:$0xf]  ;;  %v4218_v55 = vshrl.u32 %v4165_v46, 16  ;;  %v4221_v57 = vshll.u32 %v4165_v46, 16  ;;  %v3731_v38 = vld [vmem:[#allocation3 + $0x28] sm:$0xf] }
 0x3d3   : > { %v3542_v7 = vsel %vm8650_vm10, %v3535_v3, %v3541_v48  ;;  %v3908_v31 = vld [vmem:[#allocation3 + $0x1c] sm:$0x1]  ;;  %v4371_v25 = vld [vmem:[#allocation3 + $0x18] sm:$0xf]  ;;  %v4425_v50 = vld [vmem:[#allocation3 + $0x24] sm:$0x1] }
 0x3d4   : > { %3543 = vst [vmem:[#allocation3 + $0x34] sm:$0x1] %v3542_v7  ;;  %v4423_v53 = vld [vmem:[#allocation3 + $0x1c] sm:$0x1]  ;;  %v3969_v45 = vshll.u32 %v3908_v31, 16  ;;  %v3967_v59 = vrot.slane %v3966_v58, 4 }
 0x3d5   : > { %4338 = vrot.lane.b32.xlu1 %v4321_v36, %s7381_s20  ;;  %v4472_v10 = vshll.u32 %v4423_v53, 16  ;;  %v4470_v28 = vrot.slane %v4469_v47, 4  ;;  %v4166_v63 = vld [vmem:[#allocation3 + $0x1c] sm:$0x1]  ;;  %v4220_v0 = vrot.slane %v4218_v55, 4  ;;  %v4223_v1 = vrot.slane %v4221_v57, 5 }
 0x3d6   : > { %4081 = vrot.lane.b32.xlu0 %v4063_v9, %s7386_s27  ;;  %v3971_v29 = vrot.slane %v3969_v45, 5  ;;  %v4227_v51 = vshll.u32 %v4166_v63, 16  ;;  %v4064_v3 = vld [vmem:[#allocation3 + $0x18] sm:$0xf]  ;;  %v3983_v9 = vshll.u32 %v3910_v2, 16  ;;  %v4486_v47 = vshll.u32 %v4425_v50, 16 }
 0x3d7   : > { %v3909_v32 = vld [vmem:[#allocation3 + $0x20] sm:$0xf]  ;;  %v4474_v33 = vrot.slane %v4472_v10, 5  ;;  %v4224_v8 = vor.u32 %v4223_v1, %v4220_v0  ;;  %v4113_v13 = vld [vmem:[#allocation3 + $0x18] sm:$0xf] }
 0x3d8   : > { %v3974_v52 = vshrl.u32 %v3909_v32, 16  ;;  %v3977_v56 = vshll.u32 %v3909_v32, 16  ;;  %v3972_v61 = vsel %vm7640_vm6, %v3967_v59, %v3971_v29  ;;  %v3808_v5 = vld [vmem:[#allocation3 + $0x20] sm:$0xf]  ;;  %v4229_v23 = vrot.slane %v4227_v51, 5 }
 0x3d9   : > { %4387 = vrot.lane.b32.xlu1 %v4370_v17, %s7383_s24  ;;  %v4475_v62 = vsel %vm7640_vm6, %v4470_v28, %v4474_v33  ;;  %v4424_v7 = vld [vmem:[#allocation3 + $0x20] sm:$0xf]  ;;  %v3985_v12 = vrot.slane %v3983_v9, 5  ;;  %v4168_v34 = vld [vmem:[#allocation3 + $0x24] sm:$0x1]  ;;  %v4488_v28 = vrot.slane %v4486_v47, 5 }
 0x3da   : > { %4130 = vrot.lane.b32.xlu0 %v4112_v18, %s7379_s17  ;;  %v3976_v4 = vrot.slane %v3974_v52, 4  ;;  %v3979_v48 = vrot.slane %v3977_v56, 5  ;;  %v4167_v36 = vld [vmem:[#allocation3 + $0x20] sm:$0xf]  ;;  %v4477_v42 = vshrl.u32 %v4424_v7, 16  ;;  %v4480_v16 = vshll.u32 %v4424_v7, 16 }
 0x3db   : > { %v3856_v15 = vld [vmem:[#allocation3 + $0x20] sm:$0xf]  ;;  %v4232_v14 = vshrl.u32 %v4167_v36, 16  ;;  %v4235_v17 = vshll.u32 %v4167_v36, 16  ;;  %v4225_v18 = vrot.slane %v4224_v8, 4  ;;  %v4241_v46 = vshll.u32 %v4168_v34, 16 }
 0x3dc   : > { %v3980_v6 = vor.u32 %v3979_v48, %v3976_v4  ;;  %v4479_v43 = vrot.slane %v4477_v42, 4  ;;  %v4482_v22 = vrot.slane %v4480_v16, 5  ;;  %v4323_v35 = vld [vmem:[#allocation3 + $0x20] sm:$0xf]  ;;  %v3753_v32 = vld [vmem:[#allocation3 + $0x30] sm:$0xf] }
 0x3dd   : > { %4548 = vrot.lane.b32.xlu1 %v4461_v27, %s7383_s24  ;;  %v4230_v19 = vsel %vm7640_vm6, %v4225_v18, %v4229_v23  ;;  %v4234_v30 = vrot.slane %v4232_v14, 4  ;;  %v4237_v40 = vrot.slane %v4235_v17, 5  ;;  %v3734_v27 = vld [vmem:[#allocation3 + $0x2c] sm:$0x1]  ;;  %v4065_v39 = vld [vmem:[#allocation3 + $0x20] sm:$0xf] }
 0x3de   : > { %4291 = vrot.lane.b32.xlu0 %v4216_v20, %s7379_s17  ;;  %v3981_v37 = vrot.slane %v3980_v6, 4  ;;  %v4372_v29 = vld [vmem:[#allocation3 + $0x20] sm:$0xf]  ;;  %v3756_v57 = vld [vmem:[#allocation3 + $0x34] sm:$0x1] }
 0x3df   : > { %v4238_v45 = vor.u32 %v4237_v40, %v4234_v30  ;;  %v4114_v33 = vld [vmem:[#allocation3 + $0x20] sm:$0xf]  ;;  %v3776_v2 = vld [vmem:[#allocation3 + $0x38] sm:$0xf] }
 0x3e0   : > { %v3986_v21 = vsel %vm7640_vm6, %v3981_v37, %v3985_v12 }
 0x3e1   : > { %3826 = vrot.lane.b32.xlu1 %v3807_v41, %s7383_s24  ;;  %v3563_v41 = vld [vmem:[#allocation3 + $0x3c] sm:$0x1]  ;;  %v4239_v56 = vrot.slane %v4238_v45, 4 }
 0x3e2   : > { %4340 = vrot.lane.b32.xlu0 %v4322_v44, %s7381_s20  ;;  %v4483_v44 = vor.u32 %v4482_v22, %v4479_v43 }
 0x3e4   : > { %v4484_v52 = vrot.slane %v4483_v44, 4 }
 0x3e5   : > { %3874 = vrot.lane.b32.xlu1 %v3855_v49, %s7374_s22 }
 0x3e6   : > { %4389 = vrot.lane.b32.xlu0 %v4371_v25, %s7383_s24 }
 0x3e9   : > { %4035 = vrot.lane.b32.xlu1 %v3972_v61, %s7374_s22  ;;  %v4243_v61 = vrot.slane %v4241_v46, 5 }
 0x3ea   : > { %4550 = vrot.lane.b32.xlu0 %v4475_v62, %s7383_s24  ;;  %v4489_v62 = vsel %vm7640_vm6, %v4484_v52, %v4488_v28 }
 0x3eb   : > { %v4244_v63 = vsel %vm7640_vm6, %v4239_v56, %v4243_v61 }
 0x3ed   : > { %4083 = vrot.lane.b32.xlu1 %v4064_v3, %s7386_s27 }
 0x3ee   : > { %3828 = vrot.lane.b32.xlu0 %v3808_v5, %s7383_s24 }
 0x3f1   : > { %4132 = vrot.lane.b32.xlu1 %v4113_v13, %s7379_s17 }
 0x3f2   : > { %3876 = vrot.lane.b32.xlu0 %v3856_v15, %s7374_s22 }
 0x3f5   : > { %4293 = vrot.lane.b32.xlu1 %v4230_v19, %s7379_s17 }
 0x3f6   : > { %4037 = vrot.lane.b32.xlu0 %v3986_v21, %s7374_s22  ;;  %v3726_v26 = vpop.permute.xlu1 %3725  ;;  %v3728_v20 = vpop.permute.xlu0 %3727  ;;  %v3801_v21 = vld [vmem:[#allocation3 + $0x44] sm:$0x1] }
 0x3f7   : > { %v3732_v31 = vsel %vm8794_vm14, %v3726_v26, %v3731_v38  ;;  %v3735_v53 = vsel %vm8799_vm4, %v3728_v20, %v3734_v27 }
 0x3f8   : > { %3733 = vst [vmem:[#allocation3 + $0x28] sm:$0xf] %v3732_v31  ;;  %3736 = vst [vmem:[#allocation3 + $0x2c] sm:$0x1] %v3735_v53 }
 0x3f9   : > { %4342 = vrot.lane.b32.xlu1 %v4323_v35, %s7381_s20 }
 0x3fa   : > { %4085 = vrot.lane.b32.xlu0 %v4065_v39, %s7386_s27  ;;  %v3557_v10 = vpop.permute.xlu1 %3556  ;;  %v3748_v58 = vpop.permute.xlu0 %3747 }
 0x3fb   : > { %v3564_v49 = vsel %vm8650_vm10, %v3557_v10, %v3563_v41  ;;  %v3754_v25 = vsel %vm8794_vm14, %v3748_v58, %v3753_v32  ;;  %vm4409_vm10 = vcmask 1044352  }
 0x3fc   : > { %3565 = vst [vmem:[#allocation3 + $0x3c] sm:$0x1] %v3564_v49  ;;  %3755 = vst [vmem:[#allocation3 + $0x30] sm:$0xf] %v3754_v25 }
 0x3fd   : > { %4391 = vrot.lane.b32.xlu1 %v4372_v29, %s7383_s24 }
 0x3fe   : > { %4134 = vrot.lane.b32.xlu0 %v4114_v33, %s7379_s17  ;;  %v3616_v55 = vpop.permute.xlu1 %3615  ;;  %v3750_v59 = vpop.permute.xlu0 %3749 }
 0x3ff   : > { %3619 = vst.msk [vmem:[#allocation3 + $0x40] sm:$0xf] %vm3572_vm11, %v3616_v55  ;;  %v3757_v60 = vsel %vm8799_vm4, %v3750_v59, %v3756_v57  ;;  %v3911_v4 = vld [vmem:[#allocation3 + $0x28] sm:$0xf]  ;;  %v3912_v5 = vld [vmem:[#allocation3 + $0x2c] sm:$0x1] }
 0x400   : > { %3758 = vst [vmem:[#allocation3 + $0x34] sm:$0x1] %v3757_v60  ;;  %v3988_v48 = vshrl.u32 %v3911_v4, 16  ;;  %v3991_v0 = vshll.u32 %v3911_v4, 16  ;;  %v4426_v1 = vld [vmem:[#allocation3 + $0x28] sm:$0xf] }
 0x401   : > { %4552 = vrot.lane.b32.xlu1 %v4489_v62, %s7383_s24  ;;  %v4491_v6 = vshrl.u32 %v4426_v1, 16  ;;  %v4494_v7 = vshll.u32 %v4426_v1, 16  ;;  %v4427_v13 = vld [vmem:[#allocation3 + $0x2c] sm:$0x1]  ;;  %v3809_v23 = vld [vmem:[#allocation3 + $0x28] sm:$0xf] }
 0x402   : > { %4295 = vrot.lane.b32.xlu0 %v4244_v63, %s7379_s17  ;;  %v3771_v51 = vpop.permute.xlu1 %3770  ;;  %v3793_v3 = vpop.permute.xlu0 %3792  ;;  %v3990_v36 = vrot.slane %v3988_v48, 4  ;;  %v3993_v9 = vrot.slane %v3991_v0, 5  ;;  %v4324_v42 = vld [vmem:[#allocation3 + $0x28] sm:$0xf]  ;;  %v3997_v14 = vshll.u32 %v3912_v5, 16  ;;  %v4500_v30 = vshll.u32 %v4427_v13, 16 }
 0x403   : > { %v3777_v8 = vsel %vm8794_vm14, %v3771_v51, %v3776_v2  ;;  %v4493_v15 = vrot.slane %v4491_v6, 4  ;;  %v4496_v37 = vrot.slane %v4494_v7, 5  ;;  %v4169_v17 = vld [vmem:[#allocation3 + $0x28] sm:$0xf]  ;;  %v3779_v12 = vld [vmem:[#allocation3 + $0x3c] sm:$0x1] }
 0x404   : > { %3778 = vst [vmem:[#allocation3 + $0x38] sm:$0xf] %v3777_v8  ;;  %v3994_v16 = vor.u32 %v3993_v9, %v3990_v36  ;;  %v3857_v38 = vld [vmem:[#allocation3 + $0x28] sm:$0xf]  ;;  %v4246_v20 = vshrl.u32 %v4169_v17, 16  ;;  %v4249_v34 = vshll.u32 %v4169_v17, 16 }
 0x405   : > { %3830 = vrot.lane.b32.xlu1 %v3809_v23, %s7383_s24  ;;  %v4497_v22 = vor.u32 %v4496_v37, %v4493_v15  ;;  %v3913_v31 = vld [vmem:[#allocation3 + $0x30] sm:$0xf]  ;;  %v4373_v53 = vld [vmem:[#allocation3 + $0x28] sm:$0xf]  ;;  %v3999_v11 = vrot.slane %v3997_v14, 5  ;;  %v4502_v45 = vrot.slane %v4500_v30, 5 }
 0x406   : > { %4344 = vrot.lane.b32.xlu0 %v4324_v42, %s7381_s20  ;;  %v3798_v18 = vld [vmem:[#allocation3 + $0x40] sm:$0xf]  ;;  %v3773_v19 = vpop.permute.xlu1 %3772  ;;  %v3821_v43 = vpop.permute.xlu0 %3820  ;;  %v3995_v27 = vrot.slane %v3994_v16, 4  ;;  %v4002_v35 = vshrl.u32 %v3913_v31, 16  ;;  %v4005_v39 = vshll.u32 %v3913_v31, 16  ;;  %v4248_v58 = vrot.slane %v4246_v20, 4 }
 0x407   : > { %v3799_v40 = vsel %vm8794_vm14, %v3793_v3, %v3798_v18  ;;  %v3780_v26 = vsel %vm8799_vm4, %v3773_v19, %v3779_v12  ;;  %3844 = vst.msk [vmem:[#allocation4] sm:$0xf] %vm3349_vm15, %v3821_v43  ;;  %v4498_v50 = vrot.slane %v4497_v22, 4  ;;  %v4251_v46 = vrot.slane %v4249_v34, 5  ;;  %v3914_v49 = vld [vmem:[#allocation3 + $0x34] sm:$0x1]  ;;  %vm9105_vm14 = vmand %vm414_vm3, %vm3399_vm1 }
 0x408   : > { %3800 = vst [vmem:[#allocation3 + $0x40] sm:$0xf] %v3799_v40  ;;  %3781 = vst [vmem:[#allocation3 + $0x3c] sm:$0x1] %v3780_v26  ;;  %v4000_v32 = vsel %vm7640_vm6, %v3995_v27, %v3999_v11  ;;  %v4004_v25 = vrot.slane %v4002_v35, 4  ;;  %v4007_v29 = vrot.slane %v4005_v39, 5 }
 0x409   : > { %3878 = vrot.lane.b32.xlu1 %v3857_v38, %s7374_s22  ;;  %v4503_v47 = vsel %vm7640_vm6, %v4498_v50, %v4502_v45  ;;  %v4170_v33 = vld [vmem:[#allocation3 + $0x2c] sm:$0x1]  ;;  %v4011_v52 = vshll.u32 %v3914_v49, 16  ;;  %v4066_v56 = vld [vmem:[#allocation3 + $0x28] sm:$0xf]  ;;  %v4252_v57 = vor.u32 %v4251_v46, %v4248_v58  ;;  %vm5267_vm1 = vcmask 781824  }
 0x40a   : > { %4393 = vrot.lane.b32.xlu0 %v4373_v53, %s7383_s24  ;;  %v3795_v41 = vpop.permute.xlu1 %3794  ;;  %v3869_v44 = vpop.permute.xlu0 %3868  ;;  %v3810_v55 = vld [vmem:[#allocation3 + $0x30] sm:$0xf]  ;;  %v4008_v59 = vor.u32 %v4007_v29, %v4004_v25  ;;  %v4255_v62 = vshll.u32 %v4170_v33, 16  ;;  %v4115_v63 = vld [vmem:[#allocation3 + $0x28] sm:$0xf] }
 0x40b   : > { %v3802_v10 = vsel %vm8799_vm4, %v3795_v41, %v3801_v21  ;;  %3893 = vst.msk [vmem:[#allocation4] sm:$0xf] %vm3398_vm0, %v3869_v44  ;;  %v4428_v28 = vld [vmem:[#allocation3 + $0x30] sm:$0xf]  ;;  %v4013_v4 = vrot.slane %v4011_v52, 5  ;;  %v4253_v51 = vrot.slane %v4252_v57, 4  ;;  %vm9112_vm4 = vmand %vm416_vm8, %vm377_vm5 }
 0x40c   : > { %3803 = vst [vmem:[#allocation3 + $0x44] sm:$0x1] %v3802_v10  ;;  %v4171_v61 = vld [vmem:[#allocation3 + $0x30] sm:$0xf]  ;;  %v4505_v48 = vshrl.u32 %v4428_v28, 16  ;;  %v4508_v0 = vshll.u32 %v4428_v28, 16 }
 0x40d   : > { %4039 = vrot.lane.b32.xlu1 %v4000_v32, %s7374_s22  ;;  %v3858_v1 = vld [vmem:[#allocation3 + $0x30] sm:$0xf]  ;;  %v4009_v2 = vrot.slane %v4008_v59, 4  ;;  %v4260_v3 = vshrl.u32 %v4171_v61, 16  ;;  %v4263_v5 = vshll.u32 %v4171_v61, 16  ;;  %v4257_v7 = vrot.slane %v4255_v62, 5 }
 0x40e   : > { %4554 = vrot.lane.b32.xlu0 %v4503_v47, %s7383_s24  ;;  %v4030_v24 = vpop.permute.xlu0 %4029  ;;  %v4507_v8 = vrot.slane %v4505_v48, 4  ;;  %v4510_v36 = vrot.slane %v4508_v0, 5  ;;  %v4429_v23 = vld [vmem:[#allocation3 + $0x34] sm:$0x1]  ;;  %v4325_v12 = vld [vmem:[#allocation3 + $0x30] sm:$0xf] }
 0x40f   : > { %4053 = vst.msk [vmem:[#allocation4] sm:$0xf] %vm3572_vm11, %v4030_v24  ;;  %v4258_v9 = vsel %vm7640_vm6, %v4253_v51, %v4257_v7  ;;  %v4014_v13 = vsel %vm7640_vm6, %v4009_v2, %v4013_v4  ;;  %v4172_v42 = vld [vmem:[#allocation3 + $0x34] sm:$0x1]  ;;  %v4262_v15 = vrot.slane %v4260_v3, 4  ;;  %v4265_v37 = vrot.slane %v4263_v5, 5 }
 0x410   : > { %v4511_v14 = vor.u32 %v4510_v36, %v4507_v8  ;;  %v4514_v17 = vshll.u32 %v4429_v23, 16  ;;  %v4269_v18 = vshll.u32 %v4172_v42, 16  ;;  %v4067_v19 = vld [vmem:[#allocation3 + $0x30] sm:$0xf]  ;;  %v3915_v21 = vld [vmem:[#allocation3 + $0x38] sm:$0xf] }
 0x411   : > { %4087 = vrot.lane.b32.xlu1 %v4066_v56, %s7386_s27  ;;  %v4266_v43 = vor.u32 %v4265_v37, %v4262_v15  ;;  %v4430_v22 = vld [vmem:[#allocation3 + $0x38] sm:$0xf]  ;;  %v4374_v30 = vld [vmem:[#allocation3 + $0x30] sm:$0xf]  ;;  %v4016_v27 = vshrl.u32 %v3915_v21, 16  ;;  %v4019_v53 = vshll.u32 %v3915_v21, 16 }
 0x412   : > { %3832 = vrot.lane.b32.xlu0 %v3810_v55, %s7383_s24  ;;  %v4078_v60 = vpop.permute.xlu0 %4077  ;;  %v4512_v40 = vrot.slane %v4511_v14, 4  ;;  %v4516_v26 = vrot.slane %v4514_v17, 5  ;;  %v4271_v38 = vrot.slane %v4269_v18, 5  ;;  %v4116_v20 = vld [vmem:[#allocation3 + $0x30] sm:$0xf]  ;;  %v4519_v50 = vshrl.u32 %v4430_v22, 16 }
 0x413   : > { %4102 = vst.msk [vmem:[#allocation4] sm:$0xf] %vm3637_vm12, %v4078_v60  ;;  %v4267_v31 = vrot.slane %v4266_v43, 4  ;;  %v4522_v34 = vshll.u32 %v4430_v22, 16  ;;  %v3916_v11 = vld [vmem:[#allocation3 + $0x3c] sm:$0x1] }
 0x414   : > { %v4517_v35 = vsel %vm7640_vm6, %v4512_v40, %v4516_v26  ;;  %v4018_v39 = vrot.slane %v4016_v27, 4  ;;  %v4021_v44 = vrot.slane %v4019_v53, 5  ;;  %v4431_v45 = vld [vmem:[#allocation3 + $0x3c] sm:$0x1]  ;;  %v4521_v10 = vrot.slane %v4519_v50, 4 }
 0x415   : > { %4136 = vrot.lane.b32.xlu1 %v4115_v63, %s7379_s17  ;;  %v4272_v41 = vsel %vm7640_vm6, %v4267_v31, %v4271_v38  ;;  %v4524_v32 = vrot.slane %v4522_v34, 5  ;;  %v4025_v58 = vshll.u32 %v3916_v11, 16  ;;  %v4528_v47 = vshll.u32 %v4431_v45, 16  ;;  %v3811_v46 = vld [vmem:[#allocation3 + $0x38] sm:$0xf] }
 0x416   : > { %3880 = vrot.lane.b32.xlu0 %v3858_v1, %s7374_s22  ;;  %v4127_v6 = vpop.permute.xlu0 %4126  ;;  %v4326_v49 = vld [vmem:[#allocation3 + $0x38] sm:$0xf]  ;;  %v4022_v25 = vor.u32 %v4021_v44, %v4018_v39  ;;  %v4174_v2 = vld [vmem:[#allocation3 + $0x3c] sm:$0x1]  ;;  %v4432_v7 = vld [vmem:[#allocation3 + $0x40] sm:$0xf] }
 0x417   : > { %4151 = vst.msk [vmem:[#allocation4] sm:$0xf] %vm4150_vm2, %v4127_v6  ;;  %v4525_v29 = vor.u32 %v4524_v32, %v4521_v10  ;;  %v4173_v24 = vld [vmem:[#allocation3 + $0x38] sm:$0xf]  ;;  %v4027_v55 = vrot.slane %v4025_v58, 5  ;;  %v4530_v57 = vrot.slane %v4528_v47, 5 }
 0x418   : > { %v3859_v56 = vld [vmem:[#allocation3 + $0x38] sm:$0xf]  ;;  %v4023_v28 = vrot.slane %v4022_v25, 4  ;;  %v4274_v60 = vshrl.u32 %v4173_v24, 16  ;;  %v4277_v62 = vshll.u32 %v4173_v24, 16  ;;  %v4283_v6 = vshll.u32 %v4174_v2, 16 }
 0x419   : > { %4297 = vrot.lane.b32.xlu1 %v4258_v9, %s7379_s17  ;;  %v4375_v59 = vld [vmem:[#allocation3 + $0x38] sm:$0xf]  ;;  %v4526_v61 = vrot.slane %v4525_v29, 4  ;;  %v4533_v42 = vshrl.u32 %v4432_v7, 16  ;;  %v4536_v15 = vshll.u32 %v4432_v7, 16  ;;  %vm6080_vm5 = vcmask 261120  }
 0x41a   : > { %4041 = vrot.lane.b32.xlu0 %v4014_v13, %s7374_s22  ;;  %v4288_v16 = vpop.permute.xlu0 %4287  ;;  %v4028_v48 = vsel %vm7640_vm6, %v4023_v28, %v4027_v55  ;;  %v4276_v1 = vrot.slane %v4274_v60, 4  ;;  %v4279_v51 = vrot.slane %v4277_v62, 5  ;;  %v4068_v3 = vld [vmem:[#allocation3 + $0x38] sm:$0xf]  ;;  %v4285_v23 = vrot.slane %v4283_v6, 5 }
 0x41b   : > { %4312 = vst.msk [vmem:[#allocation4] sm:$0xf] %vm4311_vm7, %v4288_v16  ;;  %v4531_v0 = vsel %vm7640_vm6, %v4526_v61, %v4530_v57  ;;  %v4117_v9 = vld [vmem:[#allocation3 + $0x38] sm:$0xf]  ;;  %v4535_v17 = vrot.slane %v4533_v42, 4  ;;  %v4538_v18 = vrot.slane %v4536_v15, 5 }
 0x41c   : > { %v4280_v5 = vor.u32 %v4279_v51, %v4276_v1  ;;  %v4327_v21 = vld [vmem:[#allocation3 + $0x40] sm:$0xf]  ;;  %vm5316_vm8 = vcmask 1044224  }
 0x41d   : > { %4346 = vrot.lane.b32.xlu1 %v4325_v12, %s7381_s20  ;;  %v4433_v12 = vld [vmem:[#allocation3 + $0x44] sm:$0x1]  ;;  %v4539_v22 = vor.u32 %v4538_v18, %v4535_v17  ;;  %v4376_v38 = vld [vmem:[#allocation3 + $0x40] sm:$0xf] }
 0x41e   : > { %4089 = vrot.lane.b32.xlu0 %v4067_v19, %s7386_s27  ;;  %v4281_v13 = vrot.slane %v4280_v5, 4 }
 0x41f   : > { %v4540_v27 = vrot.slane %v4539_v22, 4 }
 0x420   : > { %v4286_v14 = vsel %vm7640_vm6, %v4281_v13, %v4285_v23 }
 0x421   : > { %4395 = vrot.lane.b32.xlu1 %v4374_v30, %s7383_s24  ;;  %v4542_v30 = vshll.u32 %v4433_v12, 16 }
 0x422   : > { %4138 = vrot.lane.b32.xlu0 %v4116_v20, %s7379_s17 }
 0x423   : > { %v4544_v20 = vrot.slane %v4542_v30, 5 }
 0x425   : > { %4556 = vrot.lane.b32.xlu1 %v4517_v35, %s7383_s24  ;;  %v4545_v50 = vsel %vm7640_vm6, %v4540_v27, %v4544_v20 }
 0x426   : > { %4299 = vrot.lane.b32.xlu0 %v4272_v41, %s7379_s17 }
 0x429   : > { %3834 = vrot.lane.b32.xlu1 %v3811_v46, %s7383_s24 }
 0x42a   : > { %4348 = vrot.lane.b32.xlu0 %v4326_v49, %s7381_s20  ;;  %v3823_v33 = vpop.permute.xlu1 %3822 }
 0x42b   : > { %v4337_v52 = vpop.permute.xlu0 %4336  ;;  %3845 = vst.msk [vmem:[#allocation4 + $0x8] sm:$0xf] %vm3349_vm15, %v3823_v33 }
 0x42c   : > { %4361 = vst.msk [vmem:[#allocation4] sm:$0xf] %vm4360_vm9, %v4337_v52 }
 0x42d   : > { %3882 = vrot.lane.b32.xlu1 %v3859_v56, %s7374_s22 }
 0x42e   : > { %4397 = vrot.lane.b32.xlu0 %v4375_v59, %s7383_s24  ;;  %v3871_v63 = vpop.permute.xlu1 %3870 }
 0x42f   : > { %v4386_v4 = vpop.permute.xlu0 %4385  ;;  %3894 = vst.msk [vmem:[#allocation4 + $0x8] sm:$0xf] %vm3398_vm0, %v3871_v63 }
 0x430   : > { %4410 = vst.msk [vmem:[#allocation4] sm:$0xf] %vm4409_vm10, %v4386_v4 }
 0x431   : > { %4043 = vrot.lane.b32.xlu1 %v4028_v48, %s7374_s22  ;;  %s6855_s22 = sshll.u32 %s9583_s14, 6 }
 0x432   : > { %4558 = vrot.lane.b32.xlu0 %v4531_v0, %s7383_s24  ;;  %s9511_s18 = scalar_lea.vmem %s9562_s9, %s6855_s22 }
 0x435   : > { %4091 = vrot.lane.b32.xlu1 %v4068_v3, %s7386_s27 }
 0x437   : > { %v4032_v8 = vpop.permute.xlu1 %4031 }
 0x438   : > { %v4547_v36 = vpop.permute.xlu0 %4546  ;;  %4054 = vst.msk [vmem:[#allocation4 + $0x8] sm:$0xf] %vm3572_vm11, %v4032_v8 }
 0x439   : > { %4570 = vst.msk [vmem:[#allocation4 + $0x4] sm:$0xf] %vm3349_vm15, %v4547_v36  ;;  %4140 = vrot.lane.b32.xlu1 %v4117_v9, %s7379_s17 }
 0x43b   : > { %v4080_v37 = vpop.permute.xlu1 %4079 }
 0x43c   : > { %v3825_v16 = vpop.permute.xlu0 %3824  ;;  %4103 = vst.msk [vmem:[#allocation4 + $0x8] sm:$0xf] %vm3637_vm12, %v4080_v37 }
 0x43d   : > { %3846 = vst.msk [vmem:[#allocation4 + $0x10] sm:$0xf] %vm3349_vm15, %v3825_v16  ;;  %4301 = vrot.lane.b32.xlu1 %v4286_v14, %s7379_s17 }
 0x43f   : > { %v4129_v19 = vpop.permute.xlu1 %4128 }
 0x440   : > { %v3873_v43 = vpop.permute.xlu0 %3872  ;;  %4152 = vst.msk [vmem:[#allocation4 + $0x8] sm:$0xf] %vm4150_vm2, %v4129_v19 }
 0x441   : > { %3895 = vst.msk [vmem:[#allocation4 + $0x10] sm:$0xf] %vm3398_vm0, %v3873_v43  ;;  %4350 = vrot.lane.b32.xlu1 %v4327_v21, %s7381_s20 }
 0x443   : > { %v4290_v40 = vpop.permute.xlu1 %4289 }
 0x444   : > { %v4034_v26 = vpop.permute.xlu0 %4033  ;;  %4313 = vst.msk [vmem:[#allocation4 + $0x8] sm:$0xf] %vm4311_vm7, %v4290_v40 }
 0x445   : > { %4055 = vst.msk [vmem:[#allocation4 + $0x10] sm:$0xf] %vm3572_vm11, %v4034_v26  ;;  %4399 = vrot.lane.b32.xlu1 %v4376_v38, %s7383_s24 }
 0x447   : > { %v4339_v31 = vpop.permute.xlu1 %4338 }
 0x448   : > { %v4082_v53 = vpop.permute.xlu0 %4081  ;;  %4362 = vst.msk [vmem:[#allocation4 + $0x8] sm:$0xf] %vm4360_vm9, %v4339_v31 }
 0x449   : > { %4104 = vst.msk [vmem:[#allocation4 + $0x10] sm:$0xf] %vm3637_vm12, %v4082_v53  ;;  %4560 = vrot.lane.b32.xlu1 %v4545_v50, %s7383_s24 }
 0x44b   : > { %v4388_v34 = vpop.permute.xlu1 %4387 }
 0x44c   : > { %v4131_v35 = vpop.permute.xlu0 %4130  ;;  %4411 = vst.msk [vmem:[#allocation4 + $0x8] sm:$0xf] %vm4409_vm10, %v4388_v34 }
 0x44d   : > { %4153 = vst.msk [vmem:[#allocation4 + $0x10] sm:$0xf] %vm4150_vm2, %v4131_v35  ;;  %v5015_v35 = vld [vmem:[#allocation5] sm:$0xf] }
 0x44f   : > { %v4549_v11 = vpop.permute.xlu1 %4548 }
 0x450   : > { %v4292_v39 = vpop.permute.xlu0 %4291  ;;  %4571 = vst.msk [vmem:[#allocation4 + $0xc] sm:$0xf] %vm3349_vm15, %v4549_v11  ;;  %v5032_v11 = vshrl.u32 %v5015_v35, 16 }
 0x451   : > { %4314 = vst.msk [vmem:[#allocation4 + $0x10] sm:$0xf] %vm4311_vm7, %v4292_v39  ;;  %v5035_v39 = vshll.u32 %v5015_v35, 16 }
 0x453   : > { %v3827_v41 = vpop.permute.xlu1 %3826  ;;  %v7091_v32 = vld [vmem:[#allocation4] ss:$8 sps:$4 sm:$0xff]  }
 0x454   : > { %v4341_v44 = vpop.permute.xlu0 %4340  ;;  %3847 = vst.msk [vmem:[#allocation4 + $0x18] sm:$0xf] %vm3349_vm15, %v3827_v41  ;;  %v5034_v41 = vrot.slane %v5032_v11, 4 }
 0x455   : > { %4363 = vst.msk [vmem:[#allocation4 + $0x10] sm:$0xf] %vm4360_vm9, %v4341_v44  ;;  %v5037_v44 = vrot.slane %v5035_v39, 5 }
 0x457   : > { %v3875_v45 = vpop.permute.xlu1 %3874  ;;  %v7093_v58 = vld [vmem:[#allocation4 + $0x4] ss:$8 sps:$4 sm:$0xff]  }
 0x458   : > { %v4390_v10 = vpop.permute.xlu0 %4389  ;;  %3896 = vst.msk [vmem:[#allocation4 + $0x18] sm:$0xf] %vm3398_vm0, %v3875_v45  ;;  %6751 = vmatprep.mubr.msk.bf16.mxu1 %vm4701_vm13, %v7093_v58  ;;  %v5016_v45 = vld [vmem:[#allocation5 + $0x4] sm:$0x1] }
 0x459   : > { %4412 = vst.msk [vmem:[#allocation4 + $0x10] sm:$0xf] %vm4409_vm10, %v4390_v10  ;;  %4747 = vmatmul.mubr.bf16.vlgmr.msra.gmra.mrb[0].mxu1 %v7091_v32  ;;  %v5038_v10 = vor.u32 %v5037_v44, %v5034_v41  ;;  %v5041_v32 = vshll.u32 %v5016_v45, 16 }
 0x45b   : > { %v4036_v47 = vpop.permute.xlu1 %4035  ;;  %v5039_v58 = vrot.slane %v5038_v10, 4 }
 0x45c   : > { %v4551_v46 = vpop.permute.xlu0 %4550  ;;  %4056 = vst.msk [vmem:[#allocation4 + $0x18] sm:$0xf] %vm3572_vm11, %v4036_v47  ;;  %v5043_v47 = vrot.slane %v5041_v32, 5 }
 0x45d   : > { %4572 = vst.msk [vmem:[#allocation4 + $0x14] sm:$0xf] %vm3349_vm15, %v4551_v46 }
 0x45e   : > { %v5044_v46 = vsel %vm7640_vm6, %v5039_v58, %v5043_v47 }
 0x45f   : > { %v4084_v49 = vpop.permute.xlu1 %4083  ;;  %5143 = vrot.lane.b32.xlu0 %v5044_v46, %s7386_s27 }
 0x460   : > { %v3829_v25 = vpop.permute.xlu0 %3828  ;;  %4105 = vst.msk [vmem:[#allocation4 + $0x18] sm:$0xf] %vm3637_vm12, %v4084_v49  ;;  %v5176_v49 = vld [vmem:[#allocation5] sm:$0xe] }
 0x461   : > { %3848 = vst.msk [vmem:[#allocation4 + $0x20] sm:$0xf] %vm3349_vm15, %v3829_v25  ;;  %v5177_v25 = vld [vmem:[#allocation5 + $0x4] sm:$0x1] }
 0x463   : > { %v4133_v29 = vpop.permute.xlu1 %4132 }
 0x464   : > { %v3877_v24 = vpop.permute.xlu0 %3876  ;;  %4154 = vst.msk [vmem:[#allocation4 + $0x18] sm:$0xf] %vm4150_vm2, %v4133_v29  ;;  %v4580_v48 = vld [vmem:[#allocation4 + $0x10] sm:$0xff]  ;;  %v6771_v29 = vrot.slane %v5176_v49, 9 }
 0x465   : > { %3897 = vst.msk [vmem:[#allocation4 + $0x20] sm:$0xf] %vm3398_vm0, %v3877_v24  ;;  %v5213_v24 = vrot.slane %v5177_v25, 5 }
 0x467   : > { %v4294_v33 = vpop.permute.xlu1 %4293 }
 0x468   : > { %v4038_v52 = vpop.permute.xlu0 %4037  ;;  %4315 = vst.msk [vmem:[#allocation4 + $0x18] sm:$0xf] %vm4311_vm7, %v4294_v33 }
 0x469   : > { %4057 = vst.msk [vmem:[#allocation4 + $0x20] sm:$0xf] %vm3572_vm11, %v4038_v52 }
 0x46b   : > { %v4343_v56 = vpop.permute.xlu1 %4342 }
 0x46c   : > { %v4086_v55 = vpop.permute.xlu0 %4085  ;;  %4364 = vst.msk [vmem:[#allocation4 + $0x18] sm:$0xf] %vm4360_vm9, %v4343_v56  ;;  %v5572_v56 = vld [vmem:[#allocation5 + $0x48] sm:$0xf] }
 0x46d   : > { %4106 = vst.msk [vmem:[#allocation4 + $0x20] sm:$0xf] %vm3637_vm12, %v4086_v55  ;;  %5595 = vrot.lane.b32.xlu1 %v5572_v56, %s7379_s17  ;;  %v9089_v55 = vld [vmem:[%s9557_s4] ss:$0 sm:$0xff] }
 0x46f   : > { %v4392_v57 = vpop.permute.xlu1 %4391 }
 0x470   : > { %v4135_v59 = vpop.permute.xlu0 %4134  ;;  %4413 = vst.msk [vmem:[#allocation4 + $0x18] sm:$0xf] %vm4409_vm10, %v4392_v57 }
 0x471   : > { %4155 = vst.msk [vmem:[#allocation4 + $0x20] sm:$0xf] %vm4150_vm2, %v4135_v59 }
 0x473   : > { %v4553_v28 = vpop.permute.xlu1 %4552 }
 0x474   : > { %v4296_v61 = vpop.permute.xlu0 %4295  ;;  %4573 = vst.msk [vmem:[#allocation4 + $0x1c] sm:$0xf] %vm3349_vm15, %v4553_v28 }
 0x475   : > { %4316 = vst.msk [vmem:[#allocation4 + $0x20] sm:$0xf] %vm4311_vm7, %v4296_v61 }
 0x477   : > { %v3831_v60 = vpop.permute.xlu1 %3830 }
 0x478   : > { %v4345_v62 = vpop.permute.xlu0 %4344  ;;  %3849 = vst.msk [vmem:[#allocation4 + $0x28] sm:$0xf] %vm3349_vm15, %v3831_v60 }
 0x479   : > { %4365 = vst.msk [vmem:[#allocation4 + $0x20] sm:$0xf] %vm4360_vm9, %v4345_v62 }
 0x47b   : > { %v3879_v63 = vpop.permute.xlu1 %3878  ;;  %v4581_v0 = vld [vmem:[#allocation4 + $0x18] sm:$0xff] }
 0x47c   : > { %v4394_v4 = vpop.permute.xlu0 %4393  ;;  %v7094_v1 = vld [vmem:[#allocation4 + $0x14] ss:$8 sps:$4 sm:$0xff]   ;;  %3898 = vst.msk [vmem:[#allocation4 + $0x28] sm:$0xf] %vm3398_vm0, %v3879_v63  ;;  %v6736_v51 = vcombine.low %v4580_v48, %v4581_v0  ;;  %v7103_v0 = vld [vmem:[%s9558_s5 + $0x88] sm:$0xff]  }
 0x47d   : > { %4414 = vst.msk [vmem:[#allocation4 + $0x20] sm:$0xf] %vm4409_vm10, %v4394_v4  ;;  %6752 = vmatprep.mubr.msk.bf16.mxu1 %vm4701_vm13, %v7094_v1  ;;  %v9096_v4 = vld [vmem:[%s9558_s5 + $0x80] sm:$0xff]  }
 0x47e   : > { %4755 = vmatmul.mubr.bf16.gmra.mrb[4].mxu1 %v6736_v51  ;;  %7008 = vmatprep.subr.bf16.mxu0 %v9096_v4 }
 0x47f   : > { %v4040_v2 = vpop.permute.xlu1 %4039  ;;  %7009 = vmatpush3.bf16.msra.mxu0 %v9096_v4 }
 0x480   : > { %v4555_v3 = vpop.permute.xlu0 %4554  ;;  %4058 = vst.msk [vmem:[#allocation4 + $0x28] sm:$0xf] %vm3572_vm11, %v4040_v2  ;;  %7010 = vmatprep.subr.bf16.mxu0 %v7103_v0 }
 0x481   : > { %4574 = vst.msk [vmem:[#allocation4 + $0x24] sm:$0xf] %vm3349_vm15, %v4555_v3 }
 0x483   : > { %v4088_v5 = vpop.permute.xlu1 %4087  ;;  %7011 = vmatpush3.bf16.msra.mxu0 %v7103_v0 }
 0x484   : > { %v3833_v6 = vpop.permute.xlu0 %3832  ;;  %4107 = vst.msk [vmem:[#allocation4 + $0x28] sm:$0xf] %vm3637_vm12, %v4088_v5 }
 0x485   : > { %3850 = vst.msk [vmem:[#allocation4 + $0x30] sm:$0xf] %vm3349_vm15, %v3833_v6 }
 0x487   : > { %v4137_v7 = vpop.permute.xlu1 %4136 }
 0x488   : > { %v3881_v8 = vpop.permute.xlu0 %3880  ;;  %4156 = vst.msk [vmem:[#allocation4 + $0x28] sm:$0xf] %vm4150_vm2, %v4137_v7  ;;  %v4582_v19 = vld [vmem:[#allocation4 + $0x20] sm:$0xff] }
 0x489   : > { %3899 = vst.msk [vmem:[#allocation4 + $0x30] sm:$0xf] %vm3398_vm0, %v3881_v8 }
 0x48b   : > { %v4298_v36 = vpop.permute.xlu1 %4297 }
 0x48c   : > { %v4042_v9 = vpop.permute.xlu0 %4041  ;;  %4317 = vst.msk [vmem:[#allocation4 + $0x28] sm:$0xf] %vm4311_vm7, %v4298_v36 }
 0x48d   : > { %4059 = vst.msk [vmem:[#allocation4 + $0x30] sm:$0xf] %vm3572_vm11, %v4042_v9 }
 0x48f   : > { %v4347_v13 = vpop.permute.xlu1 %4346 }
 0x490   : > { %v4090_v23 = vpop.permute.xlu0 %4089  ;;  %4366 = vst.msk [vmem:[#allocation4 + $0x28] sm:$0xf] %vm4360_vm9, %v4347_v13 }
 0x491   : > { %4108 = vst.msk [vmem:[#allocation4 + $0x30] sm:$0xf] %vm3637_vm12, %v4090_v23  ;;  %v4999_v23 = vld [vmem:[#allocation5] sm:$0xf] }
 0x492   : > { %5007 = vst.msk [vmem:[#allocation6] sm:$0xf] %vm414_vm3, %v4999_v23 }
 0x493   : > { %v4396_v42 = vpop.permute.xlu1 %4395 }
 0x494   : > { %v4139_v15 = vpop.permute.xlu0 %4138  ;;  %4415 = vst.msk [vmem:[#allocation4 + $0x28] sm:$0xf] %vm4409_vm10, %v4396_v42 }
 0x495   : > { %4157 = vst.msk [vmem:[#allocation4 + $0x30] sm:$0xf] %vm4150_vm2, %v4139_v15 }
 0x497   : > { %v4557_v37 = vpop.permute.xlu1 %4556 }
 0x498   : > { %v4300_v16 = vpop.permute.xlu0 %4299  ;;  %4575 = vst.msk [vmem:[#allocation4 + $0x2c] sm:$0xf] %vm3349_vm15, %v4557_v37 }
 0x499   : > { %4318 = vst.msk [vmem:[#allocation4 + $0x30] sm:$0xf] %vm4311_vm7, %v4300_v16 }
 0x49b   : > { %v3835_v14 = vpop.permute.xlu1 %3834 }
 0x49c   : > { %v4349_v17 = vpop.permute.xlu0 %4348  ;;  %3851 = vst.msk [vmem:[#allocation4 + $0x38] sm:$0xf] %vm3349_vm15, %v3835_v14 }
 0x49d   : > { %4367 = vst.msk [vmem:[#allocation4 + $0x30] sm:$0xf] %vm4360_vm9, %v4349_v17  ;;  %v4855_v17 = vld [vmem:[#allocation5 + $0x8] sm:$0xf] }
 0x49f   : > { %v3883_v18 = vpop.permute.xlu1 %3882  ;;  %v4583_v43 = vld [vmem:[#allocation4 + $0x28] sm:$0xff] }
 0x4a0   : > { %v4398_v12 = vpop.permute.xlu0 %4397  ;;  %v7096_v21 = vld [vmem:[#allocation4 + $0x24] ss:$8 sps:$4 sm:$0xff]   ;;  %3900 = vst.msk [vmem:[#allocation4 + $0x38] sm:$0xf] %vm3398_vm0, %v3883_v18  ;;  %v6738_v22 = vcombine.low %v4582_v19, %v4583_v43  ;;  %vm5209_vm0 = vcmask 1046532  }
 0x4a1   : > { %4416 = vst.msk [vmem:[#allocation4 + $0x30] sm:$0xf] %vm4409_vm10, %v4398_v12  ;;  %6753 = vmatprep.mubr.msk.bf16.mxu1 %vm4701_vm13, %v7096_v21  ;;  %v4860_v18 = vld [vmem:[#allocation5 + $0xc] sm:$0x1] }
 0x4a2   : > { %4763 = vmatmul.mubr.bf16.gmra.mrb[8].mxu1 %v6738_v22 }
 0x4a3   : > { %v4044_v30 = vpop.permute.xlu1 %4043 }
 0x4a4   : > { %v4559_v40 = vpop.permute.xlu0 %4558  ;;  %4060 = vst.msk [vmem:[#allocation4 + $0x38] sm:$0xf] %vm3572_vm11, %v4044_v30 }
 0x4a5   : > { %4576 = vst.msk [vmem:[#allocation4 + $0x34] sm:$0xf] %vm3349_vm15, %v4559_v40 }
 0x4a7   : > { %v4092_v26 = vpop.permute.xlu1 %4091 }
 0x4a8   : > { %4109 = vst.msk [vmem:[#allocation4 + $0x38] sm:$0xf] %vm3637_vm12, %v4092_v26  ;;  %vm5167_vm12 = vcmask 519424  }
 0x4ab   : > { %v4141_v38 = vpop.permute.xlu1 %4140 }
 0x4ac   : > { %4158 = vst.msk [vmem:[#allocation4 + $0x38] sm:$0xf] %vm4150_vm2, %v4141_v38  ;;  %v4876_v38 = vld [vmem:[#allocation5 + $0x10] sm:$0xf] }
 0x4af   : > { %v4302_v27 = vpop.permute.xlu1 %4301 }
 0x4b0   : > { %4319 = vst.msk [vmem:[#allocation4 + $0x38] sm:$0xf] %vm4311_vm7, %v4302_v27  ;;  %v4879_v27 = vld [vmem:[#allocation5 + $0x14] sm:$0x1] }
 0x4b3   : > { %v4351_v20 = vpop.permute.xlu1 %4350 }
 0x4b4   : > { %4368 = vst.msk [vmem:[#allocation4 + $0x38] sm:$0xf] %vm4360_vm9, %v4351_v20 }
 0x4b7   : > { %v4400_v31 = vpop.permute.xlu1 %4399 }
 0x4b8   : > { %4417 = vst.msk [vmem:[#allocation4 + $0x38] sm:$0xf] %vm4409_vm10, %v4400_v31 }
 0x4bb   : > { %v4561_v53 = vpop.permute.xlu1 %4560 }
 0x4bc   : > { %4577 = vst.msk [vmem:[#allocation4 + $0x3c] sm:$0xf] %vm3349_vm15, %v4561_v53  ;;  %vm5208_vm15 = vcmask 1042432  }
 0x4bd   : > { %vm9078_vm11 = vmor %vm5208_vm15, %vm5209_vm0 }
 0x4be   : > { %v5214_v52 = vsel %vm9078_vm11, %v6771_v29, %v5213_v24 }
 0x4bf   : > { %v7100_v34 = vld [vmem:[#allocation4 + $0x30] ss:$8 sps:$4 sm:$0xff]   ;;  %5243 = vrot.lane.b32.xlu0 %v5214_v52, %s7379_s17 }
 0x4c3   : > { %v7098_v50 = vld [vmem:[#allocation4 + $0x34] ss:$8 sps:$4 sm:$0xff]  }
 0x4c4   : > { %6754 = vmatprep.mubr.msk.bf16.mxu1 %vm4701_vm13, %v7098_v50 }
 0x4c5   : > { %4771 = vmatmul.mubr.bf16.gmra.mrb[12].mxu1 %v7100_v34 }
 0x4d1   : > { %v5144_v43 = vpop.permute.xlu0 %5143 }
 0x4d2   : > { %5168 = vst.msk [vmem:[#allocation6] sm:$0xf] %vm5167_vm12, %v5144_v43 }
 0x52c   : > { %v4748_v57 = vpop.f32.mrb[0].mxu1 }
 0x52d   : > { %v4749_v59 = vadd.f32 %v9089_v55, %v4748_v57  ;;  %v4750_v28 = vpop.f32.mrb[1].mxu1 }
 0x52e   : > { %v4751_v61 = vpop.f32.mrb[2].mxu1 }
 0x52f   : > { %v6755_v60 = vmul.f32 -1.442695, %v4749_v59  ;;  %v4752_v62 = vadd.f32 %v9089_v55, %v4751_v61  ;;  %v4753_v63 = vpop.f32.mrb[3].mxu1 }
 0x531   : > { %7265 = vpow2.f32 %v6755_v60  ;;  %v6756_v48 = vmul.f32 -1.442695, %v4752_v62  ;;  %v5244_v41 = vpop.permute.xlu0 %5243 }
 0x532   : > { %5268 = vst.msk [vmem:[#allocation6] sm:$0xf] %vm5267_vm1, %v5244_v41 }
 0x533   : > { %7267 = vpow2.f32 %v6756_v48 }
 0x53b   : > { %v7266_v1 = vpop.eup %7265 }
 0x53c   : > { %v4803_v51 = vadd.f32 1.0, %v7266_v1 }
 0x53d   : > { %v7268_v2 = vpop.eup %7267 }
 0x53e   : > { %7269 = vrcp.f32 %v4803_v51  ;;  %v4804_v3 = vadd.f32 1.0, %v7268_v2 }
 0x540   : > { %7271 = vrcp.f32 %v4804_v3 }
 0x548   : > { %v7270_v5 = vpop.eup %7269 }
 0x549   : > { %v4827_v6 = vmul.f32 %v7270_v5, %v4749_v59 }
 0x54a   : > { %v7272_v7 = vpop.eup %7271 }
 0x54b   : > { %v6885_v8 = vpack.c.bf16 %v4827_v6, %v4827_v6  ;;  %v4828_v36 = vmul.f32 %v7272_v7, %v4752_v62 }
 0x54d   : > { %v4843_v9 = vshrl.u32 %v6885_v8, 16  ;;  %v6886_v13 = vpack.c.bf16 %v4828_v36, %v4828_v36  ;;  %v4846_v37 = vshll.u32 %v6885_v8, 16 }
 0x54f   : > { %v4845_v15 = vrot.slane %v4843_v9, 7  ;;  %v4866_v16 = vshrl.u32 %v6886_v13, 16  ;;  %v4869_v12 = vshll.u32 %v6886_v13, 16 }
 0x551   : > { %v4756_v19 = vpop.f32.mrb[4].mxu1  ;;  %v4848_v21 = vor.u32 %v4846_v37, %v4845_v15  ;;  %v4849_v22 = vrot.slane %v4845_v15, 4  ;;  %v4868_v30 = vrot.slane %v4866_v16, 7 }
 0x552   : > { %v9117_v40 = vadd.f32 %v9089_v55, %v4756_v19  ;;  %v4758_v26 = vpop.f32.mrb[5].mxu1 }
 0x553   : > { %v4759_v20 = vpop.f32.mrb[6].mxu1  ;;  %v4856_v31 = vsel %vm9105_vm14, %v4848_v21, %v4855_v17  ;;  %v4861_v53 = vsel %vm9112_vm4, %v4849_v22, %v4860_v18  ;;  %v4871_v50 = vor.u32 %v4869_v12, %v4868_v30  ;;  %v4872_v34 = vrot.slane %v4868_v30, 4 }
 0x554   : > { %v4761_v35 = vpop.f32.mrb[7].mxu1  ;;  %4857 = vst [vmem:[#allocation5 + $0x8] sm:$0xf] %v4856_v31  ;;  %4862 = vst [vmem:[#allocation5 + $0xc] sm:$0x1] %v4861_v53  ;;  %v9126_v39 = vadd.f32 %v9089_v55, %v4759_v20 }
 0x555   : > { %v6757_v11 = vmul.f32 -1.442695, %v9117_v40  ;;  %v4877_v44 = vsel %vm9105_vm14, %v4871_v50, %v4876_v38  ;;  %v4880_v45 = vsel %vm9112_vm4, %v4872_v34, %v4879_v27  ;;  %v5787_v53 = vld [vmem:[#allocation5 + $0x48] sm:$0xe] }
 0x556   : > { %4878 = vst [vmem:[#allocation5 + $0x10] sm:$0xf] %v4877_v44  ;;  %4881 = vst [vmem:[#allocation5 + $0x14] sm:$0x1] %v4880_v45  ;;  %v6758_v10 = vmul.f32 -1.442695, %v9126_v39 }
 0x557   : > { %7273 = vpow2.f32 %v6757_v11  ;;  %v5788_v11 = vld [vmem:[#allocation5 + $0x4c] sm:$0x1] }
 0x558   : > { %7275 = vpow2.f32 %v6758_v10 }
 0x55b   : > { %v5276_v32 = vld [vmem:[#allocation5 + $0x8] sm:$0xf]  ;;  %v5179_v47 = vld [vmem:[#allocation5 + $0xc] sm:$0x1] }
 0x55c   : > { %v5178_v58 = vld [vmem:[#allocation5 + $0x8] sm:$0xe]  ;;  %5292 = vrot.lane.b32.xlu0 %v5276_v32, %s7378_s16  ;;  %v5470_v49 = vld [vmem:[#allocation5 + $0xc] sm:$0x1]  ;;  %v5217_v24 = vrot.slane %v5179_v47, 5  ;;  %v5835_v47 = vrot.slane %v5788_v11, 5 }
 0x55d   : > { %v5469_v46 = vld [vmem:[#allocation5 + $0x8] sm:$0xe]  ;;  %v5277_v25 = vld [vmem:[#allocation5 + $0x10] sm:$0xf]  ;;  %v6772_v29 = vrot.slane %v5178_v58, 9  ;;  %v5503_v56 = vrot.slane %v5470_v49, 5 }
 0x55e   : > { %5294 = vrot.lane.b32.xlu1 %v5277_v25, %s7378_s16  ;;  %v6779_v52 = vrot.slane %v5469_v46, 9  ;;  %v5471_v57 = vld [vmem:[#allocation5 + $0x10] sm:$0xe]  ;;  %v5472_v59 = vld [vmem:[#allocation5 + $0x14] sm:$0x1]  ;;  %v6794_v58 = vrot.slane %v5787_v53, 9 }
 0x55f   : > { %v5565_v28 = vld [vmem:[#allocation5 + $0x10] sm:$0xf]  ;;  %v5181_v62 = vld [vmem:[#allocation5 + $0x14] sm:$0x1]  ;;  %v5218_v48 = vsel %vm9078_vm11, %v6772_v29, %v5217_v24  ;;  %v6780_v0 = vrot.slane %v5471_v57, 9  ;;  %v5507_v1 = vrot.slane %v5472_v59, 5 }
 0x560   : > { %5581 = vrot.lane.b32.xlu0 %v5565_v28, %s7379_s17  ;;  %v5180_v60 = vld [vmem:[#allocation5 + $0x10] sm:$0xe]  ;;  %v5504_v2 = vsel %vm9078_vm11, %v6779_v52, %v5503_v56  ;;  %v5221_v7 = vrot.slane %v5181_v62, 5  ;;  %v5774_v36 = vld [vmem:[#allocation5 + $0x14] sm:$0x1] }
 0x561   : > { %v7274_v61 = vpop.eup %7273  ;;  %v5773_v3 = vld [vmem:[#allocation5 + $0x10] sm:$0xe]  ;;  %v6773_v6 = vrot.slane %v5180_v60, 9  ;;  %v5508_v8 = vsel %vm9078_vm11, %v6780_v0, %v5507_v1  ;;  %v5325_v9 = vld [vmem:[#allocation5 + $0x8] sm:$0xf]  ;;  %v5807_v15 = vrot.slane %v5774_v36, 5 }
 0x562   : > { %v4805_v63 = vadd.f32 1.0, %v7274_v61  ;;  %v7276_v51 = vpop.eup %7275  ;;  %5245 = vrot.lane.b32.xlu1 %v5218_v48, %s7379_s17  ;;  %v6787_v13 = vrot.slane %v5773_v3, 9  ;;  %v5326_v37 = vld [vmem:[#allocation5 + $0xc] sm:$0x1]  ;;  %v5327_v16 = vld [vmem:[#allocation5 + $0x10] sm:$0xf] }
 0x563   : > { %v4806_v5 = vadd.f32 1.0, %v7276_v51  ;;  %v5222_v23 = vsel %vm9078_vm11, %v6773_v6, %v5221_v7  ;;  %v5342_v17 = vshrl.u32 %v5325_v9, 16  ;;  %v5345_v18 = vshll.u32 %v5325_v9, 16  ;;  %v5328_v19 = vld [vmem:[#allocation5 + $0x14] sm:$0x1] }
 0x564   : > { %7277 = vrcp.f32 %v4805_v63  ;;  %5533 = vrot.lane.b32.xlu0 %v5504_v2, %s7386_s27  ;;  %v5808_v12 = vsel %vm9078_vm11, %v6787_v13, %v5807_v15  ;;  %v5351_v22 = vshll.u32 %v5326_v37, 16  ;;  %v5356_v30 = vshrl.u32 %v5327_v16, 16  ;;  %v5000_v26 = vld [vmem:[#allocation5 + $0x8] sm:$0xf]  ;;  %v5001_v27 = vld [vmem:[#allocation5 + $0x10] sm:$0xf] }
 0x565   : > { %7279 = vrcp.f32 %v4806_v5  ;;  %5845 = vst.msk [vmem:[#allocation6 + $0x8] sm:$0xf] %vm414_vm3, %v5808_v12  ;;  %v5344_v43 = vrot.slane %v5342_v17, 4  ;;  %v5347_v21 = vrot.slane %v5345_v18, 5  ;;  %v5359_v38 = vshll.u32 %v5327_v16, 16 }
 0x566   : > { %5535 = vrot.lane.b32.xlu1 %v5508_v8, %s7386_s27  ;;  %5008 = vst.msk [vmem:[#allocation6 + $0xc] sm:$0xf] %vm414_vm3, %v5000_v26  ;;  %v5358_v31 = vrot.slane %v5356_v30, 4  ;;  %5009 = vst.msk [vmem:[#allocation6 + $0x18] sm:$0xf] %vm414_vm3, %v5001_v27  ;;  %v5365_v35 = vshll.u32 %v5328_v19, 16 }
 0x567   : > { %v5348_v20 = vor.u32 %v5347_v21, %v5344_v43  ;;  %v5361_v34 = vrot.slane %v5359_v38, 5  ;;  %v5353_v45 = vrot.slane %v5351_v22, 5  ;;  %v5017_v25 = vld [vmem:[#allocation5 + $0x8] sm:$0xf]  ;;  %v5613_v59 = vld [vmem:[#allocation5 + $0x10] sm:$0xf] }
 0x568   : > { %5247 = vrot.lane.b32.xlu0 %v5222_v23, %s7379_s17  ;;  %v5367_v52 = vrot.slane %v5365_v35, 5  ;;  %v4896_v28 = vld [vmem:[#allocation5 + $0x18] sm:$0xf]  ;;  %v5046_v61 = vshrl.u32 %v5017_v25, 16  ;;  %v5049_v60 = vshll.u32 %v5017_v25, 16  ;;  %v5630_v5 = vshrl.u32 %v5613_v59, 16 }
 0x569   : > { %v5349_v44 = vrot.slane %v5348_v20, 4  ;;  %v5362_v32 = vor.u32 %v5361_v34, %v5358_v31  ;;  %v4899_v48 = vld [vmem:[#allocation5 + $0x1c] sm:$0x1]  ;;  %v4915_v51 = vld [vmem:[#allocation5 + $0x20] sm:$0xf]  ;;  %v5633_v6 = vshll.u32 %v5613_v59, 16 }
 0x56a   : > { %v4918_v13 = vld [vmem:[#allocation5 + $0x24] sm:$0x1]  ;;  %v5048_v17 = vrot.slane %v5046_v61, 4  ;;  %v5051_v18 = vrot.slane %v5049_v60, 5  ;;  %v5019_v22 = vld [vmem:[#allocation5 + $0x10] sm:$0xf] }
 0x56b   : > { %v5354_v29 = vsel %vm7640_vm6, %v5349_v44, %v5353_v45  ;;  %v5363_v24 = vrot.slane %v5362_v32, 4  ;;  %v5018_v27 = vld [vmem:[#allocation5 + $0xc] sm:$0x1]  ;;  %v5632_v20 = vrot.slane %v5630_v5, 4  ;;  %v5635_v31 = vrot.slane %v5633_v6, 5  ;;  %v7105_v5 = vld [vmem:[%s9558_s5 + $0x40] sm:$0xff]  }
 0x56c   : > { %5461 = vst.msk [vmem:[#allocation6 + $0x4] sm:$0xf] %vm414_vm3, %v5354_v29  ;;  %v5060_v53 = vshrl.u32 %v5019_v22, 16  ;;  %v5052_v34 = vor.u32 %v5051_v18, %v5048_v17  ;;  %v5055_v35 = vshll.u32 %v5018_v27, 16  ;;  %v5614_v11 = vld [vmem:[#allocation5 + $0x14] sm:$0x1]  ;;  %6914 = vmatprep.subr.bf16.mxu1 %v7105_v5 }
 0x56e   : > { %v7278_v50 = vpop.eup %7277  ;;  %v5062_v44 = vrot.slane %v5060_v53, 4 }
 0x56f   : > { %v4829_v41 = vmul.f32 %v7278_v50, %v9117_v40  ;;  %v7280_v10 = vpop.eup %7279  ;;  %v5836_v40 = vsel %vm9078_vm11, %v6794_v58, %v5835_v47  ;;  %v5063_v50 = vshll.u32 %v5019_v22, 16  ;;  %v5053_v58 = vrot.slane %v5052_v34, 4  ;;  %v7108_v22 = vld [vmem:[%s9558_s5 + $0x8] sm:$0xff]   ;;  %v7109_v34 = vld [vmem:[%s9558_s5 + $0x50] sm:$0xff]  }
 0x570   : > { %v4830_v49 = vmul.f32 %v7280_v10, %v9126_v39  ;;  %5852 = vst.msk [vmem:[#allocation6 + $0x5c] sm:$0xf] %vm414_vm3, %v5836_v40  ;;  %v5368_v39 = vsel %vm7640_vm6, %v5363_v24, %v5367_v52  ;;  %v5020_v52 = vld [vmem:[#allocation5 + $0x14] sm:$0x1] }
 0x571   : > { %v6887_v46 = vpack.c.bf16 %v4829_v41, %v4829_v41  ;;  %5462 = vst.msk [vmem:[#allocation6 + $0x10] sm:$0xf] %vm414_vm3, %v5368_v39  ;;  %v5636_v41 = vor.u32 %v5635_v31, %v5632_v20  ;;  %v5065_v45 = vrot.slane %v5063_v50, 5 }
 0x572   : > { %v6888_v57 = vpack.c.bf16 %v4830_v49, %v4830_v49  ;;  %v5639_v49 = vshll.u32 %v5614_v11, 16 }
 0x573   : > { %v4886_v56 = vshrl.u32 %v6887_v46, 16  ;;  %v4889_v63 = vshll.u32 %v6887_v46, 16  ;;  %v5057_v46 = vrot.slane %v5055_v35, 5  ;;  %v5637_v59 = vrot.slane %v5636_v41, 4 }
 0x574   : > { %v4905_v0 = vshrl.u32 %v6888_v57, 16  ;;  %v4908_v9 = vshll.u32 %v6888_v57, 16 }
 0x575   : > { %v4888_v62 = vrot.slane %v4886_v56, 7  ;;  %v4764_v1 = vpop.f32.mrb[8].mxu1  ;;  %v5058_v39 = vsel %vm7640_vm6, %v5053_v58, %v5057_v46 }
 0x576   : > { %v9166_v2 = vadd.f32 %v9089_v55, %v4764_v1  ;;  %v4766_v3 = vpop.f32.mrb[9].mxu1  ;;  %v4907_v36 = vrot.slane %v4905_v0, 7 }
 0x577   : > { %v4891_v7 = vor.u32 %v4889_v63, %v4888_v62  ;;  %v4892_v8 = vrot.slane %v4888_v62, 4  ;;  %v4767_v23 = vpop.f32.mrb[10].mxu1 }
 0x578   : > { %v6759_v15 = vmul.f32 -1.442695, %v9166_v2  ;;  %v9170_v37 = vadd.f32 %v9089_v55, %v4767_v23  ;;  %v4769_v16 = vpop.f32.mrb[11].mxu1  ;;  %v4910_v43 = vor.u32 %v4908_v9, %v4907_v36  ;;  %v4911_v21 = vrot.slane %v4907_v36, 4  ;;  %v7106_v23 = vld [vmem:[%s9558_s5] sm:$0xff]  }
 0x579   : > { %v4897_v12 = vsel %vm9105_vm14, %v4891_v7, %v4896_v28  ;;  %v4900_v19 = vsel %vm9112_vm4, %v4892_v8, %v4899_v48  ;;  %v5066_v28 = vor.u32 %v5065_v45, %v5062_v44  ;;  %v5069_v7 = vshll.u32 %v5020_v52, 16  ;;  %6915 = vmatpush3.bf16.msra.mxu1 %v7106_v23 }
 0x57a   : > { %4898 = vst [vmem:[#allocation5 + $0x18] sm:$0xf] %v4897_v12  ;;  %4901 = vst [vmem:[#allocation5 + $0x1c] sm:$0x1] %v4900_v19  ;;  %7281 = vpow2.f32 %v6759_v15  ;;  %v6760_v30 = vmul.f32 -1.442695, %v9170_v37  ;;  %v4916_v26 = vsel %vm9105_vm14, %v4910_v43, %v4915_v51  ;;  %v4919_v38 = vsel %vm9112_vm4, %v4911_v21, %v4918_v13 }
 0x57b   : > { %4917 = vst [vmem:[#allocation5 + $0x20] sm:$0xf] %v4916_v26  ;;  %4920 = vst [vmem:[#allocation5 + $0x24] sm:$0x1] %v4919_v38  ;;  %v5641_v51 = vrot.slane %v5639_v49, 5  ;;  %v5067_v9 = vrot.slane %v5066_v28, 4 }
 0x57c   : > { %7283 = vpow2.f32 %v6760_v30  ;;  %v7107_v12 = vld [vmem:[%s9558_s5 + $0x48] sm:$0xff]   ;;  %v5071_v21 = vrot.slane %v5069_v7, 5 }
 0x57d   : > { %v5642_v15 = vsel %vm7640_vm6, %v5637_v59, %v5641_v51  ;;  %6916 = vmatprep.subr.bf16.mxu1 %v7107_v12  ;;  %v7111_v59 = vld [vmem:[%s9558_s5 + $0x58] sm:$0xff]  }
 0x57e   : > { %v5072_v38 = vsel %vm7640_vm6, %v5067_v9, %v5071_v21  ;;  %6917 = vmatpush3.bf16.msra.mxu1 %v7108_v22  ;;  %v7112_v51 = vld [vmem:[%s9558_s5 + $0x18] sm:$0xff]   ;;  %v4938_v9 = vld [vmem:[#allocation5 + $0x2c] sm:$0x1] }
 0x57f   : > { %6918 = vmatprep.subr.bf16.mxu1 %v7109_v34 }
 0x581   : > { %v5566_v10 = vld [vmem:[#allocation5 + $0x18] sm:$0xf]  ;;  %v5776_v25 = vld [vmem:[#allocation5 + $0x1c] sm:$0x1] }
 0x582   : > { %v5278_v32 = vld [vmem:[#allocation5 + $0x18] sm:$0xf]  ;;  %5583 = vrot.lane.b32.xlu1 %v5566_v10, %s7379_s17  ;;  %v5777_v29 = vld [vmem:[#allocation5 + $0x20] sm:$0xe]  ;;  %v5778_v24 = vld [vmem:[#allocation5 + $0x24] sm:$0x1] }
 0x583   : > { %v5775_v47 = vld [vmem:[#allocation5 + $0x18] sm:$0xe]  ;;  %5296 = vrot.lane.b32.xlu0 %v5278_v32, %s7378_s16  ;;  %v6789_v56 = vrot.slane %v5777_v29, 9  ;;  %v5815_v57 = vrot.slane %v5778_v24, 5  ;;  %v5567_v62 = vld [vmem:[#allocation5 + $0x20] sm:$0xf] }
 0x584   : > { %v7282_v40 = vpop.eup %7281  ;;  %v5182_v61 = vld [vmem:[#allocation5 + $0x18] sm:$0xe]  ;;  %v6788_v63 = vrot.slane %v5775_v47, 9  ;;  %v5811_v48 = vrot.slane %v5776_v25, 5  ;;  %v5183_v3 = vld [vmem:[#allocation5 + $0x1c] sm:$0x1] }
 0x585   : > { %v4807_v60 = vadd.f32 1.0, %v7282_v40  ;;  %v5816_v1 = vsel %vm9078_vm11, %v6789_v56, %v5815_v57  ;;  %v5279_v36 = vld [vmem:[#allocation5 + $0x20] sm:$0xf]  ;;  %v6774_v13 = vrot.slane %v5182_v61, 9  ;;  %v5225_v16 = vrot.slane %v5183_v3, 5  ;;  %v7110_v57 = vld [vmem:[%s9558_s5 + $0x10] sm:$0xff]  }
 0x586   : > { %v7284_v0 = vpop.eup %7283  ;;  %5145 = vrot.lane.b32.xlu1 %v5058_v39, %s7386_s27  ;;  %5847 = vst.msk [vmem:[#allocation6 + $0x20] sm:$0xf] %vm414_vm3, %v5816_v1  ;;  %v5812_v8 = vsel %vm9078_vm11, %v6788_v63, %v5811_v48  ;;  %v5473_v17 = vld [vmem:[#allocation5 + $0x18] sm:$0xe]  ;;  %v5474_v18 = vld [vmem:[#allocation5 + $0x1c] sm:$0x1]  ;;  %6919 = vmatpush3.bf16.msra.mxu1 %v7110_v57 }
 0x587   : > { %5585 = vrot.lane.b32.xlu0 %v5567_v62, %s7379_s17  ;;  %7285 = vrcp.f32 %v4807_v60  ;;  %v4808_v6 = vadd.f32 1.0, %v7284_v0  ;;  %5846 = vst.msk [vmem:[#allocation6 + $0x14] sm:$0xf] %vm414_vm3, %v5812_v8  ;;  %v5475_v19 = vld [vmem:[#allocation5 + $0x20] sm:$0xe]  ;;  %v6781_v30 = vrot.slane %v5473_v17, 9  ;;  %v5226_v27 = vsel %vm9078_vm11, %v6774_v13, %v5225_v16  ;;  %6920 = vmatprep.subr.bf16.mxu1 %v7111_v59 }
 0x588   : > { %v5476_v43 = vld [vmem:[#allocation5 + $0x24] sm:$0x1]  ;;  %v5511_v26 = vrot.slane %v5474_v18, 5  ;;  %v6782_v20 = vrot.slane %v5475_v19, 9  ;;  %v5184_v53 = vld [vmem:[#allocation5 + $0x20] sm:$0xe] }
 0x589   : > { %7287 = vrcp.f32 %v4808_v6  ;;  %v5515_v31 = vrot.slane %v5476_v43, 5  ;;  %v5185_v50 = vld [vmem:[#allocation5 + $0x24] sm:$0x1]  ;;  %v5615_v11 = vld [vmem:[#allocation5 + $0x18] sm:$0xf]  ;;  %v6775_v41 = vrot.slane %v5184_v53, 9 }
 0x58a   : > { %5298 = vrot.lane.b32.xlu1 %v5279_v36, %s7378_s16  ;;  %v5229_v44 = vrot.slane %v5185_v50, 5  ;;  %v5512_v10 = vsel %vm9078_vm11, %v6781_v30, %v5511_v26  ;;  %v9223_v58 = vld [vmem:[#allocation5 + $0x18] sm:$0xf]  ;;  %v5331_v47 = vld [vmem:[#allocation5 + $0x20] sm:$0xf]  ;;  %v5644_v49 = vshrl.u32 %v5615_v11, 16  ;;  %6921 = vmatpush3.bf16.msra.mxu1 %v7112_v51 }
 0x58b   : > { %5741 = vrot.lane.b32.xlu0 %v5642_v15, %s7378_s16  ;;  %v5516_v32 = vsel %vm9078_vm11, %v6782_v20, %v5515_v31  ;;  %v5332_v25 = vld [vmem:[#allocation5 + $0x24] sm:$0x1]  ;;  %v5384_v29 = vshrl.u32 %v5331_v47, 16  ;;  %v5329_v24 = vld [vmem:[#allocation5 + $0x18] sm:$0xf]  ;;  %v5647_v40 = vshll.u32 %v5615_v11, 16 }
 0x58c   : > { %v5387_v56 = vshll.u32 %v5331_v47, 16  ;;  %v5230_v61 = vsel %vm9078_vm11, %v6775_v41, %v5229_v44  ;;  %v5002_v39 = vld [vmem:[#allocation5 + $0x18] sm:$0xf]  ;;  %v5003_v62 = vld [vmem:[#allocation5 + $0x20] sm:$0xf]  ;;  %v5074_v63 = vshrl.u32 %v9223_v58, 16 }
 0x58d   : > { %v5386_v60 = vrot.slane %v5384_v29, 4  ;;  %v5393_v0 = vshll.u32 %v5332_v25, 16  ;;  %v5370_v1 = vshrl.u32 %v5329_v24, 16  ;;  %5010 = vst.msk [vmem:[#allocation6 + $0x24] sm:$0xf] %vm414_vm3, %v5002_v39  ;;  %v9244_v5 = vrot.slane %v5644_v49, 4 }
 0x58e   : > { %5249 = vrot.lane.b32.xlu1 %v5226_v27, %s7379_s17  ;;  %v7101_v35 = vld [vmem:[#allocation6 + $0x8] ss:$12 sps:$4 sm:$0xff]   ;;  %v5389_v48 = vrot.slane %v5387_v56, 5  ;;  %5011 = vst.msk [vmem:[#allocation6 + $0x30] sm:$0xf] %vm414_vm3, %v5003_v62  ;;  %v5077_v6 = vshll.u32 %v9223_v58, 16 }
 0x58f   : > { %5147 = vrot.lane.b32.xlu0 %v5072_v38, %s7386_s27  ;;  %7012 = vmatprep.mubr.msk.bf16.mxu0 %vm6080_vm5, %v7101_v35  ;;  %v5330_v7 = vld [vmem:[#allocation5 + $0x1c] sm:$0x1]  ;;  %v4935_v36 = vld [vmem:[#allocation5 + $0x28] sm:$0xf]  ;;  %v9250_v13 = vrot.slane %v5647_v40, 5  ;;  %v5372_v15 = vrot.slane %v5370_v1, 4 }
 0x590   : > { %v7113_v8 = vld [vmem:[%s9558_s5 + $0x60] sm:$0xff]   ;;  %v5390_v23 = vor.u32 %v5389_v48, %v5386_v60  ;;  %v5373_v16 = vshll.u32 %v5329_v24, 16  ;;  %v5617_v19 = vld [vmem:[#allocation5 + $0x20] sm:$0xf]  ;;  %v5395_v43 = vrot.slane %v5393_v0, 5  ;;  %v5379_v38 = vshll.u32 %v5330_v7, 16 }
 0x591   : > { %v7286_v45 = vpop.eup %7285  ;;  %v7114_v27 = vld [vmem:[%s9558_s5 + $0x20] sm:$0xff]   ;;  %v4954_v50 = vld [vmem:[#allocation5 + $0x30] sm:$0xf]  ;;  %6922 = vmatprep.subr.bf16.mxu1 %v7113_v8  ;;  %v7115_v11 = vld [vmem:[%s9558_s5 + $0x68] sm:$0xff]   ;;  %v5650_v60 = vor.u32 %v9250_v13, %v9244_v5  ;;  %v5076_v1 = vrot.slane %v5074_v63, 4  ;;  %v5079_v51 = vrot.slane %v5077_v6, 5 }
 0x592   : > { %v4831_v46 = vmul.f32 %v7286_v45, %v9166_v2  ;;  %5539 = vrot.lane.b32.xlu1 %v5516_v32, %s7386_s27  ;;  %v5391_v30 = vrot.slane %v5390_v23, 4  ;;  %v5375_v26 = vrot.slane %v5373_v16, 5  ;;  %v4957_v41 = vld [vmem:[#allocation5 + $0x34] sm:$0x1]  ;;  %v5658_v45 = vshrl.u32 %v5617_v19, 16  ;;  %6923 = vmatpush3.bf16.msra.mxu1 %v7114_v27  ;;  %v7118_v8 = vld [vmem:[%s9558_s5 + $0x30] sm:$0xff]  }
 0x593   : > { %5537 = vrot.lane.b32.xlu0 %v5512_v10, %s7386_s27  ;;  %v7288_v52 = vpop.eup %7287  ;;  %v5661_v10 = vshll.u32 %v5617_v19, 16  ;;  %v5381_v59 = vrot.slane %v5379_v38, 5  ;;  %6924 = vmatprep.subr.bf16.mxu1 %v7115_v11  ;;  %v5616_v62 = vld [vmem:[#allocation5 + $0x1c] sm:$0x1]  ;;  %v7119_v63 = vld [vmem:[%s9558_s5 + $0x78] sm:$0xff]   ;;  %v5080_v16 = vor.u32 %v5079_v51, %v5076_v1 }
 0x594   : > { %v6889_v2 = vpack.c.bf16 %v4831_v46, %v4831_v46  ;;  %v4832_v28 = vmul.f32 %v7288_v52, %v9170_v37  ;;  %v5396_v32 = vsel %vm7640_vm6, %v5391_v30, %v5395_v43  ;;  %v5376_v47 = vor.u32 %v5375_v26, %v5372_v15  ;;  %v5023_v52 = vld [vmem:[#allocation5 + $0x20] sm:$0xf]  ;;  %v5022_v58 = vld [vmem:[#allocation5 + $0x1c] sm:$0x1]  ;;  %v5618_v6 = vld [vmem:[#allocation5 + $0x24] sm:$0x1] }
 0x595   : > { %5464 = vst.msk [vmem:[#allocation6 + $0x28] sm:$0xf] %vm414_vm3, %v5396_v32  ;;  %v5088_v48 = vshrl.u32 %v5023_v52, 16  ;;  %v5091_v5 = vshll.u32 %v5023_v52, 16  ;;  %v5653_v7 = vshll.u32 %v5616_v62, 16  ;;  %v5667_v38 = vshll.u32 %v5618_v6, 16 }
 0x596   : > { %v4925_v37 = vshrl.u32 %v6889_v2, 16  ;;  %v6890_v3 = vpack.c.bf16 %v4832_v28, %v4832_v28  ;;  %v4928_v18 = vshll.u32 %v6889_v2, 16  ;;  %v5377_v57 = vrot.slane %v5376_v47, 4  ;;  %v7116_v2 = vld [vmem:[%s9558_s5 + $0x28] sm:$0xff]   ;;  %v7120_v27 = vld [vmem:[%s9558_s5 + $0x38] sm:$0xff]  }
 0x597   : > { %5251 = vrot.lane.b32.xlu0 %v5230_v61, %s7379_s17  ;;  %6925 = vmatpush3.bf16.msra.mxu1 %v7116_v2  ;;  %v5093_v43 = vrot.slane %v5091_v5, 5  ;;  %v5024_v30 = vld [vmem:[#allocation5 + $0x24] sm:$0x1]  ;;  %v5669_v32 = vrot.slane %v5667_v38, 5 }
 0x598   : > { %v4927_v17 = vrot.slane %v4925_v37, 7  ;;  %v4944_v12 = vshrl.u32 %v6890_v3, 16  ;;  %v4947_v21 = vshll.u32 %v6890_v3, 16  ;;  %v4772_v22 = vpop.f32.mrb[12].mxu1  ;;  %v5382_v0 = vsel %vm7640_vm6, %v5377_v57, %v5381_v59 }
 0x599   : > { %v9256_v34 = vadd.f32 %v9089_v55, %v4772_v22  ;;  %v4774_v35 = vpop.f32.mrb[13].mxu1  ;;  %5463 = vst.msk [vmem:[#allocation6 + $0x1c] sm:$0xf] %vm414_vm3, %v5382_v0  ;;  %v5660_v37 = vrot.slane %v5658_v45, 4  ;;  %v5663_v3 = vrot.slane %v5661_v10, 5  ;;  %v5083_v22 = vshll.u32 %v5022_v58, 16 }
 0x59a   : > { %v4930_v20 = vor.u32 %v4928_v18, %v4927_v17  ;;  %v4931_v31 = vrot.slane %v4927_v17, 4  ;;  %v4946_v53 = vrot.slane %v4944_v12, 7  ;;  %v4775_v44 = vpop.f32.mrb[14].mxu1 }
 0x59b   : > { %v4777_v24 = vpop.f32.mrb[15].mxu1  ;;  %v6761_v40 = vmul.f32 -1.442695, %v9256_v34  ;;  %v9270_v56 = vadd.f32 %v9089_v55, %v4775_v44  ;;  %v7117_v55 = vld [vmem:[%s9558_s5 + $0x70] sm:$0xff]   ;;  %v5664_v19 = vor.u32 %v5663_v3, %v5660_v37  ;;  %v5085_v45 = vrot.slane %v5083_v22, 5 }
 0x59c   : > { %v4936_v46 = vsel %vm9105_vm14, %v4930_v20, %v4935_v36  ;;  %v4939_v49 = vsel %vm9112_vm4, %v4931_v31, %v4938_v9  ;;  %v4949_v25 = vor.u32 %v4947_v21, %v4946_v53  ;;  %v4950_v29 = vrot.slane %v4946_v53, 4  ;;  %6926 = vmatprep.subr.bf16.mxu1 %v7117_v55 }
 0x59d   : > { %4937 = vst [vmem:[#allocation5 + $0x28] sm:$0xf] %v4936_v46  ;;  %4940 = vst [vmem:[#allocation5 + $0x2c] sm:$0x1] %v4939_v49  ;;  %7289 = vpow2.f32 %v6761_v40  ;;  %v6762_v39 = vmul.f32 -1.442695, %v9270_v56  ;;  %6927 = vmatpush3.bf16.msra.mxu1 %v7118_v8 }
 0x59e   : > { %v4955_v28 = vsel %vm9105_vm14, %v4949_v25, %v4954_v50  ;;  %v4958_v61 = vsel %vm9112_vm4, %v4950_v29, %v4957_v41  ;;  %v5651_v36 = vrot.slane %v5650_v60, 4  ;;  %v5090_v9 = vrot.slane %v5088_v48, 4  ;;  %6928 = vmatprep.subr.bf16.mxu1 %v7119_v63 }
 0x59f   : > { %4956 = vst [vmem:[#allocation5 + $0x30] sm:$0xf] %v4955_v28  ;;  %4959 = vst [vmem:[#allocation5 + $0x34] sm:$0x1] %v4958_v61  ;;  %7291 = vpow2.f32 %v6762_v39  ;;  %v5655_v21 = vrot.slane %v5653_v7, 5  ;;  %v5081_v31 = vrot.slane %v5080_v16, 4 }
 0x5a0   : > { %v5665_v35 = vrot.slane %v5664_v19, 4  ;;  %v5094_v11 = vor.u32 %v5093_v43, %v5090_v9  ;;  %v5097_v41 = vshll.u32 %v5024_v30, 16 }
 0x5a1   : > { %v5656_v20 = vsel %vm7640_vm6, %v5651_v36, %v5655_v21  ;;  %6929 = vmatpush3.bf16.msra.mxu1 %v7120_v27  ;;  %v5086_v46 = vsel %vm7640_vm6, %v5081_v31, %v5085_v45 }
 0x5a2   : > { %7032 = vmatprep.subr.bf16.mxu1 %v9096_v4  ;;  %v5670_v49 = vsel %vm7640_vm6, %v5665_v35, %v5669_v32  ;;  %v5095_v25 = vrot.slane %v5094_v11, 4  ;;  %v5099_v29 = vrot.slane %v5097_v41, 5 }
 0x5a4   : > { %v5779_v13 = vld [vmem:[#allocation5 + $0x28] sm:$0xe]  ;;  %v5780_v23 = vld [vmem:[#allocation5 + $0x2c] sm:$0x1]  ;;  %v5100_v39 = vsel %vm7640_vm6, %v5095_v25, %v5099_v29 }
 0x5a5   : > { %v5568_v15 = vld [vmem:[#allocation5 + $0x28] sm:$0xf]  ;;  %v6790_v17 = vrot.slane %v5779_v13, 9  ;;  %v5819_v18 = vrot.slane %v5780_v23, 5  ;;  %v5187_v52 = vld [vmem:[#allocation5 + $0x2c] sm:$0x1] }
 0x5a6   : > { %5587 = vrot.lane.b32.xlu1 %v5568_v15, %s7379_s17  ;;  %v5280_v12 = vld [vmem:[#allocation5 + $0x28] sm:$0xf]  ;;  %v5569_v50 = vld [vmem:[#allocation5 + $0x30] sm:$0xf]  ;;  %v5478_v57 = vld [vmem:[#allocation5 + $0x2c] sm:$0x1] }
 0x5a7   : > { %5300 = vrot.lane.b32.xlu0 %v5280_v12, %s7378_s16  ;;  %v5820_v26 = vsel %vm9078_vm11, %v6790_v17, %v5819_v18  ;;  %v7290_v53 = vpop.eup %7289  ;;  %v5186_v24 = vld [vmem:[#allocation5 + $0x28] sm:$0xe]  ;;  %v5281_v4 = vld [vmem:[#allocation5 + $0x30] sm:$0xf]  ;;  %v5233_v61 = vrot.slane %v5187_v52, 5  ;;  %v5519_v48 = vrot.slane %v5478_v57, 5 }
 0x5a8   : > { %5848 = vst.msk [vmem:[#allocation6 + $0x2c] sm:$0xf] %vm414_vm3, %v5820_v26  ;;  %v4809_v44 = vadd.f32 1.0, %v7290_v53  ;;  %v5477_v40 = vld [vmem:[#allocation5 + $0x28] sm:$0xe]  ;;  %v6776_v28 = vrot.slane %v5186_v24, 9 }
 0x5a9   : > { %v7292_v10 = vpop.eup %7291  ;;  %v5188_v2 = vld [vmem:[#allocation5 + $0x30] sm:$0xe]  ;;  %v5189_v60 = vld [vmem:[#allocation5 + $0x34] sm:$0x1]  ;;  %v6783_v62 = vrot.slane %v5477_v40, 9 }
 0x5aa   : > { %5743 = vrot.lane.b32.xlu1 %v5656_v20, %s7378_s16  ;;  %7293 = vrcp.f32 %v4809_v44  ;;  %v4810_v47 = vadd.f32 1.0, %v7292_v10  ;;  %v5479_v55 = vld [vmem:[#allocation5 + $0x30] sm:$0xe]  ;;  %v5480_v0 = vld [vmem:[#allocation5 + $0x34] sm:$0x1]  ;;  %v6777_v37 = vrot.slane %v5188_v2, 9  ;;  %v5234_v7 = vsel %vm9078_vm11, %v6776_v28, %v5233_v61 }
 0x5ab   : > { %5589 = vrot.lane.b32.xlu0 %v5569_v50, %s7379_s17  ;;  %v5333_v1 = vld [vmem:[#allocation5 + $0x28] sm:$0xf]  ;;  %v5781_v51 = vld [vmem:[#allocation5 + $0x30] sm:$0xe]  ;;  %v5237_v3 = vrot.slane %v5189_v60, 5  ;;  %v6784_v5 = vrot.slane %v5479_v55, 9  ;;  %v5520_v6 = vsel %vm9078_vm11, %v6783_v62, %v5519_v48 }
 0x5ac   : > { %7295 = vrcp.f32 %v4810_v47  ;;  %v5523_v8 = vrot.slane %v5480_v0, 5  ;;  %v5334_v63 = vld [vmem:[#allocation5 + $0x2c] sm:$0x1]  ;;  %v5398_v36 = vshrl.u32 %v5333_v1, 16  ;;  %v5335_v58 = vld [vmem:[#allocation5 + $0x30] sm:$0xf] }
 0x5ad   : > { %v5619_v9 = vld [vmem:[#allocation5 + $0x28] sm:$0xf]  ;;  %v5401_v13 = vshll.u32 %v5333_v1, 16  ;;  %v5412_v17 = vshrl.u32 %v5335_v58, 16  ;;  %v5005_v18 = vld [vmem:[#allocation5 + $0x30] sm:$0xf]  ;;  %v5238_v38 = vsel %vm9078_vm11, %v6777_v37, %v5237_v3 }
 0x5ae   : > { %5149 = vrot.lane.b32.xlu1 %v5086_v46, %s7386_s27  ;;  %v5004_v23 = vld [vmem:[#allocation5 + $0x28] sm:$0xf]  ;;  %v5400_v16 = vrot.slane %v5398_v36, 4  ;;  %v6791_v12 = vrot.slane %v5781_v51, 9  ;;  %v5407_v21 = vshll.u32 %v5334_v63, 16  ;;  %v5524_v27 = vsel %vm9078_vm11, %v6784_v5, %v5523_v8 }
 0x5af   : > { %5745 = vrot.lane.b32.xlu0 %v5670_v49, %s7378_s16  ;;  %v7104_v59 = vld [vmem:[#allocation6 + $0x20] ss:$12 sps:$4 sm:$0xff]   ;;  %5012 = vst.msk [vmem:[#allocation6 + $0x3c] sm:$0xf] %vm414_vm3, %v5004_v23  ;;  %v5403_v43 = vrot.slane %v5401_v13, 5  ;;  %v5414_v20 = vrot.slane %v5412_v17, 4 }
 0x5b0   : > { %7013 = vmatmul.mubr.msk.bf16.vlgmr.msra.gmra.mrb[32].mxu0 %vm6080_vm5, %v7104_v59  ;;  %v5336_v22 = vld [vmem:[#allocation5 + $0x34] sm:$0x1]  ;;  %5013 = vst.msk [vmem:[#allocation6 + $0x48] sm:$0xf] %vm414_vm3, %v5005_v18  ;;  %v5415_v31 = vshll.u32 %v5335_v58, 16  ;;  %v5675_v41 = vshll.u32 %v5619_v9, 16 }
 0x5b1   : > { %v5782_v30 = vld [vmem:[#allocation5 + $0x34] sm:$0x1]  ;;  %v5025_v35 = vld [vmem:[#allocation5 + $0x28] sm:$0xf]  ;;  %v5404_v11 = vor.u32 %v5403_v43, %v5400_v16  ;;  %v5421_v45 = vshll.u32 %v5336_v22, 16  ;;  %v5409_v25 = vrot.slane %v5407_v21, 5 }
 0x5b2   : > { %5302 = vrot.lane.b32.xlu1 %v5281_v4, %s7378_s16  ;;  %v5417_v44 = vrot.slane %v5415_v31, 5  ;;  %v5823_v10 = vrot.slane %v5782_v30, 5  ;;  %v5621_v46 = vld [vmem:[#allocation5 + $0x30] sm:$0xf]  ;;  %v5102_v29 = vshrl.u32 %v5025_v35, 16  ;;  %v5105_v24 = vshll.u32 %v5025_v35, 16 }
 0x5b3   : > { %5151 = vrot.lane.b32.xlu0 %v5100_v39, %s7386_s27  ;;  %v5405_v49 = vrot.slane %v5404_v11, 4  ;;  %v4974_v57 = vld [vmem:[#allocation5 + $0x38] sm:$0xf]  ;;  %v4977_v28 = vld [vmem:[#allocation5 + $0x3c] sm:$0x1]  ;;  %v5686_v61 = vshrl.u32 %v5621_v46, 16 }
 0x5b4   : > { %v7294_v15 = vpop.eup %7293  ;;  %v5418_v52 = vor.u32 %v5417_v44, %v5414_v20  ;;  %v5689_v60 = vshll.u32 %v5621_v46, 16  ;;  %v5423_v39 = vrot.slane %v5421_v45, 5  ;;  %v5027_v51 = vld [vmem:[#allocation5 + $0x30] sm:$0xf]  ;;  %v4993_v37 = vld [vmem:[#allocation5 + $0x40] sm:$0xf]  ;;  %v9360_v46 = vpop.permute.xlu1 %5595 }
 0x5b5   : > { %v4833_v19 = vmul.f32 %v7294_v15, %v9256_v34  ;;  %v5672_v34 = vshrl.u32 %v5619_v9, 16  ;;  %v5410_v2 = vsel %vm7640_vm6, %v5405_v49, %v5409_v25  ;;  %v4996_v3 = vld [vmem:[#allocation5 + $0x44] sm:$0x1]  ;;  %v5620_v9 = vld [vmem:[#allocation5 + $0x2c] sm:$0x1]  ;;  %v5104_v13 = vrot.slane %v5102_v29, 4 }
 0x5b6   : > { %5253 = vrot.lane.b32.xlu1 %v5234_v7, %s7379_s17  ;;  %v7296_v26 = vpop.eup %7295  ;;  %5465 = vst.msk [vmem:[#allocation6 + $0x34] sm:$0xf] %vm414_vm3, %v5410_v2  ;;  %v5419_v55 = vrot.slane %v5418_v52, 4  ;;  %v5677_v7 = vrot.slane %v5675_v41, 5  ;;  %v5107_v23 = vrot.slane %v5105_v24, 5  ;;  %v5688_v15 = vrot.slane %v5686_v61, 4 }
 0x5b7   : > { %5541 = vrot.lane.b32.xlu0 %v5520_v6, %s7386_s27  ;;  %v6891_v53 = vpack.c.bf16 %v4833_v19, %v4833_v19  ;;  %v4834_v50 = vmul.f32 %v7296_v26, %v9270_v56  ;;  %v5824_v56 = vsel %vm9078_vm11, %v6791_v12, %v5823_v10  ;;  %v5674_v5 = vrot.slane %v5672_v34, 4  ;;  %v5026_v12 = vld [vmem:[#allocation5 + $0x2c] sm:$0x1]  ;;  %v5622_v19 = vld [vmem:[#allocation5 + $0x34] sm:$0x1] }
 0x5b8   : > { %5849 = vst.msk [vmem:[#allocation6 + $0x38] sm:$0xf] %vm414_vm3, %v5824_v56  ;;  %v5424_v8 = vsel %vm7640_vm6, %v5419_v55, %v5423_v39  ;;  %v5116_v16 = vshrl.u32 %v5027_v51, 16  ;;  %v5691_v43 = vrot.slane %v5689_v60, 5  ;;  %v5119_v21 = vshll.u32 %v5027_v51, 16 }
 0x5b9   : > { %v4964_v32 = vshrl.u32 %v6891_v53, 16  ;;  %v6892_v47 = vpack.c.bf16 %v4834_v50, %v4834_v50  ;;  %v4967_v40 = vshll.u32 %v6891_v53, 16  ;;  %5466 = vst.msk [vmem:[#allocation6 + $0x40] sm:$0xf] %vm414_vm3, %v5424_v8  ;;  %v5678_v22 = vor.u32 %v5677_v7, %v5674_v5  ;;  %v5028_v53 = vld [vmem:[#allocation5 + $0x34] sm:$0x1] }
 0x5ba   : > { %5543 = vrot.lane.b32.xlu1 %v5524_v27, %s7386_s27  ;;  %v5681_v30 = vshll.u32 %v5620_v9, 16  ;;  %v5111_v26 = vshll.u32 %v5026_v12, 16  ;;  %v9355_v27 = vld [vmem:[#allocation5 + $0x48] sm:$0xf]  ;;  %v5108_v20 = vor.u32 %v5107_v23, %v5104_v13  ;;  %v5692_v31 = vor.u32 %v5691_v43, %v5688_v15 }
 0x5bb   : > { %5255 = vrot.lane.b32.xlu0 %v5238_v38, %s7379_s17  ;;  %v4966_v4 = vrot.slane %v4964_v32, 7  ;;  %v4983_v59 = vshrl.u32 %v6892_v47, 16  ;;  %v4986_v1 = vshll.u32 %v6892_v47, 16  ;;  %v5695_v38 = vshll.u32 %v5622_v19, 16 }
 0x5bc   : > { %v5118_v42 = vrot.slane %v5116_v16, 4  ;;  %v5121_v50 = vrot.slane %v5119_v21, 5  ;;  %v5679_v35 = vrot.slane %v5678_v22, 4  ;;  %v5728_v11 = vshrl.u32 %v9355_v27, 16 }
 0x5bd   : > { %v4969_v62 = vor.u32 %v4967_v40, %v4966_v4  ;;  %v4970_v48 = vrot.slane %v4966_v4, 4  ;;  %v4985_v0 = vrot.slane %v4983_v59, 7  ;;  %v5683_v41 = vrot.slane %v5681_v30, 5 }
 0x5be   : > { %v5113_v44 = vrot.slane %v5111_v26, 5  ;;  %v5697_v45 = vrot.slane %v5695_v38, 5  ;;  %v5125_v10 = vshll.u32 %v5028_v53, 16  ;;  %v5109_v49 = vrot.slane %v5108_v20, 4 }
 0x5bf   : > { %v4975_v63 = vsel %vm9105_vm14, %v4969_v62, %v4974_v57  ;;  %v4978_v36 = vsel %vm9112_vm4, %v4970_v48, %v4977_v28  ;;  %v4988_v58 = vor.u32 %v4986_v1, %v4985_v0  ;;  %v4989_v6 = vrot.slane %v4985_v0, 4 }
 0x5c0   : > { %4976 = vst [vmem:[#allocation5 + $0x38] sm:$0xf] %v4975_v63  ;;  %4979 = vst [vmem:[#allocation5 + $0x3c] sm:$0x1] %v4978_v36  ;;  %v5693_v25 = vrot.slane %v5692_v31, 4  ;;  %v5122_v29 = vor.u32 %v5121_v50, %v5118_v42  ;;  %v5684_v40 = vsel %vm7640_vm6, %v5679_v35, %v5683_v41  ;;  %v5127_v61 = vrot.slane %v5125_v10, 5 }
 0x5c1   : > { %v4994_v17 = vsel %vm9105_vm14, %v4988_v58, %v4993_v37  ;;  %v4997_v18 = vsel %vm9112_vm4, %v4989_v6, %v4996_v3  ;;  %v5731_v39 = vshll.u32 %v9355_v27, 16  ;;  %v5114_v0 = vsel %vm7640_vm6, %v5109_v49, %v5113_v44 }
 0x5c2   : > { %4995 = vst [vmem:[#allocation5 + $0x40] sm:$0xf] %v4994_v17  ;;  %4998 = vst [vmem:[#allocation5 + $0x44] sm:$0x1] %v4997_v18  ;;  %v5698_v1 = vsel %vm7640_vm6, %v5693_v25, %v5697_v45  ;;  %v5123_v51 = vrot.slane %v5122_v29, 4 }
 0x5c4   : > { %v5128_v19 = vsel %vm7640_vm6, %v5123_v51, %v5127_v61  ;;  %v5730_v51 = vrot.slane %v5728_v11, 4 }
 0x5c7   : > { %v5570_v14 = vld [vmem:[#allocation5 + $0x38] sm:$0xf]  ;;  %v5482_v4 = vld [vmem:[#allocation5 + $0x3c] sm:$0x1] }
 0x5c8   : > { %v5282_v34 = vld [vmem:[#allocation5 + $0x38] sm:$0xf]  ;;  %5591 = vrot.lane.b32.xlu1 %v5570_v14, %s7379_s17  ;;  %v5191_v60 = vld [vmem:[#allocation5 + $0x3c] sm:$0x1]  ;;  %v5527_v5 = vrot.slane %v5482_v4, 5 }
 0x5c9   : > { %5304 = vrot.lane.b32.xlu0 %v5282_v34, %s7378_s16  ;;  %v5785_v32 = vld [vmem:[#allocation5 + $0x40] sm:$0xe]  ;;  %v5786_v47 = vld [vmem:[#allocation5 + $0x44] sm:$0x1]  ;;  %v5481_v56 = vld [vmem:[#allocation5 + $0x38] sm:$0xe] }
 0x5ca   : > { %v6793_v24 = vrot.slane %v5785_v32, 9  ;;  %v5831_v52 = vrot.slane %v5786_v47, 5  ;;  %v5571_v57 = vld [vmem:[#allocation5 + $0x40] sm:$0xf]  ;;  %v5190_v59 = vld [vmem:[#allocation5 + $0x38] sm:$0xe] }
 0x5cb   : > { %v5625_v2 = vld [vmem:[#allocation5 + $0x40] sm:$0xf]  ;;  %v9369_v62 = vld [vmem:[#allocation5 + $0x38] sm:$0xe]  ;;  %v6785_v3 = vrot.slane %v5481_v56, 9  ;;  %v6778_v7 = vrot.slane %v5190_v59, 9 }
 0x5cc   : > { %v5832_v28 = vsel %vm9078_vm11, %v6793_v24, %v5831_v52  ;;  %5747 = vrot.lane.b32.xlu1 %v5684_v40, %s7378_s16  ;;  %v5714_v55 = vshrl.u32 %v5625_v2, 16  ;;  %v5717_v37 = vshll.u32 %v5625_v2, 16  ;;  %v5623_v63 = vld [vmem:[#allocation5 + $0x38] sm:$0xf]  ;;  %v5241_v58 = vrot.slane %v5191_v60, 5 }
 0x5cd   : > { %5593 = vrot.lane.b32.xlu0 %v5571_v57, %s7379_s17  ;;  %5851 = vst.msk [vmem:[#allocation6 + $0x50] sm:$0xf] %vm414_vm3, %v5832_v28  ;;  %v5700_v9 = vshrl.u32 %v5623_v63, 16  ;;  %v5703_v13 = vshll.u32 %v5623_v63, 16  ;;  %v5029_v23 = vld [vmem:[#allocation5 + $0x38] sm:$0xf]  ;;  %v5528_v44 = vsel %vm9078_vm11, %v6785_v3, %v5527_v5 }
 0x5ce   : > { %v5293_v48 = vpop.permute.xlu0 %5292  ;;  %v5716_v8 = vrot.slane %v5714_v55, 4  ;;  %v5719_v6 = vrot.slane %v5717_v37, 5  ;;  %v5626_v15 = vld [vmem:[#allocation5 + $0x44] sm:$0x1]  ;;  %v5483_v16 = vld [vmem:[#allocation5 + $0x40] sm:$0xe]  ;;  %v5242_v45 = vsel %vm9078_vm11, %v6778_v7, %v5241_v58 }
 0x5cf   : > { %5317 = vst.msk [vmem:[#allocation6] sm:$0xf] %vm5316_vm8, %v5293_v48  ;;  %v5484_v17 = vld [vmem:[#allocation5 + $0x44] sm:$0x1]  ;;  %v5283_v12 = vld [vmem:[#allocation5 + $0x40] sm:$0xf] }
 0x5d0   : > { %v9377_v36 = vpop.permute.xlu1 %5294  ;;  %5153 = vrot.lane.b32.xlu1 %v5114_v0, %s7386_s27  ;;  %v5130_v43 = vshrl.u32 %v5029_v23, 16  ;;  %v5133_v21 = vshll.u32 %v5029_v23, 16  ;;  %v5337_v22 = vld [vmem:[#allocation5 + $0x38] sm:$0xf]  ;;  %v6792_v30 = vrot.slane %v9369_v62, 9  ;;  %v5720_v26 = vor.u32 %v5719_v6, %v5716_v8 }
 0x5d1   : > { %5749 = vrot.lane.b32.xlu0 %v5698_v1, %s7378_s16  ;;  %v5702_v38 = vrot.slane %v5700_v9, 4  ;;  %v5705_v20 = vrot.slane %v5703_v13, 5  ;;  %v5338_v31 = vld [vmem:[#allocation5 + $0x3c] sm:$0x1]  ;;  %v5426_v53 = vshrl.u32 %v5337_v22, 16  ;;  %v5723_v50 = vshll.u32 %v5626_v15, 16 }
 0x5d2   : > { %v5582_v18 = vpop.permute.xlu0 %5581  ;;  %v6786_v14 = vrot.slane %v5483_v16, 9  ;;  %v5531_v34 = vrot.slane %v5484_v17, 5  ;;  %v5429_v35 = vshll.u32 %v5337_v22, 16  ;;  %v5339_v41 = vld [vmem:[#allocation5 + $0x40] sm:$0xf]  ;;  %v5132_v29 = vrot.slane %v5130_v43, 4 }
 0x5d3   : > { %v5624_v10 = vld [vmem:[#allocation5 + $0x3c] sm:$0x1]  ;;  %v5428_v32 = vrot.slane %v5426_v53, 4  ;;  %v5340_v47 = vld [vmem:[#allocation5 + $0x44] sm:$0x1]  ;;  %v5440_v49 = vshrl.u32 %v5339_v41, 16  ;;  %v5706_v57 = vor.u32 %v5705_v20, %v5702_v38 }
 0x5d4   : > { %v9384_v42 = vpop.permute.xlu1 %5245  ;;  %5306 = vrot.lane.b32.xlu1 %v5283_v12, %s7378_s16  ;;  %v5431_v24 = vrot.slane %v5429_v35, 5  ;;  %v5435_v52 = vshll.u32 %v5338_v31, 16  ;;  %v5443_v56 = vshll.u32 %v5339_v41, 16  ;;  %v5006_v4 = vld [vmem:[#allocation5 + $0x38] sm:$0xf]  ;;  %v5721_v40 = vrot.slane %v5720_v26, 4 }
 0x5d5   : > { %5155 = vrot.lane.b32.xlu0 %v5128_v19, %s7386_s27  ;;  %v5135_v59 = vrot.slane %v5133_v21, 5  ;;  %v5442_v2 = vrot.slane %v5440_v49, 4  ;;  %5014 = vst.msk [vmem:[#allocation6 + $0x54] sm:$0xf] %vm414_vm3, %v5006_v4  ;;  %v5784_v28 = vld [vmem:[#allocation5 + $0x3c] sm:$0x1]  ;;  %v5532_v6 = vsel %vm9078_vm11, %v6786_v14, %v5531_v34 }
 0x5d6   : > { %v5534_v25 = vpop.permute.xlu0 %5533  ;;  %v5432_v60 = vor.u32 %v5431_v24, %v5428_v32  ;;  %v5445_v55 = vrot.slane %v5443_v56, 5  ;;  %v5449_v62 = vshll.u32 %v5340_v47, 16  ;;  %v5827_v48 = vrot.slane %v5784_v28, 5  ;;  %v5628_v3 = vld [vmem:[#allocation5 + $0x4c] sm:$0x1]  ;;  %v7363_v4 = vld [vmem:[%s9558_s5 + $0x80] sm:$0xff]  }
 0x5d7   : > { %5557 = vst.msk [vmem:[#allocation6 + $0x4] sm:$0xf] %vm5167_vm12, %v5534_v25  ;;  %v5725_v0 = vrot.slane %v5723_v50, 5  ;;  %v5709_v1 = vshll.u32 %v5624_v10, 16  ;;  %v5733_v37 = vrot.slane %v5731_v39, 5  ;;  %v5437_v7 = vrot.slane %v5435_v52, 5 }
 0x5d8   : > { %5605 = vst.msk [vmem:[#allocation6 + $0x4] sm:$0xf] %vm5267_vm1, %v5582_v18  ;;  %v5536_v61 = vpop.permute.xlu1 %5535  ;;  %5257 = vrot.lane.b32.xlu1 %v5242_v45, %s7379_s17  ;;  %v5433_v5 = vrot.slane %v5432_v60, 4  ;;  %v5446_v8 = vor.u32 %v5445_v55, %v5442_v2  ;;  %v5828_v63 = vsel %vm9078_vm11, %v6792_v30, %v5827_v48  ;;  %v5030_v9 = vld [vmem:[#allocation5 + $0x3c] sm:$0x1]  ;;  %v5136_v13 = vor.u32 %v5135_v59, %v5132_v29  ;;  %s372_s17 = scalar_lea.vmem %s9563_s10, %s6855_s22 }
 0x5d9   : > { %5558 = vst.msk [vmem:[#allocation6 + $0x10] sm:$0xf] %vm5167_vm12, %v5536_v61  ;;  %5545 = vrot.lane.b32.xlu0 %v5528_v44, %s7386_s27  ;;  %v5726_v58 = vsel %vm7640_vm6, %v5721_v40, %v5725_v0  ;;  %v5707_v11 = vrot.slane %v5706_v57, 4  ;;  %v5451_v23 = vrot.slane %v5449_v62, 5  ;;  %v5737_v15 = vshll.u32 %v5628_v3, 16  ;;  %v7364_v57 = vld [vmem:[%s9558_s5 + $0x88] sm:$0xff]  }
 0x5da   : > { %5850 = vst.msk [vmem:[#allocation6 + $0x44] sm:$0xf] %vm414_vm3, %v5828_v63  ;;  %v5438_v27 = vsel %vm7640_vm6, %v5433_v5, %v5437_v7  ;;  %v5447_v39 = vrot.slane %v5446_v8, 4  ;;  %v5711_v16 = vrot.slane %v5709_v1, 5  ;;  %v5139_v33 = vshll.u32 %v5030_v9, 16  ;;  %v5248_v38 = vpop.permute.xlu0 %5247 }
 0x5db   : > { %5467 = vst.msk [vmem:[#allocation6 + $0x4c] sm:$0xf] %vm414_vm3, %v5438_v27  ;;  %v5734_v17 = vor.u32 %v5733_v37, %v5730_v51  ;;  %v5137_v19 = vrot.slane %v5136_v13, 4  ;;  %v5739_v22 = vrot.slane %v5737_v15, 5 }
 0x5dc   : > { %5547 = vrot.lane.b32.xlu1 %v5532_v6, %s7386_s27  ;;  %v5452_v18 = vsel %vm7640_vm6, %v5447_v39, %v5451_v23  ;;  %v5712_v12 = vsel %vm7640_vm6, %v5707_v11, %v5711_v16  ;;  %v5141_v43 = vrot.slane %v5139_v33, 5  ;;  %v7134_v39 = vld [vmem:[#allocation6 + $0x50] ss:$12 sps:$4 sm:$0xff]  }
 0x5dd   : > { %5753 = vrot.lane.b32.xlu0 %v5726_v58, %s7378_s16  ;;  %5468 = vst.msk [vmem:[#allocation6 + $0x58] sm:$0xf] %vm414_vm3, %v5452_v18  ;;  %v5735_v21 = vrot.slane %v5734_v17, 4  ;;  %v7135_v17 = vld [vmem:[%s9560_s7] sm:$0xff]   ;;  %v7136_v18 = vld [vmem:[%s9560_s7 + $0x8] sm:$0xff]   ;;  %vm6472_vm3 = vcmask 31744  }
 0x5de   : > { %v5142_v30 = vsel %vm7640_vm6, %v5137_v19, %v5141_v43  ;;  %7020 = vmatprep.subr.bf16.mxu0 %v7135_v17  ;;  %v9488_v19 = vld [vmem:[%s9559_s6] ss:$0 sm:$0xff] }
 0x5df   : > { %v5740_v26 = vsel %vm7640_vm6, %v5735_v21, %v5739_v22  ;;  %7021 = vmatpush3.bf16.msra.mxu0 %v7135_v17  ;;  %vm6383_vm6 = vcmask 64512  }
 0x5e0   : > { %5751 = vrot.lane.b32.xlu1 %v5712_v12, %s7378_s16  ;;  %7022 = vmatprep.subr.bf16.mxu0 %v7136_v18 }
 0x5e3   : > { %7023 = vmatpush3.bf16.msra.mxu0 %v7136_v18 }
 0x5e4   : > { %5157 = vrot.lane.b32.xlu1 %v5142_v30, %s7386_s27 }
 0x5e8   : > { %5755 = vrot.lane.b32.xlu1 %v5740_v26, %s7378_s16 }
 0x5f4   : > { %v5584_v20 = vpop.permute.xlu1 %5583 }
 0x5f5   : > { %v5297_v31 = vpop.permute.xlu0 %5296  ;;  %5606 = vst.msk [vmem:[#allocation6 + $0x10] sm:$0xf] %vm5267_vm1, %v5584_v20 }
 0x5f8   : > { %v5146_v53 = vpop.permute.xlu1 %5145 }
 0x5f9   : > { %v5586_v50 = vpop.permute.xlu0 %5585  ;;  %5169 = vst.msk [vmem:[#allocation6 + $0xc] sm:$0xf] %vm5167_vm12, %v5146_v53 }
 0x5fa   : > { %5269 = vst.msk [vmem:[#allocation6 + $0xc] sm:$0xf] %vm5267_vm1, %v9384_v42 }
 0x5fb   : > { %5318 = vst.msk [vmem:[#allocation6 + $0xc] sm:$0xf] %vm5316_vm8, %v9377_v36 }
 0x5fc   : > { %v5299_v14 = vpop.permute.xlu1 %5298 }
 0x5fd   : > { %v5742_v54 = vpop.permute.xlu0 %5741 }
 0x5fe   : > { %5765 = vst.msk [vmem:[#allocation6 + $0x4] sm:$0xf] %vm5316_vm8, %v5742_v54 }
 0x600   : > { %v5250_v34 = vpop.permute.xlu1 %5249 }
 0x601   : > { %v5148_v35 = vpop.permute.xlu0 %5147 }
 0x602   : > { %5170 = vst.msk [vmem:[#allocation6 + $0x18] sm:$0xf] %vm5167_vm12, %v5148_v35  ;;  %v7121_v29 = vld [vmem:[#allocation6] ss:$12 sps:$4 sm:$0xff]  }
 0x603   : > { %5270 = vst.msk [vmem:[#allocation6 + $0x18] sm:$0xf] %vm5267_vm1, %v5248_v38 }
 0x604   : > { %5319 = vst.msk [vmem:[#allocation6 + $0x18] sm:$0xf] %vm5316_vm8, %v5297_v31  ;;  %v5540_v41 = vpop.permute.xlu1 %5539 }
 0x605   : > { %v5538_v44 = vpop.permute.xlu0 %5537  ;;  %5560 = vst.msk [vmem:[#allocation6 + $0x28] sm:$0xf] %vm5167_vm12, %v5540_v41 }
 0x606   : > { %5559 = vst.msk [vmem:[#allocation6 + $0x1c] sm:$0xf] %vm5167_vm12, %v5538_v44 }
 0x607   : > { %5607 = vst.msk [vmem:[#allocation6 + $0x1c] sm:$0xf] %vm5267_vm1, %v5586_v50 }
 0x609   : > { %v5252_v36 = vpop.permute.xlu0 %5251 }
 0x618   : > { %v5588_v42 = vpop.permute.xlu1 %5587 }
 0x619   : > { %5608 = vst.msk [vmem:[#allocation6 + $0x28] sm:$0xf] %vm5267_vm1, %v5588_v42  ;;  %v5301_v45 = vpop.permute.xlu0 %5300 }
 0x61c   : > { %v5744_v10 = vpop.permute.xlu1 %5743 }
 0x61d   : > { %5766 = vst.msk [vmem:[#allocation6 + $0x10] sm:$0xf] %vm5316_vm8, %v5744_v10  ;;  %v5590_v32 = vpop.permute.xlu0 %5589 }
 0x620   : > { %v5150_v47 = vpop.permute.xlu1 %5149 }
 0x621   : > { %5171 = vst.msk [vmem:[#allocation6 + $0x24] sm:$0xf] %vm5167_vm12, %v5150_v47  ;;  %v5746_v49 = vpop.permute.xlu0 %5745 }
 0x622   : > { %5271 = vst.msk [vmem:[#allocation6 + $0x24] sm:$0xf] %vm5267_vm1, %v5250_v34 }
 0x623   : > { %5767 = vst.msk [vmem:[#allocation6 + $0x1c] sm:$0xf] %vm5316_vm8, %v5746_v49  ;;  %5320 = vst.msk [vmem:[#allocation6 + $0x24] sm:$0xf] %vm5316_vm8, %v5299_v14 }
 0x624   : > { %v5303_v25 = vpop.permute.xlu1 %5302  ;;  %v7123_v24 = vld [vmem:[#allocation6 + $0x4] ss:$12 sps:$4 sm:$0xff]  }
 0x625   : > { %v5152_v52 = vpop.permute.xlu0 %5151  ;;  %6125 = vmatprep.mubr.bf16.mxu1 %v7123_v24 }
 0x626   : > { %5172 = vst.msk [vmem:[#allocation6 + $0x30] sm:$0xf] %vm5167_vm12, %v5152_v52  ;;  %6126 = vmatmul.mubr.bf16.vlgmr.msra.gmra.mrb[16].mxu1 %v7121_v29 }
 0x627   : > { %5272 = vst.msk [vmem:[#allocation6 + $0x30] sm:$0xf] %vm5267_vm1, %v5252_v36  ;;  %7034 = vmatpush3.bf16.msra.mxu1 %v7363_v4 }
 0x628   : > { %5321 = vst.msk [vmem:[#allocation6 + $0x30] sm:$0xf] %vm5316_vm8, %v5301_v45  ;;  %v5254_v56 = vpop.permute.xlu1 %5253  ;;  %7033 = vmatprep.subr.bf16.mxu1 %v7364_v57 }
 0x629   : > { %v5542_v40 = vpop.permute.xlu0 %5541 }
 0x62a   : > { %5561 = vst.msk [vmem:[#allocation6 + $0x34] sm:$0xf] %vm5167_vm12, %v5542_v40  ;;  %v7126_v37 = vld [vmem:[#allocation6 + $0x18] ss:$12 sps:$4 sm:$0xff]  }
 0x62b   : > { %5609 = vst.msk [vmem:[#allocation6 + $0x34] sm:$0xf] %vm5267_vm1, %v5590_v32  ;;  %7035 = vmatpush3.bf16.msra.mxu1 %v7364_v57 }
 0x62c   : > { %v5544_v59 = vpop.permute.xlu1 %5543 }
 0x62d   : > { %5562 = vst.msk [vmem:[#allocation6 + $0x40] sm:$0xf] %vm5167_vm12, %v5544_v59  ;;  %v5256_v2 = vpop.permute.xlu0 %5255 }
 0x63a   : > { %v5592_v28 = vpop.permute.xlu1 %5591 }
 0x63b   : > { %v5305_v61 = vpop.permute.xlu0 %5304  ;;  %5610 = vst.msk [vmem:[#allocation6 + $0x40] sm:$0xf] %vm5267_vm1, %v5592_v28 }
 0x63e   : > { %v5748_v60 = vpop.permute.xlu1 %5747 }
 0x63f   : > { %v5594_v55 = vpop.permute.xlu0 %5593  ;;  %5768 = vst.msk [vmem:[#allocation6 + $0x28] sm:$0xf] %vm5316_vm8, %v5748_v60 }
 0x642   : > { %v5154_v62 = vpop.permute.xlu1 %5153 }
 0x643   : > { %v5750_v48 = vpop.permute.xlu0 %5749  ;;  %5173 = vst.msk [vmem:[#allocation6 + $0x3c] sm:$0xf] %vm5167_vm12, %v5154_v62 }
 0x644   : > { %5769 = vst.msk [vmem:[#allocation6 + $0x34] sm:$0xf] %vm5316_vm8, %v5750_v48 }
 0x645   : > { %5273 = vst.msk [vmem:[#allocation6 + $0x3c] sm:$0xf] %vm5267_vm1, %v5254_v56 }
 0x646   : > { %5322 = vst.msk [vmem:[#allocation6 + $0x3c] sm:$0xf] %vm5316_vm8, %v5303_v25  ;;  %v5307_v0 = vpop.permute.xlu1 %5306  ;;  %v7124_v51 = vld [vmem:[#allocation6 + $0x1c] ss:$12 sps:$4 sm:$0xff]  }
 0x647   : > { %v5156_v1 = vpop.permute.xlu0 %5155  ;;  %6133 = vmatprep.mubr.bf16.mxu1 %v7124_v51 }
 0x648   : > { %5174 = vst.msk [vmem:[#allocation6 + $0x48] sm:$0xf] %vm5167_vm12, %v5156_v1  ;;  %6134 = vmatmul.mubr.bf16.gmra.mrb[20].mxu1 %v7126_v37 }
 0x649   : > { %5274 = vst.msk [vmem:[#allocation6 + $0x48] sm:$0xf] %vm5267_vm1, %v5256_v2 }
 0x64a   : > { %5323 = vst.msk [vmem:[#allocation6 + $0x48] sm:$0xf] %vm5316_vm8, %v5305_v61  ;;  %v5258_v3 = vpop.permute.xlu1 %5257 }
 0x64b   : > { %v5546_v5 = vpop.permute.xlu0 %5545 }
 0x64c   : > { %5563 = vst.msk [vmem:[#allocation6 + $0x4c] sm:$0xf] %vm5167_vm12, %v5546_v5 }
 0x64d   : > { %5611 = vst.msk [vmem:[#allocation6 + $0x4c] sm:$0xf] %vm5267_vm1, %v5594_v55  ;;  %v7129_v13 = vld [vmem:[#allocation6 + $0x30] ss:$12 sps:$4 sm:$0xff]  }
 0x64e   : > { %v5548_v7 = vpop.permute.xlu1 %5547 }
 0x64f   : > { %v5754_v8 = vpop.permute.xlu0 %5753  ;;  %5564 = vst.msk [vmem:[#allocation6 + $0x58] sm:$0xf] %vm5167_vm12, %v5548_v7 }
 0x650   : > { %5771 = vst.msk [vmem:[#allocation6 + $0x4c] sm:$0xf] %vm5316_vm8, %v5754_v8 }
 0x651   : > { %5612 = vst.msk [vmem:[#allocation6 + $0x58] sm:$0xf] %vm5267_vm1, %v9360_v46  ;;  %v7133_v46 = vld [vmem:[#allocation6 + $0x38] ss:$12 sps:$4 sm:$0xff]  }
 0x652   : > { %v5752_v63 = vpop.permute.xlu1 %5751 }
 0x653   : > { %5770 = vst.msk [vmem:[#allocation6 + $0x40] sm:$0xf] %vm5316_vm8, %v5752_v63 }
 0x656   : > { %v5158_v58 = vpop.permute.xlu1 %5157 }
 0x657   : > { %5175 = vst.msk [vmem:[#allocation6 + $0x54] sm:$0xf] %vm5167_vm12, %v5158_v58 }
 0x658   : > { %5275 = vst.msk [vmem:[#allocation6 + $0x54] sm:$0xf] %vm5267_vm1, %v5258_v3 }
 0x659   : > { %5324 = vst.msk [vmem:[#allocation6 + $0x54] sm:$0xf] %vm5316_vm8, %v5307_v0 }
 0x65a   : > { %v5756_v6 = vpop.permute.xlu1 %5755  ;;  %v7127_v9 = vld [vmem:[#allocation6 + $0x34] ss:$12 sps:$4 sm:$0xff]  }
 0x65b   : > { %5772 = vst.msk [vmem:[#allocation6 + $0x58] sm:$0xf] %vm5316_vm8, %v5756_v6  ;;  %6141 = vmatprep.mubr.bf16.mxu1 %v7127_v9 }
 0x65c   : > { %6142 = vmatmul.mubr.bf16.gmra.mrb[24].mxu1 %v7129_v13 }
 0x660   : > { %v7132_v27 = vld [vmem:[#allocation6 + $0x48] ss:$12 sps:$4 sm:$0xff]  }
 0x662   : > { %v7130_v11 = vld [vmem:[#allocation6 + $0x4c] ss:$12 sps:$4 sm:$0xff]  }
 0x663   : > { %6149 = vmatprep.mubr.bf16.mxu1 %v7130_v11 }
 0x664   : > { %6150 = vmatmul.mubr.bf16.gmra.mrb[28].mxu1 %v7132_v27 }
 0x665   : > { %7016 = vmatprep.mubr.msk.bf16.mxu1 %vm6080_vm5, %v7133_v46 }
 0x66c   : > { %7017 = vmatmul.mubr.msk.bf16.vlgmr.msra.gmra.mrb[32].mxu1 %vm6080_vm5, %v7134_v39 }
 0x683   : > { %v7014_v23 = vpop.f32.mrb[32].mxu0 }
 0x684   : > { %v6192_v15 = vpop.f32.mrb[33].mxu0 }
 0x685   : > { %v7015_v16 = vpop.f32.mrb[34].mxu0 }
 0x686   : > { %v6195_v33 = vpop.f32.mrb[35].mxu0 }
 0x6f9   : > { %v6930_v12 = vpop.f32.mrb[16].mxu1 }
 0x6fa   : > { %v6931_v43 = vpop.f32.mrb[17].mxu1 }
 0x6fb   : > { %v6932_v21 = vadd.f32 %v6931_v43, %v6930_v12  ;;  %v6933_v22 = vpop.f32.mrb[18].mxu1 }
 0x6fc   : > { %v6934_v30 = vpop.f32.mrb[19].mxu1 }
 0x6fd   : > { %v6128_v26 = vadd.f32 %v6932_v21, %v9488_v19  ;;  %v6935_v38 = vadd.f32 %v6934_v30, %v6933_v22 }
 0x6ff   : > { %v6193_v20 = vadd.f32 %v6192_v15, %v6128_v26  ;;  %v6131_v31 = vadd.f32 %v6935_v38, %v9488_v19 }
 0x701   : > { %v6830_v53 = vmul.f32 -1.442695, %v6193_v20  ;;  %v6196_v50 = vadd.f32 %v6195_v33, %v6131_v31 }
 0x703   : > { %7297 = vpow2.f32 %v6830_v53  ;;  %v6831_v14 = vmul.f32 -1.442695, %v6196_v50 }
 0x705   : > { %7299 = vpow2.f32 %v6831_v14 }
 0x70d   : > { %v7298_v54 = vpop.eup %7297 }
 0x70e   : > { %v6247_v34 = vadd.f32 1.0, %v7298_v54 }
 0x70f   : > { %v7300_v35 = vpop.eup %7299 }
 0x710   : > { %7301 = vrcp.f32 %v6247_v34  ;;  %v6248_v41 = vadd.f32 1.0, %v7300_v35 }
 0x712   : > { %7303 = vrcp.f32 %v6248_v41 }
 0x71a   : > { %v7302_v44 = vpop.eup %7301 }
 0x71b   : > { %v6271_v42 = vmul.f32 %v7302_v44, %v6193_v20  ;;  %v6936_v10 = vpop.f32.mrb[20].mxu1 }
 0x71c   : > { %v7304_v36 = vpop.eup %7303  ;;  %v6937_v32 = vpop.f32.mrb[21].mxu1 }
 0x71d   : > { %v6272_v45 = vmul.f32 %v7304_v36, %v6196_v50  ;;  %v6938_v49 = vadd.f32 %v6937_v32, %v6936_v10  ;;  %v6939_v25 = vpop.f32.mrb[22].mxu1 }
 0x71e   : > { %v6940_v29 = vpop.f32.mrb[23].mxu1 }
 0x71f   : > { %v6279_v47 = vpack.c.bf16 %v6272_v45, %v6271_v42  ;;  %v6136_v24 = vadd.f32 %v6938_v49, %v9488_v19  ;;  %v6941_v52 = vadd.f32 %v6940_v29, %v6939_v25  ;;  %v6838_v25 = vld [vmem:[%s9561_s8] ss:$0 sm:$0xff] }
 0x721   : > { %7024 = vmatprep.mubr.msk.bf16.mxu0 %vm6080_vm5, %v6279_v47  ;;  %v6201_v56 = vadd.f32 %v7014_v23, %v6136_v24  ;;  %v6139_v4 = vadd.f32 %v6941_v52, %v9488_v19 }
 0x723   : > { %v6832_v40 = vmul.f32 -1.442695, %v6201_v56  ;;  %v6204_v57 = vadd.f32 %v7015_v16, %v6139_v4 }
 0x725   : > { %7305 = vpow2.f32 %v6832_v40  ;;  %v6833_v59 = vmul.f32 -1.442695, %v6204_v57 }
 0x727   : > { %7307 = vpow2.f32 %v6833_v59 }
 0x72f   : > { %v7306_v2 = vpop.eup %7305  ;;  %v6942_v28 = vpop.f32.mrb[24].mxu1 }
 0x730   : > { %v6249_v61 = vadd.f32 1.0, %v7306_v2  ;;  %v6943_v60 = vpop.f32.mrb[25].mxu1 }
 0x731   : > { %v7308_v55 = vpop.eup %7307  ;;  %v6944_v62 = vadd.f32 %v6943_v60, %v6942_v28  ;;  %v6945_v48 = vpop.f32.mrb[26].mxu1 }
 0x732   : > { %7309 = vrcp.f32 %v6249_v61  ;;  %v6250_v0 = vadd.f32 1.0, %v7308_v55  ;;  %v6946_v1 = vpop.f32.mrb[27].mxu1 }
 0x733   : > { %v6947_v51 = vadd.f32 %v6946_v1, %v6945_v48  ;;  %v6144_v46 = vadd.f32 %v6944_v62, %v9488_v19 }
 0x734   : > { %7311 = vrcp.f32 %v6250_v0 }
 0x735   : > { %v6147_v18 = vadd.f32 %v6947_v51, %v9488_v19 }
 0x737   : > { %v6948_v37 = vpop.f32.mrb[28].mxu1 }
 0x738   : > { %v6949_v3 = vpop.f32.mrb[29].mxu1 }
 0x739   : > { %v6950_v5 = vadd.f32 %v6949_v3, %v6948_v37  ;;  %v6951_v7 = vpop.f32.mrb[30].mxu1 }
 0x73a   : > { %v6952_v8 = vpop.f32.mrb[31].mxu1 }
 0x73b   : > { %v6953_v63 = vadd.f32 %v6952_v8, %v6951_v7  ;;  %v6152_v9 = vadd.f32 %v6950_v5, %v9488_v19 }
 0x73c   : > { %v7310_v58 = vpop.eup %7309 }
 0x73d   : > { %v6273_v13 = vmul.f32 %v7310_v58, %v6201_v56  ;;  %v6155_v15 = vadd.f32 %v6953_v63, %v9488_v19 }
 0x73e   : > { %v7312_v6 = vpop.eup %7311 }
 0x73f   : > { %v6274_v11 = vmul.f32 %v7312_v6, %v6204_v57  ;;  %v7018_v27 = vpop.f32.mrb[32].mxu1 }
 0x740   : > { %v6217_v39 = vadd.f32 %v7018_v27, %v6152_v9  ;;  %v6208_v23 = vpop.f32.mrb[33].mxu1 }
 0x741   : > { %v6280_v16 = vpack.c.bf16 %v6274_v11, %v6273_v13  ;;  %v6209_v33 = vadd.f32 %v6208_v23, %v6144_v46  ;;  %v7019_v17 = vpop.f32.mrb[34].mxu1 }
 0x742   : > { %v6836_v12 = vmul.f32 -1.442695, %v6217_v39  ;;  %v6220_v43 = vadd.f32 %v7019_v17, %v6155_v15  ;;  %v6211_v21 = vpop.f32.mrb[35].mxu1 }
 0x743   : > { %v6834_v22 = vmul.f32 -1.442695, %v6209_v33  ;;  %v6212_v30 = vadd.f32 %v6211_v21, %v6147_v18  ;;  %7025 = vmatmul.mubr.msk.bf16.vlgmr.msra.gmra.mrb[36].mxu0 %vm6080_vm5, %v6280_v16 }
 0x744   : > { %7313 = vpow2.f32 %v6836_v12  ;;  %v6837_v26 = vmul.f32 -1.442695, %v6220_v43 }
 0x745   : > { %7315 = vpow2.f32 %v6834_v22  ;;  %v6835_v38 = vmul.f32 -1.442695, %v6212_v30 }
 0x746   : > { %7317 = vpow2.f32 %v6837_v26 }
 0x747   : > { %7319 = vpow2.f32 %v6835_v38 }
 0x74e   : > { %v7314_v20 = vpop.eup %7313 }
 0x74f   : > { %v7316_v31 = vpop.eup %7315  ;;  %v6253_v53 = vadd.f32 1.0, %v7314_v20 }
 0x750   : > { %v7318_v50 = vpop.eup %7317  ;;  %v6251_v14 = vadd.f32 1.0, %v7316_v31 }
 0x751   : > { %v7320_v54 = vpop.eup %7319  ;;  %7321 = vrcp.f32 %v6253_v53  ;;  %v6254_v19 = vadd.f32 1.0, %v7318_v50 }
 0x752   : > { %7323 = vrcp.f32 %v6251_v14  ;;  %v6252_v34 = vadd.f32 1.0, %v7320_v54 }
 0x753   : > { %7325 = vrcp.f32 %v6254_v19 }
 0x754   : > { %7327 = vrcp.f32 %v6252_v34 }
 0x75b   : > { %v7322_v35 = vpop.eup %7321 }
 0x75c   : > { %v7324_v41 = vpop.eup %7323  ;;  %v6277_v42 = vmul.f32 %v7322_v35, %v6217_v39 }
 0x75d   : > { %v7326_v44 = vpop.eup %7325  ;;  %v6275_v10 = vmul.f32 %v7324_v41, %v6209_v33 }
 0x75e   : > { %v7328_v36 = vpop.eup %7327  ;;  %v6278_v45 = vmul.f32 %v7326_v44, %v6220_v43 }
 0x75f   : > { %v6276_v32 = vmul.f32 %v7328_v36, %v6212_v30 }
 0x760   : > { %v6282_v47 = vpack.c.bf16 %v6278_v45, %v6277_v42 }
 0x761   : > { %v6281_v49 = vpack.c.bf16 %v6276_v32, %v6275_v10 }
 0x763   : > { %7028 = vmatprep.mubr.msk.bf16.mxu0 %vm6080_vm5, %v6281_v49 }
 0x764   : > { %7029 = vmatmul.mubr.msk.bf16.gmra.mrb[40].mxu0 %vm6080_vm5, %v6282_v47 }
 0x816   : > { %v7026_v29 = vpop.f32.mrb[36].mxu0 }
 0x817   : > { %v6361_v24 = vadd.f32 %v7026_v29, %v6838_v25  ;;  %v6352_v52 = vpop.f32.mrb[37].mxu0 }
 0x818   : > { %v6353_v56 = vadd.f32 %v6838_v25, %v6352_v52  ;;  %v7027_v4 = vpop.f32.mrb[38].mxu0 }
 0x819   : > { %6386 = vst.msk [vmem:[%s9511_s18 + $0x10] sm:$0xff] %vm6383_vm6, %v6361_v24  ;;  %v6847_v40 = vmul.f32 -1.442695, %v6361_v24  ;;  %v6364_v57 = vadd.f32 %v7027_v4, %v6838_v25  ;;  %v6355_v59 = vpop.f32.mrb[39].mxu0 }
 0x81a   : > { %6384 = vst.msk [vmem:[%s9511_s18] sm:$0xff] %vm6383_vm6, %v6353_v56  ;;  %v6845_v2 = vmul.f32 -1.442695, %v6353_v56  ;;  %v6356_v28 = vadd.f32 %v6838_v25, %v6355_v59 }
 0x81b   : > { %7329 = vpow2.f32 %v6847_v40  ;;  %6387 = vst.msk [vmem:[%s9511_s18 + $0x18] sm:$0xff] %vm6383_vm6, %v6364_v57  ;;  %v6848_v61 = vmul.f32 -1.442695, %v6364_v57 }
 0x81c   : > { %7331 = vpow2.f32 %v6845_v2  ;;  %6385 = vst.msk [vmem:[%s9511_s18 + $0x8] sm:$0xff] %vm6383_vm6, %v6356_v28  ;;  %v6846_v60 = vmul.f32 -1.442695, %v6356_v28 }
 0x81d   : > { %7333 = vpow2.f32 %v6848_v61 }
 0x81e   : > { %7335 = vpow2.f32 %v6846_v60 }
 0x825   : > { %v7330_v55 = vpop.eup %7329 }
 0x826   : > { %v7332_v62 = vpop.eup %7331  ;;  %v6418_v48 = vadd.f32 1.0, %v7330_v55 }
 0x827   : > { %v7334_v0 = vpop.eup %7333  ;;  %v6416_v51 = vadd.f32 1.0, %v7332_v62 }
 0x828   : > { %v7336_v1 = vpop.eup %7335  ;;  %7337 = vrcp.f32 %v6418_v48  ;;  %v6419_v37 = vadd.f32 1.0, %v7334_v0 }
 0x829   : > { %v6417_v3 = vadd.f32 1.0, %v7336_v1 }
 0x82a   : > { %7339 = vrcp.f32 %v6419_v37 }
 0x82b   : > { %7341 = vrcp.f32 %v6416_v51 }
 0x82c   : > { %7343 = vrcp.f32 %v6417_v3 }
 0x832   : > { %v7338_v5 = vpop.eup %7337 }
 0x833   : > { %6452 = vrot.lane.b32.xlu0 %v7338_v5, %s7387_s28 }
 0x834   : > { %v7340_v7 = vpop.eup %7339 }
 0x835   : > { %6454 = vrot.lane.b32.xlu1 %v7340_v7, %s7387_s28  ;;  %v7342_v8 = vpop.eup %7341 }
 0x836   : > { %v7344_v58 = vpop.eup %7343 }
 0x837   : > { %6448 = vrot.lane.b32.xlu0 %v7342_v8, %s7387_s28  ;;  %v7030_v63 = vpop.f32.mrb[40].mxu0 }
 0x838   : > { %v6377_v6 = vadd.f32 %v7030_v63, %v6838_v25  ;;  %v6368_v9 = vpop.f32.mrb[41].mxu0 }
 0x839   : > { %v6369_v13 = vadd.f32 %v6838_v25, %v6368_v9  ;;  %6450 = vrot.lane.b32.xlu1 %v7344_v58, %s7387_s28  ;;  %v7031_v11 = vpop.f32.mrb[42].mxu0 }
 0x83a   : > { %6390 = vst.msk [vmem:[%s9511_s18 + $0x30] sm:$0xff] %vm6383_vm6, %v6377_v6  ;;  %v6851_v27 = vmul.f32 -1.442695, %v6377_v6  ;;  %v6380_v46 = vadd.f32 %v7031_v11, %v6838_v25  ;;  %v6371_v39 = vpop.f32.mrb[43].mxu0 }
 0x83b   : > { %6388 = vst.msk [vmem:[%s9511_s18 + $0x20] sm:$0xff] %vm6383_vm6, %v6369_v13  ;;  %v6849_v23 = vmul.f32 -1.442695, %v6369_v13  ;;  %v6372_v15 = vadd.f32 %v6838_v25, %v6371_v39 }
 0x83c   : > { %7345 = vpow2.f32 %v6851_v27  ;;  %6391 = vst.msk [vmem:[%s9511_s18 + $0x38] sm:$0xff] %vm6383_vm6, %v6380_v46  ;;  %v6852_v16 = vmul.f32 -1.442695, %v6380_v46 }
 0x83d   : > { %7347 = vpow2.f32 %v6849_v23  ;;  %6389 = vst.msk [vmem:[%s9511_s18 + $0x28] sm:$0xff] %vm6383_vm6, %v6372_v15  ;;  %v6850_v33 = vmul.f32 -1.442695, %v6372_v15 }
 0x83e   : > { %7349 = vpow2.f32 %v6852_v16 }
 0x83f   : > { %7351 = vpow2.f32 %v6850_v33 }
 0x846   : > { %v7346_v17 = vpop.eup %7345 }
 0x847   : > { %v7348_v18 = vpop.eup %7347  ;;  %v6422_v22 = vadd.f32 1.0, %v7346_v17 }
 0x848   : > { %v7350_v12 = vpop.eup %7349  ;;  %v6420_v43 = vadd.f32 1.0, %v7348_v18 }
 0x849   : > { %v7352_v21 = vpop.eup %7351  ;;  %v6423_v26 = vadd.f32 1.0, %v7350_v12 }
 0x84a   : > { %7353 = vrcp.f32 %v6420_v43  ;;  %v6421_v30 = vadd.f32 1.0, %v7352_v21 }
 0x84c   : > { %7355 = vrcp.f32 %v6421_v30 }
 0x84d   : > { %7357 = vrcp.f32 %v6422_v22 }
 0x84e   : > { %7359 = vrcp.f32 %v6423_v26 }
 0x854   : > { %v7354_v38 = vpop.eup %7353 }
 0x855   : > { %6456 = vrot.lane.b32.xlu0 %v7354_v38, %s7387_s28 }
 0x856   : > { %v7356_v20 = vpop.eup %7355 }
 0x857   : > { %6458 = vrot.lane.b32.xlu1 %v7356_v20, %s7387_s28  ;;  %v7358_v31 = vpop.eup %7357 }
 0x858   : > { %v7360_v53 = vpop.eup %7359 }
 0x859   : > { %6460 = vrot.lane.b32.xlu0 %v7358_v31, %s7387_s28 }
 0x85b   : > { %6462 = vrot.lane.b32.xlu1 %v7360_v53, %s7387_s28 }
 0x8a5   : > { %v6453_v50 = vpop.permute.xlu0 %6452 }
 0x8a6   : > { %6475 = vst.msk [vmem:[%s372_s17 + $0x10] sm:$0xff] %vm6472_vm3, %v6453_v50 }
 0x8a7   : > { %v6455_v14 = vpop.permute.xlu1 %6454 }
 0x8a8   : > { %6476 = vst.msk [vmem:[%s372_s17 + $0x18] sm:$0xff] %vm6472_vm3, %v6455_v14 }
 0x8a9   : > { %v6449_v54 = vpop.permute.xlu0 %6448 }
 0x8aa   : > { %6473 = vst.msk [vmem:[%s372_s17] sm:$0xff] %vm6472_vm3, %v6449_v54 }
 0x8ab   : > { %v6451_v19 = vpop.permute.xlu1 %6450 }
 0x8ac   : > { %6474 = vst.msk [vmem:[%s372_s17 + $0x8] sm:$0xff] %vm6472_vm3, %v6451_v19 }
 0x8c7   : > { %v6457_v34 = vpop.permute.xlu0 %6456 }
 0x8c8   : > { %6477 = vst.msk [vmem:[%s372_s17 + $0x20] sm:$0xff] %vm6472_vm3, %v6457_v34 }
 0x8c9   : > { %v6459_v35 = vpop.permute.xlu1 %6458 }
 0x8ca   : > { %6478 = vst.msk [vmem:[%s372_s17 + $0x28] sm:$0xff] %vm6472_vm3, %v6459_v35 }
 0x8cb   : > { %v6461_v41 = vpop.permute.xlu0 %6460 }
 0x8cc   : > { %6479 = vst.msk [vmem:[%s372_s17 + $0x30] sm:$0xff] %vm6472_vm3, %v6461_v41 }
 0x8cd   : > { %v6463_v44 = vpop.permute.xlu1 %6462 }
 0x8ce   : > { %6480 = vst.msk [vmem:[%s372_s17 + $0x38] sm:$0xff] %vm6472_vm3, %v6463_v44 }
 0x8cf PF: > { %s21_s13 = sadd.s32 1, %s7371_s13  }
 0x8d0   : > { %p18_p4 = scmp.ge.s32.totalorder %s21_s13, 4  }
 0x8d2   :  { %20 = sbr.rel (!%p18_p4) target bundleno = 1 (0x1), region = 118 }

</bundles_post_ra>
